<compile_context>
chip_gen: v7x
topology: tpu7x:2x2x1
jax: 0.10.0
libtpu: 0.0.40
codegen_flags: <defaults>
</compile_context>

<pallas_src>
import functools

import jax
import jax.numpy as jnp
from jax import lax
from jax.experimental import pallas as pl
from jax.experimental.pallas import tpu as pltpu

COMPUTE_DTYPE = jnp.bfloat16    # MXU operand / inter-layer activation dtype

ENC_CHANNELS = (3, 16, 32, 64)
DEC_CHANNELS = (64, 32, 16)
N_CLASSES = 1


# ----------------------------------------------------------------------------
# Pallas kernels
# ----------------------------------------------------------------------------
def _conv3x3_kernel(*refs, n_in, relu, ho, wo):
    """Fused valid 3x3 conv (+bias, optional ReLU) over one NHWC image.

    refs = (x_0..x_{n_in-1}, w_0..w_{n_in-1}, bias, out)
      x_t  : (1, H, W, Cin_t)    bf16
      w_t  : (3, 3, Cin_t, Cout) bf16
      bias : (1, Cout)           f32
      out  : (1, Ho, Wo, Cout)   bf16
    n_in > 1 implements the decoder "concat then conv" as accumulated partial
    convolutions without ever materializing the concatenated tensor.
    """
    x_refs = refs[:n_in]
    w_refs = refs[n_in:2 * n_in]
    b_ref = refs[2 * n_in]
    o_ref = refs[2 * n_in + 1]
    cout = o_ref.shape[-1]
    bias = b_ref[...].astype(jnp.float32)                    # (1, Cout)

    def row(i, carry):
        acc = jnp.zeros((wo, cout), jnp.float32)
        for x_ref, w_ref in zip(x_refs, w_refs):
            for dh in range(3):
                xrow = x_ref[0, i + dh]                      # (W, Cin_t)
                for dw in range(3):
                    acc = acc + jnp.dot(
                        xrow[dw:dw + wo],                    # (Wo, Cin_t)
                        w_ref[dh, dw],                       # (Cin_t, Cout)
                        preferred_element_type=jnp.float32)
        y = acc + bias
        if relu:
            y = jnp.maximum(y, 0.0)
        o_ref[0, i] = y.astype(o_ref.dtype)
        return carry

    lax.fori_loop(0, ho, row, 0)


def _maxpool2_kernel(x_ref, o_ref):
    """MaxPool2d(2,2).  x_ref: (1, Ho, 2, Wo, 2*C); o_ref: (1, Ho, Wo, C)."""
    c = o_ref.shape[-1]
    m = jnp.maximum(x_ref[0, :, 0], x_ref[0, :, 1])          # pool rows -> (Ho, Wo, 2C)
    o_ref[0] = jnp.maximum(m[:, :, :c], m[:, :, c:])         # pool adjacent columns


def _convt2x2_kernel(x_ref, w0_ref, w1_ref, b_ref, o_ref, *, h):
    """ConvTranspose2d(k=2, s=2) with fused 2x2 interleave.

    x_ref : (1, H, W, Cin)       bf16
    w0/w1 : (Cin, 2*Cout)        bf16  (output sub-row di=0 / di=1, cols (dj, co))
    b_ref : (1, 2*Cout)          f32
    o_ref : (1, H, 2, W, 2*Cout) bf16  (free-reshapes to (2H, 2W, Cout) outside)
    """
    bias = b_ref[...].astype(jnp.float32)

    def row(i, carry):
        xrow = x_ref[0, i]                                   # (W, Cin)
        y0 = jnp.dot(xrow, w0_ref[...], preferred_element_type=jnp.float32) + bias
        y1 = jnp.dot(xrow, w1_ref[...], preferred_element_type=jnp.float32) + bias
        o_ref[0, i, 0] = y0.astype(o_ref.dtype)              # output rows 2i
        o_ref[0, i, 1] = y1.astype(o_ref.dtype)              # output rows 2i+1
        return carry

    lax.fori_loop(0, h, row, 0)


def _matmul_bias_kernel(x_ref, w_ref, b_ref, o_ref):
    """(1, P, K) @ (K, C) + bias -> (1, P, C).  Used for the 1x1 head conv."""
    y = jnp.dot(x_ref[0], w_ref[...], preferred_element_type=jnp.float32)
    o_ref[0] = (y + b_ref[...]).astype(o_ref.dtype)


# ----------------------------------------------------------------------------
# Op wrappers (pallas_call plumbing; reshapes below are free metadata reshapes)
# ----------------------------------------------------------------------------
_PARALLEL = pltpu.CompilerParams(dimension_semantics=("parallel",))


def conv3x3(xs, ws, b, relu=False):
    """Valid 3x3 conv on NHWC. xs/ws may be lists (len>1 == fused skip concat)."""
    if not isinstance(xs, (list, tuple)):
        xs, ws = [xs], [ws]
    N, H, W, _ = xs[0].shape
    Ho, Wo = H - 2, W - 2
    Cout = ws[0].shape[-1]
    n_in = len(xs)
    kernel = functools.partial(_conv3x3_kernel, n_in=n_in, relu=relu, ho=Ho, wo=Wo)
    in_specs = []
    for x in xs:
        in_specs.append(pl.BlockSpec((1, H, W, x.shape[-1]), lambda n: (n, 0, 0, 0)))
    for w in ws:
        in_specs.append(pl.BlockSpec(w.shape, lambda n: (0, 0, 0, 0)))
    in_specs.append(pl.BlockSpec(b.shape, lambda n: (0, 0)))
    return pl.pallas_call(
        kernel,
        out_shape=jax.ShapeDtypeStruct((N, Ho, Wo, Cout), xs[0].dtype),
        grid=(N,),
        in_specs=in_specs,
        out_specs=pl.BlockSpec((1, Ho, Wo, Cout), lambda n: (n, 0, 0, 0)),
        compiler_params=_PARALLEL,
    )(*xs, *ws, b)


def maxpool2(x):
    """MaxPool2d(kernel=2, stride=2), floor mode, NHWC."""
    N, H, W, C = x.shape
    Ho, Wo = H // 2, W // 2
    x = x[:, :2 * Ho, :2 * Wo, :]                    # floor mode (no-op when even)
    xr = x.reshape(N, Ho, 2, Wo, 2 * C)              # contiguous -> free reshape
    return pl.pallas_call(
        _maxpool2_kernel,
        out_shape=jax.ShapeDtypeStruct((N, Ho, Wo, C), x.dtype),
        grid=(N,),
        in_specs=[pl.BlockSpec((1, Ho, 2, Wo, 2 * C), lambda n: (n, 0, 0, 0, 0))],
        out_specs=pl.BlockSpec((1, Ho, Wo, C), lambda n: (n, 0, 0, 0)),
        compiler_params=_PARALLEL,
    )(xr)


def conv_transpose2x2(x, w0, w1, b2):
    """ConvTranspose2d(k=2, s=2). x: (N,H,W,Cin); w0/w1: (Cin, 2*Cout)."""
    N, H, W, Cin = x.shape
    Cout = w0.shape[1] // 2
    y = pl.pallas_call(
        functools.partial(_convt2x2_kernel, h=H),
        out_shape=jax.ShapeDtypeStruct((N, H, 2, W, 2 * Cout), x.dtype),
        grid=(N,),
        in_specs=[
            pl.BlockSpec((1, H, W, Cin), lambda n: (n, 0, 0, 0)),
            pl.BlockSpec(w0.shape, lambda n: (0, 0)),
            pl.BlockSpec(w1.shape, lambda n: (0, 0)),
            pl.BlockSpec(b2.shape, lambda n: (0, 0)),
        ],
        out_specs=pl.BlockSpec((1, H, 2, W, 2 * Cout), lambda n: (n, 0, 0, 0, 0)),
        compiler_params=_PARALLEL,
    )(x, w0, w1, b2)
    # (N, H, 2, W, 2, Cout) interleave -> (N, 2H, 2W, Cout): contiguous, free.
    return y.reshape(N, 2 * H, 2 * W, Cout)


def conv1x1(x, wmat, b, out_dtype=jnp.float32):
    """1x1 conv (the head). x: (N,H,W,Cin); wmat: (Cin, Cout); b: (1, Cout)."""
    N, H, W, Cin = x.shape
    Cout = wmat.shape[1]
    P = H * W
    y = pl.pallas_call(
        _matmul_bias_kernel,
        out_shape=jax.ShapeDtypeStruct((N, P, Cout), out_dtype),
        grid=(N,),
        in_specs=[
            pl.BlockSpec((1, P, Cin), lambda n: (n, 0, 0)),
            pl.BlockSpec((Cin, Cout), lambda n: (0, 0)),
            pl.BlockSpec((1, Cout), lambda n: (0, 0)),
        ],
        out_specs=pl.BlockSpec((1, P, Cout), lambda n: (n, 0, 0)),
        compiler_params=_PARALLEL,
    )(x.reshape(N, P, Cin), wmat, b)
    return y.reshape(N, H, W, Cout)


def center_crop(x, th, tw):
    """torchvision CenterCrop on NHWC."""
    _, H, W, _ = x.shape
    top = int(round((H - th) / 2.0))
    left = int(round((W - tw) / 2.0))
    return x[:, top:top + th, left:left + tw, :]


def interpolate_nearest(x, out_h, out_w):
    """F.interpolate(mode='nearest') on NHWC: src = floor(dst * in/out)."""
    _, H, W, _ = x.shape
    rows = jnp.clip(jnp.floor(jnp.arange(out_h) * (H / out_h)).astype(jnp.int32), 0, H - 1)
    cols = jnp.clip(jnp.floor(jnp.arange(out_w) * (W / out_w)).astype(jnp.int32), 0, W - 1)
    return x[:, rows][:, :, cols]


# ----------------------------------------------------------------------------
# Parameters (PyTorch layout) + one-time packing into kernel/matmul layout
# ----------------------------------------------------------------------------
def init_params(key):
    keys = iter(jax.random.split(key, 64))

    def nrm(shape):
        return jax.random.normal(next(keys), shape, jnp.float32) * 0.1

    params = {"enc": [], "dec": []}
    # Encoder DownBlocks: Conv2d(cin,cout,3) -> ReLU -> Conv2d(cout,cout,3)
    for i in range(len(ENC_CHANNELS) - 1):
        cin, cout = ENC_CHANNELS[i], ENC_CHANNELS[i + 1]
        params["enc"].append((nrm((cout, cin, 3, 3)), nrm((cout,)),
                              nrm((cout, cout, 3, 3)), nrm((cout,))))
    # Decoder: UpBlock = ConvTranspose2d(cin,cout,2,2); then DownBlock(cin,cout)
    for i in range(len(DEC_CHANNELS) - 1):
        cin, cout = DEC_CHANNELS[i], DEC_CHANNELS[i + 1]
        params["dec"].append((nrm((cin, cout, 2, 2)), nrm((cout,)),
                              nrm((cout, cin, 3, 3)), nrm((cout,)),
                              nrm((cout, cout, 3, 3)), nrm((cout,))))
    params["head"] = (nrm((N_CLASSES, DEC_CHANNELS[-1], 1, 1)), nrm((N_CLASSES,)))
    return params


def _pack_conv(w, b):
    # (Cout, Cin, 3, 3) -> (3, 3, Cin, Cout) bf16; bias -> (1, Cout) f32.
    return (jnp.transpose(w, (2, 3, 1, 0)).astype(COMPUTE_DTYPE),
            b.reshape(1, -1).astype(jnp.float32))


def _pack_convT(w, b):
    # (Cin, Cout, 2, 2) -> two (Cin, 2*Cout) matrices (di=0 / di=1), cols (dj, co).
    cin, cout = w.shape[0], w.shape[1]
    wt = jnp.transpose(w, (0, 2, 3, 1))                      # (Cin, di, dj, Cout)
    w0 = wt[:, 0].reshape(cin, 2 * cout).astype(COMPUTE_DTYPE)
    w1 = wt[:, 1].reshape(cin, 2 * cout).astype(COMPUTE_DTYPE)
    b2 = jnp.tile(b, 2).reshape(1, 2 * cout).astype(jnp.float32)
    return w0, w1, b2


def pack_params(params):
    packed = {"enc": [], "dec": []}
    for (w1, b1, w2, b2) in params["enc"]:
        packed["enc"].append(_pack_conv(w1, b1) + _pack_conv(w2, b2))
    for (wt, bt, w1, b1, w2, b2) in params["dec"]:
        cup = wt.shape[1]                       # channels of the upsampled tensor
        w1p, b1p = _pack_conv(w1, b1)           # (3, 3, Cup + Cskip, Cout)
        # torch.cat([x, enc_feat], dim=1): first Cup input channels are x.
        packed["dec"].append(_pack_convT(wt, bt) +
                             (w1p[:, :, :cup, :], w1p[:, :, cup:, :], b1p) +
                             _pack_conv(w2, b2))
    wh, bh = params["head"]
    packed["head"] = (wh.reshape(wh.shape[0], wh.shape[1]).T.astype(COMPUTE_DTYPE),
                      bh.reshape(1, -1).astype(jnp.float32))
    return packed


# ----------------------------------------------------------------------------
# UNet forward
# ----------------------------------------------------------------------------
def unet_forward(x_nchw, packed, out_size):
    x = jnp.transpose(x_nchw, (0, 2, 3, 1)).astype(COMPUTE_DTYPE)   # NCHW -> NHWC bf16
    # --- Encoder ---
    feats = []
    n_enc = len(packed["enc"])
    for idx, (w1, b1, w2, b2) in enumerate(packed["enc"]):
        x = conv3x3(x, w1, b1, relu=True)        # conv1 + ReLU
        x = conv3x3(x, w2, b2, relu=False)       # conv2 (no ReLU, per reference)
        feats.append(x)
        if idx < n_enc - 1:                      # last pool's result is never used
            x = maxpool2(x)
    # --- Decoder ---
    x = feats[-1]
    skips = feats[::-1][1:]
    for idx, (wt0, wt1, bt, w1a, w1b, b1, w2, b2) in enumerate(packed["dec"]):
        x = conv_transpose2x2(x, wt0, wt1, bt)
        s = center_crop(skips[idx], x.shape[1], x.shape[2])
        # fused "torch.cat + conv": two accumulated partial convolutions
        x = conv3x3([x, s], [w1a, w1b], b1, relu=True)
        x = conv3x3(x, w2, b2, relu=False)
    # --- Head + retain_dim interpolation ---
    wh, bh = packed["head"]
    x = conv1x1(x, wh, bh, out_dtype=jnp.float32)
    x = interpolate_nearest(x, out_size[0], out_size[1])
    return jnp.transpose(x, (0, 3, 1, 2))        # NHWC -> NCHW


if __name__ == "__main__":
    key = jax.random.PRNGKey(0)
    pkey, xkey = jax.random.split(key)
    params = init_params(pkey)
    packed = pack_params(params)                 # one-time weight packing (bf16 matmul layout)

    # Small but valid UNet input: three 3x3-valid DownBlocks + two pools need >= ~44 px.
    x = jax.random.normal(xkey, (2, 3, 64, 64), jnp.float32)   # NCHW like PyTorch
    out_size = (64, 64)   # config.INPUT_IMAGE_HEIGHT/WIDTH -> input spatial size

    fwd = jax.jit(functools.partial(unet_forward, out_size=out_size))
    out = fwd(x, packed)
    out = jax.block_until_ready(out)
    assert out.shape == (2, 1, 64, 64), out.shape
    assert bool(jnp.all(jnp.isfinite(out)))
    print("KERNEL_OK")
</pallas_src>

<mosaic_0001>
module attributes {stable_mosaic.version = 11 : i64} {
  func.func @_conv3x3_kernel(%arg0: i32, %arg1: memref<1x64x64x3xbf16, #tpu.memory_space<vmem>>, %arg2: memref<3x3x3x16xbf16, #tpu.memory_space<vmem>>, %arg3: memref<1x16xf32, #tpu.memory_space<vmem>>, %arg4: memref<1x62x62x16xbf16, #tpu.memory_space<vmem>>) attributes {dimension_semantics = [#tpu.dimension_semantics<parallel>], iteration_bounds = array<i64: 2>, scalar_prefetch = 0 : i64, scratch_operands = 0 : i64, tpu.core_type = #tpu.core_type<tc>, window_params = [{transform_indices = @transform_0, window_bounds = array<i64: 1, 64, 64, 3>}, {pipeline_mode = #tpu.pipeline_mode<synchronous>, transform_indices = @transform_1, window_bounds = array<i64: 3, 3, 3, 16>}, {pipeline_mode = #tpu.pipeline_mode<synchronous>, transform_indices = @transform_2, window_bounds = array<i64: 1, 16>}, {transform_indices = @transform_3, window_bounds = array<i64: 1, 62, 62, 16>}]} {
    %c0 = arith.constant 0 : index
    %c0_0 = arith.constant 0 : index
    %0 = vector.load %arg3[%c0, %c0_0] : memref<1x16xf32, #tpu.memory_space<vmem>>, vector<1x16xf32>
    %c0_i32 = arith.constant 0 : i32
    %c62_i32 = arith.constant 62 : i32
    %1 = arith.addi %c0_i32, %c62_i32 : i32
    %c1_i32 = arith.constant 1 : i32
    scf.for %arg5 = %c0_i32 to %1 step %c1_i32  : i32 {
      %cst = arith.constant 0.000000e+00 : f32
      %2 = vector.broadcast %cst : f32 to vector<62x16xf32>
      %c0_i32_2 = arith.constant 0 : i32
      %3 = arith.addi %arg5, %c0_i32_2 : i32
      %c0_3 = arith.constant 0 : index
      %4 = arith.index_cast %3 : i32 to index
      %c0_4 = arith.constant 0 : index
      %c0_5 = arith.constant 0 : index
      %5 = vector.load %arg1[%c0_3, %4, %c0_4, %c0_5] : memref<1x64x64x3xbf16, #tpu.memory_space<vmem>>, vector<1x1x64x3xbf16>
      %6 = vector.shape_cast %5 : vector<1x1x64x3xbf16> to vector<64x3xbf16>
      %7 = vector.extract_strided_slice %6 {offsets = [0, 0], sizes = [62, 3], strides = [1, 1]} : vector<64x3xbf16> to vector<62x3xbf16>
      %c0_6 = arith.constant 0 : index
      %c0_7 = arith.constant 0 : index
      %c0_8 = arith.constant 0 : index
      %c0_9 = arith.constant 0 : index
      %8 = vector.load %arg2[%c0_6, %c0_7, %c0_8, %c0_9] : memref<3x3x3x16xbf16, #tpu.memory_space<vmem>>, vector<1x1x3x16xbf16>
      %9 = vector.shape_cast %8 : vector<1x1x3x16xbf16> to vector<3x16xbf16>
      %cst_10 = arith.constant dense<0.000000e+00> : vector<62x16xf32>
      %10 = tpu.matmul %7, %9, %cst_10 {dimension_numbers = #tpu.dot_dimension_numbers<[1], [0], [0], [1], [0, 0, 1, 1], [], []>} : vector<62x3xbf16>, vector<3x16xbf16>, vector<62x16xf32> -> vector<62x16xf32>
      %11 = arith.addf %2, %10 : vector<62x16xf32>
      %12 = vector.extract_strided_slice %6 {offsets = [1, 0], sizes = [62, 3], strides = [1, 1]} : vector<64x3xbf16> to vector<62x3xbf16>
      %c0_11 = arith.constant 0 : index
      %c1 = arith.constant 1 : index
      %c0_12 = arith.constant 0 : index
      %c0_13 = arith.constant 0 : index
      %13 = vector.load %arg2[%c0_11, %c1, %c0_12, %c0_13] : memref<3x3x3x16xbf16, #tpu.memory_space<vmem>>, vector<1x1x3x16xbf16>
      %14 = vector.shape_cast %13 : vector<1x1x3x16xbf16> to vector<3x16xbf16>
      %cst_14 = arith.constant dense<0.000000e+00> : vector<62x16xf32>
      %15 = tpu.matmul %12, %14, %cst_14 {dimension_numbers = #tpu.dot_dimension_numbers<[1], [0], [0], [1], [0, 0, 1, 1], [], []>} : vector<62x3xbf16>, vector<3x16xbf16>, vector<62x16xf32> -> vector<62x16xf32>
      %16 = arith.addf %11, %15 : vector<62x16xf32>
      %17 = vector.extract_strided_slice %6 {offsets = [2, 0], sizes = [62, 3], strides = [1, 1]} : vector<64x3xbf16> to vector<62x3xbf16>
      %c0_15 = arith.constant 0 : index
      %c2 = arith.constant 2 : index
      %c0_16 = arith.constant 0 : index
      %c0_17 = arith.constant 0 : index
      %18 = vector.load %arg2[%c0_15, %c2, %c0_16, %c0_17] : memref<3x3x3x16xbf16, #tpu.memory_space<vmem>>, vector<1x1x3x16xbf16>
      %19 = vector.shape_cast %18 : vector<1x1x3x16xbf16> to vector<3x16xbf16>
      %cst_18 = arith.constant dense<0.000000e+00> : vector<62x16xf32>
      %20 = tpu.matmul %17, %19, %cst_18 {dimension_numbers = #tpu.dot_dimension_numbers<[1], [0], [0], [1], [0, 0, 1, 1], [], []>} : vector<62x3xbf16>, vector<3x16xbf16>, vector<62x16xf32> -> vector<62x16xf32>
      %21 = arith.addf %16, %20 : vector<62x16xf32>
      %c1_i32_19 = arith.constant 1 : i32
      %22 = arith.addi %arg5, %c1_i32_19 : i32
      %c0_20 = arith.constant 0 : index
      %23 = arith.index_cast %22 : i32 to index
      %c0_21 = arith.constant 0 : index
      %c0_22 = arith.constant 0 : index
      %24 = vector.load %arg1[%c0_20, %23, %c0_21, %c0_22] : memref<1x64x64x3xbf16, #tpu.memory_space<vmem>>, vector<1x1x64x3xbf16>
      %25 = vector.shape_cast %24 : vector<1x1x64x3xbf16> to vector<64x3xbf16>
      %26 = vector.extract_strided_slice %25 {offsets = [0, 0], sizes = [62, 3], strides = [1, 1]} : vector<64x3xbf16> to vector<62x3xbf16>
      %c1_23 = arith.constant 1 : index
      %c0_24 = arith.constant 0 : index
      %c0_25 = arith.constant 0 : index
      %c0_26 = arith.constant 0 : index
      %27 = vector.load %arg2[%c1_23, %c0_24, %c0_25, %c0_26] : memref<3x3x3x16xbf16, #tpu.memory_space<vmem>>, vector<1x1x3x16xbf16>
      %28 = vector.shape_cast %27 : vector<1x1x3x16xbf16> to vector<3x16xbf16>
      %cst_27 = arith.constant dense<0.000000e+00> : vector<62x16xf32>
      %29 = tpu.matmul %26, %28, %cst_27 {dimension_numbers = #tpu.dot_dimension_numbers<[1], [0], [0], [1], [0, 0, 1, 1], [], []>} : vector<62x3xbf16>, vector<3x16xbf16>, vector<62x16xf32> -> vector<62x16xf32>
      %30 = arith.addf %21, %29 : vector<62x16xf32>
      %31 = vector.extract_strided_slice %25 {offsets = [1, 0], sizes = [62, 3], strides = [1, 1]} : vector<64x3xbf16> to vector<62x3xbf16>
      %c1_28 = arith.constant 1 : index
      %c1_29 = arith.constant 1 : index
      %c0_30 = arith.constant 0 : index
      %c0_31 = arith.constant 0 : index
      %32 = vector.load %arg2[%c1_28, %c1_29, %c0_30, %c0_31] : memref<3x3x3x16xbf16, #tpu.memory_space<vmem>>, vector<1x1x3x16xbf16>
      %33 = vector.shape_cast %32 : vector<1x1x3x16xbf16> to vector<3x16xbf16>
      %cst_32 = arith.constant dense<0.000000e+00> : vector<62x16xf32>
      %34 = tpu.matmul %31, %33, %cst_32 {dimension_numbers = #tpu.dot_dimension_numbers<[1], [0], [0], [1], [0, 0, 1, 1], [], []>} : vector<62x3xbf16>, vector<3x16xbf16>, vector<62x16xf32> -> vector<62x16xf32>
      %35 = arith.addf %30, %34 : vector<62x16xf32>
      %36 = vector.extract_strided_slice %25 {offsets = [2, 0], sizes = [62, 3], strides = [1, 1]} : vector<64x3xbf16> to vector<62x3xbf16>
      %c1_33 = arith.constant 1 : index
      %c2_34 = arith.constant 2 : index
      %c0_35 = arith.constant 0 : index
      %c0_36 = arith.constant 0 : index
      %37 = vector.load %arg2[%c1_33, %c2_34, %c0_35, %c0_36] : memref<3x3x3x16xbf16, #tpu.memory_space<vmem>>, vector<1x1x3x16xbf16>
      %38 = vector.shape_cast %37 : vector<1x1x3x16xbf16> to vector<3x16xbf16>
      %cst_37 = arith.constant dense<0.000000e+00> : vector<62x16xf32>
      %39 = tpu.matmul %36, %38, %cst_37 {dimension_numbers = #tpu.dot_dimension_numbers<[1], [0], [0], [1], [0, 0, 1, 1], [], []>} : vector<62x3xbf16>, vector<3x16xbf16>, vector<62x16xf32> -> vector<62x16xf32>
      %40 = arith.addf %35, %39 : vector<62x16xf32>
      %c2_i32 = arith.constant 2 : i32
      %41 = arith.addi %arg5, %c2_i32 : i32
      %c0_38 = arith.constant 0 : index
      %42 = arith.index_cast %41 : i32 to index
      %c0_39 = arith.constant 0 : index
      %c0_40 = arith.constant 0 : index
      %43 = vector.load %arg1[%c0_38, %42, %c0_39, %c0_40] : memref<1x64x64x3xbf16, #tpu.memory_space<vmem>>, vector<1x1x64x3xbf16>
      %44 = vector.shape_cast %43 : vector<1x1x64x3xbf16> to vector<64x3xbf16>
      %45 = vector.extract_strided_slice %44 {offsets = [0, 0], sizes = [62, 3], strides = [1, 1]} : vector<64x3xbf16> to vector<62x3xbf16>
      %c2_41 = arith.constant 2 : index
      %c0_42 = arith.constant 0 : index
      %c0_43 = arith.constant 0 : index
      %c0_44 = arith.constant 0 : index
      %46 = vector.load %arg2[%c2_41, %c0_42, %c0_43, %c0_44] : memref<3x3x3x16xbf16, #tpu.memory_space<vmem>>, vector<1x1x3x16xbf16>
      %47 = vector.shape_cast %46 : vector<1x1x3x16xbf16> to vector<3x16xbf16>
      %cst_45 = arith.constant dense<0.000000e+00> : vector<62x16xf32>
      %48 = tpu.matmul %45, %47, %cst_45 {dimension_numbers = #tpu.dot_dimension_numbers<[1], [0], [0], [1], [0, 0, 1, 1], [], []>} : vector<62x3xbf16>, vector<3x16xbf16>, vector<62x16xf32> -> vector<62x16xf32>
      %49 = arith.addf %40, %48 : vector<62x16xf32>
      %50 = vector.extract_strided_slice %44 {offsets = [1, 0], sizes = [62, 3], strides = [1, 1]} : vector<64x3xbf16> to vector<62x3xbf16>
      %c2_46 = arith.constant 2 : index
      %c1_47 = arith.constant 1 : index
      %c0_48 = arith.constant 0 : index
      %c0_49 = arith.constant 0 : index
      %51 = vector.load %arg2[%c2_46, %c1_47, %c0_48, %c0_49] : memref<3x3x3x16xbf16, #tpu.memory_space<vmem>>, vector<1x1x3x16xbf16>
      %52 = vector.shape_cast %51 : vector<1x1x3x16xbf16> to vector<3x16xbf16>
      %cst_50 = arith.constant dense<0.000000e+00> : vector<62x16xf32>
      %53 = tpu.matmul %50, %52, %cst_50 {dimension_numbers = #tpu.dot_dimension_numbers<[1], [0], [0], [1], [0, 0, 1, 1], [], []>} : vector<62x3xbf16>, vector<3x16xbf16>, vector<62x16xf32> -> vector<62x16xf32>
      %54 = arith.addf %49, %53 : vector<62x16xf32>
      %55 = vector.extract_strided_slice %44 {offsets = [2, 0], sizes = [62, 3], strides = [1, 1]} : vector<64x3xbf16> to vector<62x3xbf16>
      %c2_51 = arith.constant 2 : index
      %c2_52 = arith.constant 2 : index
      %c0_53 = arith.constant 0 : index
      %c0_54 = arith.constant 0 : index
      %56 = vector.load %arg2[%c2_51, %c2_52, %c0_53, %c0_54] : memref<3x3x3x16xbf16, #tpu.memory_space<vmem>>, vector<1x1x3x16xbf16>
      %57 = vector.shape_cast %56 : vector<1x1x3x16xbf16> to vector<3x16xbf16>
      %cst_55 = arith.constant dense<0.000000e+00> : vector<62x16xf32>
      %58 = tpu.matmul %55, %57, %cst_55 {dimension_numbers = #tpu.dot_dimension_numbers<[1], [0], [0], [1], [0, 0, 1, 1], [], []>} : vector<62x3xbf16>, vector<3x16xbf16>, vector<62x16xf32> -> vector<62x16xf32>
      %59 = arith.addf %54, %58 : vector<62x16xf32>
      %60 = vector.broadcast %0 : vector<1x16xf32> to vector<62x16xf32>
      %61 = arith.addf %59, %60 : vector<62x16xf32>
      %cst_56 = arith.constant 0.000000e+00 : f32
      %62 = vector.broadcast %cst_56 : f32 to vector<62x16xf32>
      %63 = arith.maximumf %61, %62 : vector<62x16xf32>
      %64 = arith.truncf %63 : vector<62x16xf32> to vector<62x16xbf16>
      %c0_57 = arith.constant 0 : index
      %65 = arith.index_cast %arg5 : i32 to index
      %c0_58 = arith.constant 0 : index
      %c0_59 = arith.constant 0 : index
      %66 = vector.load %arg4[%c0_57, %65, %c0_58, %c0_59] : memref<1x62x62x16xbf16, #tpu.memory_space<vmem>>, vector<1x1x62x16xbf16>
      %67 = vector.shape_cast %66 : vector<1x1x62x16xbf16> to vector<62x16xbf16>
      %68 = vector.shape_cast %64 : vector<62x16xbf16> to vector<1x1x62x16xbf16>
      tpu.vector_store %arg4[%c0_57, %65, %c0_58, %c0_59], %68 {strides = array<i32>} : memref<1x62x62x16xbf16, #tpu.memory_space<vmem>>, vector<1x1x62x16xbf16>,
    }
    %c62_i32_1 = arith.constant 62 : i32
    return
  }
  func.func @transform_0(%arg0: i32) -> (i32, i32, i32, i32) {
    %c0_i32 = arith.constant 0 : i32
    %c0_i32_0 = arith.constant 0 : i32
    %c0_i32_1 = arith.constant 0 : i32
    %c0_i32_2 = arith.constant 0 : i32
    return %arg0, %c0_i32, %c0_i32_0, %c0_i32_1 : i32, i32, i32, i32
  }
  func.func @transform_1(%arg0: i32) -> (i32, i32, i32, i32) {
    %c0_i32 = arith.constant 0 : i32
    %c0_i32_0 = arith.constant 0 : i32
    %c0_i32_1 = arith.constant 0 : i32
    %c0_i32_2 = arith.constant 0 : i32
    %c0_i32_3 = arith.constant 0 : i32
    return %c0_i32, %c0_i32_0, %c0_i32_1, %c0_i32_2 : i32, i32, i32, i32
  }
  func.func @transform_2(%arg0: i32) -> (i32, i32) {
    %c0_i32 = arith.constant 0 : i32
    %c0_i32_0 = arith.constant 0 : i32
    %c0_i32_1 = arith.constant 0 : i32
    return %c0_i32, %c0_i32_0 : i32, i32
  }
  func.func @transform_3(%arg0: i32) -> (i32, i32, i32, i32) {
    %c0_i32 = arith.constant 0 : i32
    %c0_i32_0 = arith.constant 0 : i32
    %c0_i32_1 = arith.constant 0 : i32
    %c0_i32_2 = arith.constant 0 : i32
    return %arg0, %c0_i32, %c0_i32_0, %c0_i32_1 : i32, i32, i32, i32
  }
}

module attributes {stable_mosaic.version = 11 : i64} {
  func.func @_conv3x3_kernel(%arg0: i32, %arg1: memref<1x62x62x16xbf16, #tpu.memory_space<vmem>>, %arg2: memref<3x3x16x16xbf16, #tpu.memory_space<vmem>>, %arg3: memref<1x16xf32, #tpu.memory_space<vmem>>, %arg4: memref<1x60x60x16xbf16, #tpu.memory_space<vmem>>) attributes {dimension_semantics = [#tpu.dimension_semantics<parallel>], iteration_bounds = array<i64: 2>, scalar_prefetch = 0 : i64, scratch_operands = 0 : i64, tpu.core_type = #tpu.core_type<tc>, window_params = [{transform_indices = @transform_0, window_bounds = array<i64: 1, 62, 62, 16>}, {pipeline_mode = #tpu.pipeline_mode<synchronous>, transform_indices = @transform_1, window_bounds = array<i64: 3, 3, 16, 16>}, {pipeline_mode = #tpu.pipeline_mode<synchronous>, transform_indices = @transform_2, window_bounds = array<i64: 1, 16>}, {transform_indices = @transform_3, window_bounds = array<i64: 1, 60, 60, 16>}]} {
    %c0 = arith.constant 0 : index
    %c0_0 = arith.constant 0 : index
    %0 = vector.load %arg3[%c0, %c0_0] : memref<1x16xf32, #tpu.memory_space<vmem>>, vector<1x16xf32>
    %c0_i32 = arith.constant 0 : i32
    %c60_i32 = arith.constant 60 : i32
    %1 = arith.addi %c0_i32, %c60_i32 : i32
    %c1_i32 = arith.constant 1 : i32
    scf.for %arg5 = %c0_i32 to %1 step %c1_i32  : i32 {
      %cst = arith.constant 0.000000e+00 : f32
      %2 = vector.broadcast %cst : f32 to vector<60x16xf32>
      %c0_i32_2 = arith.constant 0 : i32
      %3 = arith.addi %arg5, %c0_i32_2 : i32
      %c0_3 = arith.constant 0 : index
      %4 = arith.index_cast %3 : i32 to index
      %c0_4 = arith.constant 0 : index
      %c0_5 = arith.constant 0 : index
      %5 = vector.load %arg1[%c0_3, %4, %c0_4, %c0_5] : memref<1x62x62x16xbf16, #tpu.memory_space<vmem>>, vector<1x1x62x16xbf16>
      %6 = vector.shape_cast %5 : vector<1x1x62x16xbf16> to vector<62x16xbf16>
      %7 = vector.extract_strided_slice %6 {offsets = [0, 0], sizes = [60, 16], strides = [1, 1]} : vector<62x16xbf16> to vector<60x16xbf16>
      %c0_6 = arith.constant 0 : index
      %c0_7 = arith.constant 0 : index
      %c0_8 = arith.constant 0 : index
      %c0_9 = arith.constant 0 : index
      %8 = vector.load %arg2[%c0_6, %c0_7, %c0_8, %c0_9] : memref<3x3x16x16xbf16, #tpu.memory_space<vmem>>, vector<1x1x16x16xbf16>
      %9 = vector.shape_cast %8 : vector<1x1x16x16xbf16> to vector<16x16xbf16>
      %cst_10 = arith.constant dense<0.000000e+00> : vector<60x16xf32>
      %10 = tpu.matmul %7, %9, %cst_10 {dimension_numbers = #tpu.dot_dimension_numbers<[1], [0], [0], [1], [0, 0, 1, 1], [], []>} : vector<60x16xbf16>, vector<16x16xbf16>, vector<60x16xf32> -> vector<60x16xf32>
      %11 = arith.addf %2, %10 : vector<60x16xf32>
      %12 = vector.extract_strided_slice %6 {offsets = [1, 0], sizes = [60, 16], strides = [1, 1]} : vector<62x16xbf16> to vector<60x16xbf16>
      %c0_11 = arith.constant 0 : index
      %c1 = arith.constant 1 : index
      %c0_12 = arith.constant 0 : index
      %c0_13 = arith.constant 0 : index
      %13 = vector.load %arg2[%c0_11, %c1, %c0_12, %c0_13] : memref<3x3x16x16xbf16, #tpu.memory_space<vmem>>, vector<1x1x16x16xbf16>
      %14 = vector.shape_cast %13 : vector<1x1x16x16xbf16> to vector<16x16xbf16>
      %cst_14 = arith.constant dense<0.000000e+00> : vector<60x16xf32>
      %15 = tpu.matmul %12, %14, %cst_14 {dimension_numbers = #tpu.dot_dimension_numbers<[1], [0], [0], [1], [0, 0, 1, 1], [], []>} : vector<60x16xbf16>, vector<16x16xbf16>, vector<60x16xf32> -> vector<60x16xf32>
      %16 = arith.addf %11, %15 : vector<60x16xf32>
      %17 = vector.extract_strided_slice %6 {offsets = [2, 0], sizes = [60, 16], strides = [1, 1]} : vector<62x16xbf16> to vector<60x16xbf16>
      %c0_15 = arith.constant 0 : index
      %c2 = arith.constant 2 : index
      %c0_16 = arith.constant 0 : index
      %c0_17 = arith.constant 0 : index
      %18 = vector.load %arg2[%c0_15, %c2, %c0_16, %c0_17] : memref<3x3x16x16xbf16, #tpu.memory_space<vmem>>, vector<1x1x16x16xbf16>
      %19 = vector.shape_cast %18 : vector<1x1x16x16xbf16> to vector<16x16xbf16>
      %cst_18 = arith.constant dense<0.000000e+00> : vector<60x16xf32>
      %20 = tpu.matmul %17, %19, %cst_18 {dimension_numbers = #tpu.dot_dimension_numbers<[1], [0], [0], [1], [0, 0, 1, 1], [], []>} : vector<60x16xbf16>, vector<16x16xbf16>, vector<60x16xf32> -> vector<60x16xf32>
      %21 = arith.addf %16, %20 : vector<60x16xf32>
      %c1_i32_19 = arith.constant 1 : i32
      %22 = arith.addi %arg5, %c1_i32_19 : i32
      %c0_20 = arith.constant 0 : index
      %23 = arith.index_cast %22 : i32 to index
      %c0_21 = arith.constant 0 : index
      %c0_22 = arith.constant 0 : index
      %24 = vector.load %arg1[%c0_20, %23, %c0_21, %c0_22] : memref<1x62x62x16xbf16, #tpu.memory_space<vmem>>, vector<1x1x62x16xbf16>
      %25 = vector.shape_cast %24 : vector<1x1x62x16xbf16> to vector<62x16xbf16>
      %26 = vector.extract_strided_slice %25 {offsets = [0, 0], sizes = [60, 16], strides = [1, 1]} : vector<62x16xbf16> to vector<60x16xbf16>
      %c1_23 = arith.constant 1 : index
      %c0_24 = arith.constant 0 : index
      %c0_25 = arith.constant 0 : index
      %c0_26 = arith.constant 0 : index
      %27 = vector.load %arg2[%c1_23, %c0_24, %c0_25, %c0_26] : memref<3x3x16x16xbf16, #tpu.memory_space<vmem>>, vector<1x1x16x16xbf16>
      %28 = vector.shape_cast %27 : vector<1x1x16x16xbf16> to vector<16x16xbf16>
      %cst_27 = arith.constant dense<0.000000e+00> : vector<60x16xf32>
      %29 = tpu.matmul %26, %28, %cst_27 {dimension_numbers = #tpu.dot_dimension_numbers<[1], [0], [0], [1], [0, 0, 1, 1], [], []>} : vector<60x16xbf16>, vector<16x16xbf16>, vector<60x16xf32> -> vector<60x16xf32>
      %30 = arith.addf %21, %29 : vector<60x16xf32>
      %31 = vector.extract_strided_slice %25 {offsets = [1, 0], sizes = [60, 16], strides = [1, 1]} : vector<62x16xbf16> to vector<60x16xbf16>
      %c1_28 = arith.constant 1 : index
      %c1_29 = arith.constant 1 : index
      %c0_30 = arith.constant 0 : index
      %c0_31 = arith.constant 0 : index
      %32 = vector.load %arg2[%c1_28, %c1_29, %c0_30, %c0_31] : memref<3x3x16x16xbf16, #tpu.memory_space<vmem>>, vector<1x1x16x16xbf16>
      %33 = vector.shape_cast %32 : vector<1x1x16x16xbf16> to vector<16x16xbf16>
      %cst_32 = arith.constant dense<0.000000e+00> : vector<60x16xf32>
      %34 = tpu.matmul %31, %33, %cst_32 {dimension_numbers = #tpu.dot_dimension_numbers<[1], [0], [0], [1], [0, 0, 1, 1], [], []>} : vector<60x16xbf16>, vector<16x16xbf16>, vector<60x16xf32> -> vector<60x16xf32>
      %35 = arith.addf %30, %34 : vector<60x16xf32>
      %36 = vector.extract_strided_slice %25 {offsets = [2, 0], sizes = [60, 16], strides = [1, 1]} : vector<62x16xbf16> to vector<60x16xbf16>
      %c1_33 = arith.constant 1 : index
      %c2_34 = arith.constant 2 : index
      %c0_35 = arith.constant 0 : index
      %c0_36 = arith.constant 0 : index
      %37 = vector.load %arg2[%c1_33, %c2_34, %c0_35, %c0_36] : memref<3x3x16x16xbf16, #tpu.memory_space<vmem>>, vector<1x1x16x16xbf16>
      %38 = vector.shape_cast %37 : vector<1x1x16x16xbf16> to vector<16x16xbf16>
      %cst_37 = arith.constant dense<0.000000e+00> : vector<60x16xf32>
      %39 = tpu.matmul %36, %38, %cst_37 {dimension_numbers = #tpu.dot_dimension_numbers<[1], [0], [0], [1], [0, 0, 1, 1], [], []>} : vector<60x16xbf16>, vector<16x16xbf16>, vector<60x16xf32> -> vector<60x16xf32>
      %40 = arith.addf %35, %39 : vector<60x16xf32>
      %c2_i32 = arith.constant 2 : i32
      %41 = arith.addi %arg5, %c2_i32 : i32
      %c0_38 = arith.constant 0 : index
      %42 = arith.index_cast %41 : i32 to index
      %c0_39 = arith.constant 0 : index
      %c0_40 = arith.constant 0 : index
      %43 = vector.load %arg1[%c0_38, %42, %c0_39, %c0_40] : memref<1x62x62x16xbf16, #tpu.memory_space<vmem>>, vector<1x1x62x16xbf16>
      %44 = vector.shape_cast %43 : vector<1x1x62x16xbf16> to vector<62x16xbf16>
      %45 = vector.extract_strided_slice %44 {offsets = [0, 0], sizes = [60, 16], strides = [1, 1]} : vector<62x16xbf16> to vector<60x16xbf16>
      %c2_41 = arith.constant 2 : index
      %c0_42 = arith.constant 0 : index
      %c0_43 = arith.constant 0 : index
      %c0_44 = arith.constant 0 : index
      %46 = vector.load %arg2[%c2_41, %c0_42, %c0_43, %c0_44] : memref<3x3x16x16xbf16, #tpu.memory_space<vmem>>, vector<1x1x16x16xbf16>
      %47 = vector.shape_cast %46 : vector<1x1x16x16xbf16> to vector<16x16xbf16>
      %cst_45 = arith.constant dense<0.000000e+00> : vector<60x16xf32>
      %48 = tpu.matmul %45, %47, %cst_45 {dimension_numbers = #tpu.dot_dimension_numbers<[1], [0], [0], [1], [0, 0, 1, 1], [], []>} : vector<60x16xbf16>, vector<16x16xbf16>, vector<60x16xf32> -> vector<60x16xf32>
      %49 = arith.addf %40, %48 : vector<60x16xf32>
      %50 = vector.extract_strided_slice %44 {offsets = [1, 0], sizes = [60, 16], strides = [1, 1]} : vector<62x16xbf16> to vector<60x16xbf16>
      %c2_46 = arith.constant 2 : index
      %c1_47 = arith.constant 1 : index
      %c0_48 = arith.constant 0 : index
      %c0_49 = arith.constant 0 : index
      %51 = vector.load %arg2[%c2_46, %c1_47, %c0_48, %c0_49] : memref<3x3x16x16xbf16, #tpu.memory_space<vmem>>, vector<1x1x16x16xbf16>
      %52 = vector.shape_cast %51 : vector<1x1x16x16xbf16> to vector<16x16xbf16>
      %cst_50 = arith.constant dense<0.000000e+00> : vector<60x16xf32>
      %53 = tpu.matmul %50, %52, %cst_50 {dimension_numbers = #tpu.dot_dimension_numbers<[1], [0], [0], [1], [0, 0, 1, 1], [], []>} : vector<60x16xbf16>, vector<16x16xbf16>, vector<60x16xf32> -> vector<60x16xf32>
      %54 = arith.addf %49, %53 : vector<60x16xf32>
      %55 = vector.extract_strided_slice %44 {offsets = [2, 0], sizes = [60, 16], strides = [1, 1]} : vector<62x16xbf16> to vector<60x16xbf16>
      %c2_51 = arith.constant 2 : index
      %c2_52 = arith.constant 2 : index
      %c0_53 = arith.constant 0 : index
      %c0_54 = arith.constant 0 : index
      %56 = vector.load %arg2[%c2_51, %c2_52, %c0_53, %c0_54] : memref<3x3x16x16xbf16, #tpu.memory_space<vmem>>, vector<1x1x16x16xbf16>
      %57 = vector.shape_cast %56 : vector<1x1x16x16xbf16> to vector<16x16xbf16>
      %cst_55 = arith.constant dense<0.000000e+00> : vector<60x16xf32>
      %58 = tpu.matmul %55, %57, %cst_55 {dimension_numbers = #tpu.dot_dimension_numbers<[1], [0], [0], [1], [0, 0, 1, 1], [], []>} : vector<60x16xbf16>, vector<16x16xbf16>, vector<60x16xf32> -> vector<60x16xf32>
      %59 = arith.addf %54, %58 : vector<60x16xf32>
      %60 = vector.broadcast %0 : vector<1x16xf32> to vector<60x16xf32>
      %61 = arith.addf %59, %60 : vector<60x16xf32>
      %62 = arith.truncf %61 : vector<60x16xf32> to vector<60x16xbf16>
      %c0_56 = arith.constant 0 : index
      %63 = arith.index_cast %arg5 : i32 to index
      %c0_57 = arith.constant 0 : index
      %c0_58 = arith.constant 0 : index
      %64 = vector.load %arg4[%c0_56, %63, %c0_57, %c0_58] : memref<1x60x60x16xbf16, #tpu.memory_space<vmem>>, vector<1x1x60x16xbf16>
      %65 = vector.shape_cast %64 : vector<1x1x60x16xbf16> to vector<60x16xbf16>
      %66 = vector.shape_cast %62 : vector<60x16xbf16> to vector<1x1x60x16xbf16>
      tpu.vector_store %arg4[%c0_56, %63, %c0_57, %c0_58], %66 {strides = array<i32>} : memref<1x60x60x16xbf16, #tpu.memory_space<vmem>>, vector<1x1x60x16xbf16>,
    }
    %c60_i32_1 = arith.constant 60 : i32
    return
  }
  func.func @transform_0(%arg0: i32) -> (i32, i32, i32, i32) {
    %c0_i32 = arith.constant 0 : i32
    %c0_i32_0 = arith.constant 0 : i32
    %c0_i32_1 = arith.constant 0 : i32
    %c0_i32_2 = arith.constant 0 : i32
    return %arg0, %c0_i32, %c0_i32_0, %c0_i32_1 : i32, i32, i32, i32
  }
  func.func @transform_1(%arg0: i32) -> (i32, i32, i32, i32) {
    %c0_i32 = arith.constant 0 : i32
    %c0_i32_0 = arith.constant 0 : i32
    %c0_i32_1 = arith.constant 0 : i32
    %c0_i32_2 = arith.constant 0 : i32
    %c0_i32_3 = arith.constant 0 : i32
    return %c0_i32, %c0_i32_0, %c0_i32_1, %c0_i32_2 : i32, i32, i32, i32
  }
  func.func @transform_2(%arg0: i32) -> (i32, i32) {
    %c0_i32 = arith.constant 0 : i32
    %c0_i32_0 = arith.constant 0 : i32
    %c0_i32_1 = arith.constant 0 : i32
    return %c0_i32, %c0_i32_0 : i32, i32
  }
  func.func @transform_3(%arg0: i32) -> (i32, i32, i32, i32) {
    %c0_i32 = arith.constant 0 : i32
    %c0_i32_0 = arith.constant 0 : i32
    %c0_i32_1 = arith.constant 0 : i32
    %c0_i32_2 = arith.constant 0 : i32
    return %arg0, %c0_i32, %c0_i32_0, %c0_i32_1 : i32, i32, i32, i32
  }
}

module attributes {stable_mosaic.version = 11 : i64} {
  func.func @_maxpool2_kernel(%arg0: i32, %arg1: memref<1x30x2x30x32xbf16, #tpu.memory_space<vmem>>, %arg2: memref<1x30x30x16xbf16, #tpu.memory_space<vmem>>) attributes {dimension_semantics = [#tpu.dimension_semantics<parallel>], iteration_bounds = array<i64: 2>, scalar_prefetch = 0 : i64, scratch_operands = 0 : i64, tpu.core_type = #tpu.core_type<tc>, window_params = [{transform_indices = @transform_0, window_bounds = array<i64: 1, 30, 2, 30, 32>}, {transform_indices = @transform_1, window_bounds = array<i64: 1, 30, 30, 16>}]} {
    %c0 = arith.constant 0 : index
    %c0_0 = arith.constant 0 : index
    %c0_1 = arith.constant 0 : index
    %c0_2 = arith.constant 0 : index
    %c0_3 = arith.constant 0 : index
    %0 = vector.load %arg1[%c0, %c0_0, %c0_1, %c0_2, %c0_3] : memref<1x30x2x30x32xbf16, #tpu.memory_space<vmem>>, vector<1x30x1x30x32xbf16>
    %1 = vector.shape_cast %0 : vector<1x30x1x30x32xbf16> to vector<30x30x32xbf16>
    %c0_4 = arith.constant 0 : index
    %c0_5 = arith.constant 0 : index
    %c1 = arith.constant 1 : index
    %c0_6 = arith.constant 0 : index
    %c0_7 = arith.constant 0 : index
    %2 = vector.load %arg1[%c0_4, %c0_5, %c1, %c0_6, %c0_7] : memref<1x30x2x30x32xbf16, #tpu.memory_space<vmem>>, vector<1x30x1x30x32xbf16>
    %3 = vector.shape_cast %2 : vector<1x30x1x30x32xbf16> to vector<30x30x32xbf16>
    %4 = arith.maximumf %1, %3 : vector<30x30x32xbf16>
    %5 = vector.extract_strided_slice %4 {offsets = [0, 0, 0], sizes = [30, 30, 16], strides = [1, 1, 1]} : vector<30x30x32xbf16> to vector<30x30x16xbf16>
    %6 = vector.extract_strided_slice %4 {offsets = [0, 0, 16], sizes = [30, 30, 16], strides = [1, 1, 1]} : vector<30x30x32xbf16> to vector<30x30x16xbf16>
    %7 = arith.maximumf %5, %6 : vector<30x30x16xbf16>
    %c0_8 = arith.constant 0 : index
    %c0_9 = arith.constant 0 : index
    %c0_10 = arith.constant 0 : index
    %c0_11 = arith.constant 0 : index
    %8 = vector.load %arg2[%c0_8, %c0_9, %c0_10, %c0_11] : memref<1x30x30x16xbf16, #tpu.memory_space<vmem>>, vector<1x30x30x16xbf16>
    %9 = vector.shape_cast %8 : vector<1x30x30x16xbf16> to vector<30x30x16xbf16>
    %10 = vector.shape_cast %7 : vector<30x30x16xbf16> to vector<1x30x30x16xbf16>
    tpu.vector_store %arg2[%c0_8, %c0_9, %c0_10, %c0_11], %10 {strides = array<i32>} : memref<1x30x30x16xbf16, #tpu.memory_space<vmem>>, vector<1x30x30x16xbf16>,
    return
  }
  func.func @transform_0(%arg0: i32) -> (i32, i32, i32, i32, i32) {
    %c0_i32 = arith.constant 0 : i32
    %c0_i32_0 = arith.constant 0 : i32
    %c0_i32_1 = arith.constant 0 : i32
    %c0_i32_2 = arith.constant 0 : i32
    %c0_i32_3 = arith.constant 0 : i32
    return %arg0, %c0_i32, %c0_i32_0, %c0_i32_1, %c0_i32_2 : i32, i32, i32, i32, i32
  }
  func.func @transform_1(%arg0: i32) -> (i32, i32, i32, i32) {
    %c0_i32 = arith.constant 0 : i32
    %c0_i32_0 = arith.constant 0 : i32
    %c0_i32_1 = arith.constant 0 : i32
    %c0_i32_2 = arith.constant 0 : i32
    return %arg0, %c0_i32, %c0_i32_0, %c0_i32_1 : i32, i32, i32, i32
  }
}

module attributes {stable_mosaic.version = 11 : i64} {
  func.func @_conv3x3_kernel(%arg0: i32, %arg1: memref<1x30x30x16xbf16, #tpu.memory_space<vmem>>, %arg2: memref<3x3x16x32xbf16, #tpu.memory_space<vmem>>, %arg3: memref<1x32xf32, #tpu.memory_space<vmem>>, %arg4: memref<1x28x28x32xbf16, #tpu.memory_space<vmem>>) attributes {dimension_semantics = [#tpu.dimension_semantics<parallel>], iteration_bounds = array<i64: 2>, scalar_prefetch = 0 : i64, scratch_operands = 0 : i64, tpu.core_type = #tpu.core_type<tc>, window_params = [{transform_indices = @transform_0, window_bounds = array<i64: 1, 30, 30, 16>}, {pipeline_mode = #tpu.pipeline_mode<synchronous>, transform_indices = @transform_1, window_bounds = array<i64: 3, 3, 16, 32>}, {pipeline_mode = #tpu.pipeline_mode<synchronous>, transform_indices = @transform_2, window_bounds = array<i64: 1, 32>}, {transform_indices = @transform_3, window_bounds = array<i64: 1, 28, 28, 32>}]} {
    %c0 = arith.constant 0 : index
    %c0_0 = arith.constant 0 : index
    %0 = vector.load %arg3[%c0, %c0_0] : memref<1x32xf32, #tpu.memory_space<vmem>>, vector<1x32xf32>
    %c0_i32 = arith.constant 0 : i32
    %c28_i32 = arith.constant 28 : i32
    %1 = arith.addi %c0_i32, %c28_i32 : i32
    %c1_i32 = arith.constant 1 : i32
    scf.for %arg5 = %c0_i32 to %1 step %c1_i32  : i32 {
      %cst = arith.constant 0.000000e+00 : f32
      %2 = vector.broadcast %cst : f32 to vector<28x32xf32>
      %c0_i32_2 = arith.constant 0 : i32
      %3 = arith.addi %arg5, %c0_i32_2 : i32
      %c0_3 = arith.constant 0 : index
      %4 = arith.index_cast %3 : i32 to index
      %c0_4 = arith.constant 0 : index
      %c0_5 = arith.constant 0 : index
      %5 = vector.load %arg1[%c0_3, %4, %c0_4, %c0_5] : memref<1x30x30x16xbf16, #tpu.memory_space<vmem>>, vector<1x1x30x16xbf16>
      %6 = vector.shape_cast %5 : vector<1x1x30x16xbf16> to vector<30x16xbf16>
      %7 = vector.extract_strided_slice %6 {offsets = [0, 0], sizes = [28, 16], strides = [1, 1]} : vector<30x16xbf16> to vector<28x16xbf16>
      %c0_6 = arith.constant 0 : index
      %c0_7 = arith.constant 0 : index
      %c0_8 = arith.constant 0 : index
      %c0_9 = arith.constant 0 : index
      %8 = vector.load %arg2[%c0_6, %c0_7, %c0_8, %c0_9] : memref<3x3x16x32xbf16, #tpu.memory_space<vmem>>, vector<1x1x16x32xbf16>
      %9 = vector.shape_cast %8 : vector<1x1x16x32xbf16> to vector<16x32xbf16>
      %cst_10 = arith.constant dense<0.000000e+00> : vector<28x32xf32>
      %10 = tpu.matmul %7, %9, %cst_10 {dimension_numbers = #tpu.dot_dimension_numbers<[1], [0], [0], [1], [0, 0, 1, 1], [], []>} : vector<28x16xbf16>, vector<16x32xbf16>, vector<28x32xf32> -> vector<28x32xf32>
      %11 = arith.addf %2, %10 : vector<28x32xf32>
      %12 = vector.extract_strided_slice %6 {offsets = [1, 0], sizes = [28, 16], strides = [1, 1]} : vector<30x16xbf16> to vector<28x16xbf16>
      %c0_11 = arith.constant 0 : index
      %c1 = arith.constant 1 : index
      %c0_12 = arith.constant 0 : index
      %c0_13 = arith.constant 0 : index
      %13 = vector.load %arg2[%c0_11, %c1, %c0_12, %c0_13] : memref<3x3x16x32xbf16, #tpu.memory_space<vmem>>, vector<1x1x16x32xbf16>
      %14 = vector.shape_cast %13 : vector<1x1x16x32xbf16> to vector<16x32xbf16>
      %cst_14 = arith.constant dense<0.000000e+00> : vector<28x32xf32>
      %15 = tpu.matmul %12, %14, %cst_14 {dimension_numbers = #tpu.dot_dimension_numbers<[1], [0], [0], [1], [0, 0, 1, 1], [], []>} : vector<28x16xbf16>, vector<16x32xbf16>, vector<28x32xf32> -> vector<28x32xf32>
      %16 = arith.addf %11, %15 : vector<28x32xf32>
      %17 = vector.extract_strided_slice %6 {offsets = [2, 0], sizes = [28, 16], strides = [1, 1]} : vector<30x16xbf16> to vector<28x16xbf16>
      %c0_15 = arith.constant 0 : index
      %c2 = arith.constant 2 : index
      %c0_16 = arith.constant 0 : index
      %c0_17 = arith.constant 0 : index
      %18 = vector.load %arg2[%c0_15, %c2, %c0_16, %c0_17] : memref<3x3x16x32xbf16, #tpu.memory_space<vmem>>, vector<1x1x16x32xbf16>
      %19 = vector.shape_cast %18 : vector<1x1x16x32xbf16> to vector<16x32xbf16>
      %cst_18 = arith.constant dense<0.000000e+00> : vector<28x32xf32>
      %20 = tpu.matmul %17, %19, %cst_18 {dimension_numbers = #tpu.dot_dimension_numbers<[1], [0], [0], [1], [0, 0, 1, 1], [], []>} : vector<28x16xbf16>, vector<16x32xbf16>, vector<28x32xf32> -> vector<28x32xf32>
      %21 = arith.addf %16, %20 : vector<28x32xf32>
      %c1_i32_19 = arith.constant 1 : i32
      %22 = arith.addi %arg5, %c1_i32_19 : i32
      %c0_20 = arith.constant 0 : index
      %23 = arith.index_cast %22 : i32 to index
      %c0_21 = arith.constant 0 : index
      %c0_22 = arith.constant 0 : index
      %24 = vector.load %arg1[%c0_20, %23, %c0_21, %c0_22] : memref<1x30x30x16xbf16, #tpu.memory_space<vmem>>, vector<1x1x30x16xbf16>
      %25 = vector.shape_cast %24 : vector<1x1x30x16xbf16> to vector<30x16xbf16>
      %26 = vector.extract_strided_slice %25 {offsets = [0, 0], sizes = [28, 16], strides = [1, 1]} : vector<30x16xbf16> to vector<28x16xbf16>
      %c1_23 = arith.constant 1 : index
      %c0_24 = arith.constant 0 : index
      %c0_25 = arith.constant 0 : index
      %c0_26 = arith.constant 0 : index
      %27 = vector.load %arg2[%c1_23, %c0_24, %c0_25, %c0_26] : memref<3x3x16x32xbf16, #tpu.memory_space<vmem>>, vector<1x1x16x32xbf16>
      %28 = vector.shape_cast %27 : vector<1x1x16x32xbf16> to vector<16x32xbf16>
      %cst_27 = arith.constant dense<0.000000e+00> : vector<28x32xf32>
      %29 = tpu.matmul %26, %28, %cst_27 {dimension_numbers = #tpu.dot_dimension_numbers<[1], [0], [0], [1], [0, 0, 1, 1], [], []>} : vector<28x16xbf16>, vector<16x32xbf16>, vector<28x32xf32> -> vector<28x32xf32>
      %30 = arith.addf %21, %29 : vector<28x32xf32>
      %31 = vector.extract_strided_slice %25 {offsets = [1, 0], sizes = [28, 16], strides = [1, 1]} : vector<30x16xbf16> to vector<28x16xbf16>
      %c1_28 = arith.constant 1 : index
      %c1_29 = arith.constant 1 : index
      %c0_30 = arith.constant 0 : index
      %c0_31 = arith.constant 0 : index
      %32 = vector.load %arg2[%c1_28, %c1_29, %c0_30, %c0_31] : memref<3x3x16x32xbf16, #tpu.memory_space<vmem>>, vector<1x1x16x32xbf16>
      %33 = vector.shape_cast %32 : vector<1x1x16x32xbf16> to vector<16x32xbf16>
      %cst_32 = arith.constant dense<0.000000e+00> : vector<28x32xf32>
      %34 = tpu.matmul %31, %33, %cst_32 {dimension_numbers = #tpu.dot_dimension_numbers<[1], [0], [0], [1], [0, 0, 1, 1], [], []>} : vector<28x16xbf16>, vector<16x32xbf16>, vector<28x32xf32> -> vector<28x32xf32>
      %35 = arith.addf %30, %34 : vector<28x32xf32>
      %36 = vector.extract_strided_slice %25 {offsets = [2, 0], sizes = [28, 16], strides = [1, 1]} : vector<30x16xbf16> to vector<28x16xbf16>
      %c1_33 = arith.constant 1 : index
      %c2_34 = arith.constant 2 : index
      %c0_35 = arith.constant 0 : index
      %c0_36 = arith.constant 0 : index
      %37 = vector.load %arg2[%c1_33, %c2_34, %c0_35, %c0_36] : memref<3x3x16x32xbf16, #tpu.memory_space<vmem>>, vector<1x1x16x32xbf16>
      %38 = vector.shape_cast %37 : vector<1x1x16x32xbf16> to vector<16x32xbf16>
      %cst_37 = arith.constant dense<0.000000e+00> : vector<28x32xf32>
      %39 = tpu.matmul %36, %38, %cst_37 {dimension_numbers = #tpu.dot_dimension_numbers<[1], [0], [0], [1], [0, 0, 1, 1], [], []>} : vector<28x16xbf16>, vector<16x32xbf16>, vector<28x32xf32> -> vector<28x32xf32>
      %40 = arith.addf %35, %39 : vector<28x32xf32>
      %c2_i32 = arith.constant 2 : i32
      %41 = arith.addi %arg5, %c2_i32 : i32
      %c0_38 = arith.constant 0 : index
      %42 = arith.index_cast %41 : i32 to index
      %c0_39 = arith.constant 0 : index
      %c0_40 = arith.constant 0 : index
      %43 = vector.load %arg1[%c0_38, %42, %c0_39, %c0_40] : memref<1x30x30x16xbf16, #tpu.memory_space<vmem>>, vector<1x1x30x16xbf16>
      %44 = vector.shape_cast %43 : vector<1x1x30x16xbf16> to vector<30x16xbf16>
      %45 = vector.extract_strided_slice %44 {offsets = [0, 0], sizes = [28, 16], strides = [1, 1]} : vector<30x16xbf16> to vector<28x16xbf16>
      %c2_41 = arith.constant 2 : index
      %c0_42 = arith.constant 0 : index
      %c0_43 = arith.constant 0 : index
      %c0_44 = arith.constant 0 : index
      %46 = vector.load %arg2[%c2_41, %c0_42, %c0_43, %c0_44] : memref<3x3x16x32xbf16, #tpu.memory_space<vmem>>, vector<1x1x16x32xbf16>
      %47 = vector.shape_cast %46 : vector<1x1x16x32xbf16> to vector<16x32xbf16>
      %cst_45 = arith.constant dense<0.000000e+00> : vector<28x32xf32>
      %48 = tpu.matmul %45, %47, %cst_45 {dimension_numbers = #tpu.dot_dimension_numbers<[1], [0], [0], [1], [0, 0, 1, 1], [], []>} : vector<28x16xbf16>, vector<16x32xbf16>, vector<28x32xf32> -> vector<28x32xf32>
      %49 = arith.addf %40, %48 : vector<28x32xf32>
      %50 = vector.extract_strided_slice %44 {offsets = [1, 0], sizes = [28, 16], strides = [1, 1]} : vector<30x16xbf16> to vector<28x16xbf16>
      %c2_46 = arith.constant 2 : index
      %c1_47 = arith.constant 1 : index
      %c0_48 = arith.constant 0 : index
      %c0_49 = arith.constant 0 : index
      %51 = vector.load %arg2[%c2_46, %c1_47, %c0_48, %c0_49] : memref<3x3x16x32xbf16, #tpu.memory_space<vmem>>, vector<1x1x16x32xbf16>
      %52 = vector.shape_cast %51 : vector<1x1x16x32xbf16> to vector<16x32xbf16>
      %cst_50 = arith.constant dense<0.000000e+00> : vector<28x32xf32>
      %53 = tpu.matmul %50, %52, %cst_50 {dimension_numbers = #tpu.dot_dimension_numbers<[1], [0], [0], [1], [0, 0, 1, 1], [], []>} : vector<28x16xbf16>, vector<16x32xbf16>, vector<28x32xf32> -> vector<28x32xf32>
      %54 = arith.addf %49, %53 : vector<28x32xf32>
      %55 = vector.extract_strided_slice %44 {offsets = [2, 0], sizes = [28, 16], strides = [1, 1]} : vector<30x16xbf16> to vector<28x16xbf16>
      %c2_51 = arith.constant 2 : index
      %c2_52 = arith.constant 2 : index
      %c0_53 = arith.constant 0 : index
      %c0_54 = arith.constant 0 : index
      %56 = vector.load %arg2[%c2_51, %c2_52, %c0_53, %c0_54] : memref<3x3x16x32xbf16, #tpu.memory_space<vmem>>, vector<1x1x16x32xbf16>
      %57 = vector.shape_cast %56 : vector<1x1x16x32xbf16> to vector<16x32xbf16>
      %cst_55 = arith.constant dense<0.000000e+00> : vector<28x32xf32>
      %58 = tpu.matmul %55, %57, %cst_55 {dimension_numbers = #tpu.dot_dimension_numbers<[1], [0], [0], [1], [0, 0, 1, 1], [], []>} : vector<28x16xbf16>, vector<16x32xbf16>, vector<28x32xf32> -> vector<28x32xf32>
      %59 = arith.addf %54, %58 : vector<28x32xf32>
      %60 = vector.broadcast %0 : vector<1x32xf32> to vector<28x32xf32>
      %61 = arith.addf %59, %60 : vector<28x32xf32>
      %cst_56 = arith.constant 0.000000e+00 : f32
      %62 = vector.broadcast %cst_56 : f32 to vector<28x32xf32>
      %63 = arith.maximumf %61, %62 : vector<28x32xf32>
      %64 = arith.truncf %63 : vector<28x32xf32> to vector<28x32xbf16>
      %c0_57 = arith.constant 0 : index
      %65 = arith.index_cast %arg5 : i32 to index
      %c0_58 = arith.constant 0 : index
      %c0_59 = arith.constant 0 : index
      %66 = vector.load %arg4[%c0_57, %65, %c0_58, %c0_59] : memref<1x28x28x32xbf16, #tpu.memory_space<vmem>>, vector<1x1x28x32xbf16>
      %67 = vector.shape_cast %66 : vector<1x1x28x32xbf16> to vector<28x32xbf16>
      %68 = vector.shape_cast %64 : vector<28x32xbf16> to vector<1x1x28x32xbf16>
      tpu.vector_store %arg4[%c0_57, %65, %c0_58, %c0_59], %68 {strides = array<i32>} : memref<1x28x28x32xbf16, #tpu.memory_space<vmem>>, vector<1x1x28x32xbf16>,
    }
    %c28_i32_1 = arith.constant 28 : i32
    return
  }
  func.func @transform_0(%arg0: i32) -> (i32, i32, i32, i32) {
    %c0_i32 = arith.constant 0 : i32
    %c0_i32_0 = arith.constant 0 : i32
    %c0_i32_1 = arith.constant 0 : i32
    %c0_i32_2 = arith.constant 0 : i32
    return %arg0, %c0_i32, %c0_i32_0, %c0_i32_1 : i32, i32, i32, i32
  }
  func.func @transform_1(%arg0: i32) -> (i32, i32, i32, i32) {
    %c0_i32 = arith.constant 0 : i32
    %c0_i32_0 = arith.constant 0 : i32
    %c0_i32_1 = arith.constant 0 : i32
    %c0_i32_2 = arith.constant 0 : i32
    %c0_i32_3 = arith.constant 0 : i32
    return %c0_i32, %c0_i32_0, %c0_i32_1, %c0_i32_2 : i32, i32, i32, i32
  }
  func.func @transform_2(%arg0: i32) -> (i32, i32) {
    %c0_i32 = arith.constant 0 : i32
    %c0_i32_0 = arith.constant 0 : i32
    %c0_i32_1 = arith.constant 0 : i32
    return %c0_i32, %c0_i32_0 : i32, i32
  }
  func.func @transform_3(%arg0: i32) -> (i32, i32, i32, i32) {
    %c0_i32 = arith.constant 0 : i32
    %c0_i32_0 = arith.constant 0 : i32
    %c0_i32_1 = arith.constant 0 : i32
    %c0_i32_2 = arith.constant 0 : i32
    return %arg0, %c0_i32, %c0_i32_0, %c0_i32_1 : i32, i32, i32, i32
  }
}

module attributes {stable_mosaic.version = 11 : i64} {
  func.func @_conv3x3_kernel(%arg0: i32, %arg1: memref<1x28x28x32xbf16, #tpu.memory_space<vmem>>, %arg2: memref<3x3x32x32xbf16, #tpu.memory_space<vmem>>, %arg3: memref<1x32xf32, #tpu.memory_space<vmem>>, %arg4: memref<1x26x26x32xbf16, #tpu.memory_space<vmem>>) attributes {dimension_semantics = [#tpu.dimension_semantics<parallel>], iteration_bounds = array<i64: 2>, scalar_prefetch = 0 : i64, scratch_operands = 0 : i64, tpu.core_type = #tpu.core_type<tc>, window_params = [{transform_indices = @transform_0, window_bounds = array<i64: 1, 28, 28, 32>}, {pipeline_mode = #tpu.pipeline_mode<synchronous>, transform_indices = @transform_1, window_bounds = array<i64: 3, 3, 32, 32>}, {pipeline_mode = #tpu.pipeline_mode<synchronous>, transform_indices = @transform_2, window_bounds = array<i64: 1, 32>}, {transform_indices = @transform_3, window_bounds = array<i64: 1, 26, 26, 32>}]} {
    %c0 = arith.constant 0 : index
    %c0_0 = arith.constant 0 : index
    %0 = vector.load %arg3[%c0, %c0_0] : memref<1x32xf32, #tpu.memory_space<vmem>>, vector<1x32xf32>
    %c0_i32 = arith.constant 0 : i32
    %c26_i32 = arith.constant 26 : i32
    %1 = arith.addi %c0_i32, %c26_i32 : i32
    %c1_i32 = arith.constant 1 : i32
    scf.for %arg5 = %c0_i32 to %1 step %c1_i32  : i32 {
      %cst = arith.constant 0.000000e+00 : f32
      %2 = vector.broadcast %cst : f32 to vector<26x32xf32>
      %c0_i32_2 = arith.constant 0 : i32
      %3 = arith.addi %arg5, %c0_i32_2 : i32
      %c0_3 = arith.constant 0 : index
      %4 = arith.index_cast %3 : i32 to index
      %c0_4 = arith.constant 0 : index
      %c0_5 = arith.constant 0 : index
      %5 = vector.load %arg1[%c0_3, %4, %c0_4, %c0_5] : memref<1x28x28x32xbf16, #tpu.memory_space<vmem>>, vector<1x1x28x32xbf16>
      %6 = vector.shape_cast %5 : vector<1x1x28x32xbf16> to vector<28x32xbf16>
      %7 = vector.extract_strided_slice %6 {offsets = [0, 0], sizes = [26, 32], strides = [1, 1]} : vector<28x32xbf16> to vector<26x32xbf16>
      %c0_6 = arith.constant 0 : index
      %c0_7 = arith.constant 0 : index
      %c0_8 = arith.constant 0 : index
      %c0_9 = arith.constant 0 : index
      %8 = vector.load %arg2[%c0_6, %c0_7, %c0_8, %c0_9] : memref<3x3x32x32xbf16, #tpu.memory_space<vmem>>, vector<1x1x32x32xbf16>
      %9 = vector.shape_cast %8 : vector<1x1x32x32xbf16> to vector<32x32xbf16>
      %cst_10 = arith.constant dense<0.000000e+00> : vector<26x32xf32>
      %10 = tpu.matmul %7, %9, %cst_10 {dimension_numbers = #tpu.dot_dimension_numbers<[1], [0], [0], [1], [0, 0, 1, 1], [], []>} : vector<26x32xbf16>, vector<32x32xbf16>, vector<26x32xf32> -> vector<26x32xf32>
      %11 = arith.addf %2, %10 : vector<26x32xf32>
      %12 = vector.extract_strided_slice %6 {offsets = [1, 0], sizes = [26, 32], strides = [1, 1]} : vector<28x32xbf16> to vector<26x32xbf16>
      %c0_11 = arith.constant 0 : index
      %c1 = arith.constant 1 : index
      %c0_12 = arith.constant 0 : index
      %c0_13 = arith.constant 0 : index
      %13 = vector.load %arg2[%c0_11, %c1, %c0_12, %c0_13] : memref<3x3x32x32xbf16, #tpu.memory_space<vmem>>, vector<1x1x32x32xbf16>
      %14 = vector.shape_cast %13 : vector<1x1x32x32xbf16> to vector<32x32xbf16>
      %cst_14 = arith.constant dense<0.000000e+00> : vector<26x32xf32>
      %15 = tpu.matmul %12, %14, %cst_14 {dimension_numbers = #tpu.dot_dimension_numbers<[1], [0], [0], [1], [0, 0, 1, 1], [], []>} : vector<26x32xbf16>, vector<32x32xbf16>, vector<26x32xf32> -> vector<26x32xf32>
      %16 = arith.addf %11, %15 : vector<26x32xf32>
      %17 = vector.extract_strided_slice %6 {offsets = [2, 0], sizes = [26, 32], strides = [1, 1]} : vector<28x32xbf16> to vector<26x32xbf16>
      %c0_15 = arith.constant 0 : index
      %c2 = arith.constant 2 : index
      %c0_16 = arith.constant 0 : index
      %c0_17 = arith.constant 0 : index
      %18 = vector.load %arg2[%c0_15, %c2, %c0_16, %c0_17] : memref<3x3x32x32xbf16, #tpu.memory_space<vmem>>, vector<1x1x32x32xbf16>
      %19 = vector.shape_cast %18 : vector<1x1x32x32xbf16> to vector<32x32xbf16>
      %cst_18 = arith.constant dense<0.000000e+00> : vector<26x32xf32>
      %20 = tpu.matmul %17, %19, %cst_18 {dimension_numbers = #tpu.dot_dimension_numbers<[1], [0], [0], [1], [0, 0, 1, 1], [], []>} : vector<26x32xbf16>, vector<32x32xbf16>, vector<26x32xf32> -> vector<26x32xf32>
      %21 = arith.addf %16, %20 : vector<26x32xf32>
      %c1_i32_19 = arith.constant 1 : i32
      %22 = arith.addi %arg5, %c1_i32_19 : i32
      %c0_20 = arith.constant 0 : index
      %23 = arith.index_cast %22 : i32 to index
      %c0_21 = arith.constant 0 : index
      %c0_22 = arith.constant 0 : index
      %24 = vector.load %arg1[%c0_20, %23, %c0_21, %c0_22] : memref<1x28x28x32xbf16, #tpu.memory_space<vmem>>, vector<1x1x28x32xbf16>
      %25 = vector.shape_cast %24 : vector<1x1x28x32xbf16> to vector<28x32xbf16>
      %26 = vector.extract_strided_slice %25 {offsets = [0, 0], sizes = [26, 32], strides = [1, 1]} : vector<28x32xbf16> to vector<26x32xbf16>
      %c1_23 = arith.constant 1 : index
      %c0_24 = arith.constant 0 : index
      %c0_25 = arith.constant 0 : index
      %c0_26 = arith.constant 0 : index
      %27 = vector.load %arg2[%c1_23, %c0_24, %c0_25, %c0_26] : memref<3x3x32x32xbf16, #tpu.memory_space<vmem>>, vector<1x1x32x32xbf16>
      %28 = vector.shape_cast %27 : vector<1x1x32x32xbf16> to vector<32x32xbf16>
      %cst_27 = arith.constant dense<0.000000e+00> : vector<26x32xf32>
      %29 = tpu.matmul %26, %28, %cst_27 {dimension_numbers = #tpu.dot_dimension_numbers<[1], [0], [0], [1], [0, 0, 1, 1], [], []>} : vector<26x32xbf16>, vector<32x32xbf16>, vector<26x32xf32> -> vector<26x32xf32>
      %30 = arith.addf %21, %29 : vector<26x32xf32>
      %31 = vector.extract_strided_slice %25 {offsets = [1, 0], sizes = [26, 32], strides = [1, 1]} : vector<28x32xbf16> to vector<26x32xbf16>
      %c1_28 = arith.constant 1 : index
      %c1_29 = arith.constant 1 : index
      %c0_30 = arith.constant 0 : index
      %c0_31 = arith.constant 0 : index
      %32 = vector.load %arg2[%c1_28, %c1_29, %c0_30, %c0_31] : memref<3x3x32x32xbf16, #tpu.memory_space<vmem>>, vector<1x1x32x32xbf16>
      %33 = vector.shape_cast %32 : vector<1x1x32x32xbf16> to vector<32x32xbf16>
      %cst_32 = arith.constant dense<0.000000e+00> : vector<26x32xf32>
      %34 = tpu.matmul %31, %33, %cst_32 {dimension_numbers = #tpu.dot_dimension_numbers<[1], [0], [0], [1], [0, 0, 1, 1], [], []>} : vector<26x32xbf16>, vector<32x32xbf16>, vector<26x32xf32> -> vector<26x32xf32>
      %35 = arith.addf %30, %34 : vector<26x32xf32>
      %36 = vector.extract_strided_slice %25 {offsets = [2, 0], sizes = [26, 32], strides = [1, 1]} : vector<28x32xbf16> to vector<26x32xbf16>
      %c1_33 = arith.constant 1 : index
      %c2_34 = arith.constant 2 : index
      %c0_35 = arith.constant 0 : index
      %c0_36 = arith.constant 0 : index
      %37 = vector.load %arg2[%c1_33, %c2_34, %c0_35, %c0_36] : memref<3x3x32x32xbf16, #tpu.memory_space<vmem>>, vector<1x1x32x32xbf16>
      %38 = vector.shape_cast %37 : vector<1x1x32x32xbf16> to vector<32x32xbf16>
      %cst_37 = arith.constant dense<0.000000e+00> : vector<26x32xf32>
      %39 = tpu.matmul %36, %38, %cst_37 {dimension_numbers = #tpu.dot_dimension_numbers<[1], [0], [0], [1], [0, 0, 1, 1], [], []>} : vector<26x32xbf16>, vector<32x32xbf16>, vector<26x32xf32> -> vector<26x32xf32>
      %40 = arith.addf %35, %39 : vector<26x32xf32>
      %c2_i32 = arith.constant 2 : i32
      %41 = arith.addi %arg5, %c2_i32 : i32
      %c0_38 = arith.constant 0 : index
      %42 = arith.index_cast %41 : i32 to index
      %c0_39 = arith.constant 0 : index
      %c0_40 = arith.constant 0 : index
      %43 = vector.load %arg1[%c0_38, %42, %c0_39, %c0_40] : memref<1x28x28x32xbf16, #tpu.memory_space<vmem>>, vector<1x1x28x32xbf16>
      %44 = vector.shape_cast %43 : vector<1x1x28x32xbf16> to vector<28x32xbf16>
      %45 = vector.extract_strided_slice %44 {offsets = [0, 0], sizes = [26, 32], strides = [1, 1]} : vector<28x32xbf16> to vector<26x32xbf16>
      %c2_41 = arith.constant 2 : index
      %c0_42 = arith.constant 0 : index
      %c0_43 = arith.constant 0 : index
      %c0_44 = arith.constant 0 : index
      %46 = vector.load %arg2[%c2_41, %c0_42, %c0_43, %c0_44] : memref<3x3x32x32xbf16, #tpu.memory_space<vmem>>, vector<1x1x32x32xbf16>
      %47 = vector.shape_cast %46 : vector<1x1x32x32xbf16> to vector<32x32xbf16>
      %cst_45 = arith.constant dense<0.000000e+00> : vector<26x32xf32>
      %48 = tpu.matmul %45, %47, %cst_45 {dimension_numbers = #tpu.dot_dimension_numbers<[1], [0], [0], [1], [0, 0, 1, 1], [], []>} : vector<26x32xbf16>, vector<32x32xbf16>, vector<26x32xf32> -> vector<26x32xf32>
      %49 = arith.addf %40, %48 : vector<26x32xf32>
      %50 = vector.extract_strided_slice %44 {offsets = [1, 0], sizes = [26, 32], strides = [1, 1]} : vector<28x32xbf16> to vector<26x32xbf16>
      %c2_46 = arith.constant 2 : index
      %c1_47 = arith.constant 1 : index
      %c0_48 = arith.constant 0 : index
      %c0_49 = arith.constant 0 : index
      %51 = vector.load %arg2[%c2_46, %c1_47, %c0_48, %c0_49] : memref<3x3x32x32xbf16, #tpu.memory_space<vmem>>, vector<1x1x32x32xbf16>
      %52 = vector.shape_cast %51 : vector<1x1x32x32xbf16> to vector<32x32xbf16>
      %cst_50 = arith.constant dense<0.000000e+00> : vector<26x32xf32>
      %53 = tpu.matmul %50, %52, %cst_50 {dimension_numbers = #tpu.dot_dimension_numbers<[1], [0], [0], [1], [0, 0, 1, 1], [], []>} : vector<26x32xbf16>, vector<32x32xbf16>, vector<26x32xf32> -> vector<26x32xf32>
      %54 = arith.addf %49, %53 : vector<26x32xf32>
      %55 = vector.extract_strided_slice %44 {offsets = [2, 0], sizes = [26, 32], strides = [1, 1]} : vector<28x32xbf16> to vector<26x32xbf16>
      %c2_51 = arith.constant 2 : index
      %c2_52 = arith.constant 2 : index
      %c0_53 = arith.constant 0 : index
      %c0_54 = arith.constant 0 : index
      %56 = vector.load %arg2[%c2_51, %c2_52, %c0_53, %c0_54] : memref<3x3x32x32xbf16, #tpu.memory_space<vmem>>, vector<1x1x32x32xbf16>
      %57 = vector.shape_cast %56 : vector<1x1x32x32xbf16> to vector<32x32xbf16>
      %cst_55 = arith.constant dense<0.000000e+00> : vector<26x32xf32>
      %58 = tpu.matmul %55, %57, %cst_55 {dimension_numbers = #tpu.dot_dimension_numbers<[1], [0], [0], [1], [0, 0, 1, 1], [], []>} : vector<26x32xbf16>, vector<32x32xbf16>, vector<26x32xf32> -> vector<26x32xf32>
      %59 = arith.addf %54, %58 : vector<26x32xf32>
      %60 = vector.broadcast %0 : vector<1x32xf32> to vector<26x32xf32>
      %61 = arith.addf %59, %60 : vector<26x32xf32>
      %62 = arith.truncf %61 : vector<26x32xf32> to vector<26x32xbf16>
      %c0_56 = arith.constant 0 : index
      %63 = arith.index_cast %arg5 : i32 to index
      %c0_57 = arith.constant 0 : index
      %c0_58 = arith.constant 0 : index
      %64 = vector.load %arg4[%c0_56, %63, %c0_57, %c0_58] : memref<1x26x26x32xbf16, #tpu.memory_space<vmem>>, vector<1x1x26x32xbf16>
      %65 = vector.shape_cast %64 : vector<1x1x26x32xbf16> to vector<26x32xbf16>
      %66 = vector.shape_cast %62 : vector<26x32xbf16> to vector<1x1x26x32xbf16>
      tpu.vector_store %arg4[%c0_56, %63, %c0_57, %c0_58], %66 {strides = array<i32>} : memref<1x26x26x32xbf16, #tpu.memory_space<vmem>>, vector<1x1x26x32xbf16>,
    }
    %c26_i32_1 = arith.constant 26 : i32
    return
  }
  func.func @transform_0(%arg0: i32) -> (i32, i32, i32, i32) {
    %c0_i32 = arith.constant 0 : i32
    %c0_i32_0 = arith.constant 0 : i32
    %c0_i32_1 = arith.constant 0 : i32
    %c0_i32_2 = arith.constant 0 : i32
    return %arg0, %c0_i32, %c0_i32_0, %c0_i32_1 : i32, i32, i32, i32
  }
  func.func @transform_1(%arg0: i32) -> (i32, i32, i32, i32) {
    %c0_i32 = arith.constant 0 : i32
    %c0_i32_0 = arith.constant 0 : i32
    %c0_i32_1 = arith.constant 0 : i32
    %c0_i32_2 = arith.constant 0 : i32
    %c0_i32_3 = arith.constant 0 : i32
    return %c0_i32, %c0_i32_0, %c0_i32_1, %c0_i32_2 : i32, i32, i32, i32
  }
  func.func @transform_2(%arg0: i32) -> (i32, i32) {
    %c0_i32 = arith.constant 0 : i32
    %c0_i32_0 = arith.constant 0 : i32
    %c0_i32_1 = arith.constant 0 : i32
    return %c0_i32, %c0_i32_0 : i32, i32
  }
  func.func @transform_3(%arg0: i32) -> (i32, i32, i32, i32) {
    %c0_i32 = arith.constant 0 : i32
    %c0_i32_0 = arith.constant 0 : i32
    %c0_i32_1 = arith.constant 0 : i32
    %c0_i32_2 = arith.constant 0 : i32
    return %arg0, %c0_i32, %c0_i32_0, %c0_i32_1 : i32, i32, i32, i32
  }
}

module attributes {stable_mosaic.version = 11 : i64} {
  func.func @_maxpool2_kernel(%arg0: i32, %arg1: memref<1x13x2x13x64xbf16, #tpu.memory_space<vmem>>, %arg2: memref<1x13x13x32xbf16, #tpu.memory_space<vmem>>) attributes {dimension_semantics = [#tpu.dimension_semantics<parallel>], iteration_bounds = array<i64: 2>, scalar_prefetch = 0 : i64, scratch_operands = 0 : i64, tpu.core_type = #tpu.core_type<tc>, window_params = [{transform_indices = @transform_0, window_bounds = array<i64: 1, 13, 2, 13, 64>}, {transform_indices = @transform_1, window_bounds = array<i64: 1, 13, 13, 32>}]} {
    %c0 = arith.constant 0 : index
    %c0_0 = arith.constant 0 : index
    %c0_1 = arith.constant 0 : index
    %c0_2 = arith.constant 0 : index
    %c0_3 = arith.constant 0 : index
    %0 = vector.load %arg1[%c0, %c0_0, %c0_1, %c0_2, %c0_3] : memref<1x13x2x13x64xbf16, #tpu.memory_space<vmem>>, vector<1x13x1x13x64xbf16>
    %1 = vector.shape_cast %0 : vector<1x13x1x13x64xbf16> to vector<13x13x64xbf16>
    %c0_4 = arith.constant 0 : index
    %c0_5 = arith.constant 0 : index
    %c1 = arith.constant 1 : index
    %c0_6 = arith.constant 0 : index
    %c0_7 = arith.constant 0 : index
    %2 = vector.load %arg1[%c0_4, %c0_5, %c1, %c0_6, %c0_7] : memref<1x13x2x13x64xbf16, #tpu.memory_space<vmem>>, vector<1x13x1x13x64xbf16>
    %3 = vector.shape_cast %2 : vector<1x13x1x13x64xbf16> to vector<13x13x64xbf16>
    %4 = arith.maximumf %1, %3 : vector<13x13x64xbf16>
    %5 = vector.extract_strided_slice %4 {offsets = [0, 0, 0], sizes = [13, 13, 32], strides = [1, 1, 1]} : vector<13x13x64xbf16> to vector<13x13x32xbf16>
    %6 = vector.extract_strided_slice %4 {offsets = [0, 0, 32], sizes = [13, 13, 32], strides = [1, 1, 1]} : vector<13x13x64xbf16> to vector<13x13x32xbf16>
    %7 = arith.maximumf %5, %6 : vector<13x13x32xbf16>
    %c0_8 = arith.constant 0 : index
    %c0_9 = arith.constant 0 : index
    %c0_10 = arith.constant 0 : index
    %c0_11 = arith.constant 0 : index
    %8 = vector.load %arg2[%c0_8, %c0_9, %c0_10, %c0_11] : memref<1x13x13x32xbf16, #tpu.memory_space<vmem>>, vector<1x13x13x32xbf16>
    %9 = vector.shape_cast %8 : vector<1x13x13x32xbf16> to vector<13x13x32xbf16>
    %10 = vector.shape_cast %7 : vector<13x13x32xbf16> to vector<1x13x13x32xbf16>
    tpu.vector_store %arg2[%c0_8, %c0_9, %c0_10, %c0_11], %10 {strides = array<i32>} : memref<1x13x13x32xbf16, #tpu.memory_space<vmem>>, vector<1x13x13x32xbf16>,
    return
  }
  func.func @transform_0(%arg0: i32) -> (i32, i32, i32, i32, i32) {
    %c0_i32 = arith.constant 0 : i32
    %c0_i32_0 = arith.constant 0 : i32
    %c0_i32_1 = arith.constant 0 : i32
    %c0_i32_2 = arith.constant 0 : i32
    %c0_i32_3 = arith.constant 0 : i32
    return %arg0, %c0_i32, %c0_i32_0, %c0_i32_1, %c0_i32_2 : i32, i32, i32, i32, i32
  }
  func.func @transform_1(%arg0: i32) -> (i32, i32, i32, i32) {
    %c0_i32 = arith.constant 0 : i32
    %c0_i32_0 = arith.constant 0 : i32
    %c0_i32_1 = arith.constant 0 : i32
    %c0_i32_2 = arith.constant 0 : i32
    return %arg0, %c0_i32, %c0_i32_0, %c0_i32_1 : i32, i32, i32, i32
  }
}

module attributes {stable_mosaic.version = 11 : i64} {
  func.func @_conv3x3_kernel(%arg0: i32, %arg1: memref<1x13x13x32xbf16, #tpu.memory_space<vmem>>, %arg2: memref<3x3x32x64xbf16, #tpu.memory_space<vmem>>, %arg3: memref<1x64xf32, #tpu.memory_space<vmem>>, %arg4: memref<1x11x11x64xbf16, #tpu.memory_space<vmem>>) attributes {dimension_semantics = [#tpu.dimension_semantics<parallel>], iteration_bounds = array<i64: 2>, scalar_prefetch = 0 : i64, scratch_operands = 0 : i64, tpu.core_type = #tpu.core_type<tc>, window_params = [{transform_indices = @transform_0, window_bounds = array<i64: 1, 13, 13, 32>}, {pipeline_mode = #tpu.pipeline_mode<synchronous>, transform_indices = @transform_1, window_bounds = array<i64: 3, 3, 32, 64>}, {pipeline_mode = #tpu.pipeline_mode<synchronous>, transform_indices = @transform_2, window_bounds = array<i64: 1, 64>}, {transform_indices = @transform_3, window_bounds = array<i64: 1, 11, 11, 64>}]} {
    %c0 = arith.constant 0 : index
    %c0_0 = arith.constant 0 : index
    %0 = vector.load %arg3[%c0, %c0_0] : memref<1x64xf32, #tpu.memory_space<vmem>>, vector<1x64xf32>
    %c0_i32 = arith.constant 0 : i32
    %c11_i32 = arith.constant 11 : i32
    %1 = arith.addi %c0_i32, %c11_i32 : i32
    %c1_i32 = arith.constant 1 : i32
    scf.for %arg5 = %c0_i32 to %1 step %c1_i32  : i32 {
      %cst = arith.constant 0.000000e+00 : f32
      %2 = vector.broadcast %cst : f32 to vector<11x64xf32>
      %c0_i32_2 = arith.constant 0 : i32
      %3 = arith.addi %arg5, %c0_i32_2 : i32
      %c0_3 = arith.constant 0 : index
      %4 = arith.index_cast %3 : i32 to index
      %c0_4 = arith.constant 0 : index
      %c0_5 = arith.constant 0 : index
      %5 = vector.load %arg1[%c0_3, %4, %c0_4, %c0_5] : memref<1x13x13x32xbf16, #tpu.memory_space<vmem>>, vector<1x1x13x32xbf16>
      %6 = vector.shape_cast %5 : vector<1x1x13x32xbf16> to vector<13x32xbf16>
      %7 = vector.extract_strided_slice %6 {offsets = [0, 0], sizes = [11, 32], strides = [1, 1]} : vector<13x32xbf16> to vector<11x32xbf16>
      %c0_6 = arith.constant 0 : index
      %c0_7 = arith.constant 0 : index
      %c0_8 = arith.constant 0 : index
      %c0_9 = arith.constant 0 : index
      %8 = vector.load %arg2[%c0_6, %c0_7, %c0_8, %c0_9] : memref<3x3x32x64xbf16, #tpu.memory_space<vmem>>, vector<1x1x32x64xbf16>
      %9 = vector.shape_cast %8 : vector<1x1x32x64xbf16> to vector<32x64xbf16>
      %cst_10 = arith.constant dense<0.000000e+00> : vector<11x64xf32>
      %10 = tpu.matmul %7, %9, %cst_10 {dimension_numbers = #tpu.dot_dimension_numbers<[1], [0], [0], [1], [0, 0, 1, 1], [], []>} : vector<11x32xbf16>, vector<32x64xbf16>, vector<11x64xf32> -> vector<11x64xf32>
      %11 = arith.addf %2, %10 : vector<11x64xf32>
      %12 = vector.extract_strided_slice %6 {offsets = [1, 0], sizes = [11, 32], strides = [1, 1]} : vector<13x32xbf16> to vector<11x32xbf16>
      %c0_11 = arith.constant 0 : index
      %c1 = arith.constant 1 : index
      %c0_12 = arith.constant 0 : index
      %c0_13 = arith.constant 0 : index
      %13 = vector.load %arg2[%c0_11, %c1, %c0_12, %c0_13] : memref<3x3x32x64xbf16, #tpu.memory_space<vmem>>, vector<1x1x32x64xbf16>
      %14 = vector.shape_cast %13 : vector<1x1x32x64xbf16> to vector<32x64xbf16>
      %cst_14 = arith.constant dense<0.000000e+00> : vector<11x64xf32>
      %15 = tpu.matmul %12, %14, %cst_14 {dimension_numbers = #tpu.dot_dimension_numbers<[1], [0], [0], [1], [0, 0, 1, 1], [], []>} : vector<11x32xbf16>, vector<32x64xbf16>, vector<11x64xf32> -> vector<11x64xf32>
      %16 = arith.addf %11, %15 : vector<11x64xf32>
      %17 = vector.extract_strided_slice %6 {offsets = [2, 0], sizes = [11, 32], strides = [1, 1]} : vector<13x32xbf16> to vector<11x32xbf16>
      %c0_15 = arith.constant 0 : index
      %c2 = arith.constant 2 : index
      %c0_16 = arith.constant 0 : index
      %c0_17 = arith.constant 0 : index
      %18 = vector.load %arg2[%c0_15, %c2, %c0_16, %c0_17] : memref<3x3x32x64xbf16, #tpu.memory_space<vmem>>, vector<1x1x32x64xbf16>
      %19 = vector.shape_cast %18 : vector<1x1x32x64xbf16> to vector<32x64xbf16>
      %cst_18 = arith.constant dense<0.000000e+00> : vector<11x64xf32>
      %20 = tpu.matmul %17, %19, %cst_18 {dimension_numbers = #tpu.dot_dimension_numbers<[1], [0], [0], [1], [0, 0, 1, 1], [], []>} : vector<11x32xbf16>, vector<32x64xbf16>, vector<11x64xf32> -> vector<11x64xf32>
      %21 = arith.addf %16, %20 : vector<11x64xf32>
      %c1_i32_19 = arith.constant 1 : i32
      %22 = arith.addi %arg5, %c1_i32_19 : i32
      %c0_20 = arith.constant 0 : index
      %23 = arith.index_cast %22 : i32 to index
      %c0_21 = arith.constant 0 : index
      %c0_22 = arith.constant 0 : index
      %24 = vector.load %arg1[%c0_20, %23, %c0_21, %c0_22] : memref<1x13x13x32xbf16, #tpu.memory_space<vmem>>, vector<1x1x13x32xbf16>
      %25 = vector.shape_cast %24 : vector<1x1x13x32xbf16> to vector<13x32xbf16>
      %26 = vector.extract_strided_slice %25 {offsets = [0, 0], sizes = [11, 32], strides = [1, 1]} : vector<13x32xbf16> to vector<11x32xbf16>
      %c1_23 = arith.constant 1 : index
      %c0_24 = arith.constant 0 : index
      %c0_25 = arith.constant 0 : index
      %c0_26 = arith.constant 0 : index
      %27 = vector.load %arg2[%c1_23, %c0_24, %c0_25, %c0_26] : memref<3x3x32x64xbf16, #tpu.memory_space<vmem>>, vector<1x1x32x64xbf16>
      %28 = vector.shape_cast %27 : vector<1x1x32x64xbf16> to vector<32x64xbf16>
      %cst_27 = arith.constant dense<0.000000e+00> : vector<11x64xf32>
      %29 = tpu.matmul %26, %28, %cst_27 {dimension_numbers = #tpu.dot_dimension_numbers<[1], [0], [0], [1], [0, 0, 1, 1], [], []>} : vector<11x32xbf16>, vector<32x64xbf16>, vector<11x64xf32> -> vector<11x64xf32>
      %30 = arith.addf %21, %29 : vector<11x64xf32>
      %31 = vector.extract_strided_slice %25 {offsets = [1, 0], sizes = [11, 32], strides = [1, 1]} : vector<13x32xbf16> to vector<11x32xbf16>
      %c1_28 = arith.constant 1 : index
      %c1_29 = arith.constant 1 : index
      %c0_30 = arith.constant 0 : index
      %c0_31 = arith.constant 0 : index
      %32 = vector.load %arg2[%c1_28, %c1_29, %c0_30, %c0_31] : memref<3x3x32x64xbf16, #tpu.memory_space<vmem>>, vector<1x1x32x64xbf16>
      %33 = vector.shape_cast %32 : vector<1x1x32x64xbf16> to vector<32x64xbf16>
      %cst_32 = arith.constant dense<0.000000e+00> : vector<11x64xf32>
      %34 = tpu.matmul %31, %33, %cst_32 {dimension_numbers = #tpu.dot_dimension_numbers<[1], [0], [0], [1], [0, 0, 1, 1], [], []>} : vector<11x32xbf16>, vector<32x64xbf16>, vector<11x64xf32> -> vector<11x64xf32>
      %35 = arith.addf %30, %34 : vector<11x64xf32>
      %36 = vector.extract_strided_slice %25 {offsets = [2, 0], sizes = [11, 32], strides = [1, 1]} : vector<13x32xbf16> to vector<11x32xbf16>
      %c1_33 = arith.constant 1 : index
      %c2_34 = arith.constant 2 : index
      %c0_35 = arith.constant 0 : index
      %c0_36 = arith.constant 0 : index
      %37 = vector.load %arg2[%c1_33, %c2_34, %c0_35, %c0_36] : memref<3x3x32x64xbf16, #tpu.memory_space<vmem>>, vector<1x1x32x64xbf16>
      %38 = vector.shape_cast %37 : vector<1x1x32x64xbf16> to vector<32x64xbf16>
      %cst_37 = arith.constant dense<0.000000e+00> : vector<11x64xf32>
      %39 = tpu.matmul %36, %38, %cst_37 {dimension_numbers = #tpu.dot_dimension_numbers<[1], [0], [0], [1], [0, 0, 1, 1], [], []>} : vector<11x32xbf16>, vector<32x64xbf16>, vector<11x64xf32> -> vector<11x64xf32>
      %40 = arith.addf %35, %39 : vector<11x64xf32>
      %c2_i32 = arith.constant 2 : i32
      %41 = arith.addi %arg5, %c2_i32 : i32
      %c0_38 = arith.constant 0 : index
      %42 = arith.index_cast %41 : i32 to index
      %c0_39 = arith.constant 0 : index
      %c0_40 = arith.constant 0 : index
      %43 = vector.load %arg1[%c0_38, %42, %c0_39, %c0_40] : memref<1x13x13x32xbf16, #tpu.memory_space<vmem>>, vector<1x1x13x32xbf16>
      %44 = vector.shape_cast %43 : vector<1x1x13x32xbf16> to vector<13x32xbf16>
      %45 = vector.extract_strided_slice %44 {offsets = [0, 0], sizes = [11, 32], strides = [1, 1]} : vector<13x32xbf16> to vector<11x32xbf16>
      %c2_41 = arith.constant 2 : index
      %c0_42 = arith.constant 0 : index
      %c0_43 = arith.constant 0 : index
      %c0_44 = arith.constant 0 : index
      %46 = vector.load %arg2[%c2_41, %c0_42, %c0_43, %c0_44] : memref<3x3x32x64xbf16, #tpu.memory_space<vmem>>, vector<1x1x32x64xbf16>
      %47 = vector.shape_cast %46 : vector<1x1x32x64xbf16> to vector<32x64xbf16>
      %cst_45 = arith.constant dense<0.000000e+00> : vector<11x64xf32>
      %48 = tpu.matmul %45, %47, %cst_45 {dimension_numbers = #tpu.dot_dimension_numbers<[1], [0], [0], [1], [0, 0, 1, 1], [], []>} : vector<11x32xbf16>, vector<32x64xbf16>, vector<11x64xf32> -> vector<11x64xf32>
      %49 = arith.addf %40, %48 : vector<11x64xf32>
      %50 = vector.extract_strided_slice %44 {offsets = [1, 0], sizes = [11, 32], strides = [1, 1]} : vector<13x32xbf16> to vector<11x32xbf16>
      %c2_46 = arith.constant 2 : index
      %c1_47 = arith.constant 1 : index
      %c0_48 = arith.constant 0 : index
      %c0_49 = arith.constant 0 : index
      %51 = vector.load %arg2[%c2_46, %c1_47, %c0_48, %c0_49] : memref<3x3x32x64xbf16, #tpu.memory_space<vmem>>, vector<1x1x32x64xbf16>
      %52 = vector.shape_cast %51 : vector<1x1x32x64xbf16> to vector<32x64xbf16>
      %cst_50 = arith.constant dense<0.000000e+00> : vector<11x64xf32>
      %53 = tpu.matmul %50, %52, %cst_50 {dimension_numbers = #tpu.dot_dimension_numbers<[1], [0], [0], [1], [0, 0, 1, 1], [], []>} : vector<11x32xbf16>, vector<32x64xbf16>, vector<11x64xf32> -> vector<11x64xf32>
      %54 = arith.addf %49, %53 : vector<11x64xf32>
      %55 = vector.extract_strided_slice %44 {offsets = [2, 0], sizes = [11, 32], strides = [1, 1]} : vector<13x32xbf16> to vector<11x32xbf16>
      %c2_51 = arith.constant 2 : index
      %c2_52 = arith.constant 2 : index
      %c0_53 = arith.constant 0 : index
      %c0_54 = arith.constant 0 : index
      %56 = vector.load %arg2[%c2_51, %c2_52, %c0_53, %c0_54] : memref<3x3x32x64xbf16, #tpu.memory_space<vmem>>, vector<1x1x32x64xbf16>
      %57 = vector.shape_cast %56 : vector<1x1x32x64xbf16> to vector<32x64xbf16>
      %cst_55 = arith.constant dense<0.000000e+00> : vector<11x64xf32>
      %58 = tpu.matmul %55, %57, %cst_55 {dimension_numbers = #tpu.dot_dimension_numbers<[1], [0], [0], [1], [0, 0, 1, 1], [], []>} : vector<11x32xbf16>, vector<32x64xbf16>, vector<11x64xf32> -> vector<11x64xf32>
      %59 = arith.addf %54, %58 : vector<11x64xf32>
      %60 = vector.broadcast %0 : vector<1x64xf32> to vector<11x64xf32>
      %61 = arith.addf %59, %60 : vector<11x64xf32>
      %cst_56 = arith.constant 0.000000e+00 : f32
      %62 = vector.broadcast %cst_56 : f32 to vector<11x64xf32>
      %63 = arith.maximumf %61, %62 : vector<11x64xf32>
      %64 = arith.truncf %63 : vector<11x64xf32> to vector<11x64xbf16>
      %c0_57 = arith.constant 0 : index
      %65 = arith.index_cast %arg5 : i32 to index
      %c0_58 = arith.constant 0 : index
      %c0_59 = arith.constant 0 : index
      %66 = vector.load %arg4[%c0_57, %65, %c0_58, %c0_59] : memref<1x11x11x64xbf16, #tpu.memory_space<vmem>>, vector<1x1x11x64xbf16>
      %67 = vector.shape_cast %66 : vector<1x1x11x64xbf16> to vector<11x64xbf16>
      %68 = vector.shape_cast %64 : vector<11x64xbf16> to vector<1x1x11x64xbf16>
      tpu.vector_store %arg4[%c0_57, %65, %c0_58, %c0_59], %68 {strides = array<i32>} : memref<1x11x11x64xbf16, #tpu.memory_space<vmem>>, vector<1x1x11x64xbf16>,
    }
    %c11_i32_1 = arith.constant 11 : i32
    return
  }
  func.func @transform_0(%arg0: i32) -> (i32, i32, i32, i32) {
    %c0_i32 = arith.constant 0 : i32
    %c0_i32_0 = arith.constant 0 : i32
    %c0_i32_1 = arith.constant 0 : i32
    %c0_i32_2 = arith.constant 0 : i32
    return %arg0, %c0_i32, %c0_i32_0, %c0_i32_1 : i32, i32, i32, i32
  }
  func.func @transform_1(%arg0: i32) -> (i32, i32, i32, i32) {
    %c0_i32 = arith.constant 0 : i32
    %c0_i32_0 = arith.constant 0 : i32
    %c0_i32_1 = arith.constant 0 : i32
    %c0_i32_2 = arith.constant 0 : i32
    %c0_i32_3 = arith.constant 0 : i32
    return %c0_i32, %c0_i32_0, %c0_i32_1, %c0_i32_2 : i32, i32, i32, i32
  }
  func.func @transform_2(%arg0: i32) -> (i32, i32) {
    %c0_i32 = arith.constant 0 : i32
    %c0_i32_0 = arith.constant 0 : i32
    %c0_i32_1 = arith.constant 0 : i32
    return %c0_i32, %c0_i32_0 : i32, i32
  }
  func.func @transform_3(%arg0: i32) -> (i32, i32, i32, i32) {
    %c0_i32 = arith.constant 0 : i32
    %c0_i32_0 = arith.constant 0 : i32
    %c0_i32_1 = arith.constant 0 : i32
    %c0_i32_2 = arith.constant 0 : i32
    return %arg0, %c0_i32, %c0_i32_0, %c0_i32_1 : i32, i32, i32, i32
  }
}

module attributes {stable_mosaic.version = 11 : i64} {
  func.func @_conv3x3_kernel(%arg0: i32, %arg1: memref<1x11x11x64xbf16, #tpu.memory_space<vmem>>, %arg2: memref<3x3x64x64xbf16, #tpu.memory_space<vmem>>, %arg3: memref<1x64xf32, #tpu.memory_space<vmem>>, %arg4: memref<1x9x9x64xbf16, #tpu.memory_space<vmem>>) attributes {dimension_semantics = [#tpu.dimension_semantics<parallel>], iteration_bounds = array<i64: 2>, scalar_prefetch = 0 : i64, scratch_operands = 0 : i64, tpu.core_type = #tpu.core_type<tc>, window_params = [{transform_indices = @transform_0, window_bounds = array<i64: 1, 11, 11, 64>}, {pipeline_mode = #tpu.pipeline_mode<synchronous>, transform_indices = @transform_1, window_bounds = array<i64: 3, 3, 64, 64>}, {pipeline_mode = #tpu.pipeline_mode<synchronous>, transform_indices = @transform_2, window_bounds = array<i64: 1, 64>}, {transform_indices = @transform_3, window_bounds = array<i64: 1, 9, 9, 64>}]} {
    %c0 = arith.constant 0 : index
    %c0_0 = arith.constant 0 : index
    %0 = vector.load %arg3[%c0, %c0_0] : memref<1x64xf32, #tpu.memory_space<vmem>>, vector<1x64xf32>
    %c0_i32 = arith.constant 0 : i32
    %c9_i32 = arith.constant 9 : i32
    %1 = arith.addi %c0_i32, %c9_i32 : i32
    %c1_i32 = arith.constant 1 : i32
    scf.for %arg5 = %c0_i32 to %1 step %c1_i32  : i32 {
      %cst = arith.constant 0.000000e+00 : f32
      %2 = vector.broadcast %cst : f32 to vector<9x64xf32>
      %c0_i32_2 = arith.constant 0 : i32
      %3 = arith.addi %arg5, %c0_i32_2 : i32
      %c0_3 = arith.constant 0 : index
      %4 = arith.index_cast %3 : i32 to index
      %c0_4 = arith.constant 0 : index
      %c0_5 = arith.constant 0 : index
      %5 = vector.load %arg1[%c0_3, %4, %c0_4, %c0_5] : memref<1x11x11x64xbf16, #tpu.memory_space<vmem>>, vector<1x1x11x64xbf16>
      %6 = vector.shape_cast %5 : vector<1x1x11x64xbf16> to vector<11x64xbf16>
      %7 = vector.extract_strided_slice %6 {offsets = [0, 0], sizes = [9, 64], strides = [1, 1]} : vector<11x64xbf16> to vector<9x64xbf16>
      %c0_6 = arith.constant 0 : index
      %c0_7 = arith.constant 0 : index
      %c0_8 = arith.constant 0 : index
      %c0_9 = arith.constant 0 : index
      %8 = vector.load %arg2[%c0_6, %c0_7, %c0_8, %c0_9] : memref<3x3x64x64xbf16, #tpu.memory_space<vmem>>, vector<1x1x64x64xbf16>
      %9 = vector.shape_cast %8 : vector<1x1x64x64xbf16> to vector<64x64xbf16>
      %cst_10 = arith.constant dense<0.000000e+00> : vector<9x64xf32>
      %10 = tpu.matmul %7, %9, %cst_10 {dimension_numbers = #tpu.dot_dimension_numbers<[1], [0], [0], [1], [0, 0, 1, 1], [], []>} : vector<9x64xbf16>, vector<64x64xbf16>, vector<9x64xf32> -> vector<9x64xf32>
      %11 = arith.addf %2, %10 : vector<9x64xf32>
      %12 = vector.extract_strided_slice %6 {offsets = [1, 0], sizes = [9, 64], strides = [1, 1]} : vector<11x64xbf16> to vector<9x64xbf16>
      %c0_11 = arith.constant 0 : index
      %c1 = arith.constant 1 : index
      %c0_12 = arith.constant 0 : index
      %c0_13 = arith.constant 0 : index
      %13 = vector.load %arg2[%c0_11, %c1, %c0_12, %c0_13] : memref<3x3x64x64xbf16, #tpu.memory_space<vmem>>, vector<1x1x64x64xbf16>
      %14 = vector.shape_cast %13 : vector<1x1x64x64xbf16> to vector<64x64xbf16>
      %cst_14 = arith.constant dense<0.000000e+00> : vector<9x64xf32>
      %15 = tpu.matmul %12, %14, %cst_14 {dimension_numbers = #tpu.dot_dimension_numbers<[1], [0], [0], [1], [0, 0, 1, 1], [], []>} : vector<9x64xbf16>, vector<64x64xbf16>, vector<9x64xf32> -> vector<9x64xf32>
      %16 = arith.addf %11, %15 : vector<9x64xf32>
      %17 = vector.extract_strided_slice %6 {offsets = [2, 0], sizes = [9, 64], strides = [1, 1]} : vector<11x64xbf16> to vector<9x64xbf16>
      %c0_15 = arith.constant 0 : index
      %c2 = arith.constant 2 : index
      %c0_16 = arith.constant 0 : index
      %c0_17 = arith.constant 0 : index
      %18 = vector.load %arg2[%c0_15, %c2, %c0_16, %c0_17] : memref<3x3x64x64xbf16, #tpu.memory_space<vmem>>, vector<1x1x64x64xbf16>
      %19 = vector.shape_cast %18 : vector<1x1x64x64xbf16> to vector<64x64xbf16>
      %cst_18 = arith.constant dense<0.000000e+00> : vector<9x64xf32>
      %20 = tpu.matmul %17, %19, %cst_18 {dimension_numbers = #tpu.dot_dimension_numbers<[1], [0], [0], [1], [0, 0, 1, 1], [], []>} : vector<9x64xbf16>, vector<64x64xbf16>, vector<9x64xf32> -> vector<9x64xf32>
      %21 = arith.addf %16, %20 : vector<9x64xf32>
      %c1_i32_19 = arith.constant 1 : i32
      %22 = arith.addi %arg5, %c1_i32_19 : i32
      %c0_20 = arith.constant 0 : index
      %23 = arith.index_cast %22 : i32 to index
      %c0_21 = arith.constant 0 : index
      %c0_22 = arith.constant 0 : index
      %24 = vector.load %arg1[%c0_20, %23, %c0_21, %c0_22] : memref<1x11x11x64xbf16, #tpu.memory_space<vmem>>, vector<1x1x11x64xbf16>
      %25 = vector.shape_cast %24 : vector<1x1x11x64xbf16> to vector<11x64xbf16>
      %26 = vector.extract_strided_slice %25 {offsets = [0, 0], sizes = [9, 64], strides = [1, 1]} : vector<11x64xbf16> to vector<9x64xbf16>
      %c1_23 = arith.constant 1 : index
      %c0_24 = arith.constant 0 : index
      %c0_25 = arith.constant 0 : index
      %c0_26 = arith.constant 0 : index
      %27 = vector.load %arg2[%c1_23, %c0_24, %c0_25, %c0_26] : memref<3x3x64x64xbf16, #tpu.memory_space<vmem>>, vector<1x1x64x64xbf16>
      %28 = vector.shape_cast %27 : vector<1x1x64x64xbf16> to vector<64x64xbf16>
      %cst_27 = arith.constant dense<0.000000e+00> : vector<9x64xf32>
      %29 = tpu.matmul %26, %28, %cst_27 {dimension_numbers = #tpu.dot_dimension_numbers<[1], [0], [0], [1], [0, 0, 1, 1], [], []>} : vector<9x64xbf16>, vector<64x64xbf16>, vector<9x64xf32> -> vector<9x64xf32>
      %30 = arith.addf %21, %29 : vector<9x64xf32>
      %31 = vector.extract_strided_slice %25 {offsets = [1, 0], sizes = [9, 64], strides = [1, 1]} : vector<11x64xbf16> to vector<9x64xbf16>
      %c1_28 = arith.constant 1 : index
      %c1_29 = arith.constant 1 : index
      %c0_30 = arith.constant 0 : index
      %c0_31 = arith.constant 0 : index
      %32 = vector.load %arg2[%c1_28, %c1_29, %c0_30, %c0_31] : memref<3x3x64x64xbf16, #tpu.memory_space<vmem>>, vector<1x1x64x64xbf16>
      %33 = vector.shape_cast %32 : vector<1x1x64x64xbf16> to vector<64x64xbf16>
      %cst_32 = arith.constant dense<0.000000e+00> : vector<9x64xf32>
      %34 = tpu.matmul %31, %33, %cst_32 {dimension_numbers = #tpu.dot_dimension_numbers<[1], [0], [0], [1], [0, 0, 1, 1], [], []>} : vector<9x64xbf16>, vector<64x64xbf16>, vector<9x64xf32> -> vector<9x64xf32>
      %35 = arith.addf %30, %34 : vector<9x64xf32>
      %36 = vector.extract_strided_slice %25 {offsets = [2, 0], sizes = [9, 64], strides = [1, 1]} : vector<11x64xbf16> to vector<9x64xbf16>
      %c1_33 = arith.constant 1 : index
      %c2_34 = arith.constant 2 : index
      %c0_35 = arith.constant 0 : index
      %c0_36 = arith.constant 0 : index
      %37 = vector.load %arg2[%c1_33, %c2_34, %c0_35, %c0_36] : memref<3x3x64x64xbf16, #tpu.memory_space<vmem>>, vector<1x1x64x64xbf16>
      %38 = vector.shape_cast %37 : vector<1x1x64x64xbf16> to vector<64x64xbf16>
      %cst_37 = arith.constant dense<0.000000e+00> : vector<9x64xf32>
      %39 = tpu.matmul %36, %38, %cst_37 {dimension_numbers = #tpu.dot_dimension_numbers<[1], [0], [0], [1], [0, 0, 1, 1], [], []>} : vector<9x64xbf16>, vector<64x64xbf16>, vector<9x64xf32> -> vector<9x64xf32>
      %40 = arith.addf %35, %39 : vector<9x64xf32>
      %c2_i32 = arith.constant 2 : i32
      %41 = arith.addi %arg5, %c2_i32 : i32
      %c0_38 = arith.constant 0 : index
      %42 = arith.index_cast %41 : i32 to index
      %c0_39 = arith.constant 0 : index
      %c0_40 = arith.constant 0 : index
      %43 = vector.load %arg1[%c0_38, %42, %c0_39, %c0_40] : memref<1x11x11x64xbf16, #tpu.memory_space<vmem>>, vector<1x1x11x64xbf16>
      %44 = vector.shape_cast %43 : vector<1x1x11x64xbf16> to vector<11x64xbf16>
      %45 = vector.extract_strided_slice %44 {offsets = [0, 0], sizes = [9, 64], strides = [1, 1]} : vector<11x64xbf16> to vector<9x64xbf16>
      %c2_41 = arith.constant 2 : index
      %c0_42 = arith.constant 0 : index
      %c0_43 = arith.constant 0 : index
      %c0_44 = arith.constant 0 : index
      %46 = vector.load %arg2[%c2_41, %c0_42, %c0_43, %c0_44] : memref<3x3x64x64xbf16, #tpu.memory_space<vmem>>, vector<1x1x64x64xbf16>
      %47 = vector.shape_cast %46 : vector<1x1x64x64xbf16> to vector<64x64xbf16>
      %cst_45 = arith.constant dense<0.000000e+00> : vector<9x64xf32>
      %48 = tpu.matmul %45, %47, %cst_45 {dimension_numbers = #tpu.dot_dimension_numbers<[1], [0], [0], [1], [0, 0, 1, 1], [], []>} : vector<9x64xbf16>, vector<64x64xbf16>, vector<9x64xf32> -> vector<9x64xf32>
      %49 = arith.addf %40, %48 : vector<9x64xf32>
      %50 = vector.extract_strided_slice %44 {offsets = [1, 0], sizes = [9, 64], strides = [1, 1]} : vector<11x64xbf16> to vector<9x64xbf16>
      %c2_46 = arith.constant 2 : index
      %c1_47 = arith.constant 1 : index
      %c0_48 = arith.constant 0 : index
      %c0_49 = arith.constant 0 : index
      %51 = vector.load %arg2[%c2_46, %c1_47, %c0_48, %c0_49] : memref<3x3x64x64xbf16, #tpu.memory_space<vmem>>, vector<1x1x64x64xbf16>
      %52 = vector.shape_cast %51 : vector<1x1x64x64xbf16> to vector<64x64xbf16>
      %cst_50 = arith.constant dense<0.000000e+00> : vector<9x64xf32>
      %53 = tpu.matmul %50, %52, %cst_50 {dimension_numbers = #tpu.dot_dimension_numbers<[1], [0], [0], [1], [0, 0, 1, 1], [], []>} : vector<9x64xbf16>, vector<64x64xbf16>, vector<9x64xf32> -> vector<9x64xf32>
      %54 = arith.addf %49, %53 : vector<9x64xf32>
      %55 = vector.extract_strided_slice %44 {offsets = [2, 0], sizes = [9, 64], strides = [1, 1]} : vector<11x64xbf16> to vector<9x64xbf16>
      %c2_51 = arith.constant 2 : index
      %c2_52 = arith.constant 2 : index
      %c0_53 = arith.constant 0 : index
      %c0_54 = arith.constant 0 : index
      %56 = vector.load %arg2[%c2_51, %c2_52, %c0_53, %c0_54] : memref<3x3x64x64xbf16, #tpu.memory_space<vmem>>, vector<1x1x64x64xbf16>
      %57 = vector.shape_cast %56 : vector<1x1x64x64xbf16> to vector<64x64xbf16>
      %cst_55 = arith.constant dense<0.000000e+00> : vector<9x64xf32>
      %58 = tpu.matmul %55, %57, %cst_55 {dimension_numbers = #tpu.dot_dimension_numbers<[1], [0], [0], [1], [0, 0, 1, 1], [], []>} : vector<9x64xbf16>, vector<64x64xbf16>, vector<9x64xf32> -> vector<9x64xf32>
      %59 = arith.addf %54, %58 : vector<9x64xf32>
      %60 = vector.broadcast %0 : vector<1x64xf32> to vector<9x64xf32>
      %61 = arith.addf %59, %60 : vector<9x64xf32>
      %62 = arith.truncf %61 : vector<9x64xf32> to vector<9x64xbf16>
      %c0_56 = arith.constant 0 : index
      %63 = arith.index_cast %arg5 : i32 to index
      %c0_57 = arith.constant 0 : index
      %c0_58 = arith.constant 0 : index
      %64 = vector.load %arg4[%c0_56, %63, %c0_57, %c0_58] : memref<1x9x9x64xbf16, #tpu.memory_space<vmem>>, vector<1x1x9x64xbf16>
      %65 = vector.shape_cast %64 : vector<1x1x9x64xbf16> to vector<9x64xbf16>
      %66 = vector.shape_cast %62 : vector<9x64xbf16> to vector<1x1x9x64xbf16>
      tpu.vector_store %arg4[%c0_56, %63, %c0_57, %c0_58], %66 {strides = array<i32>} : memref<1x9x9x64xbf16, #tpu.memory_space<vmem>>, vector<1x1x9x64xbf16>,
    }
    %c9_i32_1 = arith.constant 9 : i32
    return
  }
  func.func @transform_0(%arg0: i32) -> (i32, i32, i32, i32) {
    %c0_i32 = arith.constant 0 : i32
    %c0_i32_0 = arith.constant 0 : i32
    %c0_i32_1 = arith.constant 0 : i32
    %c0_i32_2 = arith.constant 0 : i32
    return %arg0, %c0_i32, %c0_i32_0, %c0_i32_1 : i32, i32, i32, i32
  }
  func.func @transform_1(%arg0: i32) -> (i32, i32, i32, i32) {
    %c0_i32 = arith.constant 0 : i32
    %c0_i32_0 = arith.constant 0 : i32
    %c0_i32_1 = arith.constant 0 : i32
    %c0_i32_2 = arith.constant 0 : i32
    %c0_i32_3 = arith.constant 0 : i32
    return %c0_i32, %c0_i32_0, %c0_i32_1, %c0_i32_2 : i32, i32, i32, i32
  }
  func.func @transform_2(%arg0: i32) -> (i32, i32) {
    %c0_i32 = arith.constant 0 : i32
    %c0_i32_0 = arith.constant 0 : i32
    %c0_i32_1 = arith.constant 0 : i32
    return %c0_i32, %c0_i32_0 : i32, i32
  }
  func.func @transform_3(%arg0: i32) -> (i32, i32, i32, i32) {
    %c0_i32 = arith.constant 0 : i32
    %c0_i32_0 = arith.constant 0 : i32
    %c0_i32_1 = arith.constant 0 : i32
    %c0_i32_2 = arith.constant 0 : i32
    return %arg0, %c0_i32, %c0_i32_0, %c0_i32_1 : i32, i32, i32, i32
  }
}

module attributes {stable_mosaic.version = 11 : i64} {
  func.func @_convt2x2_kernel(%arg0: i32, %arg1: memref<1x9x9x64xbf16, #tpu.memory_space<vmem>>, %arg2: memref<64x64xbf16, #tpu.memory_space<vmem>>, %arg3: memref<64x64xbf16, #tpu.memory_space<vmem>>, %arg4: memref<1x64xf32, #tpu.memory_space<vmem>>, %arg5: memref<1x9x2x9x64xbf16, #tpu.memory_space<vmem>>) attributes {dimension_semantics = [#tpu.dimension_semantics<parallel>], iteration_bounds = array<i64: 2>, scalar_prefetch = 0 : i64, scratch_operands = 0 : i64, tpu.core_type = #tpu.core_type<tc>, window_params = [{transform_indices = @transform_0, window_bounds = array<i64: 1, 9, 9, 64>}, {pipeline_mode = #tpu.pipeline_mode<synchronous>, transform_indices = @transform_1, window_bounds = array<i64: 64, 64>}, {pipeline_mode = #tpu.pipeline_mode<synchronous>, transform_indices = @transform_2, window_bounds = array<i64: 64, 64>}, {pipeline_mode = #tpu.pipeline_mode<synchronous>, transform_indices = @transform_3, window_bounds = array<i64: 1, 64>}, {transform_indices = @transform_4, window_bounds = array<i64: 1, 9, 2, 9, 64>}]} {
    %c0 = arith.constant 0 : index
    %c0_0 = arith.constant 0 : index
    %0 = vector.load %arg4[%c0, %c0_0] : memref<1x64xf32, #tpu.memory_space<vmem>>, vector<1x64xf32>
    %c0_i32 = arith.constant 0 : i32
    %c9_i32 = arith.constant 9 : i32
    %1 = arith.addi %c0_i32, %c9_i32 : i32
    %c1_i32 = arith.constant 1 : i32
    scf.for %arg6 = %c0_i32 to %1 step %c1_i32  : i32 {
      %c0_2 = arith.constant 0 : index
      %2 = arith.index_cast %arg6 : i32 to index
      %c0_3 = arith.constant 0 : index
      %c0_4 = arith.constant 0 : index
      %3 = vector.load %arg1[%c0_2, %2, %c0_3, %c0_4] : memref<1x9x9x64xbf16, #tpu.memory_space<vmem>>, vector<1x1x9x64xbf16>
      %4 = vector.shape_cast %3 : vector<1x1x9x64xbf16> to vector<9x64xbf16>
      %c0_5 = arith.constant 0 : index
      %c0_6 = arith.constant 0 : index
      %5 = vector.load %arg2[%c0_5, %c0_6] : memref<64x64xbf16, #tpu.memory_space<vmem>>, vector<64x64xbf16>
      %cst = arith.constant dense<0.000000e+00> : vector<9x64xf32>
      %6 = tpu.matmul %4, %5, %cst {dimension_numbers = #tpu.dot_dimension_numbers<[1], [0], [0], [1], [0, 0, 1, 1], [], []>} : vector<9x64xbf16>, vector<64x64xbf16>, vector<9x64xf32> -> vector<9x64xf32>
      %7 = vector.broadcast %0 : vector<1x64xf32> to vector<9x64xf32>
      %8 = arith.addf %6, %7 : vector<9x64xf32>
      %c0_7 = arith.constant 0 : index
      %c0_8 = arith.constant 0 : index
      %9 = vector.load %arg3[%c0_7, %c0_8] : memref<64x64xbf16, #tpu.memory_space<vmem>>, vector<64x64xbf16>
      %cst_9 = arith.constant dense<0.000000e+00> : vector<9x64xf32>
      %10 = tpu.matmul %4, %9, %cst_9 {dimension_numbers = #tpu.dot_dimension_numbers<[1], [0], [0], [1], [0, 0, 1, 1], [], []>} : vector<9x64xbf16>, vector<64x64xbf16>, vector<9x64xf32> -> vector<9x64xf32>
      %11 = vector.broadcast %0 : vector<1x64xf32> to vector<9x64xf32>
      %12 = arith.addf %10, %11 : vector<9x64xf32>
      %13 = arith.truncf %8 : vector<9x64xf32> to vector<9x64xbf16>
      %c0_10 = arith.constant 0 : index
      %14 = arith.index_cast %arg6 : i32 to index
      %c0_11 = arith.constant 0 : index
      %c0_12 = arith.constant 0 : index
      %c0_13 = arith.constant 0 : index
      %15 = vector.load %arg5[%c0_10, %14, %c0_11, %c0_12, %c0_13] : memref<1x9x2x9x64xbf16, #tpu.memory_space<vmem>>, vector<1x1x1x9x64xbf16>
      %16 = vector.shape_cast %15 : vector<1x1x1x9x64xbf16> to vector<9x64xbf16>
      %17 = vector.shape_cast %13 : vector<9x64xbf16> to vector<1x1x1x9x64xbf16>
      tpu.vector_store %arg5[%c0_10, %14, %c0_11, %c0_12, %c0_13], %17 {strides = array<i32>} : memref<1x9x2x9x64xbf16, #tpu.memory_space<vmem>>, vector<1x1x1x9x64xbf16>,
      %18 = arith.truncf %12 : vector<9x64xf32> to vector<9x64xbf16>
      %c0_14 = arith.constant 0 : index
      %19 = arith.index_cast %arg6 : i32 to index
      %c1 = arith.constant 1 : index
      %c0_15 = arith.constant 0 : index
      %c0_16 = arith.constant 0 : index
      %20 = vector.load %arg5[%c0_14, %19, %c1, %c0_15, %c0_16] : memref<1x9x2x9x64xbf16, #tpu.memory_space<vmem>>, vector<1x1x1x9x64xbf16>
      %21 = vector.shape_cast %20 : vector<1x1x1x9x64xbf16> to vector<9x64xbf16>
      %22 = vector.shape_cast %18 : vector<9x64xbf16> to vector<1x1x1x9x64xbf16>
      tpu.vector_store %arg5[%c0_14, %19, %c1, %c0_15, %c0_16], %22 {strides = array<i32>} : memref<1x9x2x9x64xbf16, #tpu.memory_space<vmem>>, vector<1x1x1x9x64xbf16>,
    }
    %c9_i32_1 = arith.constant 9 : i32
    return
  }
  func.func @transform_0(%arg0: i32) -> (i32, i32, i32, i32) {
    %c0_i32 = arith.constant 0 : i32
    %c0_i32_0 = arith.constant 0 : i32
    %c0_i32_1 = arith.constant 0 : i32
    %c0_i32_2 = arith.constant 0 : i32
    return %arg0, %c0_i32, %c0_i32_0, %c0_i32_1 : i32, i32, i32, i32
  }
  func.func @transform_1(%arg0: i32) -> (i32, i32) {
    %c0_i32 = arith.constant 0 : i32
    %c0_i32_0 = arith.constant 0 : i32
    %c0_i32_1 = arith.constant 0 : i32
    return %c0_i32, %c0_i32_0 : i32, i32
  }
  func.func @transform_2(%arg0: i32) -> (i32, i32) {
    %c0_i32 = arith.constant 0 : i32
    %c0_i32_0 = arith.constant 0 : i32
    %c0_i32_1 = arith.constant 0 : i32
    return %c0_i32, %c0_i32_0 : i32, i32
  }
  func.func @transform_3(%arg0: i32) -> (i32, i32) {
    %c0_i32 = arith.constant 0 : i32
    %c0_i32_0 = arith.constant 0 : i32
    %c0_i32_1 = arith.constant 0 : i32
    return %c0_i32, %c0_i32_0 : i32, i32
  }
  func.func @transform_4(%arg0: i32) -> (i32, i32, i32, i32, i32) {
    %c0_i32 = arith.constant 0 : i32
    %c0_i32_0 = arith.constant 0 : i32
    %c0_i32_1 = arith.constant 0 : i32
    %c0_i32_2 = arith.constant 0 : i32
    %c0_i32_3 = arith.constant 0 : i32
    return %arg0, %c0_i32, %c0_i32_0, %c0_i32_1, %c0_i32_2 : i32, i32, i32, i32, i32
  }
}

module attributes {stable_mosaic.version = 11 : i64} {
  func.func @_conv3x3_kernel(%arg0: i32, %arg1: memref<1x18x18x32xbf16, #tpu.memory_space<vmem>>, %arg2: memref<1x18x18x32xbf16, #tpu.memory_space<vmem>>, %arg3: memref<3x3x32x32xbf16, #tpu.memory_space<vmem>>, %arg4: memref<3x3x32x32xbf16, #tpu.memory_space<vmem>>, %arg5: memref<1x32xf32, #tpu.memory_space<vmem>>, %arg6: memref<1x16x16x32xbf16, #tpu.memory_space<vmem>>) attributes {dimension_semantics = [#tpu.dimension_semantics<parallel>], iteration_bounds = array<i64: 2>, scalar_prefetch = 0 : i64, scratch_operands = 0 : i64, tpu.core_type = #tpu.core_type<tc>, window_params = [{transform_indices = @transform_0, window_bounds = array<i64: 1, 18, 18, 32>}, {transform_indices = @transform_1, window_bounds = array<i64: 1, 18, 18, 32>}, {pipeline_mode = #tpu.pipeline_mode<synchronous>, transform_indices = @transform_2, window_bounds = array<i64: 3, 3, 32, 32>}, {pipeline_mode = #tpu.pipeline_mode<synchronous>, transform_indices = @transform_3, window_bounds = array<i64: 3, 3, 32, 32>}, {pipeline_mode = #tpu.pipeline_mode<synchronous>, transform_indices = @transform_4, window_bounds = array<i64: 1, 32>}, {transform_indices = @transform_5, window_bounds = array<i64: 1, 16, 16, 32>}]} {
    %c0 = arith.constant 0 : index
    %c0_0 = arith.constant 0 : index
    %0 = vector.load %arg5[%c0, %c0_0] : memref<1x32xf32, #tpu.memory_space<vmem>>, vector<1x32xf32>
    %c0_i32 = arith.constant 0 : i32
    %c16_i32 = arith.constant 16 : i32
    %1 = arith.addi %c0_i32, %c16_i32 : i32
    %c1_i32 = arith.constant 1 : i32
    scf.for %arg7 = %c0_i32 to %1 step %c1_i32  : i32 {
      %cst = arith.constant 0.000000e+00 : f32
      %2 = vector.broadcast %cst : f32 to vector<16x32xf32>
      %c0_i32_2 = arith.constant 0 : i32
      %3 = arith.addi %arg7, %c0_i32_2 : i32
      %c0_3 = arith.constant 0 : index
      %4 = arith.index_cast %3 : i32 to index
      %c0_4 = arith.constant 0 : index
      %c0_5 = arith.constant 0 : index
      %5 = vector.load %arg1[%c0_3, %4, %c0_4, %c0_5] : memref<1x18x18x32xbf16, #tpu.memory_space<vmem>>, vector<1x1x18x32xbf16>
      %6 = vector.shape_cast %5 : vector<1x1x18x32xbf16> to vector<18x32xbf16>
      %7 = vector.extract_strided_slice %6 {offsets = [0, 0], sizes = [16, 32], strides = [1, 1]} : vector<18x32xbf16> to vector<16x32xbf16>
      %c0_6 = arith.constant 0 : index
      %c0_7 = arith.constant 0 : index
      %c0_8 = arith.constant 0 : index
      %c0_9 = arith.constant 0 : index
      %8 = vector.load %arg3[%c0_6, %c0_7, %c0_8, %c0_9] : memref<3x3x32x32xbf16, #tpu.memory_space<vmem>>, vector<1x1x32x32xbf16>
      %9 = vector.shape_cast %8 : vector<1x1x32x32xbf16> to vector<32x32xbf16>
      %cst_10 = arith.constant dense<0.000000e+00> : vector<16x32xf32>
      %10 = tpu.matmul %7, %9, %cst_10 {dimension_numbers = #tpu.dot_dimension_numbers<[1], [0], [0], [1], [0, 0, 1, 1], [], []>} : vector<16x32xbf16>, vector<32x32xbf16>, vector<16x32xf32> -> vector<16x32xf32>
      %11 = arith.addf %2, %10 : vector<16x32xf32>
      %12 = vector.extract_strided_slice %6 {offsets = [1, 0], sizes = [16, 32], strides = [1, 1]} : vector<18x32xbf16> to vector<16x32xbf16>
      %c0_11 = arith.constant 0 : index
      %c1 = arith.constant 1 : index
      %c0_12 = arith.constant 0 : index
      %c0_13 = arith.constant 0 : index
      %13 = vector.load %arg3[%c0_11, %c1, %c0_12, %c0_13] : memref<3x3x32x32xbf16, #tpu.memory_space<vmem>>, vector<1x1x32x32xbf16>
      %14 = vector.shape_cast %13 : vector<1x1x32x32xbf16> to vector<32x32xbf16>
      %cst_14 = arith.constant dense<0.000000e+00> : vector<16x32xf32>
      %15 = tpu.matmul %12, %14, %cst_14 {dimension_numbers = #tpu.dot_dimension_numbers<[1], [0], [0], [1], [0, 0, 1, 1], [], []>} : vector<16x32xbf16>, vector<32x32xbf16>, vector<16x32xf32> -> vector<16x32xf32>
      %16 = arith.addf %11, %15 : vector<16x32xf32>
      %17 = vector.extract_strided_slice %6 {offsets = [2, 0], sizes = [16, 32], strides = [1, 1]} : vector<18x32xbf16> to vector<16x32xbf16>
      %c0_15 = arith.constant 0 : index
      %c2 = arith.constant 2 : index
      %c0_16 = arith.constant 0 : index
      %c0_17 = arith.constant 0 : index
      %18 = vector.load %arg3[%c0_15, %c2, %c0_16, %c0_17] : memref<3x3x32x32xbf16, #tpu.memory_space<vmem>>, vector<1x1x32x32xbf16>
      %19 = vector.shape_cast %18 : vector<1x1x32x32xbf16> to vector<32x32xbf16>
      %cst_18 = arith.constant dense<0.000000e+00> : vector<16x32xf32>
      %20 = tpu.matmul %17, %19, %cst_18 {dimension_numbers = #tpu.dot_dimension_numbers<[1], [0], [0], [1], [0, 0, 1, 1], [], []>} : vector<16x32xbf16>, vector<32x32xbf16>, vector<16x32xf32> -> vector<16x32xf32>
      %21 = arith.addf %16, %20 : vector<16x32xf32>
      %c1_i32_19 = arith.constant 1 : i32
      %22 = arith.addi %arg7, %c1_i32_19 : i32
      %c0_20 = arith.constant 0 : index
      %23 = arith.index_cast %22 : i32 to index
      %c0_21 = arith.constant 0 : index
      %c0_22 = arith.constant 0 : index
      %24 = vector.load %arg1[%c0_20, %23, %c0_21, %c0_22] : memref<1x18x18x32xbf16, #tpu.memory_space<vmem>>, vector<1x1x18x32xbf16>
      %25 = vector.shape_cast %24 : vector<1x1x18x32xbf16> to vector<18x32xbf16>
      %26 = vector.extract_strided_slice %25 {offsets = [0, 0], sizes = [16, 32], strides = [1, 1]} : vector<18x32xbf16> to vector<16x32xbf16>
      %c1_23 = arith.constant 1 : index
      %c0_24 = arith.constant 0 : index
      %c0_25 = arith.constant 0 : index
      %c0_26 = arith.constant 0 : index
      %27 = vector.load %arg3[%c1_23, %c0_24, %c0_25, %c0_26] : memref<3x3x32x32xbf16, #tpu.memory_space<vmem>>, vector<1x1x32x32xbf16>
      %28 = vector.shape_cast %27 : vector<1x1x32x32xbf16> to vector<32x32xbf16>
      %cst_27 = arith.constant dense<0.000000e+00> : vector<16x32xf32>
      %29 = tpu.matmul %26, %28, %cst_27 {dimension_numbers = #tpu.dot_dimension_numbers<[1], [0], [0], [1], [0, 0, 1, 1], [], []>} : vector<16x32xbf16>, vector<32x32xbf16>, vector<16x32xf32> -> vector<16x32xf32>
      %30 = arith.addf %21, %29 : vector<16x32xf32>
      %31 = vector.extract_strided_slice %25 {offsets = [1, 0], sizes = [16, 32], strides = [1, 1]} : vector<18x32xbf16> to vector<16x32xbf16>
      %c1_28 = arith.constant 1 : index
      %c1_29 = arith.constant 1 : index
      %c0_30 = arith.constant 0 : index
      %c0_31 = arith.constant 0 : index
      %32 = vector.load %arg3[%c1_28, %c1_29, %c0_30, %c0_31] : memref<3x3x32x32xbf16, #tpu.memory_space<vmem>>, vector<1x1x32x32xbf16>
      %33 = vector.shape_cast %32 : vector<1x1x32x32xbf16> to vector<32x32xbf16>
      %cst_32 = arith.constant dense<0.000000e+00> : vector<16x32xf32>
      %34 = tpu.matmul %31, %33, %cst_32 {dimension_numbers = #tpu.dot_dimension_numbers<[1], [0], [0], [1], [0, 0, 1, 1], [], []>} : vector<16x32xbf16>, vector<32x32xbf16>, vector<16x32xf32> -> vector<16x32xf32>
      %35 = arith.addf %30, %34 : vector<16x32xf32>
      %36 = vector.extract_strided_slice %25 {offsets = [2, 0], sizes = [16, 32], strides = [1, 1]} : vector<18x32xbf16> to vector<16x32xbf16>
      %c1_33 = arith.constant 1 : index
      %c2_34 = arith.constant 2 : index
      %c0_35 = arith.constant 0 : index
      %c0_36 = arith.constant 0 : index
      %37 = vector.load %arg3[%c1_33, %c2_34, %c0_35, %c0_36] : memref<3x3x32x32xbf16, #tpu.memory_space<vmem>>, vector<1x1x32x32xbf16>
      %38 = vector.shape_cast %37 : vector<1x1x32x32xbf16> to vector<32x32xbf16>
      %cst_37 = arith.constant dense<0.000000e+00> : vector<16x32xf32>
      %39 = tpu.matmul %36, %38, %cst_37 {dimension_numbers = #tpu.dot_dimension_numbers<[1], [0], [0], [1], [0, 0, 1, 1], [], []>} : vector<16x32xbf16>, vector<32x32xbf16>, vector<16x32xf32> -> vector<16x32xf32>
      %40 = arith.addf %35, %39 : vector<16x32xf32>
      %c2_i32 = arith.constant 2 : i32
      %41 = arith.addi %arg7, %c2_i32 : i32
      %c0_38 = arith.constant 0 : index
      %42 = arith.index_cast %41 : i32 to index
      %c0_39 = arith.constant 0 : index
      %c0_40 = arith.constant 0 : index
      %43 = vector.load %arg1[%c0_38, %42, %c0_39, %c0_40] : memref<1x18x18x32xbf16, #tpu.memory_space<vmem>>, vector<1x1x18x32xbf16>
      %44 = vector.shape_cast %43 : vector<1x1x18x32xbf16> to vector<18x32xbf16>
      %45 = vector.extract_strided_slice %44 {offsets = [0, 0], sizes = [16, 32], strides = [1, 1]} : vector<18x32xbf16> to vector<16x32xbf16>
      %c2_41 = arith.constant 2 : index
      %c0_42 = arith.constant 0 : index
      %c0_43 = arith.constant 0 : index
      %c0_44 = arith.constant 0 : index
      %46 = vector.load %arg3[%c2_41, %c0_42, %c0_43, %c0_44] : memref<3x3x32x32xbf16, #tpu.memory_space<vmem>>, vector<1x1x32x32xbf16>
      %47 = vector.shape_cast %46 : vector<1x1x32x32xbf16> to vector<32x32xbf16>
      %cst_45 = arith.constant dense<0.000000e+00> : vector<16x32xf32>
      %48 = tpu.matmul %45, %47, %cst_45 {dimension_numbers = #tpu.dot_dimension_numbers<[1], [0], [0], [1], [0, 0, 1, 1], [], []>} : vector<16x32xbf16>, vector<32x32xbf16>, vector<16x32xf32> -> vector<16x32xf32>
      %49 = arith.addf %40, %48 : vector<16x32xf32>
      %50 = vector.extract_strided_slice %44 {offsets = [1, 0], sizes = [16, 32], strides = [1, 1]} : vector<18x32xbf16> to vector<16x32xbf16>
      %c2_46 = arith.constant 2 : index
      %c1_47 = arith.constant 1 : index
      %c0_48 = arith.constant 0 : index
      %c0_49 = arith.constant 0 : index
      %51 = vector.load %arg3[%c2_46, %c1_47, %c0_48, %c0_49] : memref<3x3x32x32xbf16, #tpu.memory_space<vmem>>, vector<1x1x32x32xbf16>
      %52 = vector.shape_cast %51 : vector<1x1x32x32xbf16> to vector<32x32xbf16>
      %cst_50 = arith.constant dense<0.000000e+00> : vector<16x32xf32>
      %53 = tpu.matmul %50, %52, %cst_50 {dimension_numbers = #tpu.dot_dimension_numbers<[1], [0], [0], [1], [0, 0, 1, 1], [], []>} : vector<16x32xbf16>, vector<32x32xbf16>, vector<16x32xf32> -> vector<16x32xf32>
      %54 = arith.addf %49, %53 : vector<16x32xf32>
      %55 = vector.extract_strided_slice %44 {offsets = [2, 0], sizes = [16, 32], strides = [1, 1]} : vector<18x32xbf16> to vector<16x32xbf16>
      %c2_51 = arith.constant 2 : index
      %c2_52 = arith.constant 2 : index
      %c0_53 = arith.constant 0 : index
      %c0_54 = arith.constant 0 : index
      %56 = vector.load %arg3[%c2_51, %c2_52, %c0_53, %c0_54] : memref<3x3x32x32xbf16, #tpu.memory_space<vmem>>, vector<1x1x32x32xbf16>
      %57 = vector.shape_cast %56 : vector<1x1x32x32xbf16> to vector<32x32xbf16>
      %cst_55 = arith.constant dense<0.000000e+00> : vector<16x32xf32>
      %58 = tpu.matmul %55, %57, %cst_55 {dimension_numbers = #tpu.dot_dimension_numbers<[1], [0], [0], [1], [0, 0, 1, 1], [], []>} : vector<16x32xbf16>, vector<32x32xbf16>, vector<16x32xf32> -> vector<16x32xf32>
      %59 = arith.addf %54, %58 : vector<16x32xf32>
      %c0_i32_56 = arith.constant 0 : i32
      %60 = arith.addi %arg7, %c0_i32_56 : i32
      %c0_57 = arith.constant 0 : index
      %61 = arith.index_cast %60 : i32 to index
      %c0_58 = arith.constant 0 : index
      %c0_59 = arith.constant 0 : index
      %62 = vector.load %arg2[%c0_57, %61, %c0_58, %c0_59] : memref<1x18x18x32xbf16, #tpu.memory_space<vmem>>, vector<1x1x18x32xbf16>
      %63 = vector.shape_cast %62 : vector<1x1x18x32xbf16> to vector<18x32xbf16>
      %64 = vector.extract_strided_slice %63 {offsets = [0, 0], sizes = [16, 32], strides = [1, 1]} : vector<18x32xbf16> to vector<16x32xbf16>
      %c0_60 = arith.constant 0 : index
      %c0_61 = arith.constant 0 : index
      %c0_62 = arith.constant 0 : index
      %c0_63 = arith.constant 0 : index
      %65 = vector.load %arg4[%c0_60, %c0_61, %c0_62, %c0_63] : memref<3x3x32x32xbf16, #tpu.memory_space<vmem>>, vector<1x1x32x32xbf16>
      %66 = vector.shape_cast %65 : vector<1x1x32x32xbf16> to vector<32x32xbf16>
      %cst_64 = arith.constant dense<0.000000e+00> : vector<16x32xf32>
      %67 = tpu.matmul %64, %66, %cst_64 {dimension_numbers = #tpu.dot_dimension_numbers<[1], [0], [0], [1], [0, 0, 1, 1], [], []>} : vector<16x32xbf16>, vector<32x32xbf16>, vector<16x32xf32> -> vector<16x32xf32>
      %68 = arith.addf %59, %67 : vector<16x32xf32>
      %69 = vector.extract_strided_slice %63 {offsets = [1, 0], sizes = [16, 32], strides = [1, 1]} : vector<18x32xbf16> to vector<16x32xbf16>
      %c0_65 = arith.constant 0 : index
      %c1_66 = arith.constant 1 : index
      %c0_67 = arith.constant 0 : index
      %c0_68 = arith.constant 0 : index
      %70 = vector.load %arg4[%c0_65, %c1_66, %c0_67, %c0_68] : memref<3x3x32x32xbf16, #tpu.memory_space<vmem>>, vector<1x1x32x32xbf16>
      %71 = vector.shape_cast %70 : vector<1x1x32x32xbf16> to vector<32x32xbf16>
      %cst_69 = arith.constant dense<0.000000e+00> : vector<16x32xf32>
      %72 = tpu.matmul %69, %71, %cst_69 {dimension_numbers = #tpu.dot_dimension_numbers<[1], [0], [0], [1], [0, 0, 1, 1], [], []>} : vector<16x32xbf16>, vector<32x32xbf16>, vector<16x32xf32> -> vector<16x32xf32>
      %73 = arith.addf %68, %72 : vector<16x32xf32>
      %74 = vector.extract_strided_slice %63 {offsets = [2, 0], sizes = [16, 32], strides = [1, 1]} : vector<18x32xbf16> to vector<16x32xbf16>
      %c0_70 = arith.constant 0 : index
      %c2_71 = arith.constant 2 : index
      %c0_72 = arith.constant 0 : index
      %c0_73 = arith.constant 0 : index
      %75 = vector.load %arg4[%c0_70, %c2_71, %c0_72, %c0_73] : memref<3x3x32x32xbf16, #tpu.memory_space<vmem>>, vector<1x1x32x32xbf16>
      %76 = vector.shape_cast %75 : vector<1x1x32x32xbf16> to vector<32x32xbf16>
      %cst_74 = arith.constant dense<0.000000e+00> : vector<16x32xf32>
      %77 = tpu.matmul %74, %76, %cst_74 {dimension_numbers = #tpu.dot_dimension_numbers<[1], [0], [0], [1], [0, 0, 1, 1], [], []>} : vector<16x32xbf16>, vector<32x32xbf16>, vector<16x32xf32> -> vector<16x32xf32>
      %78 = arith.addf %73, %77 : vector<16x32xf32>
      %c1_i32_75 = arith.constant 1 : i32
      %79 = arith.addi %arg7, %c1_i32_75 : i32
      %c0_76 = arith.constant 0 : index
      %80 = arith.index_cast %79 : i32 to index
      %c0_77 = arith.constant 0 : index
      %c0_78 = arith.constant 0 : index
      %81 = vector.load %arg2[%c0_76, %80, %c0_77, %c0_78] : memref<1x18x18x32xbf16, #tpu.memory_space<vmem>>, vector<1x1x18x32xbf16>
      %82 = vector.shape_cast %81 : vector<1x1x18x32xbf16> to vector<18x32xbf16>
      %83 = vector.extract_strided_slice %82 {offsets = [0, 0], sizes = [16, 32], strides = [1, 1]} : vector<18x32xbf16> to vector<16x32xbf16>
      %c1_79 = arith.constant 1 : index
      %c0_80 = arith.constant 0 : index
      %c0_81 = arith.constant 0 : index
      %c0_82 = arith.constant 0 : index
      %84 = vector.load %arg4[%c1_79, %c0_80, %c0_81, %c0_82] : memref<3x3x32x32xbf16, #tpu.memory_space<vmem>>, vector<1x1x32x32xbf16>
      %85 = vector.shape_cast %84 : vector<1x1x32x32xbf16> to vector<32x32xbf16>
      %cst_83 = arith.constant dense<0.000000e+00> : vector<16x32xf32>
      %86 = tpu.matmul %83, %85, %cst_83 {dimension_numbers = #tpu.dot_dimension_numbers<[1], [0], [0], [1], [0, 0, 1, 1], [], []>} : vector<16x32xbf16>, vector<32x32xbf16>, vector<16x32xf32> -> vector<16x32xf32>
      %87 = arith.addf %78, %86 : vector<16x32xf32>
      %88 = vector.extract_strided_slice %82 {offsets = [1, 0], sizes = [16, 32], strides = [1, 1]} : vector<18x32xbf16> to vector<16x32xbf16>
      %c1_84 = arith.constant 1 : index
      %c1_85 = arith.constant 1 : index
      %c0_86 = arith.constant 0 : index
      %c0_87 = arith.constant 0 : index
      %89 = vector.load %arg4[%c1_84, %c1_85, %c0_86, %c0_87] : memref<3x3x32x32xbf16, #tpu.memory_space<vmem>>, vector<1x1x32x32xbf16>
      %90 = vector.shape_cast %89 : vector<1x1x32x32xbf16> to vector<32x32xbf16>
      %cst_88 = arith.constant dense<0.000000e+00> : vector<16x32xf32>
      %91 = tpu.matmul %88, %90, %cst_88 {dimension_numbers = #tpu.dot_dimension_numbers<[1], [0], [0], [1], [0, 0, 1, 1], [], []>} : vector<16x32xbf16>, vector<32x32xbf16>, vector<16x32xf32> -> vector<16x32xf32>
      %92 = arith.addf %87, %91 : vector<16x32xf32>
      %93 = vector.extract_strided_slice %82 {offsets = [2, 0], sizes = [16, 32], strides = [1, 1]} : vector<18x32xbf16> to vector<16x32xbf16>
      %c1_89 = arith.constant 1 : index
      %c2_90 = arith.constant 2 : index
      %c0_91 = arith.constant 0 : index
      %c0_92 = arith.constant 0 : index
      %94 = vector.load %arg4[%c1_89, %c2_90, %c0_91, %c0_92] : memref<3x3x32x32xbf16, #tpu.memory_space<vmem>>, vector<1x1x32x32xbf16>
      %95 = vector.shape_cast %94 : vector<1x1x32x32xbf16> to vector<32x32xbf16>
      %cst_93 = arith.constant dense<0.000000e+00> : vector<16x32xf32>
      %96 = tpu.matmul %93, %95, %cst_93 {dimension_numbers = #tpu.dot_dimension_numbers<[1], [0], [0], [1], [0, 0, 1, 1], [], []>} : vector<16x32xbf16>, vector<32x32xbf16>, vector<16x32xf32> -> vector<16x32xf32>
      %97 = arith.addf %92, %96 : vector<16x32xf32>
      %c2_i32_94 = arith.constant 2 : i32
      %98 = arith.addi %arg7, %c2_i32_94 : i32
      %c0_95 = arith.constant 0 : index
      %99 = arith.index_cast %98 : i32 to index
      %c0_96 = arith.constant 0 : index
      %c0_97 = arith.constant 0 : index
      %100 = vector.load %arg2[%c0_95, %99, %c0_96, %c0_97] : memref<1x18x18x32xbf16, #tpu.memory_space<vmem>>, vector<1x1x18x32xbf16>
      %101 = vector.shape_cast %100 : vector<1x1x18x32xbf16> to vector<18x32xbf16>
      %102 = vector.extract_strided_slice %101 {offsets = [0, 0], sizes = [16, 32], strides = [1, 1]} : vector<18x32xbf16> to vector<16x32xbf16>
      %c2_98 = arith.constant 2 : index
      %c0_99 = arith.constant 0 : index
      %c0_100 = arith.constant 0 : index
      %c0_101 = arith.constant 0 : index
      %103 = vector.load %arg4[%c2_98, %c0_99, %c0_100, %c0_101] : memref<3x3x32x32xbf16, #tpu.memory_space<vmem>>, vector<1x1x32x32xbf16>
      %104 = vector.shape_cast %103 : vector<1x1x32x32xbf16> to vector<32x32xbf16>
      %cst_102 = arith.constant dense<0.000000e+00> : vector<16x32xf32>
      %105 = tpu.matmul %102, %104, %cst_102 {dimension_numbers = #tpu.dot_dimension_numbers<[1], [0], [0], [1], [0, 0, 1, 1], [], []>} : vector<16x32xbf16>, vector<32x32xbf16>, vector<16x32xf32> -> vector<16x32xf32>
      %106 = arith.addf %97, %105 : vector<16x32xf32>
      %107 = vector.extract_strided_slice %101 {offsets = [1, 0], sizes = [16, 32], strides = [1, 1]} : vector<18x32xbf16> to vector<16x32xbf16>
      %c2_103 = arith.constant 2 : index
      %c1_104 = arith.constant 1 : index
      %c0_105 = arith.constant 0 : index
      %c0_106 = arith.constant 0 : index
      %108 = vector.load %arg4[%c2_103, %c1_104, %c0_105, %c0_106] : memref<3x3x32x32xbf16, #tpu.memory_space<vmem>>, vector<1x1x32x32xbf16>
      %109 = vector.shape_cast %108 : vector<1x1x32x32xbf16> to vector<32x32xbf16>
      %cst_107 = arith.constant dense<0.000000e+00> : vector<16x32xf32>
      %110 = tpu.matmul %107, %109, %cst_107 {dimension_numbers = #tpu.dot_dimension_numbers<[1], [0], [0], [1], [0, 0, 1, 1], [], []>} : vector<16x32xbf16>, vector<32x32xbf16>, vector<16x32xf32> -> vector<16x32xf32>
      %111 = arith.addf %106, %110 : vector<16x32xf32>
      %112 = vector.extract_strided_slice %101 {offsets = [2, 0], sizes = [16, 32], strides = [1, 1]} : vector<18x32xbf16> to vector<16x32xbf16>
      %c2_108 = arith.constant 2 : index
      %c2_109 = arith.constant 2 : index
      %c0_110 = arith.constant 0 : index
      %c0_111 = arith.constant 0 : index
      %113 = vector.load %arg4[%c2_108, %c2_109, %c0_110, %c0_111] : memref<3x3x32x32xbf16, #tpu.memory_space<vmem>>, vector<1x1x32x32xbf16>
      %114 = vector.shape_cast %113 : vector<1x1x32x32xbf16> to vector<32x32xbf16>
      %cst_112 = arith.constant dense<0.000000e+00> : vector<16x32xf32>
      %115 = tpu.matmul %112, %114, %cst_112 {dimension_numbers = #tpu.dot_dimension_numbers<[1], [0], [0], [1], [0, 0, 1, 1], [], []>} : vector<16x32xbf16>, vector<32x32xbf16>, vector<16x32xf32> -> vector<16x32xf32>
      %116 = arith.addf %111, %115 : vector<16x32xf32>
      %117 = vector.broadcast %0 : vector<1x32xf32> to vector<16x32xf32>
      %118 = arith.addf %116, %117 : vector<16x32xf32>
      %cst_113 = arith.constant 0.000000e+00 : f32
      %119 = vector.broadcast %cst_113 : f32 to vector<16x32xf32>
      %120 = arith.maximumf %118, %119 : vector<16x32xf32>
      %121 = arith.truncf %120 : vector<16x32xf32> to vector<16x32xbf16>
      %c0_114 = arith.constant 0 : index
      %122 = arith.index_cast %arg7 : i32 to index
      %c0_115 = arith.constant 0 : index
      %c0_116 = arith.constant 0 : index
      %123 = vector.load %arg6[%c0_114, %122, %c0_115, %c0_116] : memref<1x16x16x32xbf16, #tpu.memory_space<vmem>>, vector<1x1x16x32xbf16>
      %124 = vector.shape_cast %123 : vector<1x1x16x32xbf16> to vector<16x32xbf16>
      %125 = vector.shape_cast %121 : vector<16x32xbf16> to vector<1x1x16x32xbf16>
      tpu.vector_store %arg6[%c0_114, %122, %c0_115, %c0_116], %125 {strides = array<i32>} : memref<1x16x16x32xbf16, #tpu.memory_space<vmem>>, vector<1x1x16x32xbf16>,
    }
    %c16_i32_1 = arith.constant 16 : i32
    return
  }
  func.func @transform_0(%arg0: i32) -> (i32, i32, i32, i32) {
    %c0_i32 = arith.constant 0 : i32
    %c0_i32_0 = arith.constant 0 : i32
    %c0_i32_1 = arith.constant 0 : i32
    %c0_i32_2 = arith.constant 0 : i32
    return %arg0, %c0_i32, %c0_i32_0, %c0_i32_1 : i32, i32, i32, i32
  }
  func.func @transform_1(%arg0: i32) -> (i32, i32, i32, i32) {
    %c0_i32 = arith.constant 0 : i32
    %c0_i32_0 = arith.constant 0 : i32
    %c0_i32_1 = arith.constant 0 : i32
    %c0_i32_2 = arith.constant 0 : i32
    return %arg0, %c0_i32, %c0_i32_0, %c0_i32_1 : i32, i32, i32, i32
  }
  func.func @transform_2(%arg0: i32) -> (i32, i32, i32, i32) {
    %c0_i32 = arith.constant 0 : i32
    %c0_i32_0 = arith.constant 0 : i32
    %c0_i32_1 = arith.constant 0 : i32
    %c0_i32_2 = arith.constant 0 : i32
    %c0_i32_3 = arith.constant 0 : i32
    return %c0_i32, %c0_i32_0, %c0_i32_1, %c0_i32_2 : i32, i32, i32, i32
  }
  func.func @transform_3(%arg0: i32) -> (i32, i32, i32, i32) {
    %c0_i32 = arith.constant 0 : i32
    %c0_i32_0 = arith.constant 0 : i32
    %c0_i32_1 = arith.constant 0 : i32
    %c0_i32_2 = arith.constant 0 : i32
    %c0_i32_3 = arith.constant 0 : i32
    return %c0_i32, %c0_i32_0, %c0_i32_1, %c0_i32_2 : i32, i32, i32, i32
  }
  func.func @transform_4(%arg0: i32) -> (i32, i32) {
    %c0_i32 = arith.constant 0 : i32
    %c0_i32_0 = arith.constant 0 : i32
    %c0_i32_1 = arith.constant 0 : i32
    return %c0_i32, %c0_i32_0 : i32, i32
  }
  func.func @transform_5(%arg0: i32) -> (i32, i32, i32, i32) {
    %c0_i32 = arith.constant 0 : i32
    %c0_i32_0 = arith.constant 0 : i32
    %c0_i32_1 = arith.constant 0 : i32
    %c0_i32_2 = arith.constant 0 : i32
    return %arg0, %c0_i32, %c0_i32_0, %c0_i32_1 : i32, i32, i32, i32
  }
}

module attributes {stable_mosaic.version = 11 : i64} {
  func.func @_conv3x3_kernel(%arg0: i32, %arg1: memref<1x16x16x32xbf16, #tpu.memory_space<vmem>>, %arg2: memref<3x3x32x32xbf16, #tpu.memory_space<vmem>>, %arg3: memref<1x32xf32, #tpu.memory_space<vmem>>, %arg4: memref<1x14x14x32xbf16, #tpu.memory_space<vmem>>) attributes {dimension_semantics = [#tpu.dimension_semantics<parallel>], iteration_bounds = array<i64: 2>, scalar_prefetch = 0 : i64, scratch_operands = 0 : i64, tpu.core_type = #tpu.core_type<tc>, window_params = [{transform_indices = @transform_0, window_bounds = array<i64: 1, 16, 16, 32>}, {pipeline_mode = #tpu.pipeline_mode<synchronous>, transform_indices = @transform_1, window_bounds = array<i64: 3, 3, 32, 32>}, {pipeline_mode = #tpu.pipeline_mode<synchronous>, transform_indices = @transform_2, window_bounds = array<i64: 1, 32>}, {transform_indices = @transform_3, window_bounds = array<i64: 1, 14, 14, 32>}]} {
    %c0 = arith.constant 0 : index
    %c0_0 = arith.constant 0 : index
    %0 = vector.load %arg3[%c0, %c0_0] : memref<1x32xf32, #tpu.memory_space<vmem>>, vector<1x32xf32>
    %c0_i32 = arith.constant 0 : i32
    %c14_i32 = arith.constant 14 : i32
    %1 = arith.addi %c0_i32, %c14_i32 : i32
    %c1_i32 = arith.constant 1 : i32
    scf.for %arg5 = %c0_i32 to %1 step %c1_i32  : i32 {
      %cst = arith.constant 0.000000e+00 : f32
      %2 = vector.broadcast %cst : f32 to vector<14x32xf32>
      %c0_i32_2 = arith.constant 0 : i32
      %3 = arith.addi %arg5, %c0_i32_2 : i32
      %c0_3 = arith.constant 0 : index
      %4 = arith.index_cast %3 : i32 to index
      %c0_4 = arith.constant 0 : index
      %c0_5 = arith.constant 0 : index
      %5 = vector.load %arg1[%c0_3, %4, %c0_4, %c0_5] : memref<1x16x16x32xbf16, #tpu.memory_space<vmem>>, vector<1x1x16x32xbf16>
      %6 = vector.shape_cast %5 : vector<1x1x16x32xbf16> to vector<16x32xbf16>
      %7 = vector.extract_strided_slice %6 {offsets = [0, 0], sizes = [14, 32], strides = [1, 1]} : vector<16x32xbf16> to vector<14x32xbf16>
      %c0_6 = arith.constant 0 : index
      %c0_7 = arith.constant 0 : index
      %c0_8 = arith.constant 0 : index
      %c0_9 = arith.constant 0 : index
      %8 = vector.load %arg2[%c0_6, %c0_7, %c0_8, %c0_9] : memref<3x3x32x32xbf16, #tpu.memory_space<vmem>>, vector<1x1x32x32xbf16>
      %9 = vector.shape_cast %8 : vector<1x1x32x32xbf16> to vector<32x32xbf16>
      %cst_10 = arith.constant dense<0.000000e+00> : vector<14x32xf32>
      %10 = tpu.matmul %7, %9, %cst_10 {dimension_numbers = #tpu.dot_dimension_numbers<[1], [0], [0], [1], [0, 0, 1, 1], [], []>} : vector<14x32xbf16>, vector<32x32xbf16>, vector<14x32xf32> -> vector<14x32xf32>
      %11 = arith.addf %2, %10 : vector<14x32xf32>
      %12 = vector.extract_strided_slice %6 {offsets = [1, 0], sizes = [14, 32], strides = [1, 1]} : vector<16x32xbf16> to vector<14x32xbf16>
      %c0_11 = arith.constant 0 : index
      %c1 = arith.constant 1 : index
      %c0_12 = arith.constant 0 : index
      %c0_13 = arith.constant 0 : index
      %13 = vector.load %arg2[%c0_11, %c1, %c0_12, %c0_13] : memref<3x3x32x32xbf16, #tpu.memory_space<vmem>>, vector<1x1x32x32xbf16>
      %14 = vector.shape_cast %13 : vector<1x1x32x32xbf16> to vector<32x32xbf16>
      %cst_14 = arith.constant dense<0.000000e+00> : vector<14x32xf32>
      %15 = tpu.matmul %12, %14, %cst_14 {dimension_numbers = #tpu.dot_dimension_numbers<[1], [0], [0], [1], [0, 0, 1, 1], [], []>} : vector<14x32xbf16>, vector<32x32xbf16>, vector<14x32xf32> -> vector<14x32xf32>
      %16 = arith.addf %11, %15 : vector<14x32xf32>
      %17 = vector.extract_strided_slice %6 {offsets = [2, 0], sizes = [14, 32], strides = [1, 1]} : vector<16x32xbf16> to vector<14x32xbf16>
      %c0_15 = arith.constant 0 : index
      %c2 = arith.constant 2 : index
      %c0_16 = arith.constant 0 : index
      %c0_17 = arith.constant 0 : index
      %18 = vector.load %arg2[%c0_15, %c2, %c0_16, %c0_17] : memref<3x3x32x32xbf16, #tpu.memory_space<vmem>>, vector<1x1x32x32xbf16>
      %19 = vector.shape_cast %18 : vector<1x1x32x32xbf16> to vector<32x32xbf16>
      %cst_18 = arith.constant dense<0.000000e+00> : vector<14x32xf32>
      %20 = tpu.matmul %17, %19, %cst_18 {dimension_numbers = #tpu.dot_dimension_numbers<[1], [0], [0], [1], [0, 0, 1, 1], [], []>} : vector<14x32xbf16>, vector<32x32xbf16>, vector<14x32xf32> -> vector<14x32xf32>
      %21 = arith.addf %16, %20 : vector<14x32xf32>
      %c1_i32_19 = arith.constant 1 : i32
      %22 = arith.addi %arg5, %c1_i32_19 : i32
      %c0_20 = arith.constant 0 : index
      %23 = arith.index_cast %22 : i32 to index
      %c0_21 = arith.constant 0 : index
      %c0_22 = arith.constant 0 : index
      %24 = vector.load %arg1[%c0_20, %23, %c0_21, %c0_22] : memref<1x16x16x32xbf16, #tpu.memory_space<vmem>>, vector<1x1x16x32xbf16>
      %25 = vector.shape_cast %24 : vector<1x1x16x32xbf16> to vector<16x32xbf16>
      %26 = vector.extract_strided_slice %25 {offsets = [0, 0], sizes = [14, 32], strides = [1, 1]} : vector<16x32xbf16> to vector<14x32xbf16>
      %c1_23 = arith.constant 1 : index
      %c0_24 = arith.constant 0 : index
      %c0_25 = arith.constant 0 : index
      %c0_26 = arith.constant 0 : index
      %27 = vector.load %arg2[%c1_23, %c0_24, %c0_25, %c0_26] : memref<3x3x32x32xbf16, #tpu.memory_space<vmem>>, vector<1x1x32x32xbf16>
      %28 = vector.shape_cast %27 : vector<1x1x32x32xbf16> to vector<32x32xbf16>
      %cst_27 = arith.constant dense<0.000000e+00> : vector<14x32xf32>
      %29 = tpu.matmul %26, %28, %cst_27 {dimension_numbers = #tpu.dot_dimension_numbers<[1], [0], [0], [1], [0, 0, 1, 1], [], []>} : vector<14x32xbf16>, vector<32x32xbf16>, vector<14x32xf32> -> vector<14x32xf32>
      %30 = arith.addf %21, %29 : vector<14x32xf32>
      %31 = vector.extract_strided_slice %25 {offsets = [1, 0], sizes = [14, 32], strides = [1, 1]} : vector<16x32xbf16> to vector<14x32xbf16>
      %c1_28 = arith.constant 1 : index
      %c1_29 = arith.constant 1 : index
      %c0_30 = arith.constant 0 : index
      %c0_31 = arith.constant 0 : index
      %32 = vector.load %arg2[%c1_28, %c1_29, %c0_30, %c0_31] : memref<3x3x32x32xbf16, #tpu.memory_space<vmem>>, vector<1x1x32x32xbf16>
      %33 = vector.shape_cast %32 : vector<1x1x32x32xbf16> to vector<32x32xbf16>
      %cst_32 = arith.constant dense<0.000000e+00> : vector<14x32xf32>
      %34 = tpu.matmul %31, %33, %cst_32 {dimension_numbers = #tpu.dot_dimension_numbers<[1], [0], [0], [1], [0, 0, 1, 1], [], []>} : vector<14x32xbf16>, vector<32x32xbf16>, vector<14x32xf32> -> vector<14x32xf32>
      %35 = arith.addf %30, %34 : vector<14x32xf32>
      %36 = vector.extract_strided_slice %25 {offsets = [2, 0], sizes = [14, 32], strides = [1, 1]} : vector<16x32xbf16> to vector<14x32xbf16>
      %c1_33 = arith.constant 1 : index
      %c2_34 = arith.constant 2 : index
      %c0_35 = arith.constant 0 : index
      %c0_36 = arith.constant 0 : index
      %37 = vector.load %arg2[%c1_33, %c2_34, %c0_35, %c0_36] : memref<3x3x32x32xbf16, #tpu.memory_space<vmem>>, vector<1x1x32x32xbf16>
      %38 = vector.shape_cast %37 : vector<1x1x32x32xbf16> to vector<32x32xbf16>
      %cst_37 = arith.constant dense<0.000000e+00> : vector<14x32xf32>
      %39 = tpu.matmul %36, %38, %cst_37 {dimension_numbers = #tpu.dot_dimension_numbers<[1], [0], [0], [1], [0, 0, 1, 1], [], []>} : vector<14x32xbf16>, vector<32x32xbf16>, vector<14x32xf32> -> vector<14x32xf32>
      %40 = arith.addf %35, %39 : vector<14x32xf32>
      %c2_i32 = arith.constant 2 : i32
      %41 = arith.addi %arg5, %c2_i32 : i32
      %c0_38 = arith.constant 0 : index
      %42 = arith.index_cast %41 : i32 to index
      %c0_39 = arith.constant 0 : index
      %c0_40 = arith.constant 0 : index
      %43 = vector.load %arg1[%c0_38, %42, %c0_39, %c0_40] : memref<1x16x16x32xbf16, #tpu.memory_space<vmem>>, vector<1x1x16x32xbf16>
      %44 = vector.shape_cast %43 : vector<1x1x16x32xbf16> to vector<16x32xbf16>
      %45 = vector.extract_strided_slice %44 {offsets = [0, 0], sizes = [14, 32], strides = [1, 1]} : vector<16x32xbf16> to vector<14x32xbf16>
      %c2_41 = arith.constant 2 : index
      %c0_42 = arith.constant 0 : index
      %c0_43 = arith.constant 0 : index
      %c0_44 = arith.constant 0 : index
      %46 = vector.load %arg2[%c2_41, %c0_42, %c0_43, %c0_44] : memref<3x3x32x32xbf16, #tpu.memory_space<vmem>>, vector<1x1x32x32xbf16>
      %47 = vector.shape_cast %46 : vector<1x1x32x32xbf16> to vector<32x32xbf16>
      %cst_45 = arith.constant dense<0.000000e+00> : vector<14x32xf32>
      %48 = tpu.matmul %45, %47, %cst_45 {dimension_numbers = #tpu.dot_dimension_numbers<[1], [0], [0], [1], [0, 0, 1, 1], [], []>} : vector<14x32xbf16>, vector<32x32xbf16>, vector<14x32xf32> -> vector<14x32xf32>
      %49 = arith.addf %40, %48 : vector<14x32xf32>
      %50 = vector.extract_strided_slice %44 {offsets = [1, 0], sizes = [14, 32], strides = [1, 1]} : vector<16x32xbf16> to vector<14x32xbf16>
      %c2_46 = arith.constant 2 : index
      %c1_47 = arith.constant 1 : index
      %c0_48 = arith.constant 0 : index
      %c0_49 = arith.constant 0 : index
      %51 = vector.load %arg2[%c2_46, %c1_47, %c0_48, %c0_49] : memref<3x3x32x32xbf16, #tpu.memory_space<vmem>>, vector<1x1x32x32xbf16>
      %52 = vector.shape_cast %51 : vector<1x1x32x32xbf16> to vector<32x32xbf16>
      %cst_50 = arith.constant dense<0.000000e+00> : vector<14x32xf32>
      %53 = tpu.matmul %50, %52, %cst_50 {dimension_numbers = #tpu.dot_dimension_numbers<[1], [0], [0], [1], [0, 0, 1, 1], [], []>} : vector<14x32xbf16>, vector<32x32xbf16>, vector<14x32xf32> -> vector<14x32xf32>
      %54 = arith.addf %49, %53 : vector<14x32xf32>
      %55 = vector.extract_strided_slice %44 {offsets = [2, 0], sizes = [14, 32], strides = [1, 1]} : vector<16x32xbf16> to vector<14x32xbf16>
      %c2_51 = arith.constant 2 : index
      %c2_52 = arith.constant 2 : index
      %c0_53 = arith.constant 0 : index
      %c0_54 = arith.constant 0 : index
      %56 = vector.load %arg2[%c2_51, %c2_52, %c0_53, %c0_54] : memref<3x3x32x32xbf16, #tpu.memory_space<vmem>>, vector<1x1x32x32xbf16>
      %57 = vector.shape_cast %56 : vector<1x1x32x32xbf16> to vector<32x32xbf16>
      %cst_55 = arith.constant dense<0.000000e+00> : vector<14x32xf32>
      %58 = tpu.matmul %55, %57, %cst_55 {dimension_numbers = #tpu.dot_dimension_numbers<[1], [0], [0], [1], [0, 0, 1, 1], [], []>} : vector<14x32xbf16>, vector<32x32xbf16>, vector<14x32xf32> -> vector<14x32xf32>
      %59 = arith.addf %54, %58 : vector<14x32xf32>
      %60 = vector.broadcast %0 : vector<1x32xf32> to vector<14x32xf32>
      %61 = arith.addf %59, %60 : vector<14x32xf32>
      %62 = arith.truncf %61 : vector<14x32xf32> to vector<14x32xbf16>
      %c0_56 = arith.constant 0 : index
      %63 = arith.index_cast %arg5 : i32 to index
      %c0_57 = arith.constant 0 : index
      %c0_58 = arith.constant 0 : index
      %64 = vector.load %arg4[%c0_56, %63, %c0_57, %c0_58] : memref<1x14x14x32xbf16, #tpu.memory_space<vmem>>, vector<1x1x14x32xbf16>
      %65 = vector.shape_cast %64 : vector<1x1x14x32xbf16> to vector<14x32xbf16>
      %66 = vector.shape_cast %62 : vector<14x32xbf16> to vector<1x1x14x32xbf16>
      tpu.vector_store %arg4[%c0_56, %63, %c0_57, %c0_58], %66 {strides = array<i32>} : memref<1x14x14x32xbf16, #tpu.memory_space<vmem>>, vector<1x1x14x32xbf16>,
    }
    %c14_i32_1 = arith.constant 14 : i32
    return
  }
  func.func @transform_0(%arg0: i32) -> (i32, i32, i32, i32) {
    %c0_i32 = arith.constant 0 : i32
    %c0_i32_0 = arith.constant 0 : i32
    %c0_i32_1 = arith.constant 0 : i32
    %c0_i32_2 = arith.constant 0 : i32
    return %arg0, %c0_i32, %c0_i32_0, %c0_i32_1 : i32, i32, i32, i32
  }
  func.func @transform_1(%arg0: i32) -> (i32, i32, i32, i32) {
    %c0_i32 = arith.constant 0 : i32
    %c0_i32_0 = arith.constant 0 : i32
    %c0_i32_1 = arith.constant 0 : i32
    %c0_i32_2 = arith.constant 0 : i32
    %c0_i32_3 = arith.constant 0 : i32
    return %c0_i32, %c0_i32_0, %c0_i32_1, %c0_i32_2 : i32, i32, i32, i32
  }
  func.func @transform_2(%arg0: i32) -> (i32, i32) {
    %c0_i32 = arith.constant 0 : i32
    %c0_i32_0 = arith.constant 0 : i32
    %c0_i32_1 = arith.constant 0 : i32
    return %c0_i32, %c0_i32_0 : i32, i32
  }
  func.func @transform_3(%arg0: i32) -> (i32, i32, i32, i32) {
    %c0_i32 = arith.constant 0 : i32
    %c0_i32_0 = arith.constant 0 : i32
    %c0_i32_1 = arith.constant 0 : i32
    %c0_i32_2 = arith.constant 0 : i32
    return %arg0, %c0_i32, %c0_i32_0, %c0_i32_1 : i32, i32, i32, i32
  }
}

module attributes {stable_mosaic.version = 11 : i64} {
  func.func @_convt2x2_kernel(%arg0: i32, %arg1: memref<1x14x14x32xbf16, #tpu.memory_space<vmem>>, %arg2: memref<32x32xbf16, #tpu.memory_space<vmem>>, %arg3: memref<32x32xbf16, #tpu.memory_space<vmem>>, %arg4: memref<1x32xf32, #tpu.memory_space<vmem>>, %arg5: memref<1x14x2x14x32xbf16, #tpu.memory_space<vmem>>) attributes {dimension_semantics = [#tpu.dimension_semantics<parallel>], iteration_bounds = array<i64: 2>, scalar_prefetch = 0 : i64, scratch_operands = 0 : i64, tpu.core_type = #tpu.core_type<tc>, window_params = [{transform_indices = @transform_0, window_bounds = array<i64: 1, 14, 14, 32>}, {pipeline_mode = #tpu.pipeline_mode<synchronous>, transform_indices = @transform_1, window_bounds = array<i64: 32, 32>}, {pipeline_mode = #tpu.pipeline_mode<synchronous>, transform_indices = @transform_2, window_bounds = array<i64: 32, 32>}, {pipeline_mode = #tpu.pipeline_mode<synchronous>, transform_indices = @transform_3, window_bounds = array<i64: 1, 32>}, {transform_indices = @transform_4, window_bounds = array<i64: 1, 14, 2, 14, 32>}]} {
    %c0 = arith.constant 0 : index
    %c0_0 = arith.constant 0 : index
    %0 = vector.load %arg4[%c0, %c0_0] : memref<1x32xf32, #tpu.memory_space<vmem>>, vector<1x32xf32>
    %c0_i32 = arith.constant 0 : i32
    %c14_i32 = arith.constant 14 : i32
    %1 = arith.addi %c0_i32, %c14_i32 : i32
    %c1_i32 = arith.constant 1 : i32
    scf.for %arg6 = %c0_i32 to %1 step %c1_i32  : i32 {
      %c0_2 = arith.constant 0 : index
      %2 = arith.index_cast %arg6 : i32 to index
      %c0_3 = arith.constant 0 : index
      %c0_4 = arith.constant 0 : index
      %3 = vector.load %arg1[%c0_2, %2, %c0_3, %c0_4] : memref<1x14x14x32xbf16, #tpu.memory_space<vmem>>, vector<1x1x14x32xbf16>
      %4 = vector.shape_cast %3 : vector<1x1x14x32xbf16> to vector<14x32xbf16>
      %c0_5 = arith.constant 0 : index
      %c0_6 = arith.constant 0 : index
      %5 = vector.load %arg2[%c0_5, %c0_6] : memref<32x32xbf16, #tpu.memory_space<vmem>>, vector<32x32xbf16>
      %cst = arith.constant dense<0.000000e+00> : vector<14x32xf32>
      %6 = tpu.matmul %4, %5, %cst {dimension_numbers = #tpu.dot_dimension_numbers<[1], [0], [0], [1], [0, 0, 1, 1], [], []>} : vector<14x32xbf16>, vector<32x32xbf16>, vector<14x32xf32> -> vector<14x32xf32>
      %7 = vector.broadcast %0 : vector<1x32xf32> to vector<14x32xf32>
      %8 = arith.addf %6, %7 : vector<14x32xf32>
      %c0_7 = arith.constant 0 : index
      %c0_8 = arith.constant 0 : index
      %9 = vector.load %arg3[%c0_7, %c0_8] : memref<32x32xbf16, #tpu.memory_space<vmem>>, vector<32x32xbf16>
      %cst_9 = arith.constant dense<0.000000e+00> : vector<14x32xf32>
      %10 = tpu.matmul %4, %9, %cst_9 {dimension_numbers = #tpu.dot_dimension_numbers<[1], [0], [0], [1], [0, 0, 1, 1], [], []>} : vector<14x32xbf16>, vector<32x32xbf16>, vector<14x32xf32> -> vector<14x32xf32>
      %11 = vector.broadcast %0 : vector<1x32xf32> to vector<14x32xf32>
      %12 = arith.addf %10, %11 : vector<14x32xf32>
      %13 = arith.truncf %8 : vector<14x32xf32> to vector<14x32xbf16>
      %c0_10 = arith.constant 0 : index
      %14 = arith.index_cast %arg6 : i32 to index
      %c0_11 = arith.constant 0 : index
      %c0_12 = arith.constant 0 : index
      %c0_13 = arith.constant 0 : index
      %15 = vector.load %arg5[%c0_10, %14, %c0_11, %c0_12, %c0_13] : memref<1x14x2x14x32xbf16, #tpu.memory_space<vmem>>, vector<1x1x1x14x32xbf16>
      %16 = vector.shape_cast %15 : vector<1x1x1x14x32xbf16> to vector<14x32xbf16>
      %17 = vector.shape_cast %13 : vector<14x32xbf16> to vector<1x1x1x14x32xbf16>
      tpu.vector_store %arg5[%c0_10, %14, %c0_11, %c0_12, %c0_13], %17 {strides = array<i32>} : memref<1x14x2x14x32xbf16, #tpu.memory_space<vmem>>, vector<1x1x1x14x32xbf16>,
      %18 = arith.truncf %12 : vector<14x32xf32> to vector<14x32xbf16>
      %c0_14 = arith.constant 0 : index
      %19 = arith.index_cast %arg6 : i32 to index
      %c1 = arith.constant 1 : index
      %c0_15 = arith.constant 0 : index
      %c0_16 = arith.constant 0 : index
      %20 = vector.load %arg5[%c0_14, %19, %c1, %c0_15, %c0_16] : memref<1x14x2x14x32xbf16, #tpu.memory_space<vmem>>, vector<1x1x1x14x32xbf16>
      %21 = vector.shape_cast %20 : vector<1x1x1x14x32xbf16> to vector<14x32xbf16>
      %22 = vector.shape_cast %18 : vector<14x32xbf16> to vector<1x1x1x14x32xbf16>
      tpu.vector_store %arg5[%c0_14, %19, %c1, %c0_15, %c0_16], %22 {strides = array<i32>} : memref<1x14x2x14x32xbf16, #tpu.memory_space<vmem>>, vector<1x1x1x14x32xbf16>,
    }
    %c14_i32_1 = arith.constant 14 : i32
    return
  }
  func.func @transform_0(%arg0: i32) -> (i32, i32, i32, i32) {
    %c0_i32 = arith.constant 0 : i32
    %c0_i32_0 = arith.constant 0 : i32
    %c0_i32_1 = arith.constant 0 : i32
    %c0_i32_2 = arith.constant 0 : i32
    return %arg0, %c0_i32, %c0_i32_0, %c0_i32_1 : i32, i32, i32, i32
  }
  func.func @transform_1(%arg0: i32) -> (i32, i32) {
    %c0_i32 = arith.constant 0 : i32
    %c0_i32_0 = arith.constant 0 : i32
    %c0_i32_1 = arith.constant 0 : i32
    return %c0_i32, %c0_i32_0 : i32, i32
  }
  func.func @transform_2(%arg0: i32) -> (i32, i32) {
    %c0_i32 = arith.constant 0 : i32
    %c0_i32_0 = arith.constant 0 : i32
    %c0_i32_1 = arith.constant 0 : i32
    return %c0_i32, %c0_i32_0 : i32, i32
  }
  func.func @transform_3(%arg0: i32) -> (i32, i32) {
    %c0_i32 = arith.constant 0 : i32
    %c0_i32_0 = arith.constant 0 : i32
    %c0_i32_1 = arith.constant 0 : i32
    return %c0_i32, %c0_i32_0 : i32, i32
  }
  func.func @transform_4(%arg0: i32) -> (i32, i32, i32, i32, i32) {
    %c0_i32 = arith.constant 0 : i32
    %c0_i32_0 = arith.constant 0 : i32
    %c0_i32_1 = arith.constant 0 : i32
    %c0_i32_2 = arith.constant 0 : i32
    %c0_i32_3 = arith.constant 0 : i32
    return %arg0, %c0_i32, %c0_i32_0, %c0_i32_1, %c0_i32_2 : i32, i32, i32, i32, i32
  }
}

module attributes {stable_mosaic.version = 11 : i64} {
  func.func @_conv3x3_kernel(%arg0: i32, %arg1: memref<1x26x26x16xbf16, #tpu.memory_space<vmem>>, %arg2: memref<3x3x16x16xbf16, #tpu.memory_space<vmem>>, %arg3: memref<1x16xf32, #tpu.memory_space<vmem>>, %arg4: memref<1x24x24x16xbf16, #tpu.memory_space<vmem>>) attributes {dimension_semantics = [#tpu.dimension_semantics<parallel>], iteration_bounds = array<i64: 2>, scalar_prefetch = 0 : i64, scratch_operands = 0 : i64, tpu.core_type = #tpu.core_type<tc>, window_params = [{transform_indices = @transform_0, window_bounds = array<i64: 1, 26, 26, 16>}, {pipeline_mode = #tpu.pipeline_mode<synchronous>, transform_indices = @transform_1, window_bounds = array<i64: 3, 3, 16, 16>}, {pipeline_mode = #tpu.pipeline_mode<synchronous>, transform_indices = @transform_2, window_bounds = array<i64: 1, 16>}, {transform_indices = @transform_3, window_bounds = array<i64: 1, 24, 24, 16>}]} {
    %c0 = arith.constant 0 : index
    %c0_0 = arith.constant 0 : index
    %0 = vector.load %arg3[%c0, %c0_0] : memref<1x16xf32, #tpu.memory_space<vmem>>, vector<1x16xf32>
    %c0_i32 = arith.constant 0 : i32
    %c24_i32 = arith.constant 24 : i32
    %1 = arith.addi %c0_i32, %c24_i32 : i32
    %c1_i32 = arith.constant 1 : i32
    scf.for %arg5 = %c0_i32 to %1 step %c1_i32  : i32 {
      %cst = arith.constant 0.000000e+00 : f32
      %2 = vector.broadcast %cst : f32 to vector<24x16xf32>
      %c0_i32_2 = arith.constant 0 : i32
      %3 = arith.addi %arg5, %c0_i32_2 : i32
      %c0_3 = arith.constant 0 : index
      %4 = arith.index_cast %3 : i32 to index
      %c0_4 = arith.constant 0 : index
      %c0_5 = arith.constant 0 : index
      %5 = vector.load %arg1[%c0_3, %4, %c0_4, %c0_5] : memref<1x26x26x16xbf16, #tpu.memory_space<vmem>>, vector<1x1x26x16xbf16>
      %6 = vector.shape_cast %5 : vector<1x1x26x16xbf16> to vector<26x16xbf16>
      %7 = vector.extract_strided_slice %6 {offsets = [0, 0], sizes = [24, 16], strides = [1, 1]} : vector<26x16xbf16> to vector<24x16xbf16>
      %c0_6 = arith.constant 0 : index
      %c0_7 = arith.constant 0 : index
      %c0_8 = arith.constant 0 : index
      %c0_9 = arith.constant 0 : index
      %8 = vector.load %arg2[%c0_6, %c0_7, %c0_8, %c0_9] : memref<3x3x16x16xbf16, #tpu.memory_space<vmem>>, vector<1x1x16x16xbf16>
      %9 = vector.shape_cast %8 : vector<1x1x16x16xbf16> to vector<16x16xbf16>
      %cst_10 = arith.constant dense<0.000000e+00> : vector<24x16xf32>
      %10 = tpu.matmul %7, %9, %cst_10 {dimension_numbers = #tpu.dot_dimension_numbers<[1], [0], [0], [1], [0, 0, 1, 1], [], []>} : vector<24x16xbf16>, vector<16x16xbf16>, vector<24x16xf32> -> vector<24x16xf32>
      %11 = arith.addf %2, %10 : vector<24x16xf32>
      %12 = vector.extract_strided_slice %6 {offsets = [1, 0], sizes = [24, 16], strides = [1, 1]} : vector<26x16xbf16> to vector<24x16xbf16>
      %c0_11 = arith.constant 0 : index
      %c1 = arith.constant 1 : index
      %c0_12 = arith.constant 0 : index
      %c0_13 = arith.constant 0 : index
      %13 = vector.load %arg2[%c0_11, %c1, %c0_12, %c0_13] : memref<3x3x16x16xbf16, #tpu.memory_space<vmem>>, vector<1x1x16x16xbf16>
      %14 = vector.shape_cast %13 : vector<1x1x16x16xbf16> to vector<16x16xbf16>
      %cst_14 = arith.constant dense<0.000000e+00> : vector<24x16xf32>
      %15 = tpu.matmul %12, %14, %cst_14 {dimension_numbers = #tpu.dot_dimension_numbers<[1], [0], [0], [1], [0, 0, 1, 1], [], []>} : vector<24x16xbf16>, vector<16x16xbf16>, vector<24x16xf32> -> vector<24x16xf32>
      %16 = arith.addf %11, %15 : vector<24x16xf32>
      %17 = vector.extract_strided_slice %6 {offsets = [2, 0], sizes = [24, 16], strides = [1, 1]} : vector<26x16xbf16> to vector<24x16xbf16>
      %c0_15 = arith.constant 0 : index
      %c2 = arith.constant 2 : index
      %c0_16 = arith.constant 0 : index
      %c0_17 = arith.constant 0 : index
      %18 = vector.load %arg2[%c0_15, %c2, %c0_16, %c0_17] : memref<3x3x16x16xbf16, #tpu.memory_space<vmem>>, vector<1x1x16x16xbf16>
      %19 = vector.shape_cast %18 : vector<1x1x16x16xbf16> to vector<16x16xbf16>
      %cst_18 = arith.constant dense<0.000000e+00> : vector<24x16xf32>
      %20 = tpu.matmul %17, %19, %cst_18 {dimension_numbers = #tpu.dot_dimension_numbers<[1], [0], [0], [1], [0, 0, 1, 1], [], []>} : vector<24x16xbf16>, vector<16x16xbf16>, vector<24x16xf32> -> vector<24x16xf32>
      %21 = arith.addf %16, %20 : vector<24x16xf32>
      %c1_i32_19 = arith.constant 1 : i32
      %22 = arith.addi %arg5, %c1_i32_19 : i32
      %c0_20 = arith.constant 0 : index
      %23 = arith.index_cast %22 : i32 to index
      %c0_21 = arith.constant 0 : index
      %c0_22 = arith.constant 0 : index
      %24 = vector.load %arg1[%c0_20, %23, %c0_21, %c0_22] : memref<1x26x26x16xbf16, #tpu.memory_space<vmem>>, vector<1x1x26x16xbf16>
      %25 = vector.shape_cast %24 : vector<1x1x26x16xbf16> to vector<26x16xbf16>
      %26 = vector.extract_strided_slice %25 {offsets = [0, 0], sizes = [24, 16], strides = [1, 1]} : vector<26x16xbf16> to vector<24x16xbf16>
      %c1_23 = arith.constant 1 : index
      %c0_24 = arith.constant 0 : index
      %c0_25 = arith.constant 0 : index
      %c0_26 = arith.constant 0 : index
      %27 = vector.load %arg2[%c1_23, %c0_24, %c0_25, %c0_26] : memref<3x3x16x16xbf16, #tpu.memory_space<vmem>>, vector<1x1x16x16xbf16>
      %28 = vector.shape_cast %27 : vector<1x1x16x16xbf16> to vector<16x16xbf16>
      %cst_27 = arith.constant dense<0.000000e+00> : vector<24x16xf32>
      %29 = tpu.matmul %26, %28, %cst_27 {dimension_numbers = #tpu.dot_dimension_numbers<[1], [0], [0], [1], [0, 0, 1, 1], [], []>} : vector<24x16xbf16>, vector<16x16xbf16>, vector<24x16xf32> -> vector<24x16xf32>
      %30 = arith.addf %21, %29 : vector<24x16xf32>
      %31 = vector.extract_strided_slice %25 {offsets = [1, 0], sizes = [24, 16], strides = [1, 1]} : vector<26x16xbf16> to vector<24x16xbf16>
      %c1_28 = arith.constant 1 : index
      %c1_29 = arith.constant 1 : index
      %c0_30 = arith.constant 0 : index
      %c0_31 = arith.constant 0 : index
      %32 = vector.load %arg2[%c1_28, %c1_29, %c0_30, %c0_31] : memref<3x3x16x16xbf16, #tpu.memory_space<vmem>>, vector<1x1x16x16xbf16>
      %33 = vector.shape_cast %32 : vector<1x1x16x16xbf16> to vector<16x16xbf16>
      %cst_32 = arith.constant dense<0.000000e+00> : vector<24x16xf32>
      %34 = tpu.matmul %31, %33, %cst_32 {dimension_numbers = #tpu.dot_dimension_numbers<[1], [0], [0], [1], [0, 0, 1, 1], [], []>} : vector<24x16xbf16>, vector<16x16xbf16>, vector<24x16xf32> -> vector<24x16xf32>
      %35 = arith.addf %30, %34 : vector<24x16xf32>
      %36 = vector.extract_strided_slice %25 {offsets = [2, 0], sizes = [24, 16], strides = [1, 1]} : vector<26x16xbf16> to vector<24x16xbf16>
      %c1_33 = arith.constant 1 : index
      %c2_34 = arith.constant 2 : index
      %c0_35 = arith.constant 0 : index
      %c0_36 = arith.constant 0 : index
      %37 = vector.load %arg2[%c1_33, %c2_34, %c0_35, %c0_36] : memref<3x3x16x16xbf16, #tpu.memory_space<vmem>>, vector<1x1x16x16xbf16>
      %38 = vector.shape_cast %37 : vector<1x1x16x16xbf16> to vector<16x16xbf16>
      %cst_37 = arith.constant dense<0.000000e+00> : vector<24x16xf32>
      %39 = tpu.matmul %36, %38, %cst_37 {dimension_numbers = #tpu.dot_dimension_numbers<[1], [0], [0], [1], [0, 0, 1, 1], [], []>} : vector<24x16xbf16>, vector<16x16xbf16>, vector<24x16xf32> -> vector<24x16xf32>
      %40 = arith.addf %35, %39 : vector<24x16xf32>
      %c2_i32 = arith.constant 2 : i32
      %41 = arith.addi %arg5, %c2_i32 : i32
      %c0_38 = arith.constant 0 : index
      %42 = arith.index_cast %41 : i32 to index
      %c0_39 = arith.constant 0 : index
      %c0_40 = arith.constant 0 : index
      %43 = vector.load %arg1[%c0_38, %42, %c0_39, %c0_40] : memref<1x26x26x16xbf16, #tpu.memory_space<vmem>>, vector<1x1x26x16xbf16>
      %44 = vector.shape_cast %43 : vector<1x1x26x16xbf16> to vector<26x16xbf16>
      %45 = vector.extract_strided_slice %44 {offsets = [0, 0], sizes = [24, 16], strides = [1, 1]} : vector<26x16xbf16> to vector<24x16xbf16>
      %c2_41 = arith.constant 2 : index
      %c0_42 = arith.constant 0 : index
      %c0_43 = arith.constant 0 : index
      %c0_44 = arith.constant 0 : index
      %46 = vector.load %arg2[%c2_41, %c0_42, %c0_43, %c0_44] : memref<3x3x16x16xbf16, #tpu.memory_space<vmem>>, vector<1x1x16x16xbf16>
      %47 = vector.shape_cast %46 : vector<1x1x16x16xbf16> to vector<16x16xbf16>
      %cst_45 = arith.constant dense<0.000000e+00> : vector<24x16xf32>
      %48 = tpu.matmul %45, %47, %cst_45 {dimension_numbers = #tpu.dot_dimension_numbers<[1], [0], [0], [1], [0, 0, 1, 1], [], []>} : vector<24x16xbf16>, vector<16x16xbf16>, vector<24x16xf32> -> vector<24x16xf32>
      %49 = arith.addf %40, %48 : vector<24x16xf32>
      %50 = vector.extract_strided_slice %44 {offsets = [1, 0], sizes = [24, 16], strides = [1, 1]} : vector<26x16xbf16> to vector<24x16xbf16>
      %c2_46 = arith.constant 2 : index
      %c1_47 = arith.constant 1 : index
      %c0_48 = arith.constant 0 : index
      %c0_49 = arith.constant 0 : index
      %51 = vector.load %arg2[%c2_46, %c1_47, %c0_48, %c0_49] : memref<3x3x16x16xbf16, #tpu.memory_space<vmem>>, vector<1x1x16x16xbf16>
      %52 = vector.shape_cast %51 : vector<1x1x16x16xbf16> to vector<16x16xbf16>
      %cst_50 = arith.constant dense<0.000000e+00> : vector<24x16xf32>
      %53 = tpu.matmul %50, %52, %cst_50 {dimension_numbers = #tpu.dot_dimension_numbers<[1], [0], [0], [1], [0, 0, 1, 1], [], []>} : vector<24x16xbf16>, vector<16x16xbf16>, vector<24x16xf32> -> vector<24x16xf32>
      %54 = arith.addf %49, %53 : vector<24x16xf32>
      %55 = vector.extract_strided_slice %44 {offsets = [2, 0], sizes = [24, 16], strides = [1, 1]} : vector<26x16xbf16> to vector<24x16xbf16>
      %c2_51 = arith.constant 2 : index
      %c2_52 = arith.constant 2 : index
      %c0_53 = arith.constant 0 : index
      %c0_54 = arith.constant 0 : index
      %56 = vector.load %arg2[%c2_51, %c2_52, %c0_53, %c0_54] : memref<3x3x16x16xbf16, #tpu.memory_space<vmem>>, vector<1x1x16x16xbf16>
      %57 = vector.shape_cast %56 : vector<1x1x16x16xbf16> to vector<16x16xbf16>
      %cst_55 = arith.constant dense<0.000000e+00> : vector<24x16xf32>
      %58 = tpu.matmul %55, %57, %cst_55 {dimension_numbers = #tpu.dot_dimension_numbers<[1], [0], [0], [1], [0, 0, 1, 1], [], []>} : vector<24x16xbf16>, vector<16x16xbf16>, vector<24x16xf32> -> vector<24x16xf32>
      %59 = arith.addf %54, %58 : vector<24x16xf32>
      %60 = vector.broadcast %0 : vector<1x16xf32> to vector<24x16xf32>
      %61 = arith.addf %59, %60 : vector<24x16xf32>
      %62 = arith.truncf %61 : vector<24x16xf32> to vector<24x16xbf16>
      %c0_56 = arith.constant 0 : index
      %63 = arith.index_cast %arg5 : i32 to index
      %c0_57 = arith.constant 0 : index
      %c0_58 = arith.constant 0 : index
      %64 = vector.load %arg4[%c0_56, %63, %c0_57, %c0_58] : memref<1x24x24x16xbf16, #tpu.memory_space<vmem>>, vector<1x1x24x16xbf16>
      %65 = vector.shape_cast %64 : vector<1x1x24x16xbf16> to vector<24x16xbf16>
      %66 = vector.shape_cast %62 : vector<24x16xbf16> to vector<1x1x24x16xbf16>
      tpu.vector_store %arg4[%c0_56, %63, %c0_57, %c0_58], %66 {strides = array<i32>} : memref<1x24x24x16xbf16, #tpu.memory_space<vmem>>, vector<1x1x24x16xbf16>,
    }
    %c24_i32_1 = arith.constant 24 : i32
    return
  }
  func.func @transform_0(%arg0: i32) -> (i32, i32, i32, i32) {
    %c0_i32 = arith.constant 0 : i32
    %c0_i32_0 = arith.constant 0 : i32
    %c0_i32_1 = arith.constant 0 : i32
    %c0_i32_2 = arith.constant 0 : i32
    return %arg0, %c0_i32, %c0_i32_0, %c0_i32_1 : i32, i32, i32, i32
  }
  func.func @transform_1(%arg0: i32) -> (i32, i32, i32, i32) {
    %c0_i32 = arith.constant 0 : i32
    %c0_i32_0 = arith.constant 0 : i32
    %c0_i32_1 = arith.constant 0 : i32
    %c0_i32_2 = arith.constant 0 : i32
    %c0_i32_3 = arith.constant 0 : i32
    return %c0_i32, %c0_i32_0, %c0_i32_1, %c0_i32_2 : i32, i32, i32, i32
  }
  func.func @transform_2(%arg0: i32) -> (i32, i32) {
    %c0_i32 = arith.constant 0 : i32
    %c0_i32_0 = arith.constant 0 : i32
    %c0_i32_1 = arith.constant 0 : i32
    return %c0_i32, %c0_i32_0 : i32, i32
  }
  func.func @transform_3(%arg0: i32) -> (i32, i32, i32, i32) {
    %c0_i32 = arith.constant 0 : i32
    %c0_i32_0 = arith.constant 0 : i32
    %c0_i32_1 = arith.constant 0 : i32
    %c0_i32_2 = arith.constant 0 : i32
    return %arg0, %c0_i32, %c0_i32_0, %c0_i32_1 : i32, i32, i32, i32
  }
}

module attributes {stable_mosaic.version = 11 : i64} {
  func.func @_conv3x3_kernel(%arg0: i32, %arg1: memref<1x28x28x16xbf16, #tpu.memory_space<vmem>>, %arg2: memref<1x28x28x16xbf16, #tpu.memory_space<vmem>>, %arg3: memref<3x3x16x16xbf16, #tpu.memory_space<vmem>>, %arg4: memref<3x3x16x16xbf16, #tpu.memory_space<vmem>>, %arg5: memref<1x16xf32, #tpu.memory_space<vmem>>, %arg6: memref<1x26x26x16xbf16, #tpu.memory_space<vmem>>) attributes {dimension_semantics = [#tpu.dimension_semantics<parallel>], iteration_bounds = array<i64: 2>, scalar_prefetch = 0 : i64, scratch_operands = 0 : i64, tpu.core_type = #tpu.core_type<tc>, window_params = [{transform_indices = @transform_0, window_bounds = array<i64: 1, 28, 28, 16>}, {transform_indices = @transform_1, window_bounds = array<i64: 1, 28, 28, 16>}, {pipeline_mode = #tpu.pipeline_mode<synchronous>, transform_indices = @transform_2, window_bounds = array<i64: 3, 3, 16, 16>}, {pipeline_mode = #tpu.pipeline_mode<synchronous>, transform_indices = @transform_3, window_bounds = array<i64: 3, 3, 16, 16>}, {pipeline_mode = #tpu.pipeline_mode<synchronous>, transform_indices = @transform_4, window_bounds = array<i64: 1, 16>}, {transform_indices = @transform_5, window_bounds = array<i64: 1, 26, 26, 16>}]} {
    %c0 = arith.constant 0 : index
    %c0_0 = arith.constant 0 : index
    %0 = vector.load %arg5[%c0, %c0_0] : memref<1x16xf32, #tpu.memory_space<vmem>>, vector<1x16xf32>
    %c0_i32 = arith.constant 0 : i32
    %c26_i32 = arith.constant 26 : i32
    %1 = arith.addi %c0_i32, %c26_i32 : i32
    %c1_i32 = arith.constant 1 : i32
    scf.for %arg7 = %c0_i32 to %1 step %c1_i32  : i32 {
      %cst = arith.constant 0.000000e+00 : f32
      %2 = vector.broadcast %cst : f32 to vector<26x16xf32>
      %c0_i32_2 = arith.constant 0 : i32
      %3 = arith.addi %arg7, %c0_i32_2 : i32
      %c0_3 = arith.constant 0 : index
      %4 = arith.index_cast %3 : i32 to index
      %c0_4 = arith.constant 0 : index
      %c0_5 = arith.constant 0 : index
      %5 = vector.load %arg1[%c0_3, %4, %c0_4, %c0_5] : memref<1x28x28x16xbf16, #tpu.memory_space<vmem>>, vector<1x1x28x16xbf16>
      %6 = vector.shape_cast %5 : vector<1x1x28x16xbf16> to vector<28x16xbf16>
      %7 = vector.extract_strided_slice %6 {offsets = [0, 0], sizes = [26, 16], strides = [1, 1]} : vector<28x16xbf16> to vector<26x16xbf16>
      %c0_6 = arith.constant 0 : index
      %c0_7 = arith.constant 0 : index
      %c0_8 = arith.constant 0 : index
      %c0_9 = arith.constant 0 : index
      %8 = vector.load %arg3[%c0_6, %c0_7, %c0_8, %c0_9] : memref<3x3x16x16xbf16, #tpu.memory_space<vmem>>, vector<1x1x16x16xbf16>
      %9 = vector.shape_cast %8 : vector<1x1x16x16xbf16> to vector<16x16xbf16>
      %cst_10 = arith.constant dense<0.000000e+00> : vector<26x16xf32>
      %10 = tpu.matmul %7, %9, %cst_10 {dimension_numbers = #tpu.dot_dimension_numbers<[1], [0], [0], [1], [0, 0, 1, 1], [], []>} : vector<26x16xbf16>, vector<16x16xbf16>, vector<26x16xf32> -> vector<26x16xf32>
      %11 = arith.addf %2, %10 : vector<26x16xf32>
      %12 = vector.extract_strided_slice %6 {offsets = [1, 0], sizes = [26, 16], strides = [1, 1]} : vector<28x16xbf16> to vector<26x16xbf16>
      %c0_11 = arith.constant 0 : index
      %c1 = arith.constant 1 : index
      %c0_12 = arith.constant 0 : index
      %c0_13 = arith.constant 0 : index
      %13 = vector.load %arg3[%c0_11, %c1, %c0_12, %c0_13] : memref<3x3x16x16xbf16, #tpu.memory_space<vmem>>, vector<1x1x16x16xbf16>
      %14 = vector.shape_cast %13 : vector<1x1x16x16xbf16> to vector<16x16xbf16>
      %cst_14 = arith.constant dense<0.000000e+00> : vector<26x16xf32>
      %15 = tpu.matmul %12, %14, %cst_14 {dimension_numbers = #tpu.dot_dimension_numbers<[1], [0], [0], [1], [0, 0, 1, 1], [], []>} : vector<26x16xbf16>, vector<16x16xbf16>, vector<26x16xf32> -> vector<26x16xf32>
      %16 = arith.addf %11, %15 : vector<26x16xf32>
      %17 = vector.extract_strided_slice %6 {offsets = [2, 0], sizes = [26, 16], strides = [1, 1]} : vector<28x16xbf16> to vector<26x16xbf16>
      %c0_15 = arith.constant 0 : index
      %c2 = arith.constant 2 : index
      %c0_16 = arith.constant 0 : index
      %c0_17 = arith.constant 0 : index
      %18 = vector.load %arg3[%c0_15, %c2, %c0_16, %c0_17] : memref<3x3x16x16xbf16, #tpu.memory_space<vmem>>, vector<1x1x16x16xbf16>
      %19 = vector.shape_cast %18 : vector<1x1x16x16xbf16> to vector<16x16xbf16>
      %cst_18 = arith.constant dense<0.000000e+00> : vector<26x16xf32>
      %20 = tpu.matmul %17, %19, %cst_18 {dimension_numbers = #tpu.dot_dimension_numbers<[1], [0], [0], [1], [0, 0, 1, 1], [], []>} : vector<26x16xbf16>, vector<16x16xbf16>, vector<26x16xf32> -> vector<26x16xf32>
      %21 = arith.addf %16, %20 : vector<26x16xf32>
      %c1_i32_19 = arith.constant 1 : i32
      %22 = arith.addi %arg7, %c1_i32_19 : i32
      %c0_20 = arith.constant 0 : index
      %23 = arith.index_cast %22 : i32 to index
      %c0_21 = arith.constant 0 : index
      %c0_22 = arith.constant 0 : index
      %24 = vector.load %arg1[%c0_20, %23, %c0_21, %c0_22] : memref<1x28x28x16xbf16, #tpu.memory_space<vmem>>, vector<1x1x28x16xbf16>
      %25 = vector.shape_cast %24 : vector<1x1x28x16xbf16> to vector<28x16xbf16>
      %26 = vector.extract_strided_slice %25 {offsets = [0, 0], sizes = [26, 16], strides = [1, 1]} : vector<28x16xbf16> to vector<26x16xbf16>
      %c1_23 = arith.constant 1 : index
      %c0_24 = arith.constant 0 : index
      %c0_25 = arith.constant 0 : index
      %c0_26 = arith.constant 0 : index
      %27 = vector.load %arg3[%c1_23, %c0_24, %c0_25, %c0_26] : memref<3x3x16x16xbf16, #tpu.memory_space<vmem>>, vector<1x1x16x16xbf16>
      %28 = vector.shape_cast %27 : vector<1x1x16x16xbf16> to vector<16x16xbf16>
      %cst_27 = arith.constant dense<0.000000e+00> : vector<26x16xf32>
      %29 = tpu.matmul %26, %28, %cst_27 {dimension_numbers = #tpu.dot_dimension_numbers<[1], [0], [0], [1], [0, 0, 1, 1], [], []>} : vector<26x16xbf16>, vector<16x16xbf16>, vector<26x16xf32> -> vector<26x16xf32>
      %30 = arith.addf %21, %29 : vector<26x16xf32>
      %31 = vector.extract_strided_slice %25 {offsets = [1, 0], sizes = [26, 16], strides = [1, 1]} : vector<28x16xbf16> to vector<26x16xbf16>
      %c1_28 = arith.constant 1 : index
      %c1_29 = arith.constant 1 : index
      %c0_30 = arith.constant 0 : index
      %c0_31 = arith.constant 0 : index
      %32 = vector.load %arg3[%c1_28, %c1_29, %c0_30, %c0_31] : memref<3x3x16x16xbf16, #tpu.memory_space<vmem>>, vector<1x1x16x16xbf16>
      %33 = vector.shape_cast %32 : vector<1x1x16x16xbf16> to vector<16x16xbf16>
      %cst_32 = arith.constant dense<0.000000e+00> : vector<26x16xf32>
      %34 = tpu.matmul %31, %33, %cst_32 {dimension_numbers = #tpu.dot_dimension_numbers<[1], [0], [0], [1], [0, 0, 1, 1], [], []>} : vector<26x16xbf16>, vector<16x16xbf16>, vector<26x16xf32> -> vector<26x16xf32>
      %35 = arith.addf %30, %34 : vector<26x16xf32>
      %36 = vector.extract_strided_slice %25 {offsets = [2, 0], sizes = [26, 16], strides = [1, 1]} : vector<28x16xbf16> to vector<26x16xbf16>
      %c1_33 = arith.constant 1 : index
      %c2_34 = arith.constant 2 : index
      %c0_35 = arith.constant 0 : index
      %c0_36 = arith.constant 0 : index
      %37 = vector.load %arg3[%c1_33, %c2_34, %c0_35, %c0_36] : memref<3x3x16x16xbf16, #tpu.memory_space<vmem>>, vector<1x1x16x16xbf16>
      %38 = vector.shape_cast %37 : vector<1x1x16x16xbf16> to vector<16x16xbf16>
      %cst_37 = arith.constant dense<0.000000e+00> : vector<26x16xf32>
      %39 = tpu.matmul %36, %38, %cst_37 {dimension_numbers = #tpu.dot_dimension_numbers<[1], [0], [0], [1], [0, 0, 1, 1], [], []>} : vector<26x16xbf16>, vector<16x16xbf16>, vector<26x16xf32> -> vector<26x16xf32>
      %40 = arith.addf %35, %39 : vector<26x16xf32>
      %c2_i32 = arith.constant 2 : i32
      %41 = arith.addi %arg7, %c2_i32 : i32
      %c0_38 = arith.constant 0 : index
      %42 = arith.index_cast %41 : i32 to index
      %c0_39 = arith.constant 0 : index
      %c0_40 = arith.constant 0 : index
      %43 = vector.load %arg1[%c0_38, %42, %c0_39, %c0_40] : memref<1x28x28x16xbf16, #tpu.memory_space<vmem>>, vector<1x1x28x16xbf16>
      %44 = vector.shape_cast %43 : vector<1x1x28x16xbf16> to vector<28x16xbf16>
      %45 = vector.extract_strided_slice %44 {offsets = [0, 0], sizes = [26, 16], strides = [1, 1]} : vector<28x16xbf16> to vector<26x16xbf16>
      %c2_41 = arith.constant 2 : index
      %c0_42 = arith.constant 0 : index
      %c0_43 = arith.constant 0 : index
      %c0_44 = arith.constant 0 : index
      %46 = vector.load %arg3[%c2_41, %c0_42, %c0_43, %c0_44] : memref<3x3x16x16xbf16, #tpu.memory_space<vmem>>, vector<1x1x16x16xbf16>
      %47 = vector.shape_cast %46 : vector<1x1x16x16xbf16> to vector<16x16xbf16>
      %cst_45 = arith.constant dense<0.000000e+00> : vector<26x16xf32>
      %48 = tpu.matmul %45, %47, %cst_45 {dimension_numbers = #tpu.dot_dimension_numbers<[1], [0], [0], [1], [0, 0, 1, 1], [], []>} : vector<26x16xbf16>, vector<16x16xbf16>, vector<26x16xf32> -> vector<26x16xf32>
      %49 = arith.addf %40, %48 : vector<26x16xf32>
      %50 = vector.extract_strided_slice %44 {offsets = [1, 0], sizes = [26, 16], strides = [1, 1]} : vector<28x16xbf16> to vector<26x16xbf16>
      %c2_46 = arith.constant 2 : index
      %c1_47 = arith.constant 1 : index
      %c0_48 = arith.constant 0 : index
      %c0_49 = arith.constant 0 : index
      %51 = vector.load %arg3[%c2_46, %c1_47, %c0_48, %c0_49] : memref<3x3x16x16xbf16, #tpu.memory_space<vmem>>, vector<1x1x16x16xbf16>
      %52 = vector.shape_cast %51 : vector<1x1x16x16xbf16> to vector<16x16xbf16>
      %cst_50 = arith.constant dense<0.000000e+00> : vector<26x16xf32>
      %53 = tpu.matmul %50, %52, %cst_50 {dimension_numbers = #tpu.dot_dimension_numbers<[1], [0], [0], [1], [0, 0, 1, 1], [], []>} : vector<26x16xbf16>, vector<16x16xbf16>, vector<26x16xf32> -> vector<26x16xf32>
      %54 = arith.addf %49, %53 : vector<26x16xf32>
      %55 = vector.extract_strided_slice %44 {offsets = [2, 0], sizes = [26, 16], strides = [1, 1]} : vector<28x16xbf16> to vector<26x16xbf16>
      %c2_51 = arith.constant 2 : index
      %c2_52 = arith.constant 2 : index
      %c0_53 = arith.constant 0 : index
      %c0_54 = arith.constant 0 : index
      %56 = vector.load %arg3[%c2_51, %c2_52, %c0_53, %c0_54] : memref<3x3x16x16xbf16, #tpu.memory_space<vmem>>, vector<1x1x16x16xbf16>
      %57 = vector.shape_cast %56 : vector<1x1x16x16xbf16> to vector<16x16xbf16>
      %cst_55 = arith.constant dense<0.000000e+00> : vector<26x16xf32>
      %58 = tpu.matmul %55, %57, %cst_55 {dimension_numbers = #tpu.dot_dimension_numbers<[1], [0], [0], [1], [0, 0, 1, 1], [], []>} : vector<26x16xbf16>, vector<16x16xbf16>, vector<26x16xf32> -> vector<26x16xf32>
      %59 = arith.addf %54, %58 : vector<26x16xf32>
      %c0_i32_56 = arith.constant 0 : i32
      %60 = arith.addi %arg7, %c0_i32_56 : i32
      %c0_57 = arith.constant 0 : index
      %61 = arith.index_cast %60 : i32 to index
      %c0_58 = arith.constant 0 : index
      %c0_59 = arith.constant 0 : index
      %62 = vector.load %arg2[%c0_57, %61, %c0_58, %c0_59] : memref<1x28x28x16xbf16, #tpu.memory_space<vmem>>, vector<1x1x28x16xbf16>
      %63 = vector.shape_cast %62 : vector<1x1x28x16xbf16> to vector<28x16xbf16>
      %64 = vector.extract_strided_slice %63 {offsets = [0, 0], sizes = [26, 16], strides = [1, 1]} : vector<28x16xbf16> to vector<26x16xbf16>
      %c0_60 = arith.constant 0 : index
      %c0_61 = arith.constant 0 : index
      %c0_62 = arith.constant 0 : index
      %c0_63 = arith.constant 0 : index
      %65 = vector.load %arg4[%c0_60, %c0_61, %c0_62, %c0_63] : memref<3x3x16x16xbf16, #tpu.memory_space<vmem>>, vector<1x1x16x16xbf16>
      %66 = vector.shape_cast %65 : vector<1x1x16x16xbf16> to vector<16x16xbf16>
      %cst_64 = arith.constant dense<0.000000e+00> : vector<26x16xf32>
      %67 = tpu.matmul %64, %66, %cst_64 {dimension_numbers = #tpu.dot_dimension_numbers<[1], [0], [0], [1], [0, 0, 1, 1], [], []>} : vector<26x16xbf16>, vector<16x16xbf16>, vector<26x16xf32> -> vector<26x16xf32>
      %68 = arith.addf %59, %67 : vector<26x16xf32>
      %69 = vector.extract_strided_slice %63 {offsets = [1, 0], sizes = [26, 16], strides = [1, 1]} : vector<28x16xbf16> to vector<26x16xbf16>
      %c0_65 = arith.constant 0 : index
      %c1_66 = arith.constant 1 : index
      %c0_67 = arith.constant 0 : index
      %c0_68 = arith.constant 0 : index
      %70 = vector.load %arg4[%c0_65, %c1_66, %c0_67, %c0_68] : memref<3x3x16x16xbf16, #tpu.memory_space<vmem>>, vector<1x1x16x16xbf16>
      %71 = vector.shape_cast %70 : vector<1x1x16x16xbf16> to vector<16x16xbf16>
      %cst_69 = arith.constant dense<0.000000e+00> : vector<26x16xf32>
      %72 = tpu.matmul %69, %71, %cst_69 {dimension_numbers = #tpu.dot_dimension_numbers<[1], [0], [0], [1], [0, 0, 1, 1], [], []>} : vector<26x16xbf16>, vector<16x16xbf16>, vector<26x16xf32> -> vector<26x16xf32>
      %73 = arith.addf %68, %72 : vector<26x16xf32>
      %74 = vector.extract_strided_slice %63 {offsets = [2, 0], sizes = [26, 16], strides = [1, 1]} : vector<28x16xbf16> to vector<26x16xbf16>
      %c0_70 = arith.constant 0 : index
      %c2_71 = arith.constant 2 : index
      %c0_72 = arith.constant 0 : index
      %c0_73 = arith.constant 0 : index
      %75 = vector.load %arg4[%c0_70, %c2_71, %c0_72, %c0_73] : memref<3x3x16x16xbf16, #tpu.memory_space<vmem>>, vector<1x1x16x16xbf16>
      %76 = vector.shape_cast %75 : vector<1x1x16x16xbf16> to vector<16x16xbf16>
      %cst_74 = arith.constant dense<0.000000e+00> : vector<26x16xf32>
      %77 = tpu.matmul %74, %76, %cst_74 {dimension_numbers = #tpu.dot_dimension_numbers<[1], [0], [0], [1], [0, 0, 1, 1], [], []>} : vector<26x16xbf16>, vector<16x16xbf16>, vector<26x16xf32> -> vector<26x16xf32>
      %78 = arith.addf %73, %77 : vector<26x16xf32>
      %c1_i32_75 = arith.constant 1 : i32
      %79 = arith.addi %arg7, %c1_i32_75 : i32
      %c0_76 = arith.constant 0 : index
      %80 = arith.index_cast %79 : i32 to index
      %c0_77 = arith.constant 0 : index
      %c0_78 = arith.constant 0 : index
      %81 = vector.load %arg2[%c0_76, %80, %c0_77, %c0_78] : memref<1x28x28x16xbf16, #tpu.memory_space<vmem>>, vector<1x1x28x16xbf16>
      %82 = vector.shape_cast %81 : vector<1x1x28x16xbf16> to vector<28x16xbf16>
      %83 = vector.extract_strided_slice %82 {offsets = [0, 0], sizes = [26, 16], strides = [1, 1]} : vector<28x16xbf16> to vector<26x16xbf16>
      %c1_79 = arith.constant 1 : index
      %c0_80 = arith.constant 0 : index
      %c0_81 = arith.constant 0 : index
      %c0_82 = arith.constant 0 : index
      %84 = vector.load %arg4[%c1_79, %c0_80, %c0_81, %c0_82] : memref<3x3x16x16xbf16, #tpu.memory_space<vmem>>, vector<1x1x16x16xbf16>
      %85 = vector.shape_cast %84 : vector<1x1x16x16xbf16> to vector<16x16xbf16>
      %cst_83 = arith.constant dense<0.000000e+00> : vector<26x16xf32>
      %86 = tpu.matmul %83, %85, %cst_83 {dimension_numbers = #tpu.dot_dimension_numbers<[1], [0], [0], [1], [0, 0, 1, 1], [], []>} : vector<26x16xbf16>, vector<16x16xbf16>, vector<26x16xf32> -> vector<26x16xf32>
      %87 = arith.addf %78, %86 : vector<26x16xf32>
      %88 = vector.extract_strided_slice %82 {offsets = [1, 0], sizes = [26, 16], strides = [1, 1]} : vector<28x16xbf16> to vector<26x16xbf16>
      %c1_84 = arith.constant 1 : index
      %c1_85 = arith.constant 1 : index
      %c0_86 = arith.constant 0 : index
      %c0_87 = arith.constant 0 : index
      %89 = vector.load %arg4[%c1_84, %c1_85, %c0_86, %c0_87] : memref<3x3x16x16xbf16, #tpu.memory_space<vmem>>, vector<1x1x16x16xbf16>
      %90 = vector.shape_cast %89 : vector<1x1x16x16xbf16> to vector<16x16xbf16>
      %cst_88 = arith.constant dense<0.000000e+00> : vector<26x16xf32>
      %91 = tpu.matmul %88, %90, %cst_88 {dimension_numbers = #tpu.dot_dimension_numbers<[1], [0], [0], [1], [0, 0, 1, 1], [], []>} : vector<26x16xbf16>, vector<16x16xbf16>, vector<26x16xf32> -> vector<26x16xf32>
      %92 = arith.addf %87, %91 : vector<26x16xf32>
      %93 = vector.extract_strided_slice %82 {offsets = [2, 0], sizes = [26, 16], strides = [1, 1]} : vector<28x16xbf16> to vector<26x16xbf16>
      %c1_89 = arith.constant 1 : index
      %c2_90 = arith.constant 2 : index
      %c0_91 = arith.constant 0 : index
      %c0_92 = arith.constant 0 : index
      %94 = vector.load %arg4[%c1_89, %c2_90, %c0_91, %c0_92] : memref<3x3x16x16xbf16, #tpu.memory_space<vmem>>, vector<1x1x16x16xbf16>
      %95 = vector.shape_cast %94 : vector<1x1x16x16xbf16> to vector<16x16xbf16>
      %cst_93 = arith.constant dense<0.000000e+00> : vector<26x16xf32>
      %96 = tpu.matmul %93, %95, %cst_93 {dimension_numbers = #tpu.dot_dimension_numbers<[1], [0], [0], [1], [0, 0, 1, 1], [], []>} : vector<26x16xbf16>, vector<16x16xbf16>, vector<26x16xf32> -> vector<26x16xf32>
      %97 = arith.addf %92, %96 : vector<26x16xf32>
      %c2_i32_94 = arith.constant 2 : i32
      %98 = arith.addi %arg7, %c2_i32_94 : i32
      %c0_95 = arith.constant 0 : index
      %99 = arith.index_cast %98 : i32 to index
      %c0_96 = arith.constant 0 : index
      %c0_97 = arith.constant 0 : index
      %100 = vector.load %arg2[%c0_95, %99, %c0_96, %c0_97] : memref<1x28x28x16xbf16, #tpu.memory_space<vmem>>, vector<1x1x28x16xbf16>
      %101 = vector.shape_cast %100 : vector<1x1x28x16xbf16> to vector<28x16xbf16>
      %102 = vector.extract_strided_slice %101 {offsets = [0, 0], sizes = [26, 16], strides = [1, 1]} : vector<28x16xbf16> to vector<26x16xbf16>
      %c2_98 = arith.constant 2 : index
      %c0_99 = arith.constant 0 : index
      %c0_100 = arith.constant 0 : index
      %c0_101 = arith.constant 0 : index
      %103 = vector.load %arg4[%c2_98, %c0_99, %c0_100, %c0_101] : memref<3x3x16x16xbf16, #tpu.memory_space<vmem>>, vector<1x1x16x16xbf16>
      %104 = vector.shape_cast %103 : vector<1x1x16x16xbf16> to vector<16x16xbf16>
      %cst_102 = arith.constant dense<0.000000e+00> : vector<26x16xf32>
      %105 = tpu.matmul %102, %104, %cst_102 {dimension_numbers = #tpu.dot_dimension_numbers<[1], [0], [0], [1], [0, 0, 1, 1], [], []>} : vector<26x16xbf16>, vector<16x16xbf16>, vector<26x16xf32> -> vector<26x16xf32>
      %106 = arith.addf %97, %105 : vector<26x16xf32>
      %107 = vector.extract_strided_slice %101 {offsets = [1, 0], sizes = [26, 16], strides = [1, 1]} : vector<28x16xbf16> to vector<26x16xbf16>
      %c2_103 = arith.constant 2 : index
      %c1_104 = arith.constant 1 : index
      %c0_105 = arith.constant 0 : index
      %c0_106 = arith.constant 0 : index
      %108 = vector.load %arg4[%c2_103, %c1_104, %c0_105, %c0_106] : memref<3x3x16x16xbf16, #tpu.memory_space<vmem>>, vector<1x1x16x16xbf16>
      %109 = vector.shape_cast %108 : vector<1x1x16x16xbf16> to vector<16x16xbf16>
      %cst_107 = arith.constant dense<0.000000e+00> : vector<26x16xf32>
      %110 = tpu.matmul %107, %109, %cst_107 {dimension_numbers = #tpu.dot_dimension_numbers<[1], [0], [0], [1], [0, 0, 1, 1], [], []>} : vector<26x16xbf16>, vector<16x16xbf16>, vector<26x16xf32> -> vector<26x16xf32>
      %111 = arith.addf %106, %110 : vector<26x16xf32>
      %112 = vector.extract_strided_slice %101 {offsets = [2, 0], sizes = [26, 16], strides = [1, 1]} : vector<28x16xbf16> to vector<26x16xbf16>
      %c2_108 = arith.constant 2 : index
      %c2_109 = arith.constant 2 : index
      %c0_110 = arith.constant 0 : index
      %c0_111 = arith.constant 0 : index
      %113 = vector.load %arg4[%c2_108, %c2_109, %c0_110, %c0_111] : memref<3x3x16x16xbf16, #tpu.memory_space<vmem>>, vector<1x1x16x16xbf16>
      %114 = vector.shape_cast %113 : vector<1x1x16x16xbf16> to vector<16x16xbf16>
      %cst_112 = arith.constant dense<0.000000e+00> : vector<26x16xf32>
      %115 = tpu.matmul %112, %114, %cst_112 {dimension_numbers = #tpu.dot_dimension_numbers<[1], [0], [0], [1], [0, 0, 1, 1], [], []>} : vector<26x16xbf16>, vector<16x16xbf16>, vector<26x16xf32> -> vector<26x16xf32>
      %116 = arith.addf %111, %115 : vector<26x16xf32>
      %117 = vector.broadcast %0 : vector<1x16xf32> to vector<26x16xf32>
      %118 = arith.addf %116, %117 : vector<26x16xf32>
      %cst_113 = arith.constant 0.000000e+00 : f32
      %119 = vector.broadcast %cst_113 : f32 to vector<26x16xf32>
      %120 = arith.maximumf %118, %119 : vector<26x16xf32>
      %121 = arith.truncf %120 : vector<26x16xf32> to vector<26x16xbf16>
      %c0_114 = arith.constant 0 : index
      %122 = arith.index_cast %arg7 : i32 to index
      %c0_115 = arith.constant 0 : index
      %c0_116 = arith.constant 0 : index
      %123 = vector.load %arg6[%c0_114, %122, %c0_115, %c0_116] : memref<1x26x26x16xbf16, #tpu.memory_space<vmem>>, vector<1x1x26x16xbf16>
      %124 = vector.shape_cast %123 : vector<1x1x26x16xbf16> to vector<26x16xbf16>
      %125 = vector.shape_cast %121 : vector<26x16xbf16> to vector<1x1x26x16xbf16>
      tpu.vector_store %arg6[%c0_114, %122, %c0_115, %c0_116], %125 {strides = array<i32>} : memref<1x26x26x16xbf16, #tpu.memory_space<vmem>>, vector<1x1x26x16xbf16>,
    }
    %c26_i32_1 = arith.constant 26 : i32
    return
  }
  func.func @transform_0(%arg0: i32) -> (i32, i32, i32, i32) {
    %c0_i32 = arith.constant 0 : i32
    %c0_i32_0 = arith.constant 0 : i32
    %c0_i32_1 = arith.constant 0 : i32
    %c0_i32_2 = arith.constant 0 : i32
    return %arg0, %c0_i32, %c0_i32_0, %c0_i32_1 : i32, i32, i32, i32
  }
  func.func @transform_1(%arg0: i32) -> (i32, i32, i32, i32) {
    %c0_i32 = arith.constant 0 : i32
    %c0_i32_0 = arith.constant 0 : i32
    %c0_i32_1 = arith.constant 0 : i32
    %c0_i32_2 = arith.constant 0 : i32
    return %arg0, %c0_i32, %c0_i32_0, %c0_i32_1 : i32, i32, i32, i32
  }
  func.func @transform_2(%arg0: i32) -> (i32, i32, i32, i32) {
    %c0_i32 = arith.constant 0 : i32
    %c0_i32_0 = arith.constant 0 : i32
    %c0_i32_1 = arith.constant 0 : i32
    %c0_i32_2 = arith.constant 0 : i32
    %c0_i32_3 = arith.constant 0 : i32
    return %c0_i32, %c0_i32_0, %c0_i32_1, %c0_i32_2 : i32, i32, i32, i32
  }
  func.func @transform_3(%arg0: i32) -> (i32, i32, i32, i32) {
    %c0_i32 = arith.constant 0 : i32
    %c0_i32_0 = arith.constant 0 : i32
    %c0_i32_1 = arith.constant 0 : i32
    %c0_i32_2 = arith.constant 0 : i32
    %c0_i32_3 = arith.constant 0 : i32
    return %c0_i32, %c0_i32_0, %c0_i32_1, %c0_i32_2 : i32, i32, i32, i32
  }
  func.func @transform_4(%arg0: i32) -> (i32, i32) {
    %c0_i32 = arith.constant 0 : i32
    %c0_i32_0 = arith.constant 0 : i32
    %c0_i32_1 = arith.constant 0 : i32
    return %c0_i32, %c0_i32_0 : i32, i32
  }
  func.func @transform_5(%arg0: i32) -> (i32, i32, i32, i32) {
    %c0_i32 = arith.constant 0 : i32
    %c0_i32_0 = arith.constant 0 : i32
    %c0_i32_1 = arith.constant 0 : i32
    %c0_i32_2 = arith.constant 0 : i32
    return %arg0, %c0_i32, %c0_i32_0, %c0_i32_1 : i32, i32, i32, i32
  }
}

module attributes {stable_mosaic.version = 11 : i64} {
  func.func @_matmul_bias_kernel(%arg0: i32, %arg1: memref<1x576x16xbf16, #tpu.memory_space<vmem>>, %arg2: memref<16x1xbf16, #tpu.memory_space<vmem>>, %arg3: memref<1x1xf32, #tpu.memory_space<vmem>>, %arg4: memref<1x576x1xf32, #tpu.memory_space<vmem>>) attributes {dimension_semantics = [#tpu.dimension_semantics<parallel>], iteration_bounds = array<i64: 2>, scalar_prefetch = 0 : i64, scratch_operands = 0 : i64, tpu.core_type = #tpu.core_type<tc>, window_params = [{transform_indices = @transform_0, window_bounds = array<i64: 1, 576, 16>}, {pipeline_mode = #tpu.pipeline_mode<synchronous>, transform_indices = @transform_1, window_bounds = array<i64: 16, 1>}, {pipeline_mode = #tpu.pipeline_mode<synchronous>, transform_indices = @transform_2, window_bounds = array<i64: 1, 1>}, {transform_indices = @transform_3, window_bounds = array<i64: 1, 576, 1>}]} {
    %c0 = arith.constant 0 : index
    %c0_0 = arith.constant 0 : index
    %c0_1 = arith.constant 0 : index
    %0 = vector.load %arg1[%c0, %c0_0, %c0_1] : memref<1x576x16xbf16, #tpu.memory_space<vmem>>, vector<1x576x16xbf16>
    %1 = vector.shape_cast %0 : vector<1x576x16xbf16> to vector<576x16xbf16>
    %c0_2 = arith.constant 0 : index
    %c0_3 = arith.constant 0 : index
    %2 = vector.load %arg2[%c0_2, %c0_3] : memref<16x1xbf16, #tpu.memory_space<vmem>>, vector<16x1xbf16>
    %cst = arith.constant dense<0.000000e+00> : vector<576x1xf32>
    %3 = tpu.matmul %1, %2, %cst {dimension_numbers = #tpu.dot_dimension_numbers<[1], [0], [0], [1], [0, 0, 1, 1], [], []>} : vector<576x16xbf16>, vector<16x1xbf16>, vector<576x1xf32> -> vector<576x1xf32>
    %c0_4 = arith.constant 0 : index
    %c0_5 = arith.constant 0 : index
    %4 = vector.load %arg3[%c0_4, %c0_5] : memref<1x1xf32, #tpu.memory_space<vmem>>, vector<1x1xf32>
    %5 = vector.broadcast %4 : vector<1x1xf32> to vector<576x1xf32>
    %6 = arith.addf %3, %5 : vector<576x1xf32>
    %c0_6 = arith.constant 0 : index
    %c0_7 = arith.constant 0 : index
    %c0_8 = arith.constant 0 : index
    %7 = vector.load %arg4[%c0_6, %c0_7, %c0_8] : memref<1x576x1xf32, #tpu.memory_space<vmem>>, vector<1x576x1xf32>
    %8 = vector.shape_cast %7 : vector<1x576x1xf32> to vector<576x1xf32>
    %9 = vector.shape_cast %6 : vector<576x1xf32> to vector<1x576x1xf32>
    tpu.vector_store %arg4[%c0_6, %c0_7, %c0_8], %9 {strides = array<i32>} : memref<1x576x1xf32, #tpu.memory_space<vmem>>, vector<1x576x1xf32>,
    return
  }
  func.func @transform_0(%arg0: i32) -> (i32, i32, i32) {
    %c0_i32 = arith.constant 0 : i32
    %c0_i32_0 = arith.constant 0 : i32
    %c0_i32_1 = arith.constant 0 : i32
    return %arg0, %c0_i32, %c0_i32_0 : i32, i32, i32
  }
  func.func @transform_1(%arg0: i32) -> (i32, i32) {
    %c0_i32 = arith.constant 0 : i32
    %c0_i32_0 = arith.constant 0 : i32
    %c0_i32_1 = arith.constant 0 : i32
    return %c0_i32, %c0_i32_0 : i32, i32
  }
  func.func @transform_2(%arg0: i32) -> (i32, i32) {
    %c0_i32 = arith.constant 0 : i32
    %c0_i32_0 = arith.constant 0 : i32
    %c0_i32_1 = arith.constant 0 : i32
    return %c0_i32, %c0_i32_0 : i32, i32
  }
  func.func @transform_3(%arg0: i32) -> (i32, i32, i32) {
    %c0_i32 = arith.constant 0 : i32
    %c0_i32_0 = arith.constant 0 : i32
    %c0_i32_1 = arith.constant 0 : i32
    return %arg0, %c0_i32, %c0_i32_0 : i32, i32, i32
  }
}

</mosaic_0001>

<bundles_post_ra>
// kernel: unet_forward.15
= control target key start
LH: loop header
LB: loop body
LE: loop exit
PB: predicated region body
PF: predicated region fallthrough
CT: control target
= control target key end

     0   :  { %s1687_s12 = smov 0   ;;  %s1917_s0 = inlined_call_operand.vmem [shape: bf16[2,64,64,3], index: 0, kind: input, shape index: {}]   ;;  %s1918_s1 = inlined_call_operand.vmem [shape: bf16[3,3,3,16], index: 1, kind: input, shape index: {}]   ;;  %s1919_s2 = inlined_call_operand.vmem [shape: f32[1,16], index: 2, kind: input, shape index: {}]   ;;  %s1920_s3 = inlined_call_operand.vmem [shape: bf16[2,62,62,16], index: 3, kind: output, shape index: {}]  }
   0x1 LB: > { %s1312_s13 = sadd.s32 4294967295, %s1660_s12   ;;  %p1316_p0 = scmp.ge.s32.totalorder %s1660_s12, 1  ;;  %s1660_s12 = sphi %s1687_s12, %s13_s12  }
   0x2   : > { %p137_p1 = scmp.lt.s32.totalorder %s1660_s12, 3 }
   0x4   : > { %p138_p2 = pnand %p1316_p0, %p137_p1 }
   0x5   : > { %p161_p3 = scmp.lt.s32.totalorder (!%p138_p2), %s1312_s13, 1  ;;  %v1698_v0 = vld [vmem:[%s1919_s2] ss:$0 sm:$0xff] (!%p138_p2)  ;;  %s1710_s24 = smov (!%p138_p2), 0  }
   0x6   : > { %141 = sbr.rel (%p138_p2) target bundleno = 322 (0x142), region = 32 }
   0xd   : > { %s1922_s13 = smov (!%p161_p3, %s1312_s13), 1 }
   0xe   : > { %s1408_s16 = sshll.u32 %s1922_s13, 11  ;;  %s1620_s17 = smul.u32 1984, %s1922_s13 }
   0xf   : > { %s1703_s20 = scalar_lea.vmem %s1917_s0, %s1408_s16 }
  0x10   : > { %s1708_s23 = scalar_lea.vmem %s1920_s3, %s1620_s17 }
  0x11 LB: >> { %v1322_v1 = vld [vmem:[%s1918_s1 + $0x2] sm:$0x3]  ;;  %vm258_vm0 = vcmask 1040384   ;;  %vm259_vm1 = vcmask 1041408   ;;  %v1666_v2 = vmov 65535   ;;  %s1409_s29 = sshll.u32 %s1664_s24, 5  ;;  %s1664_s24 = sphi %s1710_s24, %s178_s24  }
  0x12   : >> { %v260_v3 = vsel %vm258_vm0, 4294967295, %v1666_v2  ;;  %v1358_v4 = vld [vmem:[%s1918_s1 + $0x8] sm:$0x3]  ;;  %v190_v6 = vld [vmem:[%s1918_s1] sm:$0x3]  ;;  %s1737_s7 = scalar_lea.vmem %s1703_s20, %s1409_s29  ;;  %vm245_vm3 = vcmask 23552   ;;  %s1889_s19 = scalar_lea.vmem %s1708_s23, %s1409_s29 }
  0x13   : >> { %v1721_v5 = vsel %vm259_vm1, %v260_v3, 0  ;;  %v1363_v7 = vld [vmem:[%s1918_s1 + $0xa] sm:$0x3]  ;;  %v1743_v12 = vld [vmem:[%s1737_s7] sm:$0xff]   ;;  %vm213_vm2 = vsmask.f32 7424 }
  0x14   : >> { %v263_v8 = vand.u32 %v1322_v1, %v1721_v5  ;;  %v1732_v9 = vand.u32 %v1358_v4, %v1721_v5  ;;  %v339_v10 = vand.u32 %v1721_v5, %v190_v6  ;;  %v765_v11 = vand.u32 %v1363_v7, %v1721_v5  ;;  %v1746_v13 = vld [vmem:[%s1737_s7 + $0x8] sm:$0xff]   ;;  %v1754_v18 = vld [vmem:[%s1737_s7 + $0x20] sm:$0xff]   ;;  %v1760_v22 = vld [vmem:[%s1737_s7 + $0x10] sm:$0xff]   ;;  %s178_s24 = sadd.s32 1, %s1664_s24  }
  0x15   : >> { %v215_v14 = vshrl.u32 %v1743_v12, 16  ;;  %v217_v15 = vshll.u32 %v1743_v12, 16  ;;  %v222_v16 = vshll.u32 %v1746_v13, 16  ;;  %v226_v17 = vshrl.u32 %v1746_v13, 16  ;;  %v1757_v19 = vld [vmem:[%s1737_s7 + $0x28] sm:$0xff]   ;;  %v1763_v23 = vld [vmem:[%s1737_s7 + $0x30] sm:$0xff]  }
  0x16   : >> { %1464 = vmatprep.subr.bf16.mxu1 %v263_v8  ;;  %1504 = vmatprep.subr.bf16.mxu0 %v1732_v9  ;;  %vm408_vm4 = vcmask 1046528   ;;  %v1335_v24 = vld [vmem:[%s1918_s1 + $0x4] sm:$0x3]  ;;  %v628_v25 = vshrl.u32 %v1754_v18, 16  ;;  %v630_v26 = vshll.u32 %v1754_v18, 16  ;;  %v634_v27 = vshll.u32 %v1757_v19, 16 }
  0x17   : >> { %1465 = vmatpush3.bf16.msra.mxu1 %v263_v8  ;;  %1505 = vmatpush3.bf16.msra.mxu0 %v1732_v9  ;;  %v219_v20 = vrot.slane %v217_v15, 1  ;;  %v224_v21 = vrot.slane %v222_v16, 1  ;;  %v638_v28 = vshrl.u32 %v1757_v19, 16  ;;  %v1377_v29 = vld [vmem:[%s1918_s1 + $0xc] sm:$0x3]  ;;  %v230_v32 = vshll.u32 %v1760_v22, 16 }
  0x18   : >> { %1474 = vmatprep.subr.bf16.mxu1 %v339_v10  ;;  %1514 = vmatprep.subr.bf16.mxu0 %v765_v11  ;;  %v641_v33 = vshll.u32 %v1763_v23, 16  ;;  %v632_v34 = vrot.slane %v630_v26, 1  ;;  %v636_v35 = vrot.slane %v634_v27, 1  ;;  %v1778_v36 = vld [vmem:[%s1737_s7 + $0x18] sm:$0xff]   ;;  %v234_v37 = vshrl.u32 %v1760_v22, 16  ;;  %v1646_v6 = vld [vmem:[%s1737_s7 + $0x40] sm:$0xff]  }
  0x19   : >> { %v220_v30 = vor.u32 %v219_v20, %v215_v14  ;;  %v228_v31 = vor.u32 %v226_v17, %v224_v21  ;;  %v232_v39 = vrot.slane %v230_v32, 1  ;;  %v745_v41 = vrot.slane %v1754_v18, 1  ;;  %v1803_v57 = vld [vmem:[%s1737_s7 + $0x38] sm:$0xff]   ;;  %v1386_v60 = vld [vmem:[%s1918_s1 + $0xe] sm:$0x3]  ;;  %v1648_v14 = vld [vmem:[%s1737_s7 + $0x50] sm:$0xff]  }
  0x1a   : >> { %v1782_v40 = vrot.slane %v641_v33, 1  ;;  %v633_v42 = vor.u32 %v632_v34, %v628_v25  ;;  %v640_v43 = vor.u32 %v638_v28, %v636_v35  ;;  %v238_v44 = vshll.u32 %v1778_v36, 16  ;;  %v1349_v62 = vld [vmem:[%s1918_s1 + $0x6] sm:$0x3]  ;;  %v1649_v26 = vld [vmem:[%s1737_s7 + $0x58] sm:$0xff]   ;;  %p175_p4 = scmp.ge.s32.totalorder %s178_s24, 62  }
  0x1b   : >> { %v225_v38 = vsel %vm213_vm2, %v220_v30, %v224_v21  ;;  %v429_v45 = vand.u32 %v1335_v24, %v1721_v5  ;;  %v233_v46 = vsel %vm213_vm2, %v228_v31, %v232_v39  ;;  %v236_v47 = vor.u32 %v234_v37, %v232_v39 }
  0x1c   : >> { %1466 = vmatprep.mubr.msk.bf16.mxu1 %vm245_vm3, %v225_v38  ;;  %v746_v48 = vrot.slane %v1757_v19, 1  ;;  %v887_v49 = vand.u32 %v1377_v29, %v1721_v5  ;;  %v637_v50 = vsel %vm213_vm2, %v633_v42, %v636_v35  ;;  %v644_v51 = vsel %vm213_vm2, %v640_v43, %v1782_v40 }
  0x1d   : >> { %1467 = vmatmul.mubr.msk.bf16.vlgmr.msra.gmra.mrb[0].mxu1 %vm245_vm3, %v233_v46  ;;  %v240_v52 = vrot.slane %v238_v44, 1  ;;  %v242_v53 = vshrl.u32 %v1778_v36, 16  ;;  %1506 = vmatprep.mubr.msk.bf16.mxu0 %vm245_vm3, %v637_v50  ;;  %v748_v58 = vrot.slane %v1763_v23, 1  ;;  %v750_v59 = vrot.slane %v1803_v57, 1 }
  0x1e   : >> { %1475 = vmatpush3.bf16.msra.mxu1 %v339_v10  ;;  %v747_v54 = vsel %vm408_vm4, %v745_v41, %v746_v48  ;;  %1507 = vmatmul.mubr.msk.bf16.vlgmr.msra.gmra.mrb[0].mxu0 %vm245_vm3, %v644_v51  ;;  %v1004_v1 = vand.u32 %v1386_v60, %v1721_v5  ;;  %v551_v2 = vand.u32 %v1349_v62, %v1721_v5  ;;  %v409_v3 = vrot.slane %v1743_v12, 1 }
  0x1f   : >> { %v241_v55 = vsel %vm213_vm2, %v236_v47, %v240_v52  ;;  %1484 = vmatprep.subr.bf16.mxu1 %v429_v45  ;;  %1515 = vmatpush3.bf16.msra.mxu0 %v765_v11  ;;  %v244_v56 = vor.u32 %v242_v53, %v240_v52  ;;  %v749_v61 = vsel %vm408_vm4, %v746_v48, %v748_v58  ;;  %v410_v4 = vrot.slane %v1746_v13, 1  ;;  %v1391_v11 = vld [vmem:[%s1918_s1 + $0x10] sm:$0x3] }
  0x20   : >> { %1470 = vmatprep.mubr.msk.bf16.mxu1 %vm245_vm3, %v241_v55  ;;  %1516 = vmatprep.mubr.msk.bf16.mxu0 %vm245_vm3, %v747_v54  ;;  %v751_v63 = vsel %vm408_vm4, %v748_v58, %v750_v59  ;;  %v966_v8 = vshll.u32 %v1646_v6, 16  ;;  %v412_v10 = vrot.slane %v1760_v22, 1  ;;  %v964_v15 = vshrl.u32 %v1646_v6, 16 }
  0x21   : >> { %1524 = vmatprep.subr.bf16.mxu0 %v887_v49  ;;  %v411_v7 = vsel %vm408_vm4, %v409_v3, %v410_v4  ;;  %v1101_v20 = vand.u32 %v1391_v11, %v1721_v5  ;;  %v977_v27 = vshll.u32 %v1648_v14, 16  ;;  %v981_v29 = vshrl.u32 %v1648_v14, 16 }
  0x22   : >> { %v968_v16 = vrot.slane %v966_v8, 1  ;;  %v413_v21 = vsel %vm408_vm4, %v410_v4, %v412_v10  ;;  %v984_v30 = vshll.u32 %v1649_v26, 16  ;;  %v988_v37 = vshrl.u32 %v1649_v26, 16 }
  0x23   : >> { %v979_v31 = vrot.slane %v977_v27, 1  ;;  %v645_v38 = vshrl.u32 %v1763_v23, 16  ;;  %v648_v39 = vshll.u32 %v1803_v57, 16  ;;  %v1081_v41 = vrot.slane %v1646_v6, 1 }
  0x24   : >> { %v969_v24 = vor.u32 %v968_v16, %v964_v15  ;;  %v986_v34 = vrot.slane %v984_v30, 1  ;;  %vm1232_vm5 = vcmask 125952   ;;  %vm1240_vm6 = vcmask 124928  }
  0x25   : >> { %1471 = vmatmul.mubr.msk.bf16.gmra.mrb[4].mxu1 %vm245_vm3, %v244_v56  ;;  %v983_v33 = vor.u32 %v981_v29, %v979_v31  ;;  %v647_v43 = vor.u32 %v645_v38, %v1782_v40  ;;  %v650_v44 = vrot.slane %v648_v39, 1  ;;  %v652_v40 = vshrl.u32 %v1803_v57, 16 }
  0x26   : >> { %1476 = vmatprep.mubr.msk.bf16.mxu1 %vm245_vm3, %v1743_v12  ;;  %v1647_v12 = vld [vmem:[%s1737_s7 + $0x48] sm:$0xff]  }
  0x27   : >> { %v970_v17 = vshll.u32 %v1647_v12, 16  ;;  %v974_v5 = vshrl.u32 %v1647_v12, 16  ;;  %v1082_v42 = vrot.slane %v1647_v12, 1  ;;  %v651_v46 = vsel %vm213_vm2, %v647_v43, %v650_v44 }
  0x28   : >> { %v654_v48 = vor.u32 %v652_v40, %v650_v44 }
  0x29   : >> { %v972_v25 = vrot.slane %v970_v17, 1 }
  0x2a   : >> { %1517 = vmatmul.mubr.msk.bf16.vlgmr.msra.gmra.mrb[0].mxu0 %vm245_vm3, %v749_v61 }
  0x2b   : >> { %1525 = vmatpush3.bf16.msra.mxu0 %v887_v49  ;;  %1520 = vmatprep.mubr.msk.bf16.mxu0 %vm245_vm3, %v751_v63  ;;  %v973_v28 = vsel %vm213_vm2, %v969_v24, %v972_v25  ;;  %v976_v32 = vor.u32 %v974_v5, %v972_v25 }
  0x2c   : >> { %1534 = vmatprep.subr.bf16.mxu0 %v1004_v1 }
  0x2d   : >> { %1477 = vmatmul.mubr.msk.bf16.vlgmr.msra.gmra.mrb[0].mxu1 %vm245_vm3, %v1746_v13  ;;  %v414_v13 = vrot.slane %v1778_v36, 1  ;;  %v980_v35 = vsel %vm213_vm2, %v976_v32, %v979_v31 }
  0x2e   : >> { %1485 = vmatpush3.bf16.msra.mxu1 %v429_v45  ;;  %1480 = vmatprep.mubr.msk.bf16.mxu1 %vm245_vm3, %v1760_v22  ;;  %v1083_v45 = vsel %vm408_vm4, %v1081_v41, %v1082_v42 }
  0x2f   : >> { %1494 = vmatprep.subr.bf16.mxu1 %v551_v2  ;;  %v415_v22 = vsel %vm408_vm4, %v412_v10, %v414_v13 }
  0x32   : >> { %1521 = vmatmul.mubr.msk.bf16.gmra.mrb[4].mxu0 %vm245_vm3, %v750_v59 }
  0x33   : >> { %1526 = vmatprep.mubr.msk.bf16.mxu0 %vm245_vm3, %v1646_v6 }
  0x35   : >> { %1481 = vmatmul.mubr.msk.bf16.gmra.mrb[4].mxu1 %vm245_vm3, %v1778_v36  ;;  %v987_v36 = vsel %vm213_vm2, %v983_v33, %v986_v34 }
  0x36   : >> { %1486 = vmatprep.mubr.msk.bf16.mxu1 %vm245_vm3, %v411_v7 }
  0x3a   : >> { %1527 = vmatmul.mubr.msk.bf16.vlgmr.msra.gmra.mrb[0].mxu0 %vm245_vm3, %v1647_v12 }
  0x3b   : >> { %1535 = vmatpush3.bf16.msra.mxu0 %v1004_v1  ;;  %1530 = vmatprep.mubr.msk.bf16.mxu0 %vm245_vm3, %v1648_v14 }
  0x3c   : >> { %1544 = vmatprep.subr.bf16.mxu0 %v1101_v20 }
  0x3d   : >> { %1487 = vmatmul.mubr.msk.bf16.vlgmr.msra.gmra.mrb[0].mxu1 %vm245_vm3, %v413_v21 }
  0x3e   : >> { %1495 = vmatpush3.bf16.msra.mxu1 %v551_v2  ;;  %1490 = vmatprep.mubr.msk.bf16.mxu1 %vm245_vm3, %v415_v22 }
  0x3f   : >> { %1554 = vmatprep.subr.bf16.mxu1 %v1732_v9 }
  0x42   : >> { %1531 = vmatmul.mubr.msk.bf16.gmra.mrb[4].mxu0 %vm245_vm3, %v1649_v26 }
  0x43   : >> { %1536 = vmatprep.mubr.msk.bf16.mxu0 %vm245_vm3, %v973_v28 }
  0x45   : >> { %1491 = vmatmul.mubr.msk.bf16.gmra.mrb[4].mxu1 %vm245_vm3, %v414_v13 }
  0x46   : >> { %1496 = vmatprep.mubr.msk.bf16.mxu1 %vm245_vm3, %v1754_v18  ;;  %v990_v18 = vor.u32 %v988_v37, %v986_v34 }
  0x4a   : >> { %1537 = vmatmul.mubr.msk.bf16.vlgmr.msra.gmra.mrb[0].mxu0 %vm245_vm3, %v980_v35 }
  0x4b   : >> { %1545 = vmatpush3.bf16.msra.mxu0 %v1101_v20  ;;  %1540 = vmatprep.mubr.msk.bf16.mxu0 %vm245_vm3, %v987_v36 }
  0x4d   : >> { %1497 = vmatmul.mubr.msk.bf16.vlgmr.msra.gmra.mrb[0].mxu1 %vm245_vm3, %v1757_v19  ;;  %v1084_v19 = vrot.slane %v1648_v14, 1 }
  0x4e   : >> { %1555 = vmatpush3.bf16.msra.mxu1 %v1732_v9  ;;  %1500 = vmatprep.mubr.msk.bf16.mxu1 %vm245_vm3, %v1763_v23  ;;  %v1086_v9 = vrot.slane %v1649_v26, 1 }
  0x4f   : >> { %v1085_v23 = vsel %vm408_vm4, %v1082_v42, %v1084_v19 }
  0x50   : >> { %v1087_v47 = vsel %vm408_vm4, %v1084_v19, %v1086_v9 }
  0x52   : >> { %1541 = vmatmul.mubr.msk.bf16.gmra.mrb[4].mxu0 %vm245_vm3, %v990_v18 }
  0x53   : >> { %1546 = vmatprep.mubr.msk.bf16.mxu0 %vm245_vm3, %v1083_v45 }
  0x55   : >> { %1501 = vmatmul.mubr.msk.bf16.gmra.mrb[4].mxu1 %vm245_vm3, %v1803_v57 }
  0x56   : >> { %1510 = vmatprep.mubr.msk.bf16.mxu1 %vm245_vm3, %v651_v46 }
  0x5a   : >> { %1547 = vmatmul.mubr.msk.bf16.vlgmr.msra.gmra.mrb[0].mxu0 %vm245_vm3, %v1085_v23 }
  0x5b   : >> { %1550 = vmatprep.mubr.msk.bf16.mxu0 %vm245_vm3, %v1087_v47 }
  0x61   : >> { %1511 = vmatmul.mubr.msk.bf16.vlgmr.msra.gmra.mrb[4].mxu1 %vm245_vm3, %v654_v48 }
  0x62   : >> { %1551 = vmatmul.mubr.msk.bf16.gmra.mrb[4].mxu0 %vm245_vm3, %v1086_v9 }
 0x120   : >> { %v1498_v49 = vpop.f32.mrb[0].mxu1 }
 0x121   : >> { %v587_v50 = vpop.f32.mrb[1].mxu1 }
 0x122   : >> { %v1499_v51 = vpop.f32.mrb[2].mxu1 }
 0x123   : >> { %v590_v52 = vpop.f32.mrb[3].mxu1 }
 0x12d   : >> { %v1548_v53 = vpop.f32.mrb[0].mxu0 }
 0x12e   : >> { %v1556_v54 = vadd.f32 %v1548_v53, %v1498_v49  ;;  %v1137_v55 = vpop.f32.mrb[1].mxu0 }
 0x12f   : >> { %v1557_v56 = vadd.f32 %v1137_v55, %v587_v50  ;;  %v1549_v57 = vpop.f32.mrb[2].mxu0 }
 0x130   : >> { %v1184_v58 = vadd.f32 %v1556_v54, %v1698_v0  ;;  %v1558_v59 = vadd.f32 %v1549_v57, %v1499_v51  ;;  %v1140_v60 = vpop.f32.mrb[3].mxu0 }
 0x131   : >> { %v1182_v61 = vadd.f32 %v1557_v56, %v1698_v0  ;;  %v1559_v62 = vadd.f32 %v1140_v60, %v590_v52 }
 0x132   : >> { %v1192_v63 = vmax.f32 %v1184_v58, 0.0  ;;  %v1185_v1 = vadd.f32 %v1558_v59, %v1698_v0 }
 0x133   : >> { %v1190_v2 = vmax.f32 %v1182_v61, 0.0  ;;  %v1183_v3 = vadd.f32 %v1559_v62, %v1698_v0 }
 0x134   : >> { %v1512_v4 = vpop.f32.mrb[4].mxu1  ;;  %v1412_v6 = vpack.c.bf16 %v1192_v63, %v1192_v63  ;;  %v1193_v7 = vmax.f32 %v1185_v1, 0.0 }
 0x135   : >> { %v720_v8 = vpop.f32.mrb[5].mxu1  ;;  %v1410_v10 = vpack.c.bf16 %v1190_v2, %v1190_v2  ;;  %v1191_v11 = vmax.f32 %v1183_v3, 0.0  ;;  %v1552_v12 = vpop.f32.mrb[4].mxu0 }
 0x136   : >> { %v1513_v13 = vpop.f32.mrb[6].mxu1  ;;  %1235 = vst.msk [vmem:[%s1889_s19 + $0x8] sm:$0xf] %vm1232_vm5, %v1412_v6  ;;  %v1413_v14 = vpack.c.bf16 %v1193_v7, %v1193_v7  ;;  %v1560_v15 = vadd.f32 %v1552_v12, %v1512_v4  ;;  %v1153_v16 = vpop.f32.mrb[5].mxu0 }
 0x137   : >> { %v723_v17 = vpop.f32.mrb[7].mxu1  ;;  %1233 = vst.msk [vmem:[%s1889_s19] sm:$0xf] %vm1232_vm5, %v1410_v10  ;;  %v1411_v20 = vpack.c.bf16 %v1191_v11, %v1191_v11  ;;  %v1561_v21 = vadd.f32 %v1153_v16, %v720_v8  ;;  %v1553_v22 = vpop.f32.mrb[6].mxu0 }
 0x138   : >> { %1236 = vst.msk [vmem:[%s1889_s19 + $0xc] sm:$0xf] %vm1232_vm5, %v1413_v14  ;;  %v1188_v24 = vadd.f32 %v1560_v15, %v1698_v0  ;;  %v1562_v25 = vadd.f32 %v1553_v22, %v1513_v13  ;;  %v1156_v26 = vpop.f32.mrb[7].mxu0 }
 0x139   : >> { %1234 = vst.msk [vmem:[%s1889_s19 + $0x4] sm:$0xf] %vm1232_vm5, %v1411_v20  ;;  %v1186_v27 = vadd.f32 %v1561_v21, %v1698_v0  ;;  %v1563_v5 = vadd.f32 %v1156_v26, %v723_v17 }
 0x13a   : >> { %v1196_v28 = vmax.f32 %v1188_v24, 0.0  ;;  %v1189_v29 = vadd.f32 %v1562_v25, %v1698_v0 }
 0x13b   : >> { %v1194_v30 = vmax.f32 %v1186_v27, 0.0  ;;  %v1187_v31 = vadd.f32 %v1563_v5, %v1698_v0  ;;  %177 = sbr.rel (!%p175_p4) target bundleno = 17 (0x11), region = 81 }
 0x13c   : >> { %v1416_v32 = vpack.c.bf16 %v1196_v28, %v1196_v28  ;;  %v1197_v33 = vmax.f32 %v1189_v29, 0.0 }
 0x13d   : >> { %v1414_v34 = vpack.c.bf16 %v1194_v30, %v1194_v30  ;;  %v1195_v35 = vmax.f32 %v1187_v31, 0.0 }
 0x13e   : >> { %1239 = vst.msk [vmem:[%s1889_s19 + $0x18] sm:$0xf] %vm1232_vm5, %v1416_v32  ;;  %v1417_v36 = vpack.c.bf16 %v1197_v33, %v1197_v33 }
 0x13f   : >> { %1237 = vst.msk [vmem:[%s1889_s19 + $0x10] sm:$0xf] %vm1232_vm5, %v1414_v34  ;;  %v1415_v37 = vpack.c.bf16 %v1195_v35, %v1195_v35 }
 0x140   : >> { %1241 = vst.msk [vmem:[%s1889_s19 + $0x1c] sm:$0x7] %vm1240_vm6, %v1417_v36 }
 0x141   : >> { %1238 = vst.msk [vmem:[%s1889_s19 + $0x14] sm:$0xf] %vm1232_vm5, %v1415_v37 }
 0x142 PF: > { %s13_s12 = sadd.s32 1, %s1660_s12  }
 0x143   : > { %p10_p5 = scmp.ge.s32.totalorder %s13_s12, 4  }
 0x145   :  { %12 = sbr.rel (!%p10_p5) target bundleno = 1 (0x1), region = 92 }

// kernel: unet_forward.16
= control target key start
LH: loop header
LB: loop body
LE: loop exit
PB: predicated region body
PF: predicated region fallthrough
CT: control target
= control target key end

     0   :  { %s1734_s12 = smov 0   ;;  %s1953_s0 = inlined_call_operand.vmem [shape: bf16[2,62,62,16], index: 0, kind: input, shape index: {}]   ;;  %s1954_s1 = inlined_call_operand.vmem [shape: bf16[3,3,16,16], index: 1, kind: input, shape index: {}]   ;;  %s1955_s2 = inlined_call_operand.vmem [shape: f32[1,16], index: 2, kind: input, shape index: {}]   ;;  %s1956_s3 = inlined_call_operand.vmem [shape: bf16[2,60,60,16], index: 3, kind: output, shape index: {}]  }
   0x1 LB: > { %s1336_s13 = sadd.s32 4294967295, %s1708_s12   ;;  %p1340_p0 = scmp.ge.s32.totalorder %s1708_s12, 1  ;;  %s1708_s12 = sphi %s1734_s12, %s13_s12  }
   0x2   : > { %p137_p1 = scmp.lt.s32.totalorder %s1708_s12, 3 }
   0x4   : > { %p138_p2 = pnand %p1340_p0, %p137_p1 }
   0x5   : > { %p161_p3 = scmp.lt.s32.totalorder (!%p138_p2), %s1336_s13, 1  ;;  %v1745_v0 = vld [vmem:[%s1955_s2] ss:$0 sm:$0xff] (!%p138_p2)  ;;  %s1757_s24 = smov (!%p138_p2), 0  }
   0x6   : > { %141 = sbr.rel (%p138_p2) target bundleno = 320 (0x140), region = 32 }
   0xd   : > { %s1958_s13 = smov (!%p161_p3, %s1336_s13), 1 }
   0xe   : > { %s1659_s16 = smul.u32 1984, %s1958_s13 }
   0xf   : > { %s1660_s17 = smul.u32 1920, %s1958_s13 }
  0x10   : > { %s1750_s20 = scalar_lea.vmem %s1953_s0, %s1659_s16 }
  0x11   : > { %s1755_s23 = scalar_lea.vmem %s1956_s3, %s1660_s17 }
  0x12 LB: >> { %v1677_v1 = vld [vmem:[%s1954_s1 + $0x8] sm:$0xff]   ;;  %v1768_v2 = vld [vmem:[%s1954_s1 + $0x20] sm:$0xff]   ;;  %s1448_s29 = sshll.u32 %s1712_s24, 5  ;;  %vm253_vm0 = vcmask 130048   ;;  %vm215_vm1 = vsmask.f32 7424  ;;  %s1712_s24 = sphi %s1757_s24, %s178_s24  }
  0x13   : >> { %1503 = vmatprep.subr.bf16.mxu1 %v1677_v1  ;;  %v1681_v3 = vld [vmem:[%s1954_s1] sm:$0xff]   ;;  %1543 = vmatprep.subr.bf16.mxu0 %v1768_v2  ;;  %s1778_s5 = scalar_lea.vmem %s1750_s20, %s1448_s29  ;;  %v1684_v12 = vld [vmem:[%s1954_s1 + $0x28] sm:$0xff]   ;;  %vm413_vm2 = vcmask 1046528   ;;  %v1688_v38 = vld [vmem:[%s1954_s1 + $0x30] sm:$0xff]   ;;  %s1923_s19 = scalar_lea.vmem %s1755_s23, %s1448_s29  ;;  %vm1256_vm3 = vcmask 125952   ;;  %vm1264_vm4 = vcmask 123904  }
  0x14   : >> { %1504 = vmatpush3.bf16.msra.mxu1 %v1677_v1  ;;  %1544 = vmatpush3.bf16.msra.mxu0 %v1768_v2  ;;  %v1782_v4 = vld [vmem:[%s1778_s5] sm:$0xff]   ;;  %v1785_v5 = vld [vmem:[%s1778_s5 + $0x8] sm:$0xff]   ;;  %v1805_v19 = vld [vmem:[%s1778_s5 + $0x10] sm:$0xff]   ;;  %s178_s24 = sadd.s32 1, %s1712_s24  }
  0x15   : >> { %1513 = vmatprep.subr.bf16.mxu1 %v1681_v3  ;;  %v217_v6 = vshrl.u32 %v1782_v4, 16  ;;  %v219_v7 = vshll.u32 %v1782_v4, 16  ;;  %v224_v8 = vshll.u32 %v1785_v5, 16  ;;  %v228_v9 = vshrl.u32 %v1785_v5, 16  ;;  %v1792_v10 = vld [vmem:[%s1778_s5 + $0x20] sm:$0xff]   ;;  %v1795_v11 = vld [vmem:[%s1778_s5 + $0x28] sm:$0xff]   ;;  %1553 = vmatprep.subr.bf16.mxu0 %v1684_v12 }
  0x16   : >> { %v641_v15 = vshrl.u32 %v1792_v10, 16  ;;  %v643_v16 = vshll.u32 %v1792_v10, 16  ;;  %v647_v17 = vshll.u32 %v1795_v11, 16  ;;  %v651_v18 = vshrl.u32 %v1795_v11, 16  ;;  %v1808_v20 = vld [vmem:[%s1778_s5 + $0x30] sm:$0xff]   ;;  %v1692_v53 = vld [vmem:[%s1954_s1 + $0x38] sm:$0xff]  }
  0x17   : >> { %v221_v13 = vrot.slane %v219_v7, 1  ;;  %v226_v14 = vrot.slane %v224_v8, 1  ;;  %v232_v25 = vshll.u32 %v1805_v19, 16  ;;  %v654_v26 = vshll.u32 %v1808_v20, 16  ;;  %v1814_v28 = vld [vmem:[%s1778_s5 + $0x18] sm:$0x7f]  }
  0x18   : >> { %v645_v23 = vrot.slane %v643_v16, 1  ;;  %v649_v24 = vrot.slane %v647_v17, 1  ;;  %v236_v29 = vshrl.u32 %v1805_v19, 16  ;;  %v762_v30 = vrot.slane %v1792_v10, 1  ;;  %v1689_v45 = vld [vmem:[%s1954_s1 + $0x10] sm:$0xff]   ;;  %v1694_v54 = vld [vmem:[%s1954_s1 + $0x18] sm:$0xff]  }
  0x19   : >> { %v222_v21 = vor.u32 %v221_v13, %v217_v6  ;;  %v230_v22 = vor.u32 %v228_v9, %v226_v14  ;;  %v763_v31 = vrot.slane %v1795_v11, 1  ;;  %v234_v34 = vrot.slane %v232_v25, 1  ;;  %v1842_v47 = vld [vmem:[%s1778_s5 + $0x38] sm:$0x7f]   ;;  %v1691_v55 = vld [vmem:[%s1778_s5 + $0x40] sm:$0xff]   ;;  %v1693_v60 = vld [vmem:[%s1778_s5 + $0x48] sm:$0xff]  }
  0x1a   : >> { %v646_v32 = vor.u32 %v645_v23, %v641_v15  ;;  %v653_v33 = vor.u32 %v651_v18, %v649_v24  ;;  %v1820_v35 = vrot.slane %v654_v26, 1  ;;  %v240_v36 = vshll.u32 %v1814_v28, 16  ;;  %v1695_v62 = vld [vmem:[%s1778_s5 + $0x50] sm:$0xff]   ;;  %p175_p4 = scmp.ge.s32.totalorder %s178_s24, 60  }
  0x1b   : >> { %v227_v27 = vsel %vm215_vm1, %v222_v21, %v226_v14  ;;  %v764_v37 = vsel %vm413_vm2, %v762_v30, %v763_v31  ;;  %v235_v40 = vsel %vm215_vm1, %v230_v22, %v234_v34  ;;  %v238_v42 = vor.u32 %v236_v29, %v234_v34 }
  0x1c   : >> { %1505 = vmatprep.mubr.msk.bf16.mxu1 %vm253_vm0, %v227_v27  ;;  %v650_v39 = vsel %vm215_vm1, %v646_v32, %v649_v24  ;;  %v657_v41 = vsel %vm215_vm1, %v653_v33, %v1820_v35  ;;  %v242_v43 = vrot.slane %v240_v36, 1  ;;  %v244_v44 = vshrl.u32 %v1814_v28, 16 }
  0x1d   : >> { %1545 = vmatprep.mubr.msk.bf16.mxu0 %vm253_vm0, %v650_v39  ;;  %1506 = vmatmul.mubr.msk.bf16.vlgmr.msra.gmra.mrb[0].mxu1 %vm253_vm0, %v235_v40  ;;  %v765_v49 = vrot.slane %v1808_v20, 1  ;;  %v767_v50 = vrot.slane %v1842_v47, 1  ;;  %v414_v56 = vrot.slane %v1782_v4, 1  ;;  %v415_v57 = vrot.slane %v1785_v5, 1 }
  0x1e   : >> { %1514 = vmatpush3.bf16.msra.mxu1 %v1681_v3  ;;  %1546 = vmatmul.mubr.msk.bf16.vlgmr.msra.gmra.mrb[0].mxu0 %vm253_vm0, %v657_v41  ;;  %v243_v46 = vsel %vm215_vm1, %v238_v42, %v242_v43  ;;  %v246_v48 = vor.u32 %v244_v44, %v242_v43  ;;  %v991_v59 = vshll.u32 %v1691_v55, 16  ;;  %v417_v61 = vrot.slane %v1805_v19, 1 }
  0x1f   : >> { %1554 = vmatpush3.bf16.msra.mxu0 %v1684_v12  ;;  %1555 = vmatprep.mubr.msk.bf16.mxu0 %vm253_vm0, %v764_v37  ;;  %v766_v51 = vsel %vm413_vm2, %v763_v31, %v765_v49  ;;  %v768_v52 = vsel %vm413_vm2, %v765_v49, %v767_v50  ;;  %v416_v58 = vsel %vm413_vm2, %v414_v56, %v415_v57  ;;  %v419_v63 = vrot.slane %v1814_v28, 1  ;;  %v1696_v12 = vld [vmem:[%s1778_s5 + $0x58] sm:$0x7f]  }
  0x20   : >> { %1509 = vmatprep.mubr.msk.bf16.mxu1 %vm253_vm0, %v243_v46  ;;  %1563 = vmatprep.subr.bf16.mxu0 %v1688_v38  ;;  %v989_v1 = vshrl.u32 %v1691_v55, 16  ;;  %v993_v3 = vrot.slane %v991_v59, 1  ;;  %v418_v6 = vsel %vm413_vm2, %v415_v57, %v417_v61  ;;  %v1002_v13 = vshll.u32 %v1695_v62, 16 }
  0x21   : >> { %1523 = vmatprep.subr.bf16.mxu1 %v1689_v45  ;;  %v420_v7 = vsel %vm413_vm2, %v417_v61, %v419_v63  ;;  %v999_v14 = vshrl.u32 %v1693_v60, 16  ;;  %v1006_v16 = vshrl.u32 %v1695_v62, 16  ;;  %v1009_v17 = vshll.u32 %v1696_v12, 16 }
  0x22   : >> { %v994_v8 = vor.u32 %v993_v3, %v989_v1  ;;  %v1004_v18 = vrot.slane %v1002_v13, 1  ;;  %v1013_v25 = vshrl.u32 %v1696_v12, 16  ;;  %v658_v26 = vshrl.u32 %v1808_v20, 16 }
  0x23   : >> { %v1011_v22 = vrot.slane %v1009_v17, 1  ;;  %v661_v27 = vshll.u32 %v1842_v47, 16  ;;  %v1111_v29 = vrot.slane %v1693_v60, 1  ;;  %v1113_v33 = vrot.slane %v1695_v62, 1 }
  0x24   : >> { %v1008_v21 = vor.u32 %v1006_v16, %v1004_v18  ;;  %v660_v30 = vor.u32 %v658_v26, %v1820_v35  ;;  %v1115_v36 = vrot.slane %v1696_v12, 1 }
  0x25   : >> { %1510 = vmatmul.mubr.msk.bf16.gmra.mrb[4].mxu1 %vm253_vm0, %v246_v48  ;;  %v663_v31 = vrot.slane %v661_v27, 1 }
  0x26   : >> { %1515 = vmatprep.mubr.msk.bf16.mxu1 %vm253_vm0, %v1782_v4  ;;  %v995_v4 = vshll.u32 %v1693_v60, 16  ;;  %v1012_v24 = vsel %vm215_vm1, %v1008_v21, %v1011_v22 }
  0x27   : >> { %v664_v34 = vsel %vm215_vm1, %v660_v30, %v663_v31 }
  0x28   : >> { %v997_v9 = vrot.slane %v995_v4, 1 }
  0x2a   : >> { %1556 = vmatmul.mubr.msk.bf16.vlgmr.msra.gmra.mrb[0].mxu0 %vm253_vm0, %v766_v51  ;;  %v998_v15 = vsel %vm215_vm1, %v994_v8, %v997_v9 }
  0x2b   : >> { %1564 = vmatpush3.bf16.msra.mxu0 %v1688_v38  ;;  %1559 = vmatprep.mubr.msk.bf16.mxu0 %vm253_vm0, %v768_v52 }
  0x2c   : >> { %1573 = vmatprep.subr.bf16.mxu0 %v1692_v53 }
  0x2d   : >> { %1516 = vmatmul.mubr.msk.bf16.vlgmr.msra.gmra.mrb[0].mxu1 %vm253_vm0, %v1785_v5  ;;  %v1697_v5 = vld [vmem:[%s1954_s1 + $0x40] sm:$0xff]  }
  0x2e   : >> { %1524 = vmatpush3.bf16.msra.mxu1 %v1689_v45  ;;  %1519 = vmatprep.mubr.msk.bf16.mxu1 %vm253_vm0, %v1805_v19  ;;  %v1001_v19 = vor.u32 %v999_v14, %v997_v9 }
  0x2f   : >> { %1533 = vmatprep.subr.bf16.mxu1 %v1694_v54 }
  0x30   : >> { %v1005_v23 = vsel %vm215_vm1, %v1001_v19, %v1004_v18 }
  0x32   : >> { %1560 = vmatmul.mubr.msk.bf16.gmra.mrb[4].mxu0 %vm253_vm0, %v767_v50 }
  0x33   : >> { %1565 = vmatprep.mubr.msk.bf16.mxu0 %vm253_vm0, %v1691_v55 }
  0x35   : >> { %1520 = vmatmul.mubr.msk.bf16.gmra.mrb[4].mxu1 %vm253_vm0, %v1814_v28  ;;  %v1110_v28 = vrot.slane %v1691_v55, 1 }
  0x36   : >> { %1525 = vmatprep.mubr.msk.bf16.mxu1 %vm253_vm0, %v416_v58 }
  0x37   : >> { %v1112_v32 = vsel %vm413_vm2, %v1110_v28, %v1111_v29 }
  0x3a   : >> { %1566 = vmatmul.mubr.msk.bf16.vlgmr.msra.gmra.mrb[0].mxu0 %vm253_vm0, %v1693_v60 }
  0x3b   : >> { %1574 = vmatpush3.bf16.msra.mxu0 %v1692_v53  ;;  %1569 = vmatprep.mubr.msk.bf16.mxu0 %vm253_vm0, %v1695_v62 }
  0x3c   : >> { %1583 = vmatprep.subr.bf16.mxu0 %v1697_v5 }
  0x3d   : >> { %1526 = vmatmul.mubr.msk.bf16.vlgmr.msra.gmra.mrb[0].mxu1 %vm253_vm0, %v418_v6 }
  0x3e   : >> { %1534 = vmatpush3.bf16.msra.mxu1 %v1694_v54  ;;  %1529 = vmatprep.mubr.msk.bf16.mxu1 %vm253_vm0, %v420_v7 }
  0x3f   : >> { %1593 = vmatprep.subr.bf16.mxu1 %v1768_v2 }
  0x42   : >> { %1570 = vmatmul.mubr.msk.bf16.gmra.mrb[4].mxu0 %vm253_vm0, %v1696_v12 }
  0x43   : >> { %1575 = vmatprep.mubr.msk.bf16.mxu0 %vm253_vm0, %v998_v15 }
  0x45   : >> { %1530 = vmatmul.mubr.msk.bf16.gmra.mrb[4].mxu1 %vm253_vm0, %v419_v63 }
  0x46   : >> { %1535 = vmatprep.mubr.msk.bf16.mxu1 %vm253_vm0, %v1792_v10  ;;  %v1015_v10 = vor.u32 %v1013_v25, %v1011_v22 }
  0x4a   : >> { %1576 = vmatmul.mubr.msk.bf16.vlgmr.msra.gmra.mrb[0].mxu0 %vm253_vm0, %v1005_v23 }
  0x4b   : >> { %1584 = vmatpush3.bf16.msra.mxu0 %v1697_v5  ;;  %1579 = vmatprep.mubr.msk.bf16.mxu0 %vm253_vm0, %v1012_v24 }
  0x4d   : >> { %1536 = vmatmul.mubr.msk.bf16.vlgmr.msra.gmra.mrb[0].mxu1 %vm253_vm0, %v1795_v11  ;;  %v1116_v11 = vsel %vm413_vm2, %v1113_v33, %v1115_v36 }
  0x4e   : >> { %1594 = vmatpush3.bf16.msra.mxu1 %v1768_v2  ;;  %1539 = vmatprep.mubr.msk.bf16.mxu1 %vm253_vm0, %v1808_v20  ;;  %v1114_v2 = vsel %vm413_vm2, %v1111_v29, %v1113_v33  ;;  %v665_v20 = vshrl.u32 %v1842_v47, 16 }
  0x50   : >> { %v667_v35 = vor.u32 %v665_v20, %v663_v31 }
  0x52   : >> { %1580 = vmatmul.mubr.msk.bf16.gmra.mrb[4].mxu0 %vm253_vm0, %v1015_v10 }
  0x53   : >> { %1585 = vmatprep.mubr.msk.bf16.mxu0 %vm253_vm0, %v1112_v32 }
  0x55   : >> { %1540 = vmatmul.mubr.msk.bf16.gmra.mrb[4].mxu1 %vm253_vm0, %v1842_v47 }
  0x56   : >> { %1549 = vmatprep.mubr.msk.bf16.mxu1 %vm253_vm0, %v664_v34 }
  0x5a   : >> { %1586 = vmatmul.mubr.msk.bf16.vlgmr.msra.gmra.mrb[0].mxu0 %vm253_vm0, %v1114_v2 }
  0x5b   : >> { %1589 = vmatprep.mubr.msk.bf16.mxu0 %vm253_vm0, %v1116_v11 }
  0x61   : >> { %1550 = vmatmul.mubr.msk.bf16.vlgmr.msra.gmra.mrb[4].mxu1 %vm253_vm0, %v667_v35 }
  0x62   : >> { %1590 = vmatmul.mubr.msk.bf16.gmra.mrb[4].mxu0 %vm253_vm0, %v1115_v36 }
 0x120   : >> { %v1537_v37 = vpop.f32.mrb[0].mxu1 }
 0x121   : >> { %v599_v38 = vpop.f32.mrb[1].mxu1 }
 0x122   : >> { %v1538_v39 = vpop.f32.mrb[2].mxu1 }
 0x123   : >> { %v602_v40 = vpop.f32.mrb[3].mxu1 }
 0x12d   : >> { %v1587_v41 = vpop.f32.mrb[0].mxu0 }
 0x12e   : >> { %v1595_v42 = vadd.f32 %v1587_v41, %v1537_v37  ;;  %v1169_v43 = vpop.f32.mrb[1].mxu0 }
 0x12f   : >> { %v1596_v44 = vadd.f32 %v1169_v43, %v599_v38  ;;  %v1588_v45 = vpop.f32.mrb[2].mxu0 }
 0x130   : >> { %v1216_v46 = vadd.f32 %v1595_v42, %v1745_v0  ;;  %v1597_v47 = vadd.f32 %v1588_v45, %v1538_v39  ;;  %v1172_v48 = vpop.f32.mrb[3].mxu0 }
 0x131   : >> { %v1214_v49 = vadd.f32 %v1596_v44, %v1745_v0  ;;  %v1598_v50 = vadd.f32 %v1172_v48, %v602_v40 }
 0x132   : >> { %v1451_v51 = vpack.c.bf16 %v1216_v46, %v1216_v46  ;;  %v1217_v52 = vadd.f32 %v1597_v47, %v1745_v0 }
 0x133   : >> { %v1449_v53 = vpack.c.bf16 %v1214_v49, %v1214_v49  ;;  %v1215_v54 = vadd.f32 %v1598_v50, %v1745_v0 }
 0x134   : >> { %1259 = vst.msk [vmem:[%s1923_s19 + $0x8] sm:$0xf] %vm1256_vm3, %v1451_v51  ;;  %v1452_v55 = vpack.c.bf16 %v1217_v52, %v1217_v52  ;;  %v1551_v56 = vpop.f32.mrb[4].mxu1 }
 0x135   : >> { %1257 = vst.msk [vmem:[%s1923_s19] sm:$0xf] %vm1256_vm3, %v1449_v53  ;;  %v1450_v57 = vpack.c.bf16 %v1215_v54, %v1215_v54  ;;  %v1591_v58 = vpop.f32.mrb[4].mxu0  ;;  %v736_v59 = vpop.f32.mrb[5].mxu1 }
 0x136   : >> { %1260 = vst.msk [vmem:[%s1923_s19 + $0xc] sm:$0xf] %vm1256_vm3, %v1452_v55  ;;  %v1599_v60 = vadd.f32 %v1591_v58, %v1551_v56  ;;  %v1185_v61 = vpop.f32.mrb[5].mxu0  ;;  %v1552_v62 = vpop.f32.mrb[6].mxu1 }
 0x137   : >> { %1258 = vst.msk [vmem:[%s1923_s19 + $0x4] sm:$0xf] %vm1256_vm3, %v1450_v57  ;;  %v1600_v63 = vadd.f32 %v1185_v61, %v736_v59  ;;  %v1592_v1 = vpop.f32.mrb[6].mxu0  ;;  %v739_v3 = vpop.f32.mrb[7].mxu1 }
 0x138   : >> { %v1220_v4 = vadd.f32 %v1599_v60, %v1745_v0  ;;  %v1601_v5 = vadd.f32 %v1592_v1, %v1552_v62  ;;  %v1188_v6 = vpop.f32.mrb[7].mxu0 }
 0x139   : >> { %v1218_v7 = vadd.f32 %v1600_v63, %v1745_v0  ;;  %v1602_v8 = vadd.f32 %v1188_v6, %v739_v3  ;;  %177 = sbr.rel (!%p175_p4) target bundleno = 18 (0x12), region = 81 }
 0x13a   : >> { %v1455_v9 = vpack.c.bf16 %v1220_v4, %v1220_v4  ;;  %v1221_v12 = vadd.f32 %v1601_v5, %v1745_v0 }
 0x13b   : >> { %v1453_v13 = vpack.c.bf16 %v1218_v7, %v1218_v7  ;;  %v1219_v14 = vadd.f32 %v1602_v8, %v1745_v0 }
 0x13c   : >> { %1263 = vst.msk [vmem:[%s1923_s19 + $0x18] sm:$0xf] %vm1256_vm3, %v1455_v9  ;;  %v1456_v15 = vpack.c.bf16 %v1221_v12, %v1221_v12 }
 0x13d   : >> { %1261 = vst.msk [vmem:[%s1923_s19 + $0x10] sm:$0xf] %vm1256_vm3, %v1453_v13  ;;  %v1454_v16 = vpack.c.bf16 %v1219_v14, %v1219_v14 }
 0x13e   : >> { %1265 = vst.msk [vmem:[%s1923_s19 + $0x1c] sm:$0x3] %vm1264_vm4, %v1456_v15 }
 0x13f   : >> { %1262 = vst.msk [vmem:[%s1923_s19 + $0x14] sm:$0xf] %vm1256_vm3, %v1454_v16 }
 0x140 PF: > { %s13_s12 = sadd.s32 1, %s1708_s12  }
 0x141   : > { %p10_p5 = scmp.ge.s32.totalorder %s13_s12, 4  }
 0x143   :  { %12 = sbr.rel (!%p10_p5) target bundleno = 1 (0x1), region = 92 }

// kernel: unet_forward.18
= control target key start
LH: loop header
LB: loop body
LE: loop exit
PB: predicated region body
PF: predicated region fallthrough
CT: control target
= control target key end

     0   :  { %s1258_s12 = smov 0   ;;  %s1374_s0 = inlined_call_operand.vmem [shape: bf16[2,30,30,16], index: 0, kind: input, shape index: {}]   ;;  %s1375_s1 = inlined_call_operand.vmem [shape: bf16[3,3,16,32], index: 1, kind: input, shape index: {}]   ;;  %s1376_s2 = inlined_call_operand.vmem [shape: f32[1,32], index: 2, kind: input, shape index: {}]   ;;  %s1377_s3 = inlined_call_operand.vmem [shape: bf16[2,28,28,32], index: 3, kind: output, shape index: {}]  }
   0x1 LB: > { %s994_s13 = sadd.s32 4294967295, %s1232_s12   ;;  %p998_p0 = scmp.ge.s32.totalorder %s1232_s12, 1  ;;  %s1232_s12 = sphi %s1258_s12, %s13_s12  }
   0x2   : > { %p137_p1 = scmp.lt.s32.totalorder %s1232_s12, 3 }
   0x4   : > { %p138_p2 = pnand %p998_p0, %p137_p1 }
   0x5   : > { %p161_p3 = scmp.lt.s32.totalorder (!%p138_p2), %s994_s13, 1  ;;  %v1269_v0 = vld [vmem:[%s1376_s2] ss:$0 sm:$0xff] (!%p138_p2)  ;;  %s1281_s24 = smov (!%p138_p2), 0  }
   0x6   : > { %141 = sbr.rel (%p138_p2) target bundleno = 303 (0x12f), region = 32 }
   0xd   : > { %s1379_s13 = smov (!%p161_p3, %s994_s13), 1 }
   0xe   : > { %s1189_s16 = smul.u32 480, %s1379_s13 }
   0xf   : > { %s1190_s17 = smul.u32 448, %s1379_s13 }
  0x10   : > { %s1274_s20 = scalar_lea.vmem %s1374_s0, %s1189_s16 }
  0x11   : > { %s1279_s23 = scalar_lea.vmem %s1377_s3, %s1190_s17 }
  0x12 LB: >> { %v1207_v1 = vld [vmem:[%s1375_s1 + $0x20] sm:$0xff]   ;;  %v1208_v2 = vld [vmem:[%s1375_s1 + $0x8] sm:$0xff]   ;;  %s1070_s29 = sshll.u32 %s1236_s24, 4  ;;  %vm223_vm0 = vcmask 130048   ;;  %vm201_vm1 = vsmask.f32 7424  ;;  %s1236_s24 = sphi %s1281_s24, %s178_s24  }
  0x13   : >> { %1127 = vmatprep.subr.bf16.mxu0 %v1207_v1  ;;  %v1213_v3 = vld [vmem:[%s1375_s1 + $0x28] sm:$0xff]   ;;  %1103 = vmatprep.subr.bf16.mxu1 %v1208_v2  ;;  %s1299_s5 = scalar_lea.vmem %s1274_s20, %s1070_s29  ;;  %v1214_v12 = vld [vmem:[%s1375_s1] sm:$0xff]   ;;  %vm341_vm2 = vcmask 1046528   ;;  %v1216_v26 = vld [vmem:[%s1375_s1 + $0x10] sm:$0xff]   ;;  %s917_s19 = scalar_lea.vmem %s1279_s23, %s1070_s29  ;;  %vm918_vm3 = vcmask 257024   ;;  %vm922_vm4 = vcmask 254976  }
  0x14   : >> { %1128 = vmatpush3.bf16.msra.mxu0 %v1207_v1  ;;  %1104 = vmatpush3.bf16.msra.mxu1 %v1208_v2  ;;  %v1209_v4 = vld [vmem:[%s1299_s5] sm:$0xff]   ;;  %v1303_v5 = vld [vmem:[%s1299_s5 + $0x8] sm:$0x7f]   ;;  %v1211_v10 = vld [vmem:[%s1299_s5 + $0x10] sm:$0xff]   ;;  %s178_s24 = sadd.s32 1, %s1236_s24  }
  0x15   : >> { %1133 = vmatprep.subr.bf16.mxu0 %v1213_v3  ;;  %v203_v6 = vshrl.u32 %v1209_v4, 16  ;;  %v205_v7 = vshll.u32 %v1209_v4, 16  ;;  %v210_v8 = vshll.u32 %v1303_v5, 16  ;;  %v214_v9 = vshrl.u32 %v1303_v5, 16  ;;  %v1309_v11 = vld [vmem:[%s1299_s5 + $0x18] sm:$0x7f]   ;;  %1109 = vmatprep.subr.bf16.mxu1 %v1214_v12 }
  0x16   : >> { %v499_v15 = vshrl.u32 %v1211_v10, 16  ;;  %v501_v16 = vshll.u32 %v1211_v10, 16  ;;  %v505_v17 = vshll.u32 %v1309_v11, 16  ;;  %v509_v18 = vshrl.u32 %v1309_v11, 16  ;;  %v1215_v31 = vld [vmem:[%s1375_s1 + $0x30] sm:$0xff]   ;;  %v1220_v35 = vld [vmem:[%s1375_s1 + $0x18] sm:$0xff]  }
  0x17   : >> { %v207_v13 = vrot.slane %v205_v7, 1  ;;  %v212_v14 = vrot.slane %v210_v8, 1  ;;  %v580_v21 = vrot.slane %v1211_v10, 1  ;;  %v581_v22 = vrot.slane %v1309_v11, 1  ;;  %v1217_v36 = vld [vmem:[%s1299_s5 + $0x20] sm:$0xff]   ;;  %v1218_v37 = vld [vmem:[%s1375_s1 + $0x38] sm:$0xff]  }
  0x18   : >> { %v503_v23 = vrot.slane %v501_v16, 1  ;;  %v507_v24 = vrot.slane %v505_v17, 1  ;;  %v342_v32 = vrot.slane %v1209_v4, 1  ;;  %v343_v33 = vrot.slane %v1303_v5, 1  ;;  %v1219_v39 = vld [vmem:[%s1299_s5 + $0x28] sm:$0x7f]  }
  0x19   : >> { %v208_v19 = vor.u32 %v207_v13, %v203_v6  ;;  %v216_v20 = vor.u32 %v214_v9, %v212_v14  ;;  %v582_v30 = vsel %vm341_vm2, %v580_v21, %v581_v22  ;;  %v739_v38 = vshll.u32 %v1217_v36, 16  ;;  %v1221_v46 = vld [vmem:[%s1375_s1 + $0x40] sm:$0xff]   ;;  %p175_p4 = scmp.ge.s32.totalorder %s178_s24, 28  }
  0x1a   : >> { %v504_v27 = vor.u32 %v503_v23, %v499_v15  ;;  %v511_v28 = vor.u32 %v509_v18, %v507_v24  ;;  %v344_v34 = vsel %vm341_vm2, %v342_v32, %v343_v33  ;;  %v737_v40 = vshrl.u32 %v1217_v36, 16 }
  0x1b   : >> { %v213_v25 = vsel %vm201_vm1, %v208_v19, %v212_v14  ;;  %v741_v41 = vrot.slane %v739_v38, 1  ;;  %v743_v42 = vshll.u32 %v1219_v39, 16  ;;  %v747_v47 = vshrl.u32 %v1219_v39, 16 }
  0x1c   : >> { %1105 = vmatprep.mubr.msk.bf16.mxu1 %vm223_vm0, %v213_v25  ;;  %v508_v29 = vsel %vm201_vm1, %v504_v27, %v507_v24  ;;  %v818_v48 = vrot.slane %v1217_v36, 1  ;;  %v819_v49 = vrot.slane %v1219_v39, 1 }
  0x1d   : >> { %1106 = vmatmul.mubr.msk.bf16.vlgmr.msra.gmra.mrb[0].mxu1 %vm223_vm0, %v216_v20  ;;  %1129 = vmatprep.mubr.msk.bf16.mxu0 %vm223_vm0, %v508_v29  ;;  %v742_v43 = vor.u32 %v741_v41, %v737_v40  ;;  %v745_v44 = vrot.slane %v743_v42, 1 }
  0x1e   : >> { %1110 = vmatpush3.bf16.msra.mxu1 %v1214_v12  ;;  %1111 = vmatprep.mubr.msk.bf16.mxu1 %vm223_vm0, %v1209_v4  ;;  %v820_v51 = vsel %vm341_vm2, %v818_v48, %v819_v49 }
  0x1f   : >> { %1115 = vmatprep.subr.bf16.mxu1 %v1216_v26  ;;  %1130 = vmatmul.mubr.msk.bf16.vlgmr.msra.gmra.mrb[0].mxu0 %vm223_vm0, %v511_v28  ;;  %v746_v45 = vsel %vm201_vm1, %v742_v43, %v745_v44  ;;  %v749_v50 = vor.u32 %v747_v47, %v745_v44 }
  0x20   : >> { %1134 = vmatpush3.bf16.msra.mxu0 %v1213_v3  ;;  %1135 = vmatprep.mubr.msk.bf16.mxu0 %vm223_vm0, %v582_v30 }
  0x21   : >> { %1139 = vmatprep.subr.bf16.mxu0 %v1215_v31 }
  0x29   : >> { %1112 = vmatmul.mubr.msk.bf16.vlgmr.msra.gmra.mrb[0].mxu1 %vm223_vm0, %v1303_v5 }
  0x2a   : >> { %1116 = vmatpush3.bf16.msra.mxu1 %v1216_v26  ;;  %1117 = vmatprep.mubr.msk.bf16.mxu1 %vm223_vm0, %v344_v34 }
  0x2b   : >> { %1121 = vmatprep.subr.bf16.mxu1 %v1220_v35  ;;  %1136 = vmatmul.mubr.msk.bf16.vlgmr.msra.gmra.mrb[0].mxu0 %vm223_vm0, %v581_v22 }
  0x2c   : >> { %1140 = vmatpush3.bf16.msra.mxu0 %v1215_v31  ;;  %1141 = vmatprep.mubr.msk.bf16.mxu0 %vm223_vm0, %v1217_v36 }
  0x2d   : >> { %1145 = vmatprep.subr.bf16.mxu0 %v1218_v37 }
  0x35   : >> { %1118 = vmatmul.mubr.msk.bf16.vlgmr.msra.gmra.mrb[0].mxu1 %vm223_vm0, %v343_v33 }
  0x36   : >> { %1122 = vmatpush3.bf16.msra.mxu1 %v1220_v35  ;;  %1123 = vmatprep.mubr.msk.bf16.mxu1 %vm223_vm0, %v1211_v10 }
  0x37   : >> { %1142 = vmatmul.mubr.msk.bf16.vlgmr.msra.gmra.mrb[0].mxu0 %vm223_vm0, %v1219_v39 }
  0x38   : >> { %1146 = vmatpush3.bf16.msra.mxu0 %v1218_v37  ;;  %1147 = vmatprep.mubr.msk.bf16.mxu0 %vm223_vm0, %v746_v45 }
  0x39   : >> { %1151 = vmatprep.subr.bf16.mxu0 %v1221_v46 }
  0x41   : >> { %1124 = vmatmul.mubr.msk.bf16.vlgmr.msra.gmra.mrb[0].mxu1 %vm223_vm0, %v1309_v11 }
  0x43   : >> { %1148 = vmatmul.mubr.msk.bf16.vlgmr.msra.gmra.mrb[0].mxu0 %vm223_vm0, %v749_v50 }
  0x44   : >> { %1152 = vmatpush3.bf16.msra.mxu0 %v1221_v46  ;;  %1153 = vmatprep.mubr.msk.bf16.mxu0 %vm223_vm0, %v820_v51 }
  0x4f   : >> { %1154 = vmatmul.mubr.msk.bf16.vlgmr.msra.gmra.mrb[0].mxu0 %vm223_vm0, %v819_v49 }
 0x114   : >> { %v1125_v52 = vpop.f32.mrb[0].mxu1 }
 0x115   : >> { %v477_v53 = vpop.f32.mrb[1].mxu1 }
 0x116   : >> { %v1126_v54 = vpop.f32.mrb[2].mxu1 }
 0x117   : >> { %v480_v55 = vpop.f32.mrb[3].mxu1 }
 0x122   : >> { %v1155_v56 = vpop.f32.mrb[0].mxu0 }
 0x123   : >> { %v1157_v57 = vadd.f32 %v1155_v56, %v1125_v52  ;;  %v867_v58 = vpop.f32.mrb[1].mxu0 }
 0x124   : >> { %v1158_v59 = vadd.f32 %v867_v58, %v477_v53  ;;  %v1156_v60 = vpop.f32.mrb[2].mxu0 }
 0x125   : >> { %v894_v61 = vadd.f32 %v1157_v57, %v1269_v0  ;;  %v1159_v62 = vadd.f32 %v1156_v60, %v1126_v54  ;;  %v870_v63 = vpop.f32.mrb[3].mxu0 }
 0x126   : >> { %v892_v1 = vadd.f32 %v1158_v59, %v1269_v0  ;;  %v1160_v2 = vadd.f32 %v870_v63, %v480_v55 }
 0x127   : >> { %v898_v3 = vmax.f32 %v894_v61, 0.0  ;;  %v895_v4 = vadd.f32 %v1159_v62, %v1269_v0 }
 0x128   : >> { %v896_v5 = vmax.f32 %v892_v1, 0.0  ;;  %v893_v6 = vadd.f32 %v1160_v2, %v1269_v0  ;;  %177 = sbr.rel (!%p175_p4) target bundleno = 18 (0x12), region = 81 }
 0x129   : >> { %v1073_v7 = vpack.c.bf16 %v898_v3, %v898_v3  ;;  %v899_v8 = vmax.f32 %v895_v4, 0.0 }
 0x12a   : >> { %v1071_v9 = vpack.c.bf16 %v896_v5, %v896_v5  ;;  %v897_v10 = vmax.f32 %v893_v6, 0.0 }
 0x12b   : >> { %921 = vst.msk [vmem:[%s917_s19 + $0x8] sm:$0xf] %vm918_vm3, %v1073_v7  ;;  %v1074_v11 = vpack.c.bf16 %v899_v8, %v899_v8 }
 0x12c   : >> { %919 = vst.msk [vmem:[%s917_s19] sm:$0xf] %vm918_vm3, %v1071_v9  ;;  %v1072_v12 = vpack.c.bf16 %v897_v10, %v897_v10 }
 0x12d   : >> { %923 = vst.msk [vmem:[%s917_s19 + $0xc] sm:$0x3] %vm922_vm4, %v1074_v11 }
 0x12e   : >> { %920 = vst.msk [vmem:[%s917_s19 + $0x4] sm:$0xf] %vm918_vm3, %v1072_v12 }
 0x12f PF: > { %s13_s12 = sadd.s32 1, %s1232_s12  }
 0x130   : > { %p10_p5 = scmp.ge.s32.totalorder %s13_s12, 4  }
 0x132   :  { %12 = sbr.rel (!%p10_p5) target bundleno = 1 (0x1), region = 92 }

// kernel: unet_forward.17
= control target key start
LH: loop header
LB: loop body
LE: loop exit
PB: predicated region body
PF: predicated region fallthrough
CT: control target
= control target key end

     0   :  { %s1414_s6 = smov 0   ;;  %s2519_s0 = inlined_call_operand.vmem [shape: bf16[2,30,2,30,32], index: 0, kind: input, shape index: {}]   ;;  %s2520_s1 = inlined_call_operand.vmem [shape: bf16[2,30,30,16], index: 1, kind: output, shape index: {}]  }
   0x1 LB: > { %s1255_s7 = sadd.s32 4294967295, %s1401_s6   ;;  %p1259_p0 = scmp.ge.s32.totalorder %s1401_s6, 1  ;;  %s1401_s6 = sphi %s1414_s6, %s11_s6  }
   0x2   : > { %p87_p1 = scmp.lt.s32.totalorder %s1401_s6, 3 }
   0x4   : > { %p88_p2 = pnand %p1259_p0, %p87_p1 }
   0x6   : > { %91 = sbr.rel (%p88_p2) target bundleno = 377 (0x179), region = 24 }
   0xd   : > { %p107_p3 = scmp.lt.s32.totalorder %s1255_s7, 1  ;;  %s1403_s12 = smov 112   ;;  %vm1078_vm0 = vcmask 125952   ;;  %vm1082_vm1 = vcmask 124928  }
   0xf   : > { %s2567_s7 = smov (!%p107_p3, %s1255_s7), 1 }
  0x10   : > { %s1384_s8 = smul.u32 960, %s2567_s7 }
  0x11   : > { %s1385_s13 = smul.u32 480, %s2567_s7 }
  0x12   : > { %s1428_s11 = scalar_lea.vmem %s2519_s0, %s1384_s8 }
  0x13   : > { %v119_v0 = vld [vmem:[%s1428_s11 + $0x8] sm:$0xf]  ;;  %v1264_v1 = vld [vmem:[%s1428_s11 + $0x18] sm:$0xf]  ;;  %v117_v2 = vld [vmem:[%s1428_s11] sm:$0xf]  ;;  %s1792_s16 = scalar_lea.vmem %s2520_s1, %s1385_s13 }
  0x14   : > { %v1433_v3 = vmax.bf16 %v1264_v1, %v119_v0  ;;  %v1262_v4 = vld [vmem:[%s1428_s11 + $0x10] sm:$0xf]  ;;  %v120_v5 = vld [vmem:[%s1428_s11 + $0xc] sm:$0x7]  ;;  %v1265_v6 = vld [vmem:[%s1428_s11 + $0x1c] sm:$0x7] }
  0x15   : > { %v1438_v7 = vmax.bf16 %v1262_v4, %v117_v2  ;;  %v118_v8 = vld [vmem:[%s1428_s11 + $0x4] sm:$0xf]  ;;  %v1263_v9 = vld [vmem:[%s1428_s11 + $0x14] sm:$0xf]  ;;  %v1444_v10 = vmax.bf16 %v1265_v6, %v120_v5  ;;  %v121_v14 = vld [vmem:[%s1428_s11 + $0x20] sm:$0xf] }
  0x16   : > { %602 = vrot.lane.b32.xlu1 %v1433_v3, %s1403_s12  ;;  %v1448_v11 = vmax.bf16 %v1263_v9, %v118_v8  ;;  %v122_v12 = vld [vmem:[%s1428_s11 + $0x24] sm:$0xf]  ;;  %v1267_v13 = vld [vmem:[%s1428_s11 + $0x34] sm:$0xf]  ;;  %v1266_v15 = vld [vmem:[%s1428_s11 + $0x30] sm:$0xf] }
  0x17   : > { %598 = vrot.lane.b32.xlu0 %v1438_v7, %s1403_s12  ;;  %v1456_v16 = vmax.bf16 %v1267_v13, %v122_v12  ;;  %v1460_v17 = vmax.bf16 %v1266_v15, %v121_v14  ;;  %v124_v18 = vld [vmem:[%s1428_s11 + $0x2c] sm:$0x7]  ;;  %v1269_v19 = vld [vmem:[%s1428_s11 + $0x3c] sm:$0x7]  ;;  %v123_v20 = vld [vmem:[%s1428_s11 + $0x28] sm:$0xf] }
  0x18   : > { %v1268_v21 = vld [vmem:[%s1428_s11 + $0x38] sm:$0xf]  ;;  %v1468_v22 = vmax.bf16 %v1269_v19, %v124_v18  ;;  %v126_v24 = vld [vmem:[%s1428_s11 + $0x44] sm:$0xf]  ;;  %v1271_v25 = vld [vmem:[%s1428_s11 + $0x54] sm:$0xf] }
  0x19   : > { %v1472_v23 = vmax.bf16 %v1268_v21, %v123_v20  ;;  %v125_v26 = vld [vmem:[%s1428_s11 + $0x40] sm:$0xf]  ;;  %v1270_v27 = vld [vmem:[%s1428_s11 + $0x50] sm:$0xf]  ;;  %v1480_v28 = vmax.bf16 %v1271_v25, %v126_v24  ;;  %v128_v30 = vld [vmem:[%s1428_s11 + $0x4c] sm:$0x7] }
  0x1a   : > { %604 = vrot.lane.b32.xlu1 %v1444_v10, %s1403_s12  ;;  %v1484_v29 = vmax.bf16 %v1270_v27, %v125_v26  ;;  %v1273_v31 = vld [vmem:[%s1428_s11 + $0x5c] sm:$0x7]  ;;  %v127_v32 = vld [vmem:[%s1428_s11 + $0x48] sm:$0xf]  ;;  %v1272_v33 = vld [vmem:[%s1428_s11 + $0x58] sm:$0xf] }
  0x1b   : > { %600 = vrot.lane.b32.xlu0 %v1448_v11, %s1403_s12  ;;  %v1492_v34 = vmax.bf16 %v1273_v31, %v128_v30  ;;  %v1496_v35 = vmax.bf16 %v1272_v33, %v127_v32  ;;  %v130_v36 = vld [vmem:[%s1428_s11 + $0x64] sm:$0xf]  ;;  %v1275_v37 = vld [vmem:[%s1428_s11 + $0x74] sm:$0xf]  ;;  %v129_v38 = vld [vmem:[%s1428_s11 + $0x60] sm:$0xf] }
  0x1c   : > { %v1274_v39 = vld [vmem:[%s1428_s11 + $0x70] sm:$0xf]  ;;  %v1504_v40 = vmax.bf16 %v1275_v37, %v130_v36  ;;  %v132_v42 = vld [vmem:[%s1428_s11 + $0x6c] sm:$0x7]  ;;  %v1277_v43 = vld [vmem:[%s1428_s11 + $0x7c] sm:$0x7] }
  0x1d   : > { %v1508_v41 = vmax.bf16 %v1274_v39, %v129_v38  ;;  %v131_v44 = vld [vmem:[%s1428_s11 + $0x68] sm:$0xf]  ;;  %v1276_v45 = vld [vmem:[%s1428_s11 + $0x78] sm:$0xf]  ;;  %v1516_v46 = vmax.bf16 %v1277_v43, %v132_v42  ;;  %v134_v48 = vld [vmem:[%s1428_s11 + $0x84] sm:$0xf] }
  0x1e   : > { %608 = vrot.lane.b32.xlu1 %v1456_v16, %s1403_s12  ;;  %v1520_v47 = vmax.bf16 %v1276_v45, %v131_v44  ;;  %v1279_v49 = vld [vmem:[%s1428_s11 + $0x94] sm:$0xf]  ;;  %v133_v50 = vld [vmem:[%s1428_s11 + $0x80] sm:$0xf]  ;;  %v1278_v51 = vld [vmem:[%s1428_s11 + $0x90] sm:$0xf] }
  0x1f   : > { %606 = vrot.lane.b32.xlu0 %v1460_v17, %s1403_s12  ;;  %v1528_v52 = vmax.bf16 %v1279_v49, %v134_v48  ;;  %v1532_v53 = vmax.bf16 %v1278_v51, %v133_v50  ;;  %v136_v54 = vld [vmem:[%s1428_s11 + $0x8c] sm:$0x7]  ;;  %v1281_v55 = vld [vmem:[%s1428_s11 + $0x9c] sm:$0x7]  ;;  %v135_v56 = vld [vmem:[%s1428_s11 + $0x88] sm:$0xf] }
  0x20   : > { %v1280_v57 = vld [vmem:[%s1428_s11 + $0x98] sm:$0xf]  ;;  %v1540_v58 = vmax.bf16 %v1281_v55, %v136_v54  ;;  %v138_v60 = vld [vmem:[%s1428_s11 + $0xa4] sm:$0xf]  ;;  %v1283_v61 = vld [vmem:[%s1428_s11 + $0xb4] sm:$0xf] }
  0x21   : > { %v1544_v59 = vmax.bf16 %v1280_v57, %v135_v56  ;;  %v137_v62 = vld [vmem:[%s1428_s11 + $0xa0] sm:$0xf]  ;;  %v1282_v63 = vld [vmem:[%s1428_s11 + $0xb0] sm:$0xf]  ;;  %v1552_v0 = vmax.bf16 %v1283_v61, %v138_v60  ;;  %v140_v2 = vld [vmem:[%s1428_s11 + $0xac] sm:$0x7] }
  0x22   : > { %612 = vrot.lane.b32.xlu1 %v1468_v22, %s1403_s12  ;;  %v1556_v1 = vmax.bf16 %v1282_v63, %v137_v62  ;;  %v1285_v4 = vld [vmem:[%s1428_s11 + $0xbc] sm:$0x7]  ;;  %v139_v5 = vld [vmem:[%s1428_s11 + $0xa8] sm:$0xf]  ;;  %v1284_v6 = vld [vmem:[%s1428_s11 + $0xb8] sm:$0xf] }
  0x23   : > { %610 = vrot.lane.b32.xlu0 %v1472_v23, %s1403_s12  ;;  %v1564_v8 = vmax.bf16 %v1285_v4, %v140_v2  ;;  %v1568_v9 = vmax.bf16 %v1284_v6, %v139_v5  ;;  %v142_v12 = vld [vmem:[%s1428_s11 + $0xc4] sm:$0xf]  ;;  %v1287_v13 = vld [vmem:[%s1428_s11 + $0xd4] sm:$0xf]  ;;  %v141_v14 = vld [vmem:[%s1428_s11 + $0xc0] sm:$0xf] }
  0x24   : > { %v1286_v15 = vld [vmem:[%s1428_s11 + $0xd0] sm:$0xf]  ;;  %v1576_v18 = vmax.bf16 %v1287_v13, %v142_v12  ;;  %v144_v20 = vld [vmem:[%s1428_s11 + $0xcc] sm:$0x7]  ;;  %v1289_v21 = vld [vmem:[%s1428_s11 + $0xdc] sm:$0x7] }
  0x25   : > { %v1580_v19 = vmax.bf16 %v1286_v15, %v141_v14  ;;  %v143_v24 = vld [vmem:[%s1428_s11 + $0xc8] sm:$0xf]  ;;  %v1288_v25 = vld [vmem:[%s1428_s11 + $0xd8] sm:$0xf]  ;;  %v1588_v26 = vmax.bf16 %v1289_v21, %v144_v20  ;;  %v146_v30 = vld [vmem:[%s1428_s11 + $0xe4] sm:$0xf] }
  0x26   : > { %616 = vrot.lane.b32.xlu1 %v1480_v28, %s1403_s12  ;;  %v1592_v27 = vmax.bf16 %v1288_v25, %v143_v24  ;;  %v1291_v31 = vld [vmem:[%s1428_s11 + $0xf4] sm:$0xf]  ;;  %v145_v32 = vld [vmem:[%s1428_s11 + $0xe0] sm:$0xf]  ;;  %v1290_v33 = vld [vmem:[%s1428_s11 + $0xf0] sm:$0xf] }
  0x27   : > { %614 = vrot.lane.b32.xlu0 %v1484_v29, %s1403_s12  ;;  %v1600_v36 = vmax.bf16 %v1291_v31, %v146_v30  ;;  %v1604_v37 = vmax.bf16 %v1290_v33, %v145_v32  ;;  %v148_v38 = vld [vmem:[%s1428_s11 + $0xec] sm:$0x7]  ;;  %v1293_v39 = vld [vmem:[%s1428_s11 + $0xfc] sm:$0x7]  ;;  %v147_v42 = vld [vmem:[%s1428_s11 + $0xe8] sm:$0xf] }
  0x28   : > { %v1292_v43 = vld [vmem:[%s1428_s11 + $0xf8] sm:$0xf]  ;;  %v1612_v44 = vmax.bf16 %v1293_v39, %v148_v38  ;;  %v150_v48 = vld [vmem:[%s1428_s11 + $0x104] sm:$0xf]  ;;  %v1295_v49 = vld [vmem:[%s1428_s11 + $0x114] sm:$0xf] }
  0x29   : > { %v1616_v45 = vmax.bf16 %v1292_v43, %v147_v42  ;;  %v149_v50 = vld [vmem:[%s1428_s11 + $0x100] sm:$0xf]  ;;  %v1294_v51 = vld [vmem:[%s1428_s11 + $0x110] sm:$0xf]  ;;  %v1624_v54 = vmax.bf16 %v1295_v49, %v150_v48  ;;  %v152_v56 = vld [vmem:[%s1428_s11 + $0x10c] sm:$0x7] }
  0x2a   : > { %620 = vrot.lane.b32.xlu1 %v1492_v34, %s1403_s12  ;;  %v1628_v55 = vmax.bf16 %v1294_v51, %v149_v50  ;;  %v1297_v57 = vld [vmem:[%s1428_s11 + $0x11c] sm:$0x7]  ;;  %v151_v60 = vld [vmem:[%s1428_s11 + $0x108] sm:$0xf]  ;;  %v1296_v61 = vld [vmem:[%s1428_s11 + $0x118] sm:$0xf] }
  0x2b   : > { %618 = vrot.lane.b32.xlu0 %v1496_v35, %s1403_s12  ;;  %v1636_v62 = vmax.bf16 %v1297_v57, %v152_v56  ;;  %v1640_v63 = vmax.bf16 %v1296_v61, %v151_v60  ;;  %v154_v2 = vld [vmem:[%s1428_s11 + $0x124] sm:$0xf]  ;;  %v1299_v4 = vld [vmem:[%s1428_s11 + $0x134] sm:$0xf]  ;;  %v153_v5 = vld [vmem:[%s1428_s11 + $0x120] sm:$0xf] }
  0x2c   : > { %v1298_v6 = vld [vmem:[%s1428_s11 + $0x130] sm:$0xf]  ;;  %v1648_v12 = vmax.bf16 %v1299_v4, %v154_v2  ;;  %v156_v14 = vld [vmem:[%s1428_s11 + $0x12c] sm:$0x7]  ;;  %v1301_v15 = vld [vmem:[%s1428_s11 + $0x13c] sm:$0x7] }
  0x2d   : > { %v1652_v13 = vmax.bf16 %v1298_v6, %v153_v5  ;;  %v155_v20 = vld [vmem:[%s1428_s11 + $0x128] sm:$0xf]  ;;  %v1300_v21 = vld [vmem:[%s1428_s11 + $0x138] sm:$0xf]  ;;  %v1660_v24 = vmax.bf16 %v1301_v15, %v156_v14  ;;  %v158_v30 = vld [vmem:[%s1428_s11 + $0x144] sm:$0xf] }
  0x2e   : > { %624 = vrot.lane.b32.xlu1 %v1504_v40, %s1403_s12  ;;  %v1664_v25 = vmax.bf16 %v1300_v21, %v155_v20  ;;  %v1303_v31 = vld [vmem:[%s1428_s11 + $0x154] sm:$0xf]  ;;  %v157_v32 = vld [vmem:[%s1428_s11 + $0x140] sm:$0xf]  ;;  %v1302_v33 = vld [vmem:[%s1428_s11 + $0x150] sm:$0xf] }
  0x2f   : > { %622 = vrot.lane.b32.xlu0 %v1508_v41, %s1403_s12  ;;  %v1672_v38 = vmax.bf16 %v1303_v31, %v158_v30  ;;  %v1676_v39 = vmax.bf16 %v1302_v33, %v157_v32  ;;  %v160_v42 = vld [vmem:[%s1428_s11 + $0x14c] sm:$0x7]  ;;  %v1305_v43 = vld [vmem:[%s1428_s11 + $0x15c] sm:$0x7]  ;;  %v159_v48 = vld [vmem:[%s1428_s11 + $0x148] sm:$0xf] }
  0x30   : > { %v1304_v49 = vld [vmem:[%s1428_s11 + $0x158] sm:$0xf]  ;;  %v1684_v50 = vmax.bf16 %v1305_v43, %v160_v42  ;;  %v162_v56 = vld [vmem:[%s1428_s11 + $0x164] sm:$0xf]  ;;  %v1307_v57 = vld [vmem:[%s1428_s11 + $0x174] sm:$0xf] }
  0x31   : > { %v1688_v51 = vmax.bf16 %v1304_v49, %v159_v48  ;;  %v161_v60 = vld [vmem:[%s1428_s11 + $0x160] sm:$0xf]  ;;  %v1306_v61 = vld [vmem:[%s1428_s11 + $0x170] sm:$0xf]  ;;  %v1696_v2 = vmax.bf16 %v1307_v57, %v162_v56  ;;  %v164_v5 = vld [vmem:[%s1428_s11 + $0x16c] sm:$0x7] }
  0x32   : > { %628 = vrot.lane.b32.xlu1 %v1516_v46, %s1403_s12  ;;  %v1700_v4 = vmax.bf16 %v1306_v61, %v161_v60  ;;  %v1309_v6 = vld [vmem:[%s1428_s11 + $0x17c] sm:$0x7]  ;;  %v163_v14 = vld [vmem:[%s1428_s11 + $0x168] sm:$0xf]  ;;  %v1308_v15 = vld [vmem:[%s1428_s11 + $0x178] sm:$0xf] }
  0x33   : > { %626 = vrot.lane.b32.xlu0 %v1520_v47, %s1403_s12  ;;  %v1708_v20 = vmax.bf16 %v1309_v6, %v164_v5  ;;  %v1712_v21 = vmax.bf16 %v1308_v15, %v163_v14  ;;  %v166_v30 = vld [vmem:[%s1428_s11 + $0x184] sm:$0xf]  ;;  %v1311_v31 = vld [vmem:[%s1428_s11 + $0x194] sm:$0xf]  ;;  %v165_v32 = vld [vmem:[%s1428_s11 + $0x180] sm:$0xf] }
  0x34   : > { %v1310_v33 = vld [vmem:[%s1428_s11 + $0x190] sm:$0xf]  ;;  %v1720_v42 = vmax.bf16 %v1311_v31, %v166_v30  ;;  %v168_v48 = vld [vmem:[%s1428_s11 + $0x18c] sm:$0x7]  ;;  %v1313_v49 = vld [vmem:[%s1428_s11 + $0x19c] sm:$0x7] }
  0x35   : > { %v1724_v43 = vmax.bf16 %v1310_v33, %v165_v32  ;;  %v167_v56 = vld [vmem:[%s1428_s11 + $0x188] sm:$0xf]  ;;  %v1312_v57 = vld [vmem:[%s1428_s11 + $0x198] sm:$0xf]  ;;  %v1732_v60 = vmax.bf16 %v1313_v49, %v168_v48  ;;  %v170_v5 = vld [vmem:[%s1428_s11 + $0x1a4] sm:$0xf] }
  0x36   : > { %632 = vrot.lane.b32.xlu1 %v1528_v52, %s1403_s12  ;;  %v1736_v61 = vmax.bf16 %v1312_v57, %v167_v56  ;;  %v1315_v6 = vld [vmem:[%s1428_s11 + $0x1b4] sm:$0xf]  ;;  %v169_v14 = vld [vmem:[%s1428_s11 + $0x1a0] sm:$0xf]  ;;  %v1314_v15 = vld [vmem:[%s1428_s11 + $0x1b0] sm:$0xf] }
  0x37   : > { %630 = vrot.lane.b32.xlu0 %v1532_v53, %s1403_s12  ;;  %v1744_v30 = vmax.bf16 %v1315_v6, %v170_v5  ;;  %v1748_v31 = vmax.bf16 %v1314_v15, %v169_v14  ;;  %v172_v32 = vld [vmem:[%s1428_s11 + $0x1ac] sm:$0x7]  ;;  %v1317_v33 = vld [vmem:[%s1428_s11 + $0x1bc] sm:$0x7]  ;;  %v171_v48 = vld [vmem:[%s1428_s11 + $0x1a8] sm:$0xf] }
  0x38   : > { %2536 = vst [vmem:[#allocation2_spill] sm:$0xff] %v1736_v61  ;;  %v1316_v49 = vld [vmem:[%s1428_s11 + $0x1b8] sm:$0xf]  ;;  %v1756_v56 = vmax.bf16 %v1317_v33, %v172_v32  ;;  %v174_v5 = vld [vmem:[%s1428_s11 + $0x1c4] sm:$0xf] }
  0x39   : > { %2537 = vst [vmem:[#allocation3_spill] sm:$0xff] %v1744_v30  ;;  %2538 = vst [vmem:[#allocation4_spill] sm:$0xff] %v1748_v31  ;;  %v1760_v57 = vmax.bf16 %v1316_v49, %v171_v48  ;;  %v1319_v6 = vld [vmem:[%s1428_s11 + $0x1d4] sm:$0xf]  ;;  %v173_v14 = vld [vmem:[%s1428_s11 + $0x1c0] sm:$0xf] }
  0x3a   : > { %636 = vrot.lane.b32.xlu1 %v1540_v58, %s1403_s12  ;;  %2539 = vst [vmem:[#allocation5_spill] sm:$0xff] %v1756_v56  ;;  %v1318_v15 = vld [vmem:[%s1428_s11 + $0x1d0] sm:$0xf]  ;;  %v176_v33 = vld [vmem:[%s1428_s11 + $0x1cc] sm:$0x7] }
  0x3b   : > { %634 = vrot.lane.b32.xlu0 %v1544_v59, %s1403_s12  ;;  %2540 = vst [vmem:[#allocation6_spill] sm:$0xff] %v1760_v57  ;;  %v1772_v32 = vmax.bf16 %v1318_v15, %v173_v14  ;;  %v1321_v48 = vld [vmem:[%s1428_s11 + $0x1dc] sm:$0x7]  ;;  %v175_v49 = vld [vmem:[%s1428_s11 + $0x1c8] sm:$0xf] }
  0x3c   : > { %v1323_v14 = vld [vmem:[%s1428_s11 + $0x1f4] sm:$0xf] }
  0x3d   : > { %2542 = vst [vmem:[#allocation8_spill] sm:$0xff] %v1772_v32 }
  0x3e   : > { %640 = vrot.lane.b32.xlu1 %v1552_v0, %s1403_s12 }
  0x3f   : > { %638 = vrot.lane.b32.xlu0 %v1556_v1, %s1403_s12 }
  0x42   : > { %644 = vrot.lane.b32.xlu1 %v1564_v8, %s1403_s12 }
  0x43   : > { %642 = vrot.lane.b32.xlu0 %v1568_v9, %s1403_s12 }
  0x46   : > { %648 = vrot.lane.b32.xlu1 %v1576_v18, %s1403_s12 }
  0x47   : > { %646 = vrot.lane.b32.xlu0 %v1580_v19, %s1403_s12 }
  0x4a   : > { %652 = vrot.lane.b32.xlu1 %v1588_v26, %s1403_s12 }
  0x4b   : > { %650 = vrot.lane.b32.xlu0 %v1592_v27, %s1403_s12 }
  0x4e   : > { %656 = vrot.lane.b32.xlu1 %v1600_v36, %s1403_s12 }
  0x4f   : > { %654 = vrot.lane.b32.xlu0 %v1604_v37, %s1403_s12 }
  0x52   : > { %660 = vrot.lane.b32.xlu1 %v1612_v44, %s1403_s12 }
  0x53   : > { %658 = vrot.lane.b32.xlu0 %v1616_v45, %s1403_s12 }
  0x56   : > { %664 = vrot.lane.b32.xlu1 %v1624_v54, %s1403_s12 }
  0x57   : > { %662 = vrot.lane.b32.xlu0 %v1628_v55, %s1403_s12 }
  0x5a   : > { %668 = vrot.lane.b32.xlu1 %v1636_v62, %s1403_s12 }
  0x5b   : > { %666 = vrot.lane.b32.xlu0 %v1640_v63, %s1403_s12 }
  0x5e   : > { %672 = vrot.lane.b32.xlu1 %v1648_v12, %s1403_s12 }
  0x5f   : > { %670 = vrot.lane.b32.xlu0 %v1652_v13, %s1403_s12 }
  0x62   : > { %676 = vrot.lane.b32.xlu1 %v1660_v24, %s1403_s12 }
  0x63   : > { %674 = vrot.lane.b32.xlu0 %v1664_v25, %s1403_s12 }
  0x66   : > { %680 = vrot.lane.b32.xlu1 %v1672_v38, %s1403_s12 }
  0x67   : > { %678 = vrot.lane.b32.xlu0 %v1676_v39, %s1403_s12 }
  0x6a   : > { %684 = vrot.lane.b32.xlu1 %v1684_v50, %s1403_s12 }
  0x6b   : > { %682 = vrot.lane.b32.xlu0 %v1688_v51, %s1403_s12 }
  0x6e   : > { %688 = vrot.lane.b32.xlu1 %v1696_v2, %s1403_s12 }
  0x6f   : > { %686 = vrot.lane.b32.xlu0 %v1700_v4, %s1403_s12 }
  0x72   : > { %692 = vrot.lane.b32.xlu1 %v1708_v20, %s1403_s12 }
  0x73   : > { %690 = vrot.lane.b32.xlu0 %v1712_v21, %s1403_s12 }
  0x76   : > { %696 = vrot.lane.b32.xlu1 %v1720_v42, %s1403_s12 }
  0x77   : > { %694 = vrot.lane.b32.xlu0 %v1724_v43, %s1403_s12 }
  0x7a   : > { %700 = vrot.lane.b32.xlu1 %v1732_v60, %s1403_s12 }
  0x7b   : > { %698 = vrot.lane.b32.xlu0 %v1736_v61, %s1403_s12  ;;  %v1768_v61 = vmax.bf16 %v1319_v6, %v174_v5  ;;  %v178_v6 = vld [vmem:[%s1428_s11 + $0x1e4] sm:$0xf] }
  0x7d   : > { %2541 = vst [vmem:[#allocation7_spill] sm:$0xff] %v1768_v61 }
  0x7e   : > { %704 = vrot.lane.b32.xlu1 %v1744_v30, %s1403_s12  ;;  %v1781_v30 = vmax.bf16 %v1321_v48, %v176_v33  ;;  %v177_v33 = vld [vmem:[%s1428_s11 + $0x1e0] sm:$0xf]  ;;  %v1322_v48 = vld [vmem:[%s1428_s11 + $0x1f0] sm:$0xf] }
  0x7f   : > { %702 = vrot.lane.b32.xlu0 %v1748_v31, %s1403_s12  ;;  %v1320_v31 = vld [vmem:[%s1428_s11 + $0x1d8] sm:$0xf] }
  0x80   : > { %v1785_v5 = vmax.bf16 %v1320_v31, %v175_v49 }
  0x82   : > { %708 = vrot.lane.b32.xlu1 %v1756_v56, %s1403_s12  ;;  %v180_v56 = vld [vmem:[%s1428_s11 + $0x1ec] sm:$0x7] }
  0x83   : > { %706 = vrot.lane.b32.xlu0 %v1760_v57, %s1403_s12  ;;  %v1806_v57 = vmax.bf16 %v1322_v48, %v177_v33  ;;  %v182_v48 = vld [vmem:[%s1428_s11 + $0x204] sm:$0xf] }
  0x86   : > { %712 = vrot.lane.b32.xlu1 %v1768_v61, %s1403_s12  ;;  %v1800_v61 = vmax.bf16 %v1323_v14, %v178_v6  ;;  %v179_v6 = vld [vmem:[%s1428_s11 + $0x1e8] sm:$0xf]  ;;  %v1324_v14 = vld [vmem:[%s1428_s11 + $0x1f8] sm:$0xf] }
  0x87   : > { %710 = vrot.lane.b32.xlu0 %v1772_v32, %s1403_s12 }
  0x88   : > { %v603_v15 = vpop.permute.xlu1 %602 }
  0x89   : > { %v960_v31 = vmax.bf16 %v603_v15, %v1433_v3  ;;  %v599_v49 = vpop.permute.xlu0 %598  ;;  %v1325_v3 = vld [vmem:[%s1428_s11 + $0x1fc] sm:$0x7] }
  0x8a   : > { %v958_v32 = vmax.bf16 %v599_v49, %v1438_v7  ;;  %716 = vrot.lane.b32.xlu1 %v1781_v30, %s1403_s12  ;;  %v1818_v33 = vmax.bf16 %v1325_v3, %v180_v56  ;;  %v1326_v56 = vld [vmem:[%s1428_s11 + $0x210] sm:$0xf] }
  0x8b   : > { %1081 = vst.msk [vmem:[%s1792_s16 + $0x8] sm:$0xf] %vm1078_vm0, %v960_v31  ;;  %714 = vrot.lane.b32.xlu0 %v1785_v5, %s1403_s12 }
  0x8c   : > { %1079 = vst.msk [vmem:[%s1792_s16] sm:$0xf] %vm1078_vm0, %v958_v32  ;;  %v605_v7 = vpop.permute.xlu1 %604  ;;  %v1824_v32 = vmax.bf16 %v1324_v14, %v179_v6 }
  0x8d   : > { %v961_v15 = vmax.bf16 %v605_v7, %v1444_v10  ;;  %v601_v31 = vpop.permute.xlu0 %600  ;;  %v1327_v10 = vld [vmem:[%s1428_s11 + $0x214] sm:$0xf]  ;;  %v181_v7 = vld [vmem:[%s1428_s11 + $0x200] sm:$0xf] }
  0x8e   : > { %v959_v49 = vmax.bf16 %v601_v31, %v1448_v11  ;;  %720 = vrot.lane.b32.xlu1 %v1800_v61, %s1403_s12  ;;  %v1836_v6 = vmax.bf16 %v1327_v10, %v182_v48  ;;  %v1842_v14 = vmax.bf16 %v1326_v56, %v181_v7  ;;  %v1328_v48 = vld [vmem:[%s1428_s11 + $0x218] sm:$0xf] }
  0x8f   : > { %1083 = vst.msk [vmem:[%s1792_s16 + $0xc] sm:$0x7] %vm1082_vm1, %v961_v15  ;;  %718 = vrot.lane.b32.xlu0 %v1806_v57, %s1403_s12 }
  0x90   : > { %1080 = vst.msk [vmem:[%s1792_s16 + $0x4] sm:$0xf] %vm1078_vm0, %v959_v49  ;;  %v609_v11 = vpop.permute.xlu1 %608  ;;  %v184_v49 = vld [vmem:[%s1428_s11 + $0x20c] sm:$0x7] }
  0x91   : > { %v963_v3 = vmax.bf16 %v609_v11, %v1456_v16  ;;  %v607_v15 = vpop.permute.xlu0 %606  ;;  %v1329_v16 = vld [vmem:[%s1428_s11 + $0x21c] sm:$0x7]  ;;  %v183_v11 = vld [vmem:[%s1428_s11 + $0x208] sm:$0xf] }
  0x92   : > { %v962_v31 = vmax.bf16 %v607_v15, %v1460_v17  ;;  %724 = vrot.lane.b32.xlu1 %v1818_v33, %s1403_s12  ;;  %v1854_v7 = vmax.bf16 %v1329_v16, %v184_v49  ;;  %v1860_v56 = vmax.bf16 %v1328_v48, %v183_v11  ;;  %v1330_v49 = vld [vmem:[%s1428_s11 + $0x230] sm:$0xf] }
  0x93   : > { %1085 = vst.msk [vmem:[%s1792_s16 + $0x14] sm:$0xf] %vm1078_vm0, %v963_v3  ;;  %722 = vrot.lane.b32.xlu0 %v1824_v32, %s1403_s12 }
  0x94   : > { %1084 = vst.msk [vmem:[%s1792_s16 + $0x10] sm:$0xf] %vm1078_vm0, %v962_v31  ;;  %v613_v17 = vpop.permute.xlu1 %612  ;;  %v186_v31 = vld [vmem:[%s1428_s11 + $0x224] sm:$0xf] }
  0x95   : > { %v965_v10 = vmax.bf16 %v613_v17, %v1468_v22  ;;  %v611_v3 = vpop.permute.xlu0 %610  ;;  %v1331_v22 = vld [vmem:[%s1428_s11 + $0x234] sm:$0xf]  ;;  %v185_v17 = vld [vmem:[%s1428_s11 + $0x220] sm:$0xf] }
  0x96   : > { %v964_v15 = vmax.bf16 %v611_v3, %v1472_v23  ;;  %728 = vrot.lane.b32.xlu1 %v1836_v6, %s1403_s12  ;;  %v1872_v11 = vmax.bf16 %v1331_v22, %v186_v31  ;;  %v1878_v48 = vmax.bf16 %v1330_v49, %v185_v17  ;;  %v1332_v31 = vld [vmem:[%s1428_s11 + $0x238] sm:$0xf] }
  0x97   : > { %1087 = vst.msk [vmem:[%s1792_s16 + $0x1c] sm:$0x7] %vm1082_vm1, %v965_v10  ;;  %726 = vrot.lane.b32.xlu0 %v1842_v14, %s1403_s12 }
  0x98   : > { %1086 = vst.msk [vmem:[%s1792_s16 + $0x18] sm:$0xf] %vm1078_vm0, %v964_v15  ;;  %v617_v23 = vpop.permute.xlu1 %616  ;;  %v188_v15 = vld [vmem:[%s1428_s11 + $0x22c] sm:$0x7] }
  0x99   : > { %v967_v16 = vmax.bf16 %v617_v23, %v1480_v28  ;;  %v615_v10 = vpop.permute.xlu0 %614  ;;  %v1333_v28 = vld [vmem:[%s1428_s11 + $0x23c] sm:$0x7]  ;;  %v187_v23 = vld [vmem:[%s1428_s11 + $0x228] sm:$0xf] }
  0x9a   : > { %v966_v3 = vmax.bf16 %v615_v10, %v1484_v29  ;;  %732 = vrot.lane.b32.xlu1 %v1854_v7, %s1403_s12  ;;  %v1890_v17 = vmax.bf16 %v1333_v28, %v188_v15  ;;  %v1896_v49 = vmax.bf16 %v1332_v31, %v187_v23  ;;  %v1334_v15 = vld [vmem:[%s1428_s11 + $0x250] sm:$0xf] }
  0x9b   : > { %1089 = vst.msk [vmem:[%s1792_s16 + $0x24] sm:$0xf] %vm1078_vm0, %v967_v16  ;;  %730 = vrot.lane.b32.xlu0 %v1860_v56, %s1403_s12 }
  0x9c   : > { %1088 = vst.msk [vmem:[%s1792_s16 + $0x20] sm:$0xf] %vm1078_vm0, %v966_v3  ;;  %v621_v29 = vpop.permute.xlu1 %620  ;;  %v190_v3 = vld [vmem:[%s1428_s11 + $0x244] sm:$0xf] }
  0x9d   : > { %v969_v22 = vmax.bf16 %v621_v29, %v1492_v34  ;;  %v619_v16 = vpop.permute.xlu0 %618  ;;  %v1335_v34 = vld [vmem:[%s1428_s11 + $0x254] sm:$0xf]  ;;  %v189_v29 = vld [vmem:[%s1428_s11 + $0x240] sm:$0xf] }
  0x9e   : > { %v968_v10 = vmax.bf16 %v619_v16, %v1496_v35  ;;  %736 = vrot.lane.b32.xlu1 %v1872_v11, %s1403_s12  ;;  %v1908_v23 = vmax.bf16 %v1335_v34, %v190_v3  ;;  %v1914_v31 = vmax.bf16 %v1334_v15, %v189_v29  ;;  %v1336_v3 = vld [vmem:[%s1428_s11 + $0x258] sm:$0xf] }
  0x9f   : > { %1091 = vst.msk [vmem:[%s1792_s16 + $0x2c] sm:$0x7] %vm1082_vm1, %v969_v22  ;;  %734 = vrot.lane.b32.xlu0 %v1878_v48, %s1403_s12 }
  0xa0   : > { %1090 = vst.msk [vmem:[%s1792_s16 + $0x28] sm:$0xf] %vm1078_vm0, %v968_v10  ;;  %v625_v35 = vpop.permute.xlu1 %624  ;;  %v192_v10 = vld [vmem:[%s1428_s11 + $0x24c] sm:$0x7] }
  0xa1   : > { %v971_v28 = vmax.bf16 %v625_v35, %v1504_v40  ;;  %v623_v22 = vpop.permute.xlu0 %622  ;;  %v1337_v40 = vld [vmem:[%s1428_s11 + $0x25c] sm:$0x7]  ;;  %v191_v35 = vld [vmem:[%s1428_s11 + $0x248] sm:$0xf] }
  0xa2   : > { %v970_v16 = vmax.bf16 %v623_v22, %v1508_v41  ;;  %740 = vrot.lane.b32.xlu1 %v1890_v17, %s1403_s12  ;;  %v1926_v29 = vmax.bf16 %v1337_v40, %v192_v10  ;;  %v1932_v15 = vmax.bf16 %v1336_v3, %v191_v35  ;;  %v1338_v10 = vld [vmem:[%s1428_s11 + $0x270] sm:$0xf] }
  0xa3   : > { %1093 = vst.msk [vmem:[%s1792_s16 + $0x34] sm:$0xf] %vm1078_vm0, %v971_v28  ;;  %738 = vrot.lane.b32.xlu0 %v1896_v49, %s1403_s12 }
  0xa4   : > { %1092 = vst.msk [vmem:[%s1792_s16 + $0x30] sm:$0xf] %vm1078_vm0, %v970_v16  ;;  %v629_v41 = vpop.permute.xlu1 %628  ;;  %v194_v16 = vld [vmem:[%s1428_s11 + $0x264] sm:$0xf] }
  0xa5   : > { %v973_v34 = vmax.bf16 %v629_v41, %v1516_v46  ;;  %v627_v28 = vpop.permute.xlu0 %626  ;;  %v1339_v46 = vld [vmem:[%s1428_s11 + $0x274] sm:$0xf]  ;;  %v193_v41 = vld [vmem:[%s1428_s11 + $0x260] sm:$0xf] }
  0xa6   : > { %v972_v22 = vmax.bf16 %v627_v28, %v1520_v47  ;;  %744 = vrot.lane.b32.xlu1 %v1908_v23, %s1403_s12  ;;  %v1944_v35 = vmax.bf16 %v1339_v46, %v194_v16  ;;  %v1950_v3 = vmax.bf16 %v1338_v10, %v193_v41  ;;  %v1340_v16 = vld [vmem:[%s1428_s11 + $0x278] sm:$0xf] }
  0xa7   : > { %1095 = vst.msk [vmem:[%s1792_s16 + $0x3c] sm:$0x7] %vm1082_vm1, %v973_v34  ;;  %742 = vrot.lane.b32.xlu0 %v1914_v31, %s1403_s12 }
  0xa8   : > { %1094 = vst.msk [vmem:[%s1792_s16 + $0x38] sm:$0xf] %vm1078_vm0, %v972_v22  ;;  %v633_v47 = vpop.permute.xlu1 %632  ;;  %v196_v22 = vld [vmem:[%s1428_s11 + $0x26c] sm:$0x7] }
  0xa9   : > { %v975_v40 = vmax.bf16 %v633_v47, %v1528_v52  ;;  %v631_v34 = vpop.permute.xlu0 %630  ;;  %v1341_v52 = vld [vmem:[%s1428_s11 + $0x27c] sm:$0x7]  ;;  %v195_v47 = vld [vmem:[%s1428_s11 + $0x268] sm:$0xf] }
  0xaa   : > { %v974_v28 = vmax.bf16 %v631_v34, %v1532_v53  ;;  %748 = vrot.lane.b32.xlu1 %v1926_v29, %s1403_s12  ;;  %v1962_v41 = vmax.bf16 %v1341_v52, %v196_v22  ;;  %v1968_v10 = vmax.bf16 %v1340_v16, %v195_v47  ;;  %v1342_v22 = vld [vmem:[%s1428_s11 + $0x290] sm:$0xf] }
  0xab   : > { %1097 = vst.msk [vmem:[%s1792_s16 + $0x44] sm:$0xf] %vm1078_vm0, %v975_v40  ;;  %746 = vrot.lane.b32.xlu0 %v1932_v15, %s1403_s12 }
  0xac   : > { %1096 = vst.msk [vmem:[%s1792_s16 + $0x40] sm:$0xf] %vm1078_vm0, %v974_v28  ;;  %v637_v53 = vpop.permute.xlu1 %636  ;;  %v198_v28 = vld [vmem:[%s1428_s11 + $0x284] sm:$0xf] }
  0xad   : > { %v977_v46 = vmax.bf16 %v637_v53, %v1540_v58  ;;  %v635_v40 = vpop.permute.xlu0 %634  ;;  %v1343_v58 = vld [vmem:[%s1428_s11 + $0x294] sm:$0xf]  ;;  %v197_v53 = vld [vmem:[%s1428_s11 + $0x280] sm:$0xf] }
  0xae   : > { %v976_v34 = vmax.bf16 %v635_v40, %v1544_v59  ;;  %752 = vrot.lane.b32.xlu1 %v1944_v35, %s1403_s12  ;;  %v1980_v47 = vmax.bf16 %v1343_v58, %v198_v28  ;;  %v1986_v16 = vmax.bf16 %v1342_v22, %v197_v53  ;;  %v1344_v28 = vld [vmem:[%s1428_s11 + $0x298] sm:$0xf] }
  0xaf   : > { %1099 = vst.msk [vmem:[%s1792_s16 + $0x4c] sm:$0x7] %vm1082_vm1, %v977_v46  ;;  %750 = vrot.lane.b32.xlu0 %v1950_v3, %s1403_s12 }
  0xb0   : > { %1098 = vst.msk [vmem:[%s1792_s16 + $0x48] sm:$0xf] %vm1078_vm0, %v976_v34  ;;  %v641_v59 = vpop.permute.xlu1 %640  ;;  %v200_v34 = vld [vmem:[%s1428_s11 + $0x28c] sm:$0x7] }
  0xb1   : > { %v979_v52 = vmax.bf16 %v641_v59, %v1552_v0  ;;  %v639_v46 = vpop.permute.xlu0 %638  ;;  %v1345_v0 = vld [vmem:[%s1428_s11 + $0x29c] sm:$0x7]  ;;  %v199_v59 = vld [vmem:[%s1428_s11 + $0x288] sm:$0xf] }
  0xb2   : > { %v978_v40 = vmax.bf16 %v639_v46, %v1556_v1  ;;  %756 = vrot.lane.b32.xlu1 %v1962_v41, %s1403_s12  ;;  %v1998_v53 = vmax.bf16 %v1345_v0, %v200_v34  ;;  %v2004_v22 = vmax.bf16 %v1344_v28, %v199_v59  ;;  %v1346_v34 = vld [vmem:[%s1428_s11 + $0x2b0] sm:$0xf] }
  0xb3   : > { %1101 = vst.msk [vmem:[%s1792_s16 + $0x54] sm:$0xf] %vm1078_vm0, %v979_v52  ;;  %754 = vrot.lane.b32.xlu0 %v1968_v10, %s1403_s12 }
  0xb4   : > { %1100 = vst.msk [vmem:[%s1792_s16 + $0x50] sm:$0xf] %vm1078_vm0, %v978_v40  ;;  %v645_v1 = vpop.permute.xlu1 %644  ;;  %v202_v40 = vld [vmem:[%s1428_s11 + $0x2a4] sm:$0xf] }
  0xb5   : > { %v981_v58 = vmax.bf16 %v645_v1, %v1564_v8  ;;  %v643_v52 = vpop.permute.xlu0 %642  ;;  %v1347_v8 = vld [vmem:[%s1428_s11 + $0x2b4] sm:$0xf]  ;;  %v201_v1 = vld [vmem:[%s1428_s11 + $0x2a0] sm:$0xf] }
  0xb6   : > { %v980_v46 = vmax.bf16 %v643_v52, %v1568_v9  ;;  %760 = vrot.lane.b32.xlu1 %v1980_v47, %s1403_s12  ;;  %v2016_v59 = vmax.bf16 %v1347_v8, %v202_v40  ;;  %v2022_v28 = vmax.bf16 %v1346_v34, %v201_v1  ;;  %v1348_v40 = vld [vmem:[%s1428_s11 + $0x2b8] sm:$0xf] }
  0xb7   : > { %1103 = vst.msk [vmem:[%s1792_s16 + $0x5c] sm:$0x7] %vm1082_vm1, %v981_v58  ;;  %758 = vrot.lane.b32.xlu0 %v1986_v16, %s1403_s12 }
  0xb8   : > { %1102 = vst.msk [vmem:[%s1792_s16 + $0x58] sm:$0xf] %vm1078_vm0, %v980_v46  ;;  %v649_v9 = vpop.permute.xlu1 %648  ;;  %v204_v46 = vld [vmem:[%s1428_s11 + $0x2ac] sm:$0x7] }
  0xb9   : > { %v983_v0 = vmax.bf16 %v649_v9, %v1576_v18  ;;  %v647_v58 = vpop.permute.xlu0 %646  ;;  %v1349_v18 = vld [vmem:[%s1428_s11 + $0x2bc] sm:$0x7]  ;;  %v203_v9 = vld [vmem:[%s1428_s11 + $0x2a8] sm:$0xf] }
  0xba   : > { %v982_v52 = vmax.bf16 %v647_v58, %v1580_v19  ;;  %764 = vrot.lane.b32.xlu1 %v1998_v53, %s1403_s12  ;;  %v2034_v1 = vmax.bf16 %v1349_v18, %v204_v46  ;;  %v2040_v34 = vmax.bf16 %v1348_v40, %v203_v9  ;;  %v1350_v46 = vld [vmem:[%s1428_s11 + $0x2d0] sm:$0xf] }
  0xbb   : > { %1105 = vst.msk [vmem:[%s1792_s16 + $0x64] sm:$0xf] %vm1078_vm0, %v983_v0  ;;  %762 = vrot.lane.b32.xlu0 %v2004_v22, %s1403_s12 }
  0xbc   : > { %1104 = vst.msk [vmem:[%s1792_s16 + $0x60] sm:$0xf] %vm1078_vm0, %v982_v52  ;;  %v653_v19 = vpop.permute.xlu1 %652  ;;  %v206_v52 = vld [vmem:[%s1428_s11 + $0x2c4] sm:$0xf] }
  0xbd   : > { %v985_v8 = vmax.bf16 %v653_v19, %v1588_v26  ;;  %v651_v0 = vpop.permute.xlu0 %650  ;;  %v1351_v26 = vld [vmem:[%s1428_s11 + $0x2d4] sm:$0xf]  ;;  %v205_v19 = vld [vmem:[%s1428_s11 + $0x2c0] sm:$0xf] }
  0xbe   : > { %v984_v58 = vmax.bf16 %v651_v0, %v1592_v27  ;;  %768 = vrot.lane.b32.xlu1 %v2016_v59, %s1403_s12  ;;  %v2052_v9 = vmax.bf16 %v1351_v26, %v206_v52  ;;  %v2058_v40 = vmax.bf16 %v1350_v46, %v205_v19  ;;  %v1352_v52 = vld [vmem:[%s1428_s11 + $0x2d8] sm:$0xf] }
  0xbf   : > { %1107 = vst.msk [vmem:[%s1792_s16 + $0x6c] sm:$0x7] %vm1082_vm1, %v985_v8  ;;  %766 = vrot.lane.b32.xlu0 %v2022_v28, %s1403_s12 }
  0xc0   : > { %1106 = vst.msk [vmem:[%s1792_s16 + $0x68] sm:$0xf] %vm1078_vm0, %v984_v58  ;;  %v657_v27 = vpop.permute.xlu1 %656  ;;  %v208_v58 = vld [vmem:[%s1428_s11 + $0x2cc] sm:$0x7] }
  0xc1   : > { %v987_v18 = vmax.bf16 %v657_v27, %v1600_v36  ;;  %v655_v8 = vpop.permute.xlu0 %654  ;;  %v1353_v36 = vld [vmem:[%s1428_s11 + $0x2dc] sm:$0x7]  ;;  %v207_v27 = vld [vmem:[%s1428_s11 + $0x2c8] sm:$0xf] }
  0xc2   : > { %v986_v0 = vmax.bf16 %v655_v8, %v1604_v37  ;;  %772 = vrot.lane.b32.xlu1 %v2034_v1, %s1403_s12  ;;  %v2070_v19 = vmax.bf16 %v1353_v36, %v208_v58  ;;  %v2076_v46 = vmax.bf16 %v1352_v52, %v207_v27  ;;  %v1354_v58 = vld [vmem:[%s1428_s11 + $0x2f0] sm:$0xf] }
  0xc3   : > { %1109 = vst.msk [vmem:[%s1792_s16 + $0x74] sm:$0xf] %vm1078_vm0, %v987_v18  ;;  %770 = vrot.lane.b32.xlu0 %v2040_v34, %s1403_s12 }
  0xc4   : > { %1108 = vst.msk [vmem:[%s1792_s16 + $0x70] sm:$0xf] %vm1078_vm0, %v986_v0  ;;  %v661_v37 = vpop.permute.xlu1 %660  ;;  %v210_v0 = vld [vmem:[%s1428_s11 + $0x2e4] sm:$0xf] }
  0xc5   : > { %v989_v26 = vmax.bf16 %v661_v37, %v1612_v44  ;;  %v659_v18 = vpop.permute.xlu0 %658  ;;  %v1355_v44 = vld [vmem:[%s1428_s11 + $0x2f4] sm:$0xf]  ;;  %v209_v37 = vld [vmem:[%s1428_s11 + $0x2e0] sm:$0xf] }
  0xc6   : > { %v988_v8 = vmax.bf16 %v659_v18, %v1616_v45  ;;  %776 = vrot.lane.b32.xlu1 %v2052_v9, %s1403_s12  ;;  %v2088_v27 = vmax.bf16 %v1355_v44, %v210_v0  ;;  %v2094_v52 = vmax.bf16 %v1354_v58, %v209_v37  ;;  %v1356_v0 = vld [vmem:[%s1428_s11 + $0x2f8] sm:$0xf] }
  0xc7   : > { %1111 = vst.msk [vmem:[%s1792_s16 + $0x7c] sm:$0x7] %vm1082_vm1, %v989_v26  ;;  %774 = vrot.lane.b32.xlu0 %v2058_v40, %s1403_s12 }
  0xc8   : > { %1110 = vst.msk [vmem:[%s1792_s16 + $0x78] sm:$0xf] %vm1078_vm0, %v988_v8  ;;  %v665_v45 = vpop.permute.xlu1 %664  ;;  %v212_v8 = vld [vmem:[%s1428_s11 + $0x2ec] sm:$0x7] }
  0xc9   : > { %v991_v36 = vmax.bf16 %v665_v45, %v1624_v54  ;;  %v663_v26 = vpop.permute.xlu0 %662  ;;  %v1357_v54 = vld [vmem:[%s1428_s11 + $0x2fc] sm:$0x7]  ;;  %v211_v45 = vld [vmem:[%s1428_s11 + $0x2e8] sm:$0xf] }
  0xca   : > { %v990_v18 = vmax.bf16 %v663_v26, %v1628_v55  ;;  %780 = vrot.lane.b32.xlu1 %v2070_v19, %s1403_s12  ;;  %v2106_v37 = vmax.bf16 %v1357_v54, %v212_v8  ;;  %v2112_v58 = vmax.bf16 %v1356_v0, %v211_v45  ;;  %v1358_v8 = vld [vmem:[%s1428_s11 + $0x310] sm:$0xf] }
  0xcb   : > { %1113 = vst.msk [vmem:[%s1792_s16 + $0x84] sm:$0xf] %vm1078_vm0, %v991_v36  ;;  %778 = vrot.lane.b32.xlu0 %v2076_v46, %s1403_s12 }
  0xcc   : > { %1112 = vst.msk [vmem:[%s1792_s16 + $0x80] sm:$0xf] %vm1078_vm0, %v990_v18  ;;  %v669_v55 = vpop.permute.xlu1 %668  ;;  %v214_v18 = vld [vmem:[%s1428_s11 + $0x304] sm:$0xf] }
  0xcd   : > { %v993_v44 = vmax.bf16 %v669_v55, %v1636_v62  ;;  %v667_v36 = vpop.permute.xlu0 %666  ;;  %v1359_v62 = vld [vmem:[%s1428_s11 + $0x314] sm:$0xf]  ;;  %v213_v55 = vld [vmem:[%s1428_s11 + $0x300] sm:$0xf] }
  0xce   : > { %v992_v26 = vmax.bf16 %v667_v36, %v1640_v63  ;;  %784 = vrot.lane.b32.xlu1 %v2088_v27, %s1403_s12  ;;  %v2124_v45 = vmax.bf16 %v1359_v62, %v214_v18  ;;  %v2130_v0 = vmax.bf16 %v1358_v8, %v213_v55  ;;  %v1360_v18 = vld [vmem:[%s1428_s11 + $0x318] sm:$0xf] }
  0xcf   : > { %1115 = vst.msk [vmem:[%s1792_s16 + $0x8c] sm:$0x7] %vm1082_vm1, %v993_v44  ;;  %782 = vrot.lane.b32.xlu0 %v2094_v52, %s1403_s12 }
  0xd0   : > { %1114 = vst.msk [vmem:[%s1792_s16 + $0x88] sm:$0xf] %vm1078_vm0, %v992_v26  ;;  %v673_v63 = vpop.permute.xlu1 %672  ;;  %v216_v26 = vld [vmem:[%s1428_s11 + $0x30c] sm:$0x7] }
  0xd1   : > { %v995_v54 = vmax.bf16 %v673_v63, %v1648_v12  ;;  %v671_v44 = vpop.permute.xlu0 %670  ;;  %v1361_v12 = vld [vmem:[%s1428_s11 + $0x31c] sm:$0x7]  ;;  %v215_v63 = vld [vmem:[%s1428_s11 + $0x308] sm:$0xf] }
  0xd2   : > { %v994_v36 = vmax.bf16 %v671_v44, %v1652_v13  ;;  %788 = vrot.lane.b32.xlu1 %v2106_v37, %s1403_s12  ;;  %v2142_v55 = vmax.bf16 %v1361_v12, %v216_v26  ;;  %v2148_v8 = vmax.bf16 %v1360_v18, %v215_v63  ;;  %v1362_v26 = vld [vmem:[%s1428_s11 + $0x330] sm:$0xf] }
  0xd3   : > { %1117 = vst.msk [vmem:[%s1792_s16 + $0x94] sm:$0xf] %vm1078_vm0, %v995_v54  ;;  %786 = vrot.lane.b32.xlu0 %v2112_v58, %s1403_s12 }
  0xd4   : > { %1116 = vst.msk [vmem:[%s1792_s16 + $0x90] sm:$0xf] %vm1078_vm0, %v994_v36  ;;  %v677_v13 = vpop.permute.xlu1 %676  ;;  %v218_v36 = vld [vmem:[%s1428_s11 + $0x324] sm:$0xf] }
  0xd5   : > { %v997_v62 = vmax.bf16 %v677_v13, %v1660_v24  ;;  %v675_v54 = vpop.permute.xlu0 %674  ;;  %v1363_v24 = vld [vmem:[%s1428_s11 + $0x334] sm:$0xf]  ;;  %v217_v13 = vld [vmem:[%s1428_s11 + $0x320] sm:$0xf] }
  0xd6   : > { %v996_v44 = vmax.bf16 %v675_v54, %v1664_v25  ;;  %792 = vrot.lane.b32.xlu1 %v2124_v45, %s1403_s12  ;;  %v2160_v63 = vmax.bf16 %v1363_v24, %v218_v36  ;;  %v2166_v18 = vmax.bf16 %v1362_v26, %v217_v13  ;;  %v1364_v36 = vld [vmem:[%s1428_s11 + $0x338] sm:$0xf] }
  0xd7   : > { %1119 = vst.msk [vmem:[%s1792_s16 + $0x9c] sm:$0x7] %vm1082_vm1, %v997_v62  ;;  %790 = vrot.lane.b32.xlu0 %v2130_v0, %s1403_s12 }
  0xd8   : > { %1118 = vst.msk [vmem:[%s1792_s16 + $0x98] sm:$0xf] %vm1078_vm0, %v996_v44  ;;  %v681_v25 = vpop.permute.xlu1 %680  ;;  %v220_v44 = vld [vmem:[%s1428_s11 + $0x32c] sm:$0x7] }
  0xd9   : > { %v999_v12 = vmax.bf16 %v681_v25, %v1672_v38  ;;  %v679_v62 = vpop.permute.xlu0 %678  ;;  %v1365_v38 = vld [vmem:[%s1428_s11 + $0x33c] sm:$0x7]  ;;  %v219_v25 = vld [vmem:[%s1428_s11 + $0x328] sm:$0xf] }
  0xda   : > { %v998_v54 = vmax.bf16 %v679_v62, %v1676_v39  ;;  %796 = vrot.lane.b32.xlu1 %v2142_v55, %s1403_s12  ;;  %v2178_v13 = vmax.bf16 %v1365_v38, %v220_v44  ;;  %v2184_v26 = vmax.bf16 %v1364_v36, %v219_v25  ;;  %v1366_v44 = vld [vmem:[%s1428_s11 + $0x350] sm:$0xf] }
  0xdb   : > { %1121 = vst.msk [vmem:[%s1792_s16 + $0xa4] sm:$0xf] %vm1078_vm0, %v999_v12  ;;  %794 = vrot.lane.b32.xlu0 %v2148_v8, %s1403_s12 }
  0xdc   : > { %1120 = vst.msk [vmem:[%s1792_s16 + $0xa0] sm:$0xf] %vm1078_vm0, %v998_v54  ;;  %v685_v39 = vpop.permute.xlu1 %684  ;;  %v222_v54 = vld [vmem:[%s1428_s11 + $0x344] sm:$0xf] }
  0xdd   : > { %v1001_v24 = vmax.bf16 %v685_v39, %v1684_v50  ;;  %v683_v12 = vpop.permute.xlu0 %682  ;;  %v1367_v50 = vld [vmem:[%s1428_s11 + $0x354] sm:$0xf]  ;;  %v221_v39 = vld [vmem:[%s1428_s11 + $0x340] sm:$0xf] }
  0xde   : > { %v1000_v62 = vmax.bf16 %v683_v12, %v1688_v51  ;;  %800 = vrot.lane.b32.xlu1 %v2160_v63, %s1403_s12  ;;  %v2196_v25 = vmax.bf16 %v1367_v50, %v222_v54  ;;  %v2202_v36 = vmax.bf16 %v1366_v44, %v221_v39  ;;  %v1368_v54 = vld [vmem:[%s1428_s11 + $0x358] sm:$0xf] }
  0xdf   : > { %1123 = vst.msk [vmem:[%s1792_s16 + $0xac] sm:$0x7] %vm1082_vm1, %v1001_v24  ;;  %798 = vrot.lane.b32.xlu0 %v2166_v18, %s1403_s12 }
  0xe0   : > { %1122 = vst.msk [vmem:[%s1792_s16 + $0xa8] sm:$0xf] %vm1078_vm0, %v1000_v62  ;;  %v689_v51 = vpop.permute.xlu1 %688  ;;  %v224_v62 = vld [vmem:[%s1428_s11 + $0x34c] sm:$0x7] }
  0xe1   : > { %v1003_v38 = vmax.bf16 %v689_v51, %v1696_v2  ;;  %v687_v24 = vpop.permute.xlu0 %686  ;;  %v1369_v2 = vld [vmem:[%s1428_s11 + $0x35c] sm:$0x7]  ;;  %v223_v51 = vld [vmem:[%s1428_s11 + $0x348] sm:$0xf] }
  0xe2   : > { %v1002_v12 = vmax.bf16 %v687_v24, %v1700_v4  ;;  %804 = vrot.lane.b32.xlu1 %v2178_v13, %s1403_s12  ;;  %v2214_v39 = vmax.bf16 %v1369_v2, %v224_v62  ;;  %v2220_v44 = vmax.bf16 %v1368_v54, %v223_v51  ;;  %v1370_v62 = vld [vmem:[%s1428_s11 + $0x370] sm:$0xf] }
  0xe3   : > { %1125 = vst.msk [vmem:[%s1792_s16 + $0xb4] sm:$0xf] %vm1078_vm0, %v1003_v38  ;;  %802 = vrot.lane.b32.xlu0 %v2184_v26, %s1403_s12 }
  0xe4   : > { %1124 = vst.msk [vmem:[%s1792_s16 + $0xb0] sm:$0xf] %vm1078_vm0, %v1002_v12  ;;  %v693_v4 = vpop.permute.xlu1 %692  ;;  %2543 = vst [vmem:[#allocation9_spill] sm:$0xff] %v2214_v39  ;;  %v226_v12 = vld [vmem:[%s1428_s11 + $0x364] sm:$0xf] }
  0xe5   : > { %v1005_v50 = vmax.bf16 %v693_v4, %v1708_v20  ;;  %v691_v38 = vpop.permute.xlu0 %690  ;;  %2544 = vst [vmem:[#allocation10_spill] sm:$0xff] %v2220_v44  ;;  %v1371_v20 = vld [vmem:[%s1428_s11 + $0x374] sm:$0xf]  ;;  %v225_v4 = vld [vmem:[%s1428_s11 + $0x360] sm:$0xf] }
  0xe6   : > { %v1004_v24 = vmax.bf16 %v691_v38, %v1712_v21  ;;  %808 = vrot.lane.b32.xlu1 %v2196_v25, %s1403_s12  ;;  %v2232_v51 = vmax.bf16 %v1371_v20, %v226_v12  ;;  %v2238_v54 = vmax.bf16 %v1370_v62, %v225_v4  ;;  %v1372_v12 = vld [vmem:[%s1428_s11 + $0x378] sm:$0xf] }
  0xe7   : > { %1127 = vst.msk [vmem:[%s1792_s16 + $0xbc] sm:$0x7] %vm1082_vm1, %v1005_v50  ;;  %806 = vrot.lane.b32.xlu0 %v2202_v36, %s1403_s12 }
  0xe8   : > { %1126 = vst.msk [vmem:[%s1792_s16 + $0xb8] sm:$0xf] %vm1078_vm0, %v1004_v24  ;;  %v697_v21 = vpop.permute.xlu1 %696  ;;  %2545 = vst [vmem:[#allocation11_spill] sm:$0xff] %v2232_v51  ;;  %v228_v24 = vld [vmem:[%s1428_s11 + $0x36c] sm:$0x7] }
  0xe9   : > { %v1007_v2 = vmax.bf16 %v697_v21, %v1720_v42  ;;  %v695_v50 = vpop.permute.xlu0 %694  ;;  %2546 = vst [vmem:[#allocation12_spill] sm:$0xff] %v2238_v54  ;;  %v1373_v42 = vld [vmem:[%s1428_s11 + $0x37c] sm:$0x7]  ;;  %v227_v21 = vld [vmem:[%s1428_s11 + $0x368] sm:$0xf] }
  0xea   : > { %v1006_v38 = vmax.bf16 %v695_v50, %v1724_v43  ;;  %812 = vrot.lane.b32.xlu1 %v2214_v39, %s1403_s12  ;;  %v2547_v50 = vld [vmem:[#allocation2_spill] sm:$0xff]  ;;  %v2250_v4 = vmax.bf16 %v1373_v42, %v228_v24  ;;  %v2256_v62 = vmax.bf16 %v1372_v12, %v227_v21  ;;  %v1374_v24 = vld [vmem:[%s1428_s11 + $0x390] sm:$0xf]  ;;  %v2550_v42 = vld [vmem:[#allocation3_spill] sm:$0xff] }
  0xeb   : > { %1129 = vst.msk [vmem:[%s1792_s16 + $0xc4] sm:$0xf] %vm1078_vm0, %v1007_v2  ;;  %810 = vrot.lane.b32.xlu0 %v2220_v44, %s1403_s12  ;;  %v232_v12 = vld [vmem:[%s1428_s11 + $0x38c] sm:$0x7] }
  0xec   : > { %1128 = vst.msk [vmem:[%s1792_s16 + $0xc0] sm:$0xf] %vm1078_vm0, %v1006_v38  ;;  %v701_v43 = vpop.permute.xlu1 %700  ;;  %2548 = vst [vmem:[#allocation2_spill] sm:$0xff] %v2250_v4  ;;  %v230_v38 = vld [vmem:[%s1428_s11 + $0x384] sm:$0xf] }
  0xed   : > { %v1009_v20 = vmax.bf16 %v701_v43, %v1732_v60  ;;  %v699_v2 = vpop.permute.xlu0 %698  ;;  %2549 = vst [vmem:[#allocation13_spill] sm:$0xff] %v2256_v62  ;;  %v1375_v60 = vld [vmem:[%s1428_s11 + $0x394] sm:$0xf] }
  0xee   : > { %v1008_v39 = vmax.bf16 %v699_v2, %v2547_v50  ;;  %816 = vrot.lane.b32.xlu1 %v2232_v51, %s1403_s12  ;;  %v229_v2 = vld [vmem:[%s1428_s11 + $0x380] sm:$0xf]  ;;  %v2551_v51 = vld [vmem:[#allocation4_spill] sm:$0xff]  ;;  %v2268_v21 = vmax.bf16 %v1375_v60, %v230_v38  ;;  %v1376_v38 = vld [vmem:[%s1428_s11 + $0x398] sm:$0xf] }
  0xef   : > { %1131 = vst.msk [vmem:[%s1792_s16 + $0xcc] sm:$0x7] %vm1082_vm1, %v1009_v20  ;;  %814 = vrot.lane.b32.xlu0 %v2238_v54, %s1403_s12  ;;  %v2554_v60 = vld [vmem:[#allocation5_spill] sm:$0xff] }
  0xf0   : > { %1130 = vst.msk [vmem:[%s1792_s16 + $0xc8] sm:$0xf] %vm1078_vm0, %v1008_v39  ;;  %v705_v43 = vpop.permute.xlu1 %704  ;;  %2552 = vst [vmem:[#allocation3_spill] sm:$0xff] %v2268_v21  ;;  %v2274_v39 = vmax.bf16 %v1374_v24, %v229_v2  ;;  %v234_v24 = vld [vmem:[%s1428_s11 + $0x3a4] sm:$0xf] }
  0xf1   : > { %v1011_v50 = vmax.bf16 %v705_v43, %v2550_v42  ;;  %v703_v20 = vpop.permute.xlu0 %702  ;;  %v1377_v43 = vld [vmem:[%s1428_s11 + $0x39c] sm:$0x7]  ;;  %v231_v42 = vld [vmem:[%s1428_s11 + $0x388] sm:$0xf] }
  0xf2   : > { %v1010_v44 = vmax.bf16 %v703_v20, %v2551_v51  ;;  %820 = vrot.lane.b32.xlu1 %v2250_v4, %s1403_s12  ;;  %2553 = vst [vmem:[#allocation4_spill] sm:$0xff] %v2274_v39  ;;  %v2555_v4 = vld [vmem:[#allocation6_spill] sm:$0xff]  ;;  %v2286_v2 = vmax.bf16 %v1377_v43, %v232_v12  ;;  %v1378_v12 = vld [vmem:[%s1428_s11 + $0x3b0] sm:$0xf]  ;;  %v2556_v43 = vld [vmem:[#allocation7_spill] sm:$0xff] }
  0xf3   : > { %1133 = vst.msk [vmem:[%s1792_s16 + $0xd4] sm:$0xf] %vm1078_vm0, %v1011_v50  ;;  %818 = vrot.lane.b32.xlu0 %v2256_v62, %s1403_s12 }
  0xf4   : > { %1132 = vst.msk [vmem:[%s1792_s16 + $0xd0] sm:$0xf] %vm1078_vm0, %v1010_v44  ;;  %v709_v51 = vpop.permute.xlu1 %708  ;;  %v2292_v44 = vmax.bf16 %v1376_v38, %v231_v42  ;;  %v236_v38 = vld [vmem:[%s1428_s11 + $0x3ac] sm:$0x7] }
  0xf5   : > { %v1013_v20 = vmax.bf16 %v709_v51, %v2554_v60  ;;  %v707_v50 = vpop.permute.xlu0 %706  ;;  %v1379_v51 = vld [vmem:[%s1428_s11 + $0x3b4] sm:$0xf]  ;;  %v233_v60 = vld [vmem:[%s1428_s11 + $0x3a0] sm:$0xf] }
  0xf6   : > { %v1012_v54 = vmax.bf16 %v707_v50, %v2555_v4  ;;  %824 = vrot.lane.b32.xlu1 %v2268_v21, %s1403_s12  ;;  %v2557_v21 = vld [vmem:[#allocation8_spill] sm:$0xff]  ;;  %v2304_v42 = vmax.bf16 %v1379_v51, %v234_v24 }
  0xf7   : > { %1135 = vst.msk [vmem:[%s1792_s16 + $0xdc] sm:$0x7] %vm1082_vm1, %v1013_v20  ;;  %822 = vrot.lane.b32.xlu0 %v2274_v39, %s1403_s12  ;;  %v1381_v39 = vld [vmem:[%s1428_s11 + $0x3bc] sm:$0x7] }
  0xf8   : > { %1134 = vst.msk [vmem:[%s1792_s16 + $0xd8] sm:$0xf] %vm1078_vm0, %v1012_v54  ;;  %v713_v4 = vpop.permute.xlu1 %712  ;;  %v2310_v54 = vmax.bf16 %v1378_v12, %v233_v60 }
  0xf9   : > { %v1015_v50 = vmax.bf16 %v713_v4, %v2556_v43  ;;  %v711_v20 = vpop.permute.xlu0 %710  ;;  %v1380_v43 = vld [vmem:[%s1428_s11 + $0x3b8] sm:$0xf] }
  0xfa   : > { %v1014_v62 = vmax.bf16 %v711_v20, %v2557_v21  ;;  %828 = vrot.lane.b32.xlu1 %v2286_v2, %s1403_s12  ;;  %v235_v21 = vld [vmem:[%s1428_s11 + $0x3a8] sm:$0xf] }
  0xfb   : > { %1137 = vst.msk [vmem:[%s1792_s16 + $0xe4] sm:$0xf] %vm1078_vm0, %v1015_v50  ;;  %826 = vrot.lane.b32.xlu0 %v2292_v44, %s1403_s12  ;;  %v2322_v50 = vmax.bf16 %v1381_v39, %v236_v38 }
  0xfc   : > { %1136 = vst.msk [vmem:[%s1792_s16 + $0xe0] sm:$0xf] %vm1078_vm0, %v1014_v62  ;;  %v717_v4 = vpop.permute.xlu1 %716  ;;  %v2328_v62 = vmax.bf16 %v1380_v43, %v235_v21 }
  0xfd   : > { %v1017_v20 = vmax.bf16 %v717_v4, %v1781_v30  ;;  %v715_v24 = vpop.permute.xlu0 %714 }
  0xfe   : > { %v1016_v51 = vmax.bf16 %v715_v24, %v1785_v5  ;;  %832 = vrot.lane.b32.xlu1 %v2304_v42, %s1403_s12 }
  0xff   : > { %1139 = vst.msk [vmem:[%s1792_s16 + $0xec] sm:$0x7] %vm1082_vm1, %v1017_v20  ;;  %830 = vrot.lane.b32.xlu0 %v2310_v54, %s1403_s12 }
 0x100   : > { %1138 = vst.msk [vmem:[%s1792_s16 + $0xe8] sm:$0xf] %vm1078_vm0, %v1016_v51  ;;  %v721_v30 = vpop.permute.xlu1 %720 }
 0x101   : > { %v1019_v60 = vmax.bf16 %v721_v30, %v1800_v61  ;;  %v719_v5 = vpop.permute.xlu0 %718 }
 0x102   : > { %v1018_v12 = vmax.bf16 %v719_v5, %v1806_v57  ;;  %836 = vrot.lane.b32.xlu1 %v2322_v50, %s1403_s12 }
 0x103   : > { %1141 = vst.msk [vmem:[%s1792_s16 + $0xf4] sm:$0xf] %vm1078_vm0, %v1019_v60  ;;  %834 = vrot.lane.b32.xlu0 %v2328_v62, %s1403_s12 }
 0x104   : > { %1140 = vst.msk [vmem:[%s1792_s16 + $0xf0] sm:$0xf] %vm1078_vm0, %v1018_v12  ;;  %v725_v39 = vpop.permute.xlu1 %724 }
 0x105   : > { %v1021_v38 = vmax.bf16 %v725_v39, %v1818_v33  ;;  %v723_v61 = vpop.permute.xlu0 %722 }
 0x106   : > { %v1020_v4 = vmax.bf16 %v723_v61, %v1824_v32 }
 0x107   : > { %1143 = vst.msk [vmem:[%s1792_s16 + $0xfc] sm:$0x7] %vm1082_vm1, %v1021_v38 }
 0x108   : > { %1142 = vst.msk [vmem:[%s1792_s16 + $0xf8] sm:$0xf] %vm1078_vm0, %v1020_v4  ;;  %v729_v57 = vpop.permute.xlu1 %728 }
 0x109   : > { %v1023_v21 = vmax.bf16 %v729_v57, %v1836_v6  ;;  %v727_v43 = vpop.permute.xlu0 %726 }
 0x10a   : > { %v1022_v20 = vmax.bf16 %v727_v43, %v1842_v14 }
 0x10b   : > { %1145 = vst.msk [vmem:[%s1792_s16 + $0x104] sm:$0xf] %vm1078_vm0, %v1023_v21 }
 0x10c   : > { %1144 = vst.msk [vmem:[%s1792_s16 + $0x100] sm:$0xf] %vm1078_vm0, %v1022_v20  ;;  %v733_v33 = vpop.permute.xlu1 %732 }
 0x10d   : > { %v1025_v32 = vmax.bf16 %v733_v33, %v1854_v7  ;;  %v731_v24 = vpop.permute.xlu0 %730 }
 0x10e   : > { %v1024_v51 = vmax.bf16 %v731_v24, %v1860_v56 }
 0x10f   : > { %1147 = vst.msk [vmem:[%s1792_s16 + $0x10c] sm:$0x7] %vm1082_vm1, %v1025_v32 }
 0x110   : > { %1146 = vst.msk [vmem:[%s1792_s16 + $0x108] sm:$0xf] %vm1078_vm0, %v1024_v51  ;;  %v737_v6 = vpop.permute.xlu1 %736 }
 0x111   : > { %v1027_v14 = vmax.bf16 %v737_v6, %v1872_v11  ;;  %v735_v30 = vpop.permute.xlu0 %734 }
 0x112   : > { %v1026_v60 = vmax.bf16 %v735_v30, %v1878_v48 }
 0x113   : > { %1149 = vst.msk [vmem:[%s1792_s16 + $0x114] sm:$0xf] %vm1078_vm0, %v1027_v14 }
 0x114   : > { %1148 = vst.msk [vmem:[%s1792_s16 + $0x110] sm:$0xf] %vm1078_vm0, %v1026_v60  ;;  %v741_v7 = vpop.permute.xlu1 %740 }
 0x115   : > { %v1029_v56 = vmax.bf16 %v741_v7, %v1890_v17  ;;  %v739_v5 = vpop.permute.xlu0 %738 }
 0x116   : > { %v1028_v12 = vmax.bf16 %v739_v5, %v1896_v49 }
 0x117   : > { %1151 = vst.msk [vmem:[%s1792_s16 + $0x11c] sm:$0x7] %vm1082_vm1, %v1029_v56 }
 0x118   : > { %1150 = vst.msk [vmem:[%s1792_s16 + $0x118] sm:$0xf] %vm1078_vm0, %v1028_v12  ;;  %v745_v11 = vpop.permute.xlu1 %744 }
 0x119   : > { %v1031_v48 = vmax.bf16 %v745_v11, %v1908_v23  ;;  %v743_v39 = vpop.permute.xlu0 %742 }
 0x11a   : > { %v1030_v38 = vmax.bf16 %v743_v39, %v1914_v31 }
 0x11b   : > { %1153 = vst.msk [vmem:[%s1792_s16 + $0x124] sm:$0xf] %vm1078_vm0, %v1031_v48 }
 0x11c   : > { %1152 = vst.msk [vmem:[%s1792_s16 + $0x120] sm:$0xf] %vm1078_vm0, %v1030_v38  ;;  %v749_v17 = vpop.permute.xlu1 %748 }
 0x11d   : > { %v1033_v49 = vmax.bf16 %v749_v17, %v1926_v29  ;;  %v747_v61 = vpop.permute.xlu0 %746 }
 0x11e   : > { %v1032_v4 = vmax.bf16 %v747_v61, %v1932_v15 }
 0x11f   : > { %1155 = vst.msk [vmem:[%s1792_s16 + $0x12c] sm:$0x7] %vm1082_vm1, %v1033_v49 }
 0x120   : > { %1154 = vst.msk [vmem:[%s1792_s16 + $0x128] sm:$0xf] %vm1078_vm0, %v1032_v4  ;;  %v753_v23 = vpop.permute.xlu1 %752 }
 0x121   : > { %v1035_v31 = vmax.bf16 %v753_v23, %v1944_v35  ;;  %v751_v57 = vpop.permute.xlu0 %750 }
 0x122   : > { %v1034_v21 = vmax.bf16 %v751_v57, %v1950_v3 }
 0x123   : > { %1157 = vst.msk [vmem:[%s1792_s16 + $0x134] sm:$0xf] %vm1078_vm0, %v1035_v31 }
 0x124   : > { %1156 = vst.msk [vmem:[%s1792_s16 + $0x130] sm:$0xf] %vm1078_vm0, %v1034_v21  ;;  %v757_v29 = vpop.permute.xlu1 %756 }
 0x125   : > { %v1037_v15 = vmax.bf16 %v757_v29, %v1962_v41  ;;  %v755_v43 = vpop.permute.xlu0 %754 }
 0x126   : > { %v1036_v20 = vmax.bf16 %v755_v43, %v1968_v10  ;;  %v2558_v43 = vld [vmem:[#allocation9_spill] sm:$0xff] }
 0x127   : > { %1159 = vst.msk [vmem:[%s1792_s16 + $0x13c] sm:$0x7] %vm1082_vm1, %v1037_v15 }
 0x128   : > { %1158 = vst.msk [vmem:[%s1792_s16 + $0x138] sm:$0xf] %vm1078_vm0, %v1036_v20  ;;  %v761_v35 = vpop.permute.xlu1 %760 }
 0x129   : > { %v1039_v3 = vmax.bf16 %v761_v35, %v1980_v47  ;;  %v759_v33 = vpop.permute.xlu0 %758  ;;  %v2559_v35 = vld [vmem:[#allocation10_spill] sm:$0xff] }
 0x12a   : > { %v1038_v32 = vmax.bf16 %v759_v33, %v1986_v16  ;;  %v2560_v33 = vld [vmem:[#allocation11_spill] sm:$0xff] }
 0x12b   : > { %1161 = vst.msk [vmem:[%s1792_s16 + $0x144] sm:$0xf] %vm1078_vm0, %v1039_v3 }
 0x12c   : > { %1160 = vst.msk [vmem:[%s1792_s16 + $0x140] sm:$0xf] %vm1078_vm0, %v1038_v32  ;;  %v765_v41 = vpop.permute.xlu1 %764 }
 0x12d   : > { %v1041_v10 = vmax.bf16 %v765_v41, %v1998_v53  ;;  %v763_v24 = vpop.permute.xlu0 %762  ;;  %v2561_v41 = vld [vmem:[#allocation12_spill] sm:$0xff] }
 0x12e   : > { %v1040_v51 = vmax.bf16 %v763_v24, %v2004_v22 }
 0x12f   : > { %1163 = vst.msk [vmem:[%s1792_s16 + $0x14c] sm:$0x7] %vm1082_vm1, %v1041_v10 }
 0x130   : > { %1162 = vst.msk [vmem:[%s1792_s16 + $0x148] sm:$0xf] %vm1078_vm0, %v1040_v51  ;;  %v769_v47 = vpop.permute.xlu1 %768  ;;  %v2562_v51 = vld [vmem:[#allocation2_spill] sm:$0xff] }
 0x131   : > { %v1043_v16 = vmax.bf16 %v769_v47, %v2016_v59  ;;  %v767_v6 = vpop.permute.xlu0 %766 }
 0x132   : > { %v1042_v14 = vmax.bf16 %v767_v6, %v2022_v28  ;;  %v2563_v6 = vld [vmem:[#allocation13_spill] sm:$0xff] }
 0x133   : > { %1165 = vst.msk [vmem:[%s1792_s16 + $0x154] sm:$0xf] %vm1078_vm0, %v1043_v16 }
 0x134   : > { %1164 = vst.msk [vmem:[%s1792_s16 + $0x150] sm:$0xf] %vm1078_vm0, %v1042_v14  ;;  %v773_v53 = vpop.permute.xlu1 %772 }
 0x135   : > { %v1045_v22 = vmax.bf16 %v773_v53, %v2034_v1  ;;  %v771_v30 = vpop.permute.xlu0 %770 }
 0x136   : > { %v1044_v60 = vmax.bf16 %v771_v30, %v2040_v34 }
 0x137   : > { %1167 = vst.msk [vmem:[%s1792_s16 + $0x15c] sm:$0x7] %vm1082_vm1, %v1045_v22  ;;  %v2564_v22 = vld [vmem:[#allocation3_spill] sm:$0xff] }
 0x138   : > { %1166 = vst.msk [vmem:[%s1792_s16 + $0x158] sm:$0xf] %vm1078_vm0, %v1044_v60  ;;  %v777_v59 = vpop.permute.xlu1 %776 }
 0x139   : > { %v1047_v28 = vmax.bf16 %v777_v59, %v2052_v9  ;;  %v775_v7 = vpop.permute.xlu0 %774  ;;  %v2565_v59 = vld [vmem:[#allocation4_spill] sm:$0xff] }
 0x13a   : > { %v1046_v56 = vmax.bf16 %v775_v7, %v2058_v40 }
 0x13b   : > { %1169 = vst.msk [vmem:[%s1792_s16 + $0x164] sm:$0xf] %vm1078_vm0, %v1047_v28 }
 0x13c   : > { %1168 = vst.msk [vmem:[%s1792_s16 + $0x160] sm:$0xf] %vm1078_vm0, %v1046_v56  ;;  %v781_v1 = vpop.permute.xlu1 %780 }
 0x13d   : > { %v1049_v34 = vmax.bf16 %v781_v1, %v2070_v19  ;;  %v779_v5 = vpop.permute.xlu0 %778 }
 0x13e   : > { %v1048_v12 = vmax.bf16 %v779_v5, %v2076_v46 }
 0x13f   : > { %1171 = vst.msk [vmem:[%s1792_s16 + $0x16c] sm:$0x7] %vm1082_vm1, %v1049_v34 }
 0x140   : > { %1170 = vst.msk [vmem:[%s1792_s16 + $0x168] sm:$0xf] %vm1078_vm0, %v1048_v12  ;;  %v785_v9 = vpop.permute.xlu1 %784 }
 0x141   : > { %v1051_v40 = vmax.bf16 %v785_v9, %v2088_v27  ;;  %v783_v11 = vpop.permute.xlu0 %782 }
 0x142   : > { %v1050_v48 = vmax.bf16 %v783_v11, %v2094_v52 }
 0x143   : > { %1173 = vst.msk [vmem:[%s1792_s16 + $0x174] sm:$0xf] %vm1078_vm0, %v1051_v40 }
 0x144   : > { %1172 = vst.msk [vmem:[%s1792_s16 + $0x170] sm:$0xf] %vm1078_vm0, %v1050_v48  ;;  %v789_v19 = vpop.permute.xlu1 %788 }
 0x145   : > { %v1053_v46 = vmax.bf16 %v789_v19, %v2106_v37  ;;  %v787_v39 = vpop.permute.xlu0 %786 }
 0x146   : > { %v1052_v38 = vmax.bf16 %v787_v39, %v2112_v58 }
 0x147   : > { %1175 = vst.msk [vmem:[%s1792_s16 + $0x17c] sm:$0x7] %vm1082_vm1, %v1053_v46 }
 0x148   : > { %1174 = vst.msk [vmem:[%s1792_s16 + $0x178] sm:$0xf] %vm1078_vm0, %v1052_v38  ;;  %v793_v27 = vpop.permute.xlu1 %792 }
 0x149   : > { %v1055_v52 = vmax.bf16 %v793_v27, %v2124_v45  ;;  %v791_v17 = vpop.permute.xlu0 %790 }
 0x14a   : > { %v1054_v49 = vmax.bf16 %v791_v17, %v2130_v0 }
 0x14b   : > { %1177 = vst.msk [vmem:[%s1792_s16 + $0x184] sm:$0xf] %vm1078_vm0, %v1055_v52 }
 0x14c   : > { %1176 = vst.msk [vmem:[%s1792_s16 + $0x180] sm:$0xf] %vm1078_vm0, %v1054_v49  ;;  %v797_v37 = vpop.permute.xlu1 %796 }
 0x14d   : > { %v1057_v58 = vmax.bf16 %v797_v37, %v2142_v55  ;;  %v795_v61 = vpop.permute.xlu0 %794 }
 0x14e   : > { %v1056_v4 = vmax.bf16 %v795_v61, %v2148_v8 }
 0x14f   : > { %1179 = vst.msk [vmem:[%s1792_s16 + $0x18c] sm:$0x7] %vm1082_vm1, %v1057_v58 }
 0x150   : > { %1178 = vst.msk [vmem:[%s1792_s16 + $0x188] sm:$0xf] %vm1078_vm0, %v1056_v4  ;;  %v801_v45 = vpop.permute.xlu1 %800 }
 0x151   : > { %v1059_v0 = vmax.bf16 %v801_v45, %v2160_v63  ;;  %v799_v23 = vpop.permute.xlu0 %798 }
 0x152   : > { %v1058_v31 = vmax.bf16 %v799_v23, %v2166_v18 }
 0x153   : > { %1181 = vst.msk [vmem:[%s1792_s16 + $0x194] sm:$0xf] %vm1078_vm0, %v1059_v0 }
 0x154   : > { %1180 = vst.msk [vmem:[%s1792_s16 + $0x190] sm:$0xf] %vm1078_vm0, %v1058_v31  ;;  %v805_v55 = vpop.permute.xlu1 %804 }
 0x155   : > { %v1061_v8 = vmax.bf16 %v805_v55, %v2178_v13  ;;  %v803_v57 = vpop.permute.xlu0 %802 }
 0x156   : > { %v1060_v21 = vmax.bf16 %v803_v57, %v2184_v26 }
 0x157   : > { %1183 = vst.msk [vmem:[%s1792_s16 + $0x19c] sm:$0x7] %vm1082_vm1, %v1061_v8 }
 0x158   : > { %1182 = vst.msk [vmem:[%s1792_s16 + $0x198] sm:$0xf] %vm1078_vm0, %v1060_v21  ;;  %v809_v63 = vpop.permute.xlu1 %808 }
 0x159   : > { %v1063_v18 = vmax.bf16 %v809_v63, %v2196_v25  ;;  %v807_v29 = vpop.permute.xlu0 %806 }
 0x15a   : > { %v1062_v15 = vmax.bf16 %v807_v29, %v2202_v36 }
 0x15b   : > { %1185 = vst.msk [vmem:[%s1792_s16 + $0x1a4] sm:$0xf] %vm1078_vm0, %v1063_v18 }
 0x15c   : > { %1184 = vst.msk [vmem:[%s1792_s16 + $0x1a0] sm:$0xf] %vm1078_vm0, %v1062_v15  ;;  %v813_v13 = vpop.permute.xlu1 %812 }
 0x15d   : > { %v1065_v26 = vmax.bf16 %v813_v13, %v2558_v43  ;;  %v811_v20 = vpop.permute.xlu0 %810 }
 0x15e   : > { %v1064_v3 = vmax.bf16 %v811_v20, %v2559_v35 }
 0x15f   : > { %1187 = vst.msk [vmem:[%s1792_s16 + $0x1ac] sm:$0x7] %vm1082_vm1, %v1065_v26 }
 0x160   : > { %1186 = vst.msk [vmem:[%s1792_s16 + $0x1a8] sm:$0xf] %vm1078_vm0, %v1064_v3  ;;  %v817_v25 = vpop.permute.xlu1 %816 }
 0x161   : > { %v1067_v36 = vmax.bf16 %v817_v25, %v2560_v33  ;;  %v815_v32 = vpop.permute.xlu0 %814 }
 0x162   : > { %v1066_v10 = vmax.bf16 %v815_v32, %v2561_v41 }
 0x163   : > { %1189 = vst.msk [vmem:[%s1792_s16 + $0x1b4] sm:$0xf] %vm1078_vm0, %v1067_v36 }
 0x164   : > { %1188 = vst.msk [vmem:[%s1792_s16 + $0x1b0] sm:$0xf] %vm1078_vm0, %v1066_v10  ;;  %v821_v24 = vpop.permute.xlu1 %820 }
 0x165   : > { %v1069_v47 = vmax.bf16 %v821_v24, %v2562_v51  ;;  %v819_v16 = vpop.permute.xlu0 %818 }
 0x166   : > { %v1068_v14 = vmax.bf16 %v819_v16, %v2563_v6 }
 0x167   : > { %1191 = vst.msk [vmem:[%s1792_s16 + $0x1bc] sm:$0x7] %vm1082_vm1, %v1069_v47 }
 0x168   : > { %1190 = vst.msk [vmem:[%s1792_s16 + $0x1b8] sm:$0xf] %vm1078_vm0, %v1068_v14  ;;  %v825_v53 = vpop.permute.xlu1 %824 }
 0x169   : > { %v1071_v30 = vmax.bf16 %v825_v53, %v2564_v22  ;;  %v823_v60 = vpop.permute.xlu0 %822 }
 0x16a   : > { %v1070_v28 = vmax.bf16 %v823_v60, %v2565_v59 }
 0x16b   : > { %1193 = vst.msk [vmem:[%s1792_s16 + $0x1c4] sm:$0xf] %vm1078_vm0, %v1071_v30 }
 0x16c   : > { %1192 = vst.msk [vmem:[%s1792_s16 + $0x1c0] sm:$0xf] %vm1078_vm0, %v1070_v28  ;;  %v829_v7 = vpop.permute.xlu1 %828 }
 0x16d   : > { %v1073_v56 = vmax.bf16 %v829_v7, %v2286_v2  ;;  %v827_v1 = vpop.permute.xlu0 %826 }
 0x16e   : > { %v1072_v34 = vmax.bf16 %v827_v1, %v2292_v44 }
 0x16f   : > { %1195 = vst.msk [vmem:[%s1792_s16 + $0x1cc] sm:$0x7] %vm1082_vm1, %v1073_v56 }
 0x170   : > { %1194 = vst.msk [vmem:[%s1792_s16 + $0x1c8] sm:$0xf] %vm1078_vm0, %v1072_v34  ;;  %v833_v5 = vpop.permute.xlu1 %832 }
 0x171   : > { %v1075_v12 = vmax.bf16 %v833_v5, %v2304_v42  ;;  %v831_v9 = vpop.permute.xlu0 %830 }
 0x172   : > { %v1074_v40 = vmax.bf16 %v831_v9, %v2310_v54 }
 0x173   : > { %1197 = vst.msk [vmem:[%s1792_s16 + $0x1d4] sm:$0xf] %vm1078_vm0, %v1075_v12 }
 0x174   : > { %1196 = vst.msk [vmem:[%s1792_s16 + $0x1d0] sm:$0xf] %vm1078_vm0, %v1074_v40  ;;  %v837_v11 = vpop.permute.xlu1 %836 }
 0x175   : > { %v1077_v2 = vmax.bf16 %v837_v11, %v2322_v50  ;;  %v835_v48 = vpop.permute.xlu0 %834 }
 0x176   : > { %v1076_v44 = vmax.bf16 %v835_v48, %v2328_v62 }
 0x177   : > { %1199 = vst.msk [vmem:[%s1792_s16 + $0x1dc] sm:$0x7] %vm1082_vm1, %v1077_v2 }
 0x178   : > { %1198 = vst.msk [vmem:[%s1792_s16 + $0x1d8] sm:$0xf] %vm1078_vm0, %v1076_v44 }
 0x179 PF: > { %s11_s6 = sadd.s32 1, %s1401_s6  }
 0x17a   : > { %p8_p4 = scmp.ge.s32.totalorder %s11_s6, 4  }
 0x17c   :  { %10 = sbr.rel (!%p8_p4) target bundleno = 1 (0x1), region = 55 }

// kernel: unet_forward.19
= control target key start
LH: loop header
LB: loop body
LE: loop exit
PB: predicated region body
PF: predicated region fallthrough
CT: control target
= control target key end

     0   :  { %s1387_s12 = smov 0   ;;  %s1536_s0 = inlined_call_operand.vmem [shape: bf16[2,28,28,32], index: 0, kind: input, shape index: {}]   ;;  %s1537_s1 = inlined_call_operand.vmem [shape: bf16[3,3,32,32], index: 1, kind: input, shape index: {}]   ;;  %s1538_s2 = inlined_call_operand.vmem [shape: f32[1,32], index: 2, kind: input, shape index: {}]   ;;  %s1539_s3 = inlined_call_operand.vmem [shape: bf16[2,26,26,32], index: 3, kind: output, shape index: {}]  }
   0x1 LB: > { %s1062_s13 = sadd.s32 4294967295, %s1361_s12   ;;  %p1066_p0 = scmp.ge.s32.totalorder %s1361_s12, 1  ;;  %s1361_s12 = sphi %s1387_s12, %s13_s12  }
   0x2   : > { %p137_p1 = scmp.lt.s32.totalorder %s1361_s12, 3 }
   0x4   : > { %p138_p2 = pnand %p1066_p0, %p137_p1 }
   0x5   : > { %p161_p3 = scmp.lt.s32.totalorder (!%p138_p2), %s1062_s13, 1  ;;  %v1398_v0 = vld [vmem:[%s1538_s2] ss:$0 sm:$0xff] (!%p138_p2)  ;;  %s1410_s24 = smov (!%p138_p2), 0  }
   0x6   : > { %141 = sbr.rel (%p138_p2) target bundleno = 301 (0x12d), region = 32 }
   0xd   : > { %s1541_s13 = smov (!%p161_p3, %s1062_s13), 1 }
   0xe   : > { %s1309_s16 = smul.u32 448, %s1541_s13 }
   0xf   : > { %s1310_s17 = smul.u32 416, %s1541_s13 }
  0x10   : > { %s1403_s20 = scalar_lea.vmem %s1536_s0, %s1309_s16 }
  0x11   : > { %s1408_s23 = scalar_lea.vmem %s1539_s3, %s1310_s17 }
  0x12 LB: >> { %v1327_v1 = vld [vmem:[%s1537_s1 + $0x40] sm:$0xff]   ;;  %v1328_v2 = vld [vmem:[%s1537_s1 + $0x10] sm:$0xff]   ;;  %v1329_v3 = vld [vmem:[%s1537_s1 + $0x48] sm:$0xff]   ;;  %s1163_s4 = sshll.u32 %s1365_s24, 4  ;;  %vm205_vm0 = vsmask.f32 7424  ;;  %s1365_s24 = sphi %s1410_s24, %s178_s24  }
  0x13   : >> { %1237 = vmatprep.subr.bf16.mxu0 %v1327_v1  ;;  %1205 = vmatprep.subr.bf16.mxu1 %v1328_v2  ;;  %v1330_v4 = vld [vmem:[%s1537_s1 + $0x18] sm:$0xff]   ;;  %s1431_s7 = scalar_lea.vmem %s1403_s20, %s1163_s4  ;;  %vm233_vm1 = vcmask 261120   ;;  %v1335_v19 = vld [vmem:[%s1537_s1 + $0x50] sm:$0xff]   ;;  %v1336_v20 = vld [vmem:[%s1537_s1] sm:$0xff]   ;;  %vm359_vm2 = vcmask 1046528   ;;  %s985_s15 = scalar_lea.vmem %s1408_s23, %s1163_s4  ;;  %vm986_vm3 = vcmask 257024  }
  0x14   : >> { %1238 = vmatpush3.bf16.msra.mxu0 %v1327_v1  ;;  %1206 = vmatpush3.bf16.msra.mxu1 %v1328_v2  ;;  %v1331_v5 = vld [vmem:[%s1431_s7] sm:$0xff]   ;;  %v1435_v6 = vld [vmem:[%s1431_s7 + $0x8] sm:$0x3f]   ;;  %v1440_v11 = vld [vmem:[%s1431_s7 + $0x10] sm:$0xff]   ;;  %vm990_vm4 = vcmask 253952   ;;  %s178_s24 = sadd.s32 1, %s1365_s24  }
  0x15   : >> { %1239 = vmatprep.subr.bf16.mxu0 %v1329_v3  ;;  %1207 = vmatprep.subr.bf16.mxu1 %v1330_v4  ;;  %v207_v7 = vshrl.u32 %v1331_v5, 16  ;;  %v209_v8 = vshll.u32 %v1331_v5, 16  ;;  %v214_v9 = vshll.u32 %v1435_v6, 16  ;;  %v218_v10 = vshrl.u32 %v1435_v6, 16  ;;  %v1443_v12 = vld [vmem:[%s1431_s7 + $0x18] sm:$0x3f]  }
  0x16   : >> { %v533_v15 = vshrl.u32 %v1440_v11, 16  ;;  %v535_v16 = vshll.u32 %v1440_v11, 16  ;;  %v539_v17 = vshll.u32 %v1443_v12, 16  ;;  %v543_v18 = vshrl.u32 %v1443_v12, 16  ;;  %v1338_v25 = vld [vmem:[%s1537_s1 + $0x8] sm:$0xff]   ;;  %v1337_v32 = vld [vmem:[%s1537_s1 + $0x58] sm:$0xff]  }
  0x17   : >> { %v211_v13 = vrot.slane %v209_v8, 1  ;;  %v216_v14 = vrot.slane %v214_v9, 1  ;;  %v622_v27 = vrot.slane %v1440_v11, 1  ;;  %v623_v28 = vrot.slane %v1443_v12, 1  ;;  %v1340_v34 = vld [vmem:[%s1537_s1 + $0x20] sm:$0xff]   ;;  %v1342_v38 = vld [vmem:[%s1537_s1 + $0x28] sm:$0xff]  }
  0x18   : >> { %1240 = vmatpush3.bf16.msra.mxu0 %v1329_v3  ;;  %1208 = vmatpush3.bf16.msra.mxu1 %v1330_v4  ;;  %v537_v23 = vrot.slane %v535_v16, 1  ;;  %v541_v24 = vrot.slane %v539_v17, 1  ;;  %v1339_v35 = vld [vmem:[%s1537_s1 + $0x60] sm:$0xff]   ;;  %v360_v36 = vrot.slane %v1331_v5, 1  ;;  %v361_v37 = vrot.slane %v1435_v6, 1  ;;  %v1341_v41 = vld [vmem:[%s1537_s1 + $0x68] sm:$0xff]  }
  0x19   : >> { %v212_v21 = vor.u32 %v211_v13, %v207_v7  ;;  %v220_v22 = vor.u32 %v218_v10, %v216_v14  ;;  %1245 = vmatprep.subr.bf16.mxu0 %v1335_v19  ;;  %1213 = vmatprep.subr.bf16.mxu1 %v1336_v20  ;;  %v624_v33 = vsel %vm359_vm2, %v622_v27, %v623_v28  ;;  %v1343_v40 = vld [vmem:[%s1431_s7 + $0x20] sm:$0xff]   ;;  %v1346_v43 = vld [vmem:[%s1537_s1 + $0x30] sm:$0xff]   ;;  %v1345_v44 = vld [vmem:[%s1431_s7 + $0x28] sm:$0x3f]   ;;  %p175_p4 = scmp.ge.s32.totalorder %s178_s24, 26  }
  0x1a   : >> { %v538_v29 = vor.u32 %v537_v23, %v533_v15  ;;  %v545_v30 = vor.u32 %v543_v18, %v541_v24  ;;  %v362_v39 = vsel %vm359_vm2, %v360_v36, %v361_v37  ;;  %v797_v42 = vshll.u32 %v1343_v40, 16  ;;  %v1344_v45 = vld [vmem:[%s1537_s1 + $0x70] sm:$0xff]   ;;  %v1348_v51 = vld [vmem:[%s1537_s1 + $0x38] sm:$0xff]   ;;  %v1349_v54 = vld [vmem:[%s1537_s1 + $0x80] sm:$0xff]  }
  0x1b   : >> { %v217_v26 = vsel %vm205_vm0, %v212_v21, %v216_v14  ;;  %v795_v46 = vshrl.u32 %v1343_v40, 16  ;;  %v801_v48 = vshll.u32 %v1345_v44, 16  ;;  %v1347_v52 = vld [vmem:[%s1537_s1 + $0x78] sm:$0xff]   ;;  %v805_v55 = vshrl.u32 %v1345_v44, 16  ;;  %v1350_v59 = vld [vmem:[%s1537_s1 + $0x88] sm:$0xff]  }
  0x1c   : >> { %1209 = vmatprep.mubr.msk.bf16.mxu1 %vm233_vm1, %v217_v26  ;;  %v542_v31 = vsel %vm205_vm0, %v538_v29, %v541_v24  ;;  %v799_v47 = vrot.slane %v797_v42, 1  ;;  %v884_v56 = vrot.slane %v1343_v40, 1  ;;  %v885_v57 = vrot.slane %v1345_v44, 1 }
  0x1d   : >> { %1210 = vmatmul.mubr.msk.bf16.vlgmr.msra.gmra.mrb[0].mxu1 %vm233_vm1, %v220_v22  ;;  %1241 = vmatprep.mubr.msk.bf16.mxu0 %vm233_vm1, %v542_v31  ;;  %v803_v50 = vrot.slane %v801_v48, 1 }
  0x1e   : >> { %1214 = vmatpush3.bf16.msra.mxu1 %v1336_v20  ;;  %1217 = vmatprep.mubr.msk.bf16.mxu1 %vm233_vm1, %v1331_v5  ;;  %v800_v49 = vor.u32 %v799_v47, %v795_v46  ;;  %v886_v60 = vsel %vm359_vm2, %v884_v56, %v885_v57 }
  0x1f   : >> { %1215 = vmatprep.subr.bf16.mxu1 %v1338_v25  ;;  %1242 = vmatmul.mubr.msk.bf16.vlgmr.msra.gmra.mrb[0].mxu0 %vm233_vm1, %v545_v30  ;;  %v807_v58 = vor.u32 %v805_v55, %v803_v50 }
  0x20   : >> { %1246 = vmatpush3.bf16.msra.mxu0 %v1335_v19  ;;  %1249 = vmatprep.mubr.msk.bf16.mxu0 %vm233_vm1, %v624_v33  ;;  %v804_v53 = vsel %vm205_vm0, %v800_v49, %v803_v50 }
  0x21   : >> { %1247 = vmatprep.subr.bf16.mxu0 %v1337_v32 }
  0x22   : >> { %1216 = vmatpush3.bf16.msra.mxu1 %v1338_v25 }
  0x23   : >> { %1221 = vmatprep.subr.bf16.mxu1 %v1340_v34 }
  0x24   : >> { %1248 = vmatpush3.bf16.msra.mxu0 %v1337_v32 }
  0x25   : >> { %1253 = vmatprep.subr.bf16.mxu0 %v1339_v35 }
  0x29   : >> { %1218 = vmatmul.mubr.msk.bf16.vlgmr.msra.gmra.mrb[0].mxu1 %vm233_vm1, %v1435_v6 }
  0x2a   : >> { %1222 = vmatpush3.bf16.msra.mxu1 %v1340_v34  ;;  %1225 = vmatprep.mubr.msk.bf16.mxu1 %vm233_vm1, %v362_v39 }
  0x2b   : >> { %1223 = vmatprep.subr.bf16.mxu1 %v1342_v38  ;;  %1250 = vmatmul.mubr.msk.bf16.vlgmr.msra.gmra.mrb[0].mxu0 %vm233_vm1, %v623_v28 }
  0x2c   : >> { %1254 = vmatpush3.bf16.msra.mxu0 %v1339_v35  ;;  %1257 = vmatprep.mubr.msk.bf16.mxu0 %vm233_vm1, %v1343_v40 }
  0x2d   : >> { %1255 = vmatprep.subr.bf16.mxu0 %v1341_v41 }
  0x2e   : >> { %1224 = vmatpush3.bf16.msra.mxu1 %v1342_v38 }
  0x2f   : >> { %1229 = vmatprep.subr.bf16.mxu1 %v1346_v43 }
  0x30   : >> { %1256 = vmatpush3.bf16.msra.mxu0 %v1341_v41 }
  0x31   : >> { %1261 = vmatprep.subr.bf16.mxu0 %v1344_v45 }
  0x35   : >> { %1226 = vmatmul.mubr.msk.bf16.vlgmr.msra.gmra.mrb[0].mxu1 %vm233_vm1, %v361_v37 }
  0x36   : >> { %1230 = vmatpush3.bf16.msra.mxu1 %v1346_v43  ;;  %1233 = vmatprep.mubr.msk.bf16.mxu1 %vm233_vm1, %v1440_v11 }
  0x37   : >> { %1231 = vmatprep.subr.bf16.mxu1 %v1348_v51  ;;  %1258 = vmatmul.mubr.msk.bf16.vlgmr.msra.gmra.mrb[0].mxu0 %vm233_vm1, %v1345_v44 }
  0x38   : >> { %1262 = vmatpush3.bf16.msra.mxu0 %v1344_v45  ;;  %1265 = vmatprep.mubr.msk.bf16.mxu0 %vm233_vm1, %v804_v53 }
  0x39   : >> { %1263 = vmatprep.subr.bf16.mxu0 %v1347_v52 }
  0x3a   : >> { %1232 = vmatpush3.bf16.msra.mxu1 %v1348_v51 }
  0x3c   : >> { %1264 = vmatpush3.bf16.msra.mxu0 %v1347_v52 }
  0x3d   : >> { %1269 = vmatprep.subr.bf16.mxu0 %v1349_v54 }
  0x41   : >> { %1234 = vmatmul.mubr.msk.bf16.vlgmr.msra.gmra.mrb[0].mxu1 %vm233_vm1, %v1443_v12 }
  0x43   : >> { %1266 = vmatmul.mubr.msk.bf16.vlgmr.msra.gmra.mrb[0].mxu0 %vm233_vm1, %v807_v58 }
  0x44   : >> { %1270 = vmatpush3.bf16.msra.mxu0 %v1349_v54  ;;  %1273 = vmatprep.mubr.msk.bf16.mxu0 %vm233_vm1, %v886_v60 }
  0x45   : >> { %1271 = vmatprep.subr.bf16.mxu0 %v1350_v59 }
  0x48   : >> { %1272 = vmatpush3.bf16.msra.mxu0 %v1350_v59 }
  0x4f   : >> { %1274 = vmatmul.mubr.msk.bf16.vlgmr.msra.gmra.mrb[0].mxu0 %vm233_vm1, %v885_v57 }
 0x114   : >> { %v1235_v61 = vpop.f32.mrb[0].mxu1 }
 0x115   : >> { %v509_v62 = vpop.f32.mrb[1].mxu1 }
 0x116   : >> { %v1236_v63 = vpop.f32.mrb[2].mxu1 }
 0x117   : >> { %v512_v1 = vpop.f32.mrb[3].mxu1 }
 0x122   : >> { %v1275_v2 = vpop.f32.mrb[0].mxu0 }
 0x123   : >> { %v1277_v3 = vadd.f32 %v1275_v2, %v1235_v61  ;;  %v939_v4 = vpop.f32.mrb[1].mxu0 }
 0x124   : >> { %v1278_v5 = vadd.f32 %v939_v4, %v509_v62  ;;  %v1276_v6 = vpop.f32.mrb[2].mxu0 }
 0x125   : >> { %v966_v7 = vadd.f32 %v1277_v3, %v1398_v0  ;;  %v1279_v8 = vadd.f32 %v1276_v6, %v1236_v63  ;;  %v942_v9 = vpop.f32.mrb[3].mxu0 }
 0x126   : >> { %v964_v10 = vadd.f32 %v1278_v5, %v1398_v0  ;;  %v1280_v11 = vadd.f32 %v942_v9, %v512_v1  ;;  %177 = sbr.rel (!%p175_p4) target bundleno = 18 (0x12), region = 81 }
 0x127   : >> { %v1166_v12 = vpack.c.bf16 %v966_v7, %v966_v7  ;;  %v967_v13 = vadd.f32 %v1279_v8, %v1398_v0 }
 0x128   : >> { %v1164_v14 = vpack.c.bf16 %v964_v10, %v964_v10  ;;  %v965_v15 = vadd.f32 %v1280_v11, %v1398_v0 }
 0x129   : >> { %989 = vst.msk [vmem:[%s985_s15 + $0x8] sm:$0xf] %vm986_vm3, %v1166_v12  ;;  %v1167_v16 = vpack.c.bf16 %v967_v13, %v967_v13 }
 0x12a   : >> { %987 = vst.msk [vmem:[%s985_s15] sm:$0xf] %vm986_vm3, %v1164_v14  ;;  %v1165_v17 = vpack.c.bf16 %v965_v15, %v965_v15 }
 0x12b   : >> { %991 = vst.msk [vmem:[%s985_s15 + $0xc] sm:$0x1] %vm990_vm4, %v1167_v16 }
 0x12c   : >> { %988 = vst.msk [vmem:[%s985_s15 + $0x4] sm:$0xf] %vm986_vm3, %v1165_v17 }
 0x12d PF: > { %s13_s12 = sadd.s32 1, %s1361_s12  }
 0x12e   : > { %p10_p5 = scmp.ge.s32.totalorder %s13_s12, 4  }
 0x130   :  { %12 = sbr.rel (!%p10_p5) target bundleno = 1 (0x1), region = 92 }

// kernel: unet_forward.20
= control target key start
LH: loop header
LB: loop body
LE: loop exit
PB: predicated region body
PF: predicated region fallthrough
CT: control target
= control target key end

     0   :  { %s502_s6 = smov 0   ;;  %s791_s0 = inlined_call_operand.vmem [shape: bf16[2,13,2,13,64], index: 0, kind: input, shape index: {}]   ;;  %s792_s1 = inlined_call_operand.vmem [shape: bf16[2,13,13,32], index: 1, kind: output, shape index: {}]  }
   0x1 LB: > { %s437_s7 = sadd.s32 4294967295, %s489_s6   ;;  %p441_p0 = scmp.ge.s32.totalorder %s489_s6, 1  ;;  %s489_s6 = sphi %s502_s6, %s11_s6  }
   0x2   : > { %p87_p1 = scmp.lt.s32.totalorder %s489_s6, 3 }
   0x4   : > { %p88_p2 = pnand %p441_p0, %p87_p1 }
   0x5   : > { %p107_p3 = scmp.lt.s32.totalorder (!%p88_p2), %s437_s7, 1  ;;  %s491_s12 = smov (!%p88_p2), 96   ;;  %vm328_vm0 = vcmask (!%p88_p2), 256000   ;;  %vm329_vm1 = vsmask.f32 (!%p88_p2), 2304  ;;  %vm326_vm3 = vcmask (!%p88_p2), 257024  }
   0x6   : > { %91 = sbr.rel (%p88_p2) target bundleno = 187 (0xbb), region = 24  ;;  %vm680_vm2 = vmand (!%p88_p2), %vm328_vm0, %vm329_vm1 }
   0xd   : > { %s796_s7 = smov (!%p107_p3, %s437_s7), 1 }
   0xe   : > { %s472_s8 = smul.u32 208, %s796_s7 }
   0xf   : > { %s473_s13 = smul.u32 104, %s796_s7 }
  0x10   : > { %s516_s11 = scalar_lea.vmem %s791_s0, %s472_s8 }
  0x11   : > { %v122_v0 = vld [vmem:[%s516_s11 + $0x24] sm:$0x7]  ;;  %v449_v1 = vld [vmem:[%s516_s11 + $0x2c] sm:$0x7]  ;;  %v124_v5 = vld [vmem:[%s516_s11 + $0x34] sm:$0x7]  ;;  %s678_s16 = scalar_lea.vmem %s792_s1, %s473_s13 }
  0x12   : > { %v118_v2 = vld [vmem:[%s516_s11 + $0x4] sm:$0x7]  ;;  %v521_v3 = vmax.bf16 %v449_v1, %v122_v0  ;;  %v445_v4 = vld [vmem:[%s516_s11 + $0xc] sm:$0x7]  ;;  %v451_v6 = vld [vmem:[%s516_s11 + $0x3c] sm:$0x7] }
  0x13   : > { %v526_v7 = vmax.bf16 %v445_v4, %v118_v2  ;;  %v120_v8 = vld [vmem:[%s516_s11 + $0x14] sm:$0x7]  ;;  %v447_v9 = vld [vmem:[%s516_s11 + $0x1c] sm:$0x7]  ;;  %v532_v10 = vmax.bf16 %v451_v6, %v124_v5  ;;  %v126_v14 = vld [vmem:[%s516_s11 + $0x44] sm:$0x7] }
  0x14   : > { %232 = vrot.lane.b32.xlu1 %v521_v3, %s491_s12  ;;  %v536_v11 = vmax.bf16 %v447_v9, %v120_v8  ;;  %v128_v12 = vld [vmem:[%s516_s11 + $0x54] sm:$0x7]  ;;  %v455_v13 = vld [vmem:[%s516_s11 + $0x5c] sm:$0x7]  ;;  %v453_v15 = vld [vmem:[%s516_s11 + $0x4c] sm:$0x7] }
  0x15   : > { %224 = vrot.lane.b32.xlu0 %v526_v7, %s491_s12  ;;  %v544_v16 = vmax.bf16 %v455_v13, %v128_v12  ;;  %v548_v17 = vmax.bf16 %v453_v15, %v126_v14  ;;  %v132_v18 = vld [vmem:[%s516_s11 + $0x74] sm:$0x7]  ;;  %v459_v19 = vld [vmem:[%s516_s11 + $0x7c] sm:$0x7]  ;;  %v130_v20 = vld [vmem:[%s516_s11 + $0x64] sm:$0x7] }
  0x16   : > { %v457_v21 = vld [vmem:[%s516_s11 + $0x6c] sm:$0x7]  ;;  %v556_v22 = vmax.bf16 %v459_v19, %v132_v18  ;;  %v136_v24 = vld [vmem:[%s516_s11 + $0x94] sm:$0x7]  ;;  %v463_v25 = vld [vmem:[%s516_s11 + $0x9c] sm:$0x7] }
  0x17   : > { %v560_v23 = vmax.bf16 %v457_v21, %v130_v20  ;;  %v134_v26 = vld [vmem:[%s516_s11 + $0x84] sm:$0x7]  ;;  %v461_v27 = vld [vmem:[%s516_s11 + $0x8c] sm:$0x7]  ;;  %v568_v28 = vmax.bf16 %v463_v25, %v136_v24  ;;  %v140_v30 = vld [vmem:[%s516_s11 + $0xb4] sm:$0x7] }
  0x18   : > { %236 = vrot.lane.b32.xlu1 %v532_v10, %s491_s12  ;;  %v572_v29 = vmax.bf16 %v461_v27, %v134_v26  ;;  %v467_v31 = vld [vmem:[%s516_s11 + $0xbc] sm:$0x7]  ;;  %v138_v32 = vld [vmem:[%s516_s11 + $0xa4] sm:$0x7]  ;;  %v465_v33 = vld [vmem:[%s516_s11 + $0xac] sm:$0x7] }
  0x19   : > { %228 = vrot.lane.b32.xlu0 %v536_v11, %s491_s12  ;;  %v580_v34 = vmax.bf16 %v467_v31, %v140_v30  ;;  %v584_v35 = vmax.bf16 %v465_v33, %v138_v32  ;;  %v117_v36 = vld [vmem:[%s516_s11] sm:$0xf]  ;;  %v444_v37 = vld [vmem:[%s516_s11 + $0x8] sm:$0xf]  ;;  %v142_v38 = vld [vmem:[%s516_s11 + $0xc4] sm:$0x7] }
  0x1a   : > { %v469_v39 = vld [vmem:[%s516_s11 + $0xcc] sm:$0x7]  ;;  %v592_v40 = vmax.bf16 %v444_v37, %v117_v36  ;;  %v121_v42 = vld [vmem:[%s516_s11 + $0x20] sm:$0xf]  ;;  %v448_v43 = vld [vmem:[%s516_s11 + $0x28] sm:$0xf] }
  0x1b   : > { %v596_v41 = vmax.bf16 %v469_v39, %v142_v38  ;;  %v119_v44 = vld [vmem:[%s516_s11 + $0x10] sm:$0xf]  ;;  %v446_v45 = vld [vmem:[%s516_s11 + $0x18] sm:$0xf]  ;;  %v604_v46 = vmax.bf16 %v448_v43, %v121_v42  ;;  %v125_v48 = vld [vmem:[%s516_s11 + $0x40] sm:$0xf] }
  0x1c   : > { %244 = vrot.lane.b32.xlu1 %v544_v16, %s491_s12  ;;  %v608_v47 = vmax.bf16 %v446_v45, %v119_v44  ;;  %v452_v49 = vld [vmem:[%s516_s11 + $0x48] sm:$0xf]  ;;  %v123_v50 = vld [vmem:[%s516_s11 + $0x30] sm:$0xf]  ;;  %v450_v51 = vld [vmem:[%s516_s11 + $0x38] sm:$0xf] }
  0x1d   : > { %240 = vrot.lane.b32.xlu0 %v548_v17, %s491_s12  ;;  %v616_v52 = vmax.bf16 %v452_v49, %v125_v48  ;;  %v620_v53 = vmax.bf16 %v450_v51, %v123_v50  ;;  %v129_v54 = vld [vmem:[%s516_s11 + $0x60] sm:$0xf]  ;;  %v456_v55 = vld [vmem:[%s516_s11 + $0x68] sm:$0xf]  ;;  %v127_v56 = vld [vmem:[%s516_s11 + $0x50] sm:$0xf] }
  0x1e   : > { %v454_v57 = vld [vmem:[%s516_s11 + $0x58] sm:$0xf]  ;;  %v628_v58 = vmax.bf16 %v456_v55, %v129_v54  ;;  %v133_v60 = vld [vmem:[%s516_s11 + $0x80] sm:$0xf]  ;;  %v460_v61 = vld [vmem:[%s516_s11 + $0x88] sm:$0xf] }
  0x1f   : > { %v632_v59 = vmax.bf16 %v454_v57, %v127_v56  ;;  %v131_v62 = vld [vmem:[%s516_s11 + $0x70] sm:$0xf]  ;;  %v458_v63 = vld [vmem:[%s516_s11 + $0x78] sm:$0xf]  ;;  %v640_v0 = vmax.bf16 %v460_v61, %v133_v60  ;;  %v137_v2 = vld [vmem:[%s516_s11 + $0xa0] sm:$0xf] }
  0x20   : > { %252 = vrot.lane.b32.xlu1 %v556_v22, %s491_s12  ;;  %v644_v1 = vmax.bf16 %v458_v63, %v131_v62  ;;  %v464_v4 = vld [vmem:[%s516_s11 + $0xa8] sm:$0xf]  ;;  %v135_v5 = vld [vmem:[%s516_s11 + $0x90] sm:$0xf]  ;;  %v462_v6 = vld [vmem:[%s516_s11 + $0x98] sm:$0xf] }
  0x21   : > { %248 = vrot.lane.b32.xlu0 %v560_v23, %s491_s12  ;;  %v652_v8 = vmax.bf16 %v464_v4, %v137_v2  ;;  %v656_v9 = vmax.bf16 %v462_v6, %v135_v5  ;;  %v141_v12 = vld [vmem:[%s516_s11 + $0xc0] sm:$0xf]  ;;  %v468_v13 = vld [vmem:[%s516_s11 + $0xc8] sm:$0xf]  ;;  %v139_v14 = vld [vmem:[%s516_s11 + $0xb0] sm:$0xf] }
  0x22   : > { %v466_v15 = vld [vmem:[%s516_s11 + $0xb8] sm:$0xf]  ;;  %v664_v18 = vmax.bf16 %v468_v13, %v141_v12  ;;  %v339_v21 = vld [vmem:[%s678_s16 + $0x14] sm:$0x7]  ;;  %v331_v26 = vld [vmem:[%s678_s16 + $0x4] sm:$0x7] }
  0x23   : > { %v668_v19 = vmax.bf16 %v466_v15, %v139_v14  ;;  %v343_v33 = vld [vmem:[%s678_s16 + $0x1c] sm:$0x7]  ;;  %v335_v37 = vld [vmem:[%s678_s16 + $0xc] sm:$0x7]  ;;  %v347_v45 = vld [vmem:[%s678_s16 + $0x24] sm:$0x7] }
  0x24   : > { %260 = vrot.lane.b32.xlu1 %v568_v28, %s491_s12  ;;  %v351_v43 = vld [vmem:[%s678_s16 + $0x2c] sm:$0x7]  ;;  %v359_v51 = vld [vmem:[%s678_s16 + $0x3c] sm:$0x7]  ;;  %v355_v55 = vld [vmem:[%s678_s16 + $0x34] sm:$0x7] }
  0x25   : > { %256 = vrot.lane.b32.xlu0 %v572_v29, %s491_s12  ;;  %v367_v61 = vld [vmem:[%s678_s16 + $0x4c] sm:$0x7]  ;;  %v363_v63 = vld [vmem:[%s678_s16 + $0x44] sm:$0x7]  ;;  %v375_v6 = vld [vmem:[%s678_s16 + $0x5c] sm:$0x7] }
  0x28   : > { %268 = vrot.lane.b32.xlu1 %v580_v34, %s491_s12 }
  0x29   : > { %264 = vrot.lane.b32.xlu0 %v584_v35, %s491_s12 }
  0x2c   : > { %222 = vrot.lane.b32.xlu1 %v592_v40, %s491_s12 }
  0x2d   : > { %272 = vrot.lane.b32.xlu0 %v596_v41, %s491_s12 }
  0x30   : > { %230 = vrot.lane.b32.xlu1 %v604_v46, %s491_s12 }
  0x31   : > { %226 = vrot.lane.b32.xlu0 %v608_v47, %s491_s12 }
  0x34   : > { %238 = vrot.lane.b32.xlu1 %v616_v52, %s491_s12 }
  0x35   : > { %234 = vrot.lane.b32.xlu0 %v620_v53, %s491_s12 }
  0x38   : > { %246 = vrot.lane.b32.xlu1 %v628_v58, %s491_s12 }
  0x39   : > { %242 = vrot.lane.b32.xlu0 %v632_v59, %s491_s12 }
  0x3c   : > { %254 = vrot.lane.b32.xlu1 %v640_v0, %s491_s12 }
  0x3d   : > { %250 = vrot.lane.b32.xlu0 %v644_v1, %s491_s12 }
  0x40   : > { %262 = vrot.lane.b32.xlu1 %v652_v8, %s491_s12 }
  0x41   : > { %258 = vrot.lane.b32.xlu0 %v656_v9, %s491_s12 }
  0x44   : > { %270 = vrot.lane.b32.xlu1 %v664_v18, %s491_s12 }
  0x45   : > { %266 = vrot.lane.b32.xlu0 %v668_v19, %s491_s12 }
  0x86   : > { %v233_v24 = vpop.permute.xlu1 %232 }
  0x87   : > { %v305_v25 = vmax.bf16 %v233_v24, %v521_v3  ;;  %v225_v27 = vpop.permute.xlu0 %224 }
  0x88   : > { %v301_v30 = vmax.bf16 %v225_v27, %v526_v7 }
  0x89   : > { %v340_v31 = vsel %vm680_vm2, %v305_v25, %v339_v21  ;;  %v379_v25 = vld [vmem:[%s678_s16 + $0x64] sm:$0x7] }
  0x8a   : > { %341 = vst [vmem:[%s678_s16 + $0x14] sm:$0x7] %v340_v31  ;;  %v332_v32 = vsel %vm680_vm2, %v301_v30, %v331_v26  ;;  %v237_v36 = vpop.permute.xlu1 %236 }
  0x8b   : > { %333 = vst [vmem:[%s678_s16 + $0x4] sm:$0x7] %v332_v32  ;;  %v307_v3 = vmax.bf16 %v237_v36, %v532_v10  ;;  %v229_v38 = vpop.permute.xlu0 %228 }
  0x8c   : > { %v303_v7 = vmax.bf16 %v229_v38, %v536_v11 }
  0x8d   : > { %v344_v39 = vsel %vm680_vm2, %v307_v3, %v343_v33 }
  0x8e   : > { %345 = vst [vmem:[%s678_s16 + $0x1c] sm:$0x7] %v344_v39  ;;  %v336_v42 = vsel %vm680_vm2, %v303_v7, %v335_v37  ;;  %v245_v44 = vpop.permute.xlu1 %244 }
  0x8f   : > { %337 = vst [vmem:[%s678_s16 + $0xc] sm:$0x7] %v336_v42  ;;  %v311_v10 = vmax.bf16 %v245_v44, %v544_v16  ;;  %v241_v48 = vpop.permute.xlu0 %240 }
  0x90   : > { %v309_v11 = vmax.bf16 %v241_v48, %v548_v17 }
  0x91   : > { %v352_v49 = vsel %vm680_vm2, %v311_v10, %v351_v43 }
  0x92   : > { %353 = vst [vmem:[%s678_s16 + $0x2c] sm:$0x7] %v352_v49  ;;  %v348_v50 = vsel %vm680_vm2, %v309_v11, %v347_v45  ;;  %v253_v54 = vpop.permute.xlu1 %252 }
  0x93   : > { %349 = vst [vmem:[%s678_s16 + $0x24] sm:$0x7] %v348_v50  ;;  %v315_v16 = vmax.bf16 %v253_v54, %v556_v22  ;;  %v249_v56 = vpop.permute.xlu0 %248 }
  0x94   : > { %v313_v17 = vmax.bf16 %v249_v56, %v560_v23 }
  0x95   : > { %v360_v57 = vsel %vm680_vm2, %v315_v16, %v359_v51 }
  0x96   : > { %361 = vst [vmem:[%s678_s16 + $0x3c] sm:$0x7] %v360_v57  ;;  %v356_v60 = vsel %vm680_vm2, %v313_v17, %v355_v55  ;;  %v261_v62 = vpop.permute.xlu1 %260 }
  0x97   : > { %357 = vst [vmem:[%s678_s16 + $0x34] sm:$0x7] %v356_v60  ;;  %v319_v22 = vmax.bf16 %v261_v62, %v568_v28  ;;  %v257_v2 = vpop.permute.xlu0 %256  ;;  %v371_v28 = vld [vmem:[%s678_s16 + $0x54] sm:$0x7] }
  0x98   : > { %v317_v4 = vmax.bf16 %v257_v2, %v572_v29 }
  0x99   : > { %v368_v23 = vsel %vm680_vm2, %v319_v22, %v367_v61 }
  0x9a   : > { %369 = vst [vmem:[%s678_s16 + $0x4c] sm:$0x7] %v368_v23  ;;  %v364_v5 = vsel %vm680_vm2, %v317_v4, %v363_v63  ;;  %v269_v12 = vpop.permute.xlu1 %268 }
  0x9b   : > { %365 = vst [vmem:[%s678_s16 + $0x44] sm:$0x7] %v364_v5  ;;  %v323_v13 = vmax.bf16 %v269_v12, %v580_v34  ;;  %v265_v14 = vpop.permute.xlu0 %264 }
  0x9c   : > { %v321_v29 = vmax.bf16 %v265_v14, %v584_v35 }
  0x9d   : > { %v376_v15 = vsel %vm680_vm2, %v323_v13, %v375_v6 }
  0x9e   : > { %377 = vst [vmem:[%s678_s16 + $0x5c] sm:$0x7] %v376_v15  ;;  %v372_v21 = vsel %vm680_vm2, %v321_v29, %v371_v28  ;;  %v223_v24 = vpop.permute.xlu1 %222 }
  0x9f   : > { %373 = vst [vmem:[%s678_s16 + $0x54] sm:$0x7] %v372_v21  ;;  %v273_v26 = vpop.permute.xlu0 %272  ;;  %v300_v34 = vmax.bf16 %v223_v24, %v592_v40 }
  0xa0   : > { %v325_v35 = vmax.bf16 %v273_v26, %v596_v41 }
  0xa1   : > { %327 = vst.msk [vmem:[%s678_s16] sm:$0xf] %vm326_vm3, %v300_v34 }
  0xa2   : > { %v380_v27 = vsel %vm680_vm2, %v325_v35, %v379_v25  ;;  %v231_v30 = vpop.permute.xlu1 %230 }
  0xa3   : > { %381 = vst [vmem:[%s678_s16 + $0x64] sm:$0x7] %v380_v27  ;;  %v227_v31 = vpop.permute.xlu0 %226  ;;  %v304_v32 = vmax.bf16 %v231_v30, %v604_v46 }
  0xa4   : > { %v302_v33 = vmax.bf16 %v227_v31, %v608_v47 }
  0xa5   : > { %338 = vst.msk [vmem:[%s678_s16 + $0x10] sm:$0xf] %vm326_vm3, %v304_v32 }
  0xa6   : > { %334 = vst.msk [vmem:[%s678_s16 + $0x8] sm:$0xf] %vm326_vm3, %v302_v33  ;;  %v239_v40 = vpop.permute.xlu1 %238 }
  0xa7   : > { %v235_v41 = vpop.permute.xlu0 %234  ;;  %v308_v20 = vmax.bf16 %v239_v40, %v616_v52 }
  0xa8   : > { %v306_v36 = vmax.bf16 %v235_v41, %v620_v53 }
  0xa9   : > { %346 = vst.msk [vmem:[%s678_s16 + $0x20] sm:$0xf] %vm326_vm3, %v308_v20 }
  0xaa   : > { %342 = vst.msk [vmem:[%s678_s16 + $0x18] sm:$0xf] %vm326_vm3, %v306_v36  ;;  %v247_v3 = vpop.permute.xlu1 %246 }
  0xab   : > { %v243_v46 = vpop.permute.xlu0 %242  ;;  %v312_v47 = vmax.bf16 %v247_v3, %v628_v58 }
  0xac   : > { %v310_v37 = vmax.bf16 %v243_v46, %v632_v59 }
  0xad   : > { %354 = vst.msk [vmem:[%s678_s16 + $0x30] sm:$0xf] %vm326_vm3, %v312_v47 }
  0xae   : > { %350 = vst.msk [vmem:[%s678_s16 + $0x28] sm:$0xf] %vm326_vm3, %v310_v37  ;;  %v255_v38 = vpop.permute.xlu1 %254 }
  0xaf   : > { %v251_v52 = vpop.permute.xlu0 %250  ;;  %v316_v53 = vmax.bf16 %v255_v38, %v640_v0 }
  0xb0   : > { %v314_v7 = vmax.bf16 %v251_v52, %v644_v1 }
  0xb1   : > { %362 = vst.msk [vmem:[%s678_s16 + $0x40] sm:$0xf] %vm326_vm3, %v316_v53 }
  0xb2   : > { %358 = vst.msk [vmem:[%s678_s16 + $0x38] sm:$0xf] %vm326_vm3, %v314_v7  ;;  %v263_v39 = vpop.permute.xlu1 %262 }
  0xb3   : > { %v259_v58 = vpop.permute.xlu0 %258  ;;  %v320_v59 = vmax.bf16 %v263_v39, %v652_v8 }
  0xb4   : > { %v318_v42 = vmax.bf16 %v259_v58, %v656_v9 }
  0xb5   : > { %370 = vst.msk [vmem:[%s678_s16 + $0x50] sm:$0xf] %vm326_vm3, %v320_v59 }
  0xb6   : > { %366 = vst.msk [vmem:[%s678_s16 + $0x48] sm:$0xf] %vm326_vm3, %v318_v42  ;;  %v271_v43 = vpop.permute.xlu1 %270 }
  0xb7   : > { %v267_v44 = vpop.permute.xlu0 %266  ;;  %v324_v0 = vmax.bf16 %v271_v43, %v664_v18 }
  0xb8   : > { %v322_v1 = vmax.bf16 %v267_v44, %v668_v19 }
  0xb9   : > { %378 = vst.msk [vmem:[%s678_s16 + $0x60] sm:$0xf] %vm326_vm3, %v324_v0 }
  0xba   : > { %374 = vst.msk [vmem:[%s678_s16 + $0x58] sm:$0xf] %vm326_vm3, %v322_v1 }
  0xbb PF: > { %s11_s6 = sadd.s32 1, %s489_s6  }
  0xbc   : > { %p8_p4 = scmp.ge.s32.totalorder %s11_s6, 4  }
  0xbe   :  { %10 = sbr.rel (!%p8_p4) target bundleno = 1 (0x1), region = 55 }

// kernel: unet_forward.21
= control target key start
LH: loop header
LB: loop body
LE: loop exit
PB: predicated region body
PF: predicated region fallthrough
CT: control target
= control target key end

     0   :  { %s1158_s12 = smov 0   ;;  %s1305_s0 = inlined_call_operand.vmem [shape: bf16[2,13,13,32], index: 0, kind: input, shape index: {}]   ;;  %s1306_s1 = inlined_call_operand.vmem [shape: bf16[3,3,32,64], index: 1, kind: input, shape index: {}]   ;;  %s1307_s2 = inlined_call_operand.vmem [shape: f32[1,64], index: 2, kind: input, shape index: {}]   ;;  %s1308_s3 = inlined_call_operand.vmem [shape: bf16[2,11,11,64], index: 3, kind: output, shape index: {}]  }
   0x1 LB: > { %s893_s13 = sadd.s32 4294967295, %s1130_s12   ;;  %p897_p0 = scmp.ge.s32.totalorder %s1130_s12, 1  ;;  %s1130_s12 = sphi %s1158_s12, %s13_s12  }
   0x2   : > { %p137_p1 = scmp.lt.s32.totalorder %s1130_s12, 3 }
   0x4   : > { %p138_p2 = pnand %p897_p0, %p137_p1 }
   0x5   : > { %p161_p3 = scmp.lt.s32.totalorder (!%p138_p2), %s893_s13, 1  ;;  %v1169_v0 = vld [vmem:[%s1307_s2] ss:$0 sm:$0xff] (!%p138_p2)  ;;  %s1181_s24 = smov (!%p138_p2), 0  }
   0x6   : > { %141 = sbr.rel (%p138_p2) target bundleno = 283 (0x11b), region = 32 }
   0xd   : > { %s1310_s13 = smov (!%p161_p3, %s893_s13), 1 }
   0xe   : > { %s1079_s16 = smul.u32 104, %s1310_s13 }
   0xf   : > { %s1080_s17 = smul.u32 88, %s1310_s13 }
  0x10   : > { %s1174_s20 = scalar_lea.vmem %s1305_s0, %s1079_s16 }
  0x11   : > { %s1179_s23 = scalar_lea.vmem %s1308_s3, %s1080_s17 }
  0x12 LB: >> { %v1099_v1 = vld [vmem:[%s1306_s1 + $0x10] sm:$0xff]   ;;  %v1136_v2 = vmov 0.0   ;;  %v1100_v3 = vld [vmem:[%s1306_s1] sm:$0xff]   ;;  %v1101_v4 = vld [vmem:[%s1306_s1 + $0x18] sm:$0xff]   ;;  %vm1137_vm0 = vmmov 0   ;;  %s976_s4 = sshll.u32 %s1134_s24, 3  ;;  %s1134_s24 = sphi %s1181_s24, %s178_s24  }
  0x13   : >> { %1007 = vmatprep.subr.bf16.mxu0 %v1136_v2  ;;  %1015 = vmatprep.subr.bf16.mxu1 %v1136_v2  ;;  %v1102_v5 = vld [vmem:[%s1306_s1 + $0x8] sm:$0xff]   ;;  %s1207_s7 = scalar_lea.vmem %s1174_s20, %s976_s4  ;;  %vm217_vm1 = vcmask 261120   ;;  %v1105_v9 = vld [vmem:[%s1306_s1 + $0x30] sm:$0xff]   ;;  %v1104_v11 = vld [vmem:[%s1306_s1 + $0x20] sm:$0xff]   ;;  %s814_s15 = scalar_lea.vmem %s1179_s23, %s976_s4  ;;  %vm817_vm2 = vcmask 517120   ;;  %vm815_vm4 = vcmask 519168  }
  0x14   : >> { %1008 = vmatpush3.bf16.msra.mxu0 %v1099_v1  ;;  %1011 = vmatprep.mubr.msk.bf16.mxu0 %vm1137_vm0, %v1136_v2  ;;  %v1103_v6 = vld [vmem:[%s1207_s7] sm:$0x7f]   ;;  %v1107_v13 = vld [vmem:[%s1306_s1 + $0x38] sm:$0xff]   ;;  %v1109_v14 = vld [vmem:[%s1207_s7 + $0x8] sm:$0x7f]   ;;  %s178_s24 = sadd.s32 1, %s1134_s24  }
  0x15   : >> { %1016 = vmatpush3.bf16.msra.mxu1 %v1100_v3  ;;  %1009 = vmatprep.subr.bf16.mxu0 %v1136_v2  ;;  %v199_v7 = vshrl.u32 %v1103_v6, 16  ;;  %v201_v8 = vshll.u32 %v1103_v6, 16  ;;  %v1106_v15 = vld [vmem:[%s1306_s1 + $0x28] sm:$0xff]   ;;  %v1110_v16 = vld [vmem:[%s1306_s1 + $0x50] sm:$0xff]   ;;  %v322_v17 = vrot.slane %v1103_v6, 1  ;;  %v462_v18 = vshll.u32 %v1109_v14, 16 }
  0x16   : >> { %1017 = vmatprep.subr.bf16.mxu1 %v1136_v2  ;;  %1019 = vmatprep.mubr.msk.bf16.mxu1 %vm1137_vm0, %v1136_v2  ;;  %v1108_v19 = vld [vmem:[%s1306_s1 + $0x40] sm:$0xff]   ;;  %v1112_v20 = vld [vmem:[%s1306_s1 + $0x58] sm:$0xff]   ;;  %v1117_v21 = vld [vmem:[%s1207_s7 + $0x10] sm:$0x7f]   ;;  %v460_v22 = vshrl.u32 %v1109_v14, 16  ;;  %v529_v25 = vrot.slane %v1109_v14, 1 }
  0x17   : >> { %v203_v10 = vrot.slane %v201_v8, 1  ;;  %v464_v23 = vrot.slane %v462_v18, 1  ;;  %v1111_v24 = vld [vmem:[%s1306_s1 + $0x48] sm:$0xff]   ;;  %v669_v26 = vshll.u32 %v1117_v21, 16  ;;  %v1114_v27 = vld [vmem:[%s1306_s1 + $0x70] sm:$0xff]   ;;  %v1113_v29 = vld [vmem:[%s1306_s1 + $0x60] sm:$0xff]  }
  0x18   : >> { %1010 = vmatpush3.bf16.msra.mxu0 %v1101_v4  ;;  %v667_v30 = vshrl.u32 %v1117_v21, 16  ;;  %v1116_v32 = vld [vmem:[%s1306_s1 + $0x78] sm:$0xff]   ;;  %v1115_v33 = vld [vmem:[%s1306_s1 + $0x68] sm:$0xff]   ;;  %v1118_v35 = vld [vmem:[%s1306_s1 + $0x80] sm:$0xff]   ;;  %v736_v37 = vrot.slane %v1117_v21, 1  ;;  %p175_p4 = scmp.ge.s32.totalorder %s178_s24, 11  }
  0x19   : >> { %1018 = vmatpush3.bf16.msra.mxu1 %v1102_v5  ;;  %1023 = vmatprep.subr.bf16.mxu0 %v1136_v2  ;;  %v204_v12 = vor.u32 %v203_v10, %v199_v7  ;;  %v465_v28 = vor.u32 %v464_v23, %v460_v22  ;;  %v671_v31 = vrot.slane %v669_v26, 1  ;;  %v1119_v36 = vld [vmem:[%s1306_s1 + $0x88] sm:$0xff]   ;;  %vm818_vm3 = vsmask.f32 1280 }
  0x1a   : >> { %1031 = vmatprep.subr.bf16.mxu1 %v1136_v2  ;;  %vm819_vm5 = vmand %vm817_vm2, %vm818_vm3 }
  0x1b   : >> { %1012 = vmatmul.mubr.msk.bf16.vlgmr.msra.gmra.mrb[0].mxu0 %vm217_vm1, %v204_v12  ;;  %v672_v34 = vor.u32 %v671_v31, %v667_v30 }
  0x1c   : >> { %1020 = vmatmul.mubr.msk.bf16.vlgmr.msra.gmra.mrb[0].mxu1 %vm217_vm1, %v1103_v6  ;;  %1024 = vmatpush3.bf16.msra.mxu0 %v1104_v11 }
  0x1d   : >> { %1032 = vmatpush3.bf16.msra.mxu1 %v1105_v9  ;;  %1035 = vmatprep.mubr.msk.bf16.mxu1 %vm1137_vm0, %v1136_v2 }
  0x1e   : >> { %1033 = vmatprep.subr.bf16.mxu1 %v1136_v2  ;;  %1027 = vmatprep.mubr.msk.bf16.mxu0 %vm1137_vm0, %v1136_v2 }
  0x1f   : >> { %1025 = vmatprep.subr.bf16.mxu0 %v1136_v2 }
  0x20   : >> { %1026 = vmatpush3.bf16.msra.mxu0 %v1106_v15 }
  0x21   : >> { %1034 = vmatpush3.bf16.msra.mxu1 %v1107_v13  ;;  %1039 = vmatprep.subr.bf16.mxu0 %v1136_v2 }
  0x22   : >> { %1047 = vmatprep.subr.bf16.mxu1 %v1136_v2 }
  0x23   : >> { %1028 = vmatmul.mubr.msk.bf16.vlgmr.msra.gmra.mrb[4].mxu0 %vm217_vm1, %v322_v17 }
  0x24   : >> { %1036 = vmatmul.mubr.msk.bf16.vlgmr.msra.gmra.mrb[4].mxu1 %vm217_vm1, %v1109_v14  ;;  %1040 = vmatpush3.bf16.msra.mxu0 %v1108_v19 }
  0x25   : >> { %1048 = vmatpush3.bf16.msra.mxu1 %v1110_v16  ;;  %1051 = vmatprep.mubr.msk.bf16.mxu1 %vm1137_vm0, %v1136_v2 }
  0x26   : >> { %1049 = vmatprep.subr.bf16.mxu1 %v1136_v2  ;;  %1043 = vmatprep.mubr.msk.bf16.mxu0 %vm1137_vm0, %v1136_v2 }
  0x27   : >> { %1041 = vmatprep.subr.bf16.mxu0 %v1136_v2 }
  0x28   : >> { %1042 = vmatpush3.bf16.msra.mxu0 %v1111_v24 }
  0x29   : >> { %1050 = vmatpush3.bf16.msra.mxu1 %v1112_v20  ;;  %1055 = vmatprep.subr.bf16.mxu0 %v1136_v2 }
  0x2a   : >> { %1063 = vmatprep.subr.bf16.mxu1 %v1136_v2 }
  0x2b   : >> { %1044 = vmatmul.mubr.msk.bf16.vlgmr.msra.gmra.mrb[8].mxu0 %vm217_vm1, %v465_v28 }
  0x2c   : >> { %1052 = vmatmul.mubr.msk.bf16.vlgmr.msra.gmra.mrb[8].mxu1 %vm217_vm1, %v529_v25  ;;  %1056 = vmatpush3.bf16.msra.mxu0 %v1113_v29 }
  0x2d   : >> { %1064 = vmatpush3.bf16.msra.mxu1 %v1114_v27  ;;  %1067 = vmatprep.mubr.msk.bf16.mxu1 %vm1137_vm0, %v1136_v2 }
  0x2e   : >> { %1065 = vmatprep.subr.bf16.mxu1 %v1136_v2  ;;  %1059 = vmatprep.mubr.msk.bf16.mxu0 %vm1137_vm0, %v1136_v2 }
  0x2f   : >> { %1057 = vmatprep.subr.bf16.mxu0 %v1136_v2 }
  0x30   : >> { %1058 = vmatpush3.bf16.msra.mxu0 %v1115_v33 }
  0x31   : >> { %1066 = vmatpush3.bf16.msra.mxu1 %v1116_v32  ;;  %1071 = vmatprep.subr.bf16.mxu0 %v1136_v2  ;;  %v820_v32 = vld [vmem:[%s814_s15 + $0x4] sm:$0x3] }
  0x33   : >> { %1060 = vmatmul.mubr.msk.bf16.vlgmr.msra.gmra.mrb[12].mxu0 %vm217_vm1, %v1117_v21 }
  0x34   : >> { %1068 = vmatmul.mubr.msk.bf16.vlgmr.msra.gmra.mrb[12].mxu1 %vm217_vm1, %v672_v34  ;;  %1072 = vmatpush3.bf16.msra.mxu0 %v1118_v35 }
  0x35   : >> { %1075 = vmatprep.mubr.msk.bf16.mxu0 %vm1137_vm0, %v1136_v2  ;;  %1073 = vmatprep.subr.bf16.mxu0 %v1136_v2 }
  0x38   : >> { %1074 = vmatpush3.bf16.msra.mxu0 %v1119_v36 }
  0x3b   : >> { %1076 = vmatmul.mubr.msk.bf16.vlgmr.msra.gmra.mrb[16].mxu0 %vm217_vm1, %v736_v37 }
  0xee   : >> { %v255_v40 = vpop.f32.mrb[0].mxu0 }
  0xef   : >> { %v310_v38 = vpop.f32.mrb[0].mxu1  ;;  %v1013_v43 = vpop.f32.mrb[1].mxu0 }
  0xf0   : >> { %v1021_v39 = vpop.f32.mrb[1].mxu1  ;;  %v311_v42 = vadd.f32 %v310_v38, %v255_v40  ;;  %v258_v45 = vpop.f32.mrb[2].mxu0 }
  0xf1   : >> { %v313_v41 = vpop.f32.mrb[2].mxu1  ;;  %v1014_v47 = vpop.f32.mrb[3].mxu0 }
  0xf2   : >> { %v1022_v44 = vpop.f32.mrb[3].mxu1  ;;  %v314_v46 = vadd.f32 %v313_v41, %v258_v45 }
  0xf6   : >> { %v372_v50 = vpop.f32.mrb[4].mxu0 }
  0xf7   : >> { %v446_v48 = vpop.f32.mrb[4].mxu1  ;;  %v379_v52 = vadd.f32 %v372_v50, %v311_v42  ;;  %v1029_v53 = vpop.f32.mrb[5].mxu0 }
  0xf8   : >> { %v1037_v49 = vpop.f32.mrb[5].mxu1  ;;  %v375_v55 = vpop.f32.mrb[6].mxu0 }
  0xf9   : >> { %v449_v51 = vpop.f32.mrb[6].mxu1  ;;  %v380_v56 = vadd.f32 %v375_v55, %v314_v46  ;;  %v453_v57 = vadd.f32 %v446_v48, %v379_v52  ;;  %v1030_v58 = vpop.f32.mrb[7].mxu0 }
  0xfa   : >> { %v1038_v54 = vpop.f32.mrb[7].mxu1 }
  0xfb   : >> { %v454_v59 = vadd.f32 %v449_v51, %v380_v56 }
  0xfe   : >> { %v515_v62 = vpop.f32.mrb[8].mxu0 }
  0xff   : >> { %v579_v60 = vpop.f32.mrb[8].mxu1  ;;  %v522_v1 = vadd.f32 %v515_v62, %v453_v57  ;;  %v1045_v2 = vpop.f32.mrb[9].mxu0 }
 0x100   : >> { %v1053_v61 = vpop.f32.mrb[9].mxu1  ;;  %v518_v4 = vpop.f32.mrb[10].mxu0 }
 0x101   : >> { %v582_v63 = vpop.f32.mrb[10].mxu1  ;;  %v523_v5 = vadd.f32 %v518_v4, %v454_v59  ;;  %v586_v6 = vadd.f32 %v579_v60, %v522_v1  ;;  %v1046_v7 = vpop.f32.mrb[11].mxu0 }
 0x102   : >> { %v1054_v3 = vpop.f32.mrb[11].mxu1 }
 0x103   : >> { %v587_v8 = vadd.f32 %v582_v63, %v523_v5 }
 0x106   : >> { %v653_v11 = vpop.f32.mrb[12].mxu0 }
 0x107   : >> { %v722_v9 = vpop.f32.mrb[12].mxu1  ;;  %v660_v13 = vadd.f32 %v653_v11, %v586_v6  ;;  %v1061_v14 = vpop.f32.mrb[13].mxu0 }
 0x108   : >> { %v1069_v10 = vpop.f32.mrb[13].mxu1  ;;  %v656_v16 = vpop.f32.mrb[14].mxu0 }
 0x109   : >> { %v725_v12 = vpop.f32.mrb[14].mxu1  ;;  %v661_v17 = vadd.f32 %v656_v16, %v587_v8  ;;  %v729_v18 = vadd.f32 %v722_v9, %v660_v13  ;;  %v1062_v19 = vpop.f32.mrb[15].mxu0 }
 0x10a   : >> { %v1070_v15 = vpop.f32.mrb[15].mxu1 }
 0x10b   : >> { %v730_v20 = vadd.f32 %v725_v12, %v661_v17 }
 0x10e   : >> { %v786_v21 = vpop.f32.mrb[16].mxu0 }
 0x10f   : >> { %v793_v22 = vadd.f32 %v786_v21, %v729_v18  ;;  %v1077_v23 = vpop.f32.mrb[17].mxu0 }
 0x110   : >> { %v789_v24 = vpop.f32.mrb[18].mxu0 }
 0x111   : >> { %v801_v25 = vadd.f32 %v1169_v0, %v793_v22  ;;  %v794_v26 = vadd.f32 %v789_v24, %v730_v20  ;;  %v1078_v27 = vpop.f32.mrb[19].mxu0 }
 0x113   : >> { %v803_v28 = vmax.f32 %v801_v25, 0.0  ;;  %v802_v29 = vadd.f32 %v1169_v0, %v794_v26 }
 0x114   : > { %177 = sbr.rel (!%p175_p4) target bundleno = 18 (0x12), region = 81 }
 0x115   : >> { %v977_v30 = vpack.c.bf16 %v803_v28, %v803_v28  ;;  %v804_v31 = vmax.f32 %v802_v29, 0.0 }
 0x117   : >> { %816 = vst.msk [vmem:[%s814_s15] sm:$0xf] %vm815_vm4, %v977_v30  ;;  %v978_v33 = vpack.c.bf16 %v804_v31, %v804_v31 }
 0x119   : >> { %v821_v34 = vsel %vm819_vm5, %v978_v33, %v820_v32 }
 0x11a   : >> { %822 = vst [vmem:[%s814_s15 + $0x4] sm:$0x3] %v821_v34 }
 0x11b PF: > { %s13_s12 = sadd.s32 1, %s1130_s12  }
 0x11c   : > { %p10_p5 = scmp.ge.s32.totalorder %s13_s12, 4  }
 0x11e   :  { %12 = sbr.rel (!%p10_p5) target bundleno = 1 (0x1), region = 92 }

// kernel: unet_forward.22
= control target key start
LH: loop header
LB: loop body
LE: loop exit
PB: predicated region body
PF: predicated region fallthrough
CT: control target
= control target key end

     0   :  { %s1422_s12 = smov 0   ;;  %s1641_s0 = inlined_call_operand.vmem [shape: bf16[2,11,11,64], index: 0, kind: input, shape index: {}]   ;;  %s1642_s1 = inlined_call_operand.vmem [shape: bf16[3,3,64,64], index: 1, kind: input, shape index: {}]   ;;  %s1643_s2 = inlined_call_operand.vmem [shape: f32[1,64], index: 2, kind: input, shape index: {}]   ;;  %s1644_s3 = inlined_call_operand.vmem [shape: bf16[2,9,9,64], index: 3, kind: output, shape index: {}]  }
   0x1 LB: > { %s1035_s13 = sadd.s32 4294967295, %s1394_s12   ;;  %p1039_p0 = scmp.ge.s32.totalorder %s1394_s12, 1  ;;  %s1394_s12 = sphi %s1422_s12, %s13_s12  }
   0x2   : > { %p137_p1 = scmp.lt.s32.totalorder %s1394_s12, 3 }
   0x4   : > { %p138_p2 = pnand %p1039_p0, %p137_p1 }
   0x5   : > { %p161_p3 = scmp.lt.s32.totalorder (!%p138_p2), %s1035_s13, 1  ;;  %v1433_v0 = vld [vmem:[%s1643_s2] ss:$0 sm:$0xff] (!%p138_p2)  ;;  %s1445_s24 = smov (!%p138_p2), 0  }
   0x6   : > { %141 = sbr.rel (%p138_p2) target bundleno = 321 (0x141), region = 32 }
   0xd   : > { %s1646_s13 = smov (!%p161_p3, %s1035_s13), 1 }
   0xe   : > { %s1325_s16 = smul.u32 88, %s1646_s13 }
   0xf   : > { %s1326_s17 = smul.u32 72, %s1646_s13 }
  0x10   : > { %s1438_s20 = scalar_lea.vmem %s1641_s0, %s1325_s16 }
  0x11   : > { %s1443_s23 = scalar_lea.vmem %s1644_s3, %s1326_s17 }
  0x12 LB: >> { %v1345_v1 = vld [vmem:[%s1642_s1 + $0x20] sm:$0xff]   ;;  %v1400_v2 = vmov 0.0   ;;  %v1347_v4 = vld [vmem:[%s1642_s1 + $0x28] sm:$0xff]   ;;  %vm1401_vm0 = vmmov 0   ;;  %s1168_s4 = sshll.u32 %s1398_s24, 3  ;;  %v1349_v6 = vld [vmem:[%s1642_s1 + $0x30] sm:$0xff]   ;;  %s1398_s24 = sphi %s1445_s24, %s178_s24  }
  0x13   : >> { %1217 = vmatprep.subr.bf16.mxu0 %v1400_v2  ;;  %1229 = vmatprep.subr.bf16.mxu1 %v1400_v2  ;;  %v1346_v3 = vld [vmem:[%s1642_s1] sm:$0xff]   ;;  %v1348_v5 = vld [vmem:[%s1642_s1 + $0x8] sm:$0xff]   ;;  %s1474_s7 = scalar_lea.vmem %s1438_s20, %s1168_s4  ;;  %v1350_v7 = vld [vmem:[%s1642_s1 + $0x10] sm:$0xff]   ;;  %vm237_vm1 = vcmask 523264   ;;  %s956_s8 = scalar_lea.vmem %s1443_s23, %s1168_s4  ;;  %vm959_vm2 = vcmask 516096   ;;  %vm957_vm4 = vcmask 519168  }
  0x14   : >> { %1218 = vmatpush3.bf16.msra.mxu0 %v1345_v1  ;;  %1225 = vmatprep.mubr.msk.bf16.mxu0 %vm1401_vm0, %v1400_v2  ;;  %v1353_v8 = vld [vmem:[%s1474_s7] sm:$0x3f]   ;;  %v1351_v9 = vld [vmem:[%s1642_s1 + $0x38] sm:$0xff]   ;;  %v1356_v17 = vld [vmem:[%s1642_s1 + $0x48] sm:$0xff]   ;;  %vm960_vm3 = vsmask.f32 256 }
  0x15   : >> { %1230 = vmatpush3.bf16.msra.mxu1 %v1346_v3  ;;  %1219 = vmatprep.subr.bf16.mxu0 %v1400_v2  ;;  %v207_v10 = vshrl.u32 %v1353_v8, 16  ;;  %v209_v11 = vshll.u32 %v1353_v8, 16  ;;  %v1352_v12 = vld [vmem:[%s1642_s1 + $0x18] sm:$0xff]   ;;  %v1354_v15 = vld [vmem:[%s1642_s1 + $0x40] sm:$0xff]   ;;  %v1357_v18 = vld [vmem:[%s1642_s1 + $0x68] sm:$0xff]   ;;  %v358_v23 = vrot.slane %v1353_v8, 1 }
  0x16   : >> { %1231 = vmatprep.subr.bf16.mxu1 %v1400_v2  ;;  %1237 = vmatprep.mubr.msk.bf16.mxu1 %vm1401_vm0, %v1400_v2  ;;  %v1355_v16 = vld [vmem:[%s1642_s1 + $0x60] sm:$0xff]   ;;  %v1358_v19 = vld [vmem:[%s1642_s1 + $0x50] sm:$0xff]   ;;  %v1360_v21 = vld [vmem:[%s1642_s1 + $0x58] sm:$0xff]   ;;  %s178_s24 = sadd.s32 1, %s1398_s24  }
  0x17   : >> { %v211_v13 = vrot.slane %v209_v11, 1  ;;  %v1359_v20 = vld [vmem:[%s1642_s1 + $0x70] sm:$0xff]   ;;  %v1361_v22 = vld [vmem:[%s1642_s1 + $0x78] sm:$0xff]   ;;  %v1362_v24 = vld [vmem:[%s1642_s1 + $0x80] sm:$0xff]   ;;  %p175_p4 = scmp.ge.s32.totalorder %s178_s24, 9  }
  0x18   : >> { %1220 = vmatpush3.bf16.msra.mxu0 %v1347_v4  ;;  %v1363_v25 = vld [vmem:[%s1474_s7 + $0x8] sm:$0x3f]   ;;  %v1364_v26 = vld [vmem:[%s1642_s1 + $0xa0] sm:$0xff]   ;;  %v1367_v29 = vld [vmem:[%s1642_s1 + $0x90] sm:$0xff]  }
  0x19   : >> { %1232 = vmatpush3.bf16.msra.mxu1 %v1348_v5  ;;  %1221 = vmatprep.subr.bf16.mxu0 %v1400_v2  ;;  %v212_v14 = vor.u32 %v211_v13, %v207_v10  ;;  %v1365_v27 = vld [vmem:[%s1642_s1 + $0x88] sm:$0xff]   ;;  %v530_v30 = vshll.u32 %v1363_v25, 16  ;;  %v1368_v31 = vld [vmem:[%s1642_s1 + $0xb0] sm:$0xff]   ;;  %v528_v32 = vshrl.u32 %v1363_v25, 16  ;;  %v1369_v34 = vld [vmem:[%s1642_s1 + $0x98] sm:$0xff]   ;;  %v613_v38 = vrot.slane %v1363_v25, 1 }
  0x1a   : >> { %1233 = vmatprep.subr.bf16.mxu1 %v1400_v2  ;;  %v1366_v28 = vld [vmem:[%s1642_s1 + $0xa8] sm:$0xff]   ;;  %v1370_v35 = vld [vmem:[%s1642_s1 + $0xb8] sm:$0xff]   ;;  %v1371_v37 = vld [vmem:[%s1642_s1 + $0xc0] sm:$0xff]  }
  0x1b   : >> { %v532_v33 = vrot.slane %v530_v30, 1  ;;  %v1372_v39 = vld [vmem:[%s1642_s1 + $0xe0] sm:$0xff]   ;;  %v1373_v40 = vld [vmem:[%s1642_s1 + $0xc8] sm:$0xff]   ;;  %v1379_v41 = vld [vmem:[%s1474_s7 + $0x10] sm:$0x3f]  }
  0x1c   : >> { %1222 = vmatpush3.bf16.msra.mxu0 %v1349_v6  ;;  %v1374_v42 = vld [vmem:[%s1642_s1 + $0xe8] sm:$0xff]   ;;  %v1375_v43 = vld [vmem:[%s1642_s1 + $0xd0] sm:$0xff]   ;;  %v785_v44 = vshll.u32 %v1379_v41, 16  ;;  %v1377_v46 = vld [vmem:[%s1642_s1 + $0xd8] sm:$0xff]   ;;  %v783_v47 = vshrl.u32 %v1379_v41, 16  ;;  %v868_v55 = vrot.slane %v1379_v41, 1 }
  0x1d   : >> { %1234 = vmatpush3.bf16.msra.mxu1 %v1350_v7  ;;  %1223 = vmatprep.subr.bf16.mxu0 %v1400_v2  ;;  %v533_v36 = vor.u32 %v532_v33, %v528_v32  ;;  %v1376_v45 = vld [vmem:[%s1642_s1 + $0xf0] sm:$0xff]   ;;  %v1378_v49 = vld [vmem:[%s1642_s1 + $0xf8] sm:$0xff]   ;;  %v1380_v50 = vld [vmem:[%s1642_s1 + $0x100] sm:$0xff]  }
  0x1e   : >> { %1235 = vmatprep.subr.bf16.mxu1 %v1400_v2  ;;  %v787_v48 = vrot.slane %v785_v44, 1  ;;  %v1381_v52 = vld [vmem:[%s1642_s1 + $0x108] sm:$0xff]   ;;  %v1382_v53 = vld [vmem:[%s1642_s1 + $0x110] sm:$0xff]   ;;  %v1383_v54 = vld [vmem:[%s1642_s1 + $0x118] sm:$0xff]  }
  0x1f   : >> { %vm961_vm5 = vmand %vm959_vm2, %vm960_vm3 }
  0x20   : >> { %1224 = vmatpush3.bf16.msra.mxu0 %v1351_v9  ;;  %v788_v51 = vor.u32 %v787_v48, %v783_v47  ;;  %v962_v48 = vld [vmem:[%s956_s8 + $0x4] sm:$0x1] }
  0x21   : >> { %1236 = vmatpush3.bf16.msra.mxu1 %v1352_v12  ;;  %1241 = vmatprep.subr.bf16.mxu0 %v1400_v2 }
  0x22   : >> { %1253 = vmatprep.subr.bf16.mxu1 %v1400_v2 }
  0x23   : >> { %1226 = vmatmul.mubr.msk.bf16.vlgmr.msra.gmra.mrb[0].mxu0 %vm237_vm1, %v212_v14 }
  0x24   : >> { %1238 = vmatmul.mubr.msk.bf16.vlgmr.msra.gmra.mrb[0].mxu1 %vm237_vm1, %v1353_v8  ;;  %1242 = vmatpush3.bf16.msra.mxu0 %v1354_v15 }
  0x25   : >> { %1254 = vmatpush3.bf16.msra.mxu1 %v1355_v16  ;;  %1243 = vmatprep.subr.bf16.mxu0 %v1400_v2 }
  0x26   : >> { %1255 = vmatprep.subr.bf16.mxu1 %v1400_v2  ;;  %1249 = vmatprep.mubr.msk.bf16.mxu0 %vm1401_vm0, %v1400_v2 }
  0x27   : >> { %1261 = vmatprep.mubr.msk.bf16.mxu1 %vm1401_vm0, %v1400_v2 }
  0x28   : >> { %1244 = vmatpush3.bf16.msra.mxu0 %v1356_v17 }
  0x29   : >> { %1256 = vmatpush3.bf16.msra.mxu1 %v1357_v18  ;;  %1245 = vmatprep.subr.bf16.mxu0 %v1400_v2 }
  0x2a   : >> { %1257 = vmatprep.subr.bf16.mxu1 %v1400_v2 }
  0x2c   : >> { %1246 = vmatpush3.bf16.msra.mxu0 %v1358_v19 }
  0x2d   : >> { %1258 = vmatpush3.bf16.msra.mxu1 %v1359_v20  ;;  %1247 = vmatprep.subr.bf16.mxu0 %v1400_v2 }
  0x2e   : >> { %1259 = vmatprep.subr.bf16.mxu1 %v1400_v2 }
  0x30   : >> { %1248 = vmatpush3.bf16.msra.mxu0 %v1360_v21 }
  0x31   : >> { %1260 = vmatpush3.bf16.msra.mxu1 %v1361_v22  ;;  %1265 = vmatprep.subr.bf16.mxu0 %v1400_v2 }
  0x32   : >> { %1277 = vmatprep.subr.bf16.mxu1 %v1400_v2 }
  0x33   : >> { %1250 = vmatmul.mubr.msk.bf16.vlgmr.msra.gmra.mrb[4].mxu0 %vm237_vm1, %v358_v23 }
  0x34   : >> { %1266 = vmatpush3.bf16.msra.mxu0 %v1362_v24  ;;  %1262 = vmatmul.mubr.msk.bf16.vlgmr.msra.gmra.mrb[4].mxu1 %vm237_vm1, %v1363_v25 }
  0x35   : >> { %1278 = vmatpush3.bf16.msra.mxu1 %v1364_v26  ;;  %1267 = vmatprep.subr.bf16.mxu0 %v1400_v2 }
  0x36   : >> { %1279 = vmatprep.subr.bf16.mxu1 %v1400_v2  ;;  %1273 = vmatprep.mubr.msk.bf16.mxu0 %vm1401_vm0, %v1400_v2 }
  0x37   : >> { %1285 = vmatprep.mubr.msk.bf16.mxu1 %vm1401_vm0, %v1400_v2 }
  0x38   : >> { %1268 = vmatpush3.bf16.msra.mxu0 %v1365_v27 }
  0x39   : >> { %1280 = vmatpush3.bf16.msra.mxu1 %v1366_v28  ;;  %1269 = vmatprep.subr.bf16.mxu0 %v1400_v2 }
  0x3a   : >> { %1281 = vmatprep.subr.bf16.mxu1 %v1400_v2 }
  0x3c   : >> { %1270 = vmatpush3.bf16.msra.mxu0 %v1367_v29 }
  0x3d   : >> { %1282 = vmatpush3.bf16.msra.mxu1 %v1368_v31  ;;  %1271 = vmatprep.subr.bf16.mxu0 %v1400_v2 }
  0x3e   : >> { %1283 = vmatprep.subr.bf16.mxu1 %v1400_v2 }
  0x40   : >> { %1272 = vmatpush3.bf16.msra.mxu0 %v1369_v34 }
  0x41   : >> { %1284 = vmatpush3.bf16.msra.mxu1 %v1370_v35  ;;  %1289 = vmatprep.subr.bf16.mxu0 %v1400_v2 }
  0x42   : >> { %1301 = vmatprep.subr.bf16.mxu1 %v1400_v2 }
  0x43   : >> { %1274 = vmatmul.mubr.msk.bf16.vlgmr.msra.gmra.mrb[8].mxu0 %vm237_vm1, %v533_v36 }
  0x44   : >> { %1290 = vmatpush3.bf16.msra.mxu0 %v1371_v37  ;;  %1286 = vmatmul.mubr.msk.bf16.vlgmr.msra.gmra.mrb[8].mxu1 %vm237_vm1, %v613_v38 }
  0x45   : >> { %1302 = vmatpush3.bf16.msra.mxu1 %v1372_v39  ;;  %1291 = vmatprep.subr.bf16.mxu0 %v1400_v2 }
  0x46   : >> { %1303 = vmatprep.subr.bf16.mxu1 %v1400_v2  ;;  %1297 = vmatprep.mubr.msk.bf16.mxu0 %vm1401_vm0, %v1400_v2 }
  0x47   : >> { %1309 = vmatprep.mubr.msk.bf16.mxu1 %vm1401_vm0, %v1400_v2 }
  0x48   : >> { %1292 = vmatpush3.bf16.msra.mxu0 %v1373_v40 }
  0x49   : >> { %1304 = vmatpush3.bf16.msra.mxu1 %v1374_v42  ;;  %1293 = vmatprep.subr.bf16.mxu0 %v1400_v2 }
  0x4a   : >> { %1305 = vmatprep.subr.bf16.mxu1 %v1400_v2 }
  0x4c   : >> { %1294 = vmatpush3.bf16.msra.mxu0 %v1375_v43 }
  0x4d   : >> { %1306 = vmatpush3.bf16.msra.mxu1 %v1376_v45  ;;  %1295 = vmatprep.subr.bf16.mxu0 %v1400_v2 }
  0x4e   : >> { %1307 = vmatprep.subr.bf16.mxu1 %v1400_v2 }
  0x50   : >> { %1296 = vmatpush3.bf16.msra.mxu0 %v1377_v46 }
  0x51   : >> { %1308 = vmatpush3.bf16.msra.mxu1 %v1378_v49  ;;  %1313 = vmatprep.subr.bf16.mxu0 %v1400_v2 }
  0x53   : >> { %1298 = vmatmul.mubr.msk.bf16.vlgmr.msra.gmra.mrb[12].mxu0 %vm237_vm1, %v1379_v41 }
  0x54   : >> { %1314 = vmatpush3.bf16.msra.mxu0 %v1380_v50  ;;  %1310 = vmatmul.mubr.msk.bf16.vlgmr.msra.gmra.mrb[12].mxu1 %vm237_vm1, %v788_v51 }
  0x55   : >> { %1315 = vmatprep.subr.bf16.mxu0 %v1400_v2  ;;  %1321 = vmatprep.mubr.msk.bf16.mxu0 %vm1401_vm0, %v1400_v2 }
  0x58   : >> { %1316 = vmatpush3.bf16.msra.mxu0 %v1381_v52 }
  0x59   : >> { %1317 = vmatprep.subr.bf16.mxu0 %v1400_v2 }
  0x5c   : >> { %1318 = vmatpush3.bf16.msra.mxu0 %v1382_v53 }
  0x5d   : >> { %1319 = vmatprep.subr.bf16.mxu0 %v1400_v2 }
  0x60   : >> { %1320 = vmatpush3.bf16.msra.mxu0 %v1383_v54 }
  0x63   : >> { %1322 = vmatmul.mubr.msk.bf16.vlgmr.msra.gmra.mrb[16].mxu0 %vm237_vm1, %v868_v55 }
  0xf6   : >> { %v275_v56 = vpop.f32.mrb[0].mxu0 }
  0xf7   : >> { %v342_v57 = vpop.f32.mrb[0].mxu1  ;;  %v1227_v58 = vpop.f32.mrb[1].mxu0 }
  0xf8   : >> { %v343_v59 = vadd.f32 %v342_v57, %v275_v56  ;;  %v1239_v60 = vpop.f32.mrb[1].mxu1  ;;  %v278_v61 = vpop.f32.mrb[2].mxu0 }
  0xf9   : >> { %v345_v62 = vpop.f32.mrb[2].mxu1  ;;  %v1228_v63 = vpop.f32.mrb[3].mxu0 }
  0xfa   : >> { %v346_v1 = vadd.f32 %v345_v62, %v278_v61  ;;  %v1240_v3 = vpop.f32.mrb[3].mxu1 }
 0x106   : >> { %v420_v4 = vpop.f32.mrb[4].mxu0 }
 0x107   : >> { %v427_v5 = vadd.f32 %v420_v4, %v343_v59  ;;  %v1251_v6 = vpop.f32.mrb[5].mxu0  ;;  %v510_v7 = vpop.f32.mrb[4].mxu1 }
 0x108   : >> { %v423_v8 = vpop.f32.mrb[6].mxu0  ;;  %v1263_v2 = vpop.f32.mrb[5].mxu1 }
 0x109   : >> { %v428_v9 = vadd.f32 %v423_v8, %v346_v1  ;;  %v517_v10 = vadd.f32 %v510_v7, %v427_v5  ;;  %v1252_v11 = vpop.f32.mrb[7].mxu0  ;;  %v513_v12 = vpop.f32.mrb[6].mxu1 }
 0x10a   : >> { %v1264_v13 = vpop.f32.mrb[7].mxu1 }
 0x10b   : >> { %v518_v14 = vadd.f32 %v513_v12, %v428_v9 }
 0x116   : >> { %v595_v15 = vpop.f32.mrb[8].mxu0 }
 0x117   : >> { %v602_v16 = vadd.f32 %v595_v15, %v517_v10  ;;  %v1275_v17 = vpop.f32.mrb[9].mxu0  ;;  %v675_v18 = vpop.f32.mrb[8].mxu1 }
 0x118   : >> { %v598_v19 = vpop.f32.mrb[10].mxu0  ;;  %v1287_v20 = vpop.f32.mrb[9].mxu1 }
 0x119   : >> { %v603_v21 = vadd.f32 %v598_v19, %v518_v14  ;;  %v682_v22 = vadd.f32 %v675_v18, %v602_v16  ;;  %v1276_v23 = vpop.f32.mrb[11].mxu0  ;;  %v678_v24 = vpop.f32.mrb[10].mxu1 }
 0x11a   : >> { %v1288_v25 = vpop.f32.mrb[11].mxu1 }
 0x11b   : >> { %v683_v26 = vadd.f32 %v678_v24, %v603_v21 }
 0x126   : >> { %v765_v27 = vpop.f32.mrb[12].mxu0 }
 0x127   : >> { %v772_v28 = vadd.f32 %v765_v27, %v682_v22  ;;  %v1299_v29 = vpop.f32.mrb[13].mxu0  ;;  %v850_v30 = vpop.f32.mrb[12].mxu1 }
 0x128   : >> { %v768_v31 = vpop.f32.mrb[14].mxu0  ;;  %v1311_v32 = vpop.f32.mrb[13].mxu1 }
 0x129   : >> { %v773_v33 = vadd.f32 %v768_v31, %v683_v26  ;;  %v857_v34 = vadd.f32 %v850_v30, %v772_v28  ;;  %v1300_v35 = vpop.f32.mrb[15].mxu0  ;;  %v853_v36 = vpop.f32.mrb[14].mxu1 }
 0x12a   : >> { %v1312_v37 = vpop.f32.mrb[15].mxu1 }
 0x12b   : >> { %v858_v38 = vadd.f32 %v853_v36, %v773_v33 }
 0x136   : >> { %v930_v39 = vpop.f32.mrb[16].mxu0 }
 0x137   : >> { %v937_v40 = vadd.f32 %v930_v39, %v857_v34  ;;  %v1323_v41 = vpop.f32.mrb[17].mxu0 }
 0x138   : >> { %v933_v42 = vpop.f32.mrb[18].mxu0 }
 0x139   : >> { %v945_v43 = vadd.f32 %v1433_v0, %v937_v40  ;;  %v938_v44 = vadd.f32 %v933_v42, %v858_v38  ;;  %v1324_v45 = vpop.f32.mrb[19].mxu0 }
 0x13a   : > { %177 = sbr.rel (!%p175_p4) target bundleno = 18 (0x12), region = 81 }
 0x13b   : >> { %v1169_v46 = vpack.c.bf16 %v945_v43, %v945_v43  ;;  %v946_v47 = vadd.f32 %v1433_v0, %v938_v44 }
 0x13d   : >> { %958 = vst.msk [vmem:[%s956_s8] sm:$0xf] %vm957_vm4, %v1169_v46  ;;  %v1170_v49 = vpack.c.bf16 %v946_v47, %v946_v47 }
 0x13f   : >> { %v963_v50 = vsel %vm961_vm5, %v1170_v49, %v962_v48 }
 0x140   : >> { %964 = vst [vmem:[%s956_s8 + $0x4] sm:$0x1] %v963_v50 }
 0x141 PF: > { %s13_s12 = sadd.s32 1, %s1394_s12  }
 0x142   : > { %p10_p5 = scmp.ge.s32.totalorder %s13_s12, 4  }
 0x144   :  { %12 = sbr.rel (!%p10_p5) target bundleno = 1 (0x1), region = 92 }

// kernel: unet_forward.23
= control target key start
LH: loop header
LB: loop body
LE: loop exit
PB: predicated region body
PF: predicated region fallthrough
CT: control target
= control target key end

     0   :  { %s621_s15 = smov 0   ;;  %s689_s0 = inlined_call_operand.vmem [shape: bf16[2,9,9,64], index: 0, kind: input, shape index: {}]   ;;  %s690_s1 = inlined_call_operand.vmem [shape: bf16[64,64], index: 1, kind: input, shape index: {}]   ;;  %s691_s2 = inlined_call_operand.vmem [shape: bf16[64,64], index: 2, kind: input, shape index: {}]   ;;  %s692_s3 = inlined_call_operand.vmem [shape: f32[1,64], index: 3, kind: input, shape index: {}]   ;;  %s693_s4 = inlined_call_operand.vmem [shape: bf16[2,9,2,9,64], index: 4, kind: output, shape index: {}]  }
   0x1 LB: > { %s474_s16 = sadd.s32 4294967295, %s588_s15   ;;  %p478_p0 = scmp.ge.s32.totalorder %s588_s15, 1  ;;  %s588_s15 = sphi %s621_s15, %s14_s15  }
   0x2   : > { %p162_p1 = scmp.lt.s32.totalorder %s588_s15, 3 }
   0x4   : > { %p163_p2 = pnand %p478_p0, %p162_p1 }
   0x5   : > { %p188_p3 = scmp.lt.s32.totalorder (!%p163_p2), %s474_s16, 1  ;;  %v632_v0 = vld [vmem:[%s692_s3] ss:$0 sm:$0xff] (!%p163_p2)  ;;  %s644_s27 = smov (!%p163_p2), 0  }
   0x6   : > { %166 = sbr.rel (%p163_p2) target bundleno = 256 (0x100), region = 36 }
   0xd   : > { %s695_s16 = smov (!%p188_p3, %s474_s16), 1 }
   0xe   : > { %s549_s19 = smul.u32 72, %s695_s16 }
   0xf   : > { %s550_s20 = smul.u32 144, %s695_s16 }
  0x10   : > { %s637_s23 = scalar_lea.vmem %s689_s0, %s549_s19 }
  0x11   : > { %s642_s26 = scalar_lea.vmem %s693_s4, %s550_s20 }
  0x12 LB: >> { %v569_v1 = vld [vmem:[%s690_s1] sm:$0xff]   ;;  %v594_v2 = vmov 0.0   ;;  %v571_v4 = vld [vmem:[%s690_s1 + $0x8] sm:$0xff]   ;;  %vm595_vm0 = vmmov 0   ;;  %s508_s10 = sshll.u32 %s592_s27, 3  ;;  %v573_v6 = vld [vmem:[%s690_s1 + $0x10] sm:$0xff]   ;;  %s592_s27 = sphi %s644_s27, %s205_s27  }
  0x13   : >> { %525 = vmatprep.subr.bf16.mxu0 %v594_v2  ;;  %537 = vmatprep.subr.bf16.mxu1 %v594_v2  ;;  %v570_v3 = vld [vmem:[%s691_s2] sm:$0xff]   ;;  %v572_v5 = vld [vmem:[%s691_s2 + $0x8] sm:$0xff]   ;;  %v574_v7 = vld [vmem:[%s691_s2 + $0x10] sm:$0xff]   ;;  %s208_s16 = scalar_lea.vmem %s637_s23, %s508_s10  ;;  %vm254_vm1 = vcmask 523264   ;;  %s511_s21 = sshll.u32 %s592_s27, 4  ;;  %vm385_vm2 = vcmask 516096  }
  0x14   : >> { %526 = vmatpush3.bf16.msra.mxu0 %v569_v1  ;;  %533 = vmatprep.mubr.msk.bf16.mxu0 %vm595_vm0, %v594_v2  ;;  %v575_v8 = vld [vmem:[%s690_s1 + $0x18] sm:$0xff]   ;;  %v577_v10 = vld [vmem:[%s208_s16] sm:$0x1f]   ;;  %s382_s22 = scalar_lea.vmem %s642_s26, %s511_s21  ;;  %vm386_vm3 = vsmask.f32 256  ;;  %vm383_vm4 = vcmask 519168  }
  0x15   : >> { %538 = vmatpush3.bf16.msra.mxu1 %v570_v3  ;;  %527 = vmatprep.subr.bf16.mxu0 %v594_v2  ;;  %v576_v9 = vld [vmem:[%s691_s2 + $0x18] sm:$0xff]   ;;  %vm387_vm5 = vmand %vm385_vm2, %vm386_vm3  ;;  %v388_v23 = vld [vmem:[%s382_s22 + $0x4] sm:$0x1]  ;;  %s205_s27 = sadd.s32 1, %s592_s27  }
  0x16   : >> { %539 = vmatprep.subr.bf16.mxu1 %v594_v2  ;;  %545 = vmatprep.mubr.msk.bf16.mxu1 %vm595_vm0, %v594_v2  ;;  %v504_v27 = vld [vmem:[%s382_s22 + $0xc] sm:$0x1]  ;;  %p202_p4 = scmp.ge.s32.totalorder %s205_s27, 9  }
  0x18   : >> { %528 = vmatpush3.bf16.msra.mxu0 %v571_v4 }
  0x19   : >> { %540 = vmatpush3.bf16.msra.mxu1 %v572_v5  ;;  %529 = vmatprep.subr.bf16.mxu0 %v594_v2 }
  0x1a   : >> { %541 = vmatprep.subr.bf16.mxu1 %v594_v2 }
  0x1c   : >> { %530 = vmatpush3.bf16.msra.mxu0 %v573_v6 }
  0x1d   : >> { %542 = vmatpush3.bf16.msra.mxu1 %v574_v7  ;;  %531 = vmatprep.subr.bf16.mxu0 %v594_v2 }
  0x1e   : >> { %543 = vmatprep.subr.bf16.mxu1 %v594_v2 }
  0x20   : >> { %532 = vmatpush3.bf16.msra.mxu0 %v575_v8 }
  0x21   : >> { %544 = vmatpush3.bf16.msra.mxu1 %v576_v9 }
  0x23   : >> { %534 = vmatmul.mubr.msk.bf16.vlgmr.msra.gmra.mrb[0].mxu0 %vm254_vm1, %v577_v10 }
  0x24   : >> { %546 = vmatmul.mubr.msk.bf16.vlgmr.msra.gmra.mrb[0].mxu1 %vm254_vm1, %v577_v10 }
  0xf6   : >> { %v292_v11 = vpop.f32.mrb[0].mxu0 }
  0xf7   : >> { %v293_v12 = vadd.f32 %v632_v0, %v292_v11  ;;  %v365_v13 = vpop.f32.mrb[0].mxu1  ;;  %v535_v14 = vpop.f32.mrb[1].mxu0 }
  0xf8   : >> { %v366_v15 = vadd.f32 %v632_v0, %v365_v13  ;;  %v547_v16 = vpop.f32.mrb[1].mxu1  ;;  %v295_v17 = vpop.f32.mrb[2].mxu0 }
  0xf9   : >> { %v509_v18 = vpack.c.bf16 %v293_v12, %v293_v12  ;;  %v296_v19 = vadd.f32 %v632_v0, %v295_v17  ;;  %v368_v20 = vpop.f32.mrb[2].mxu1  ;;  %v536_v21 = vpop.f32.mrb[3].mxu0  ;;  %204 = sbr.rel (!%p202_p4) target bundleno = 18 (0x12), region = 76 }
  0xfa   : >> { %v512_v22 = vpack.c.bf16 %v366_v15, %v366_v15  ;;  %v369_v24 = vadd.f32 %v632_v0, %v368_v20  ;;  %v548_v25 = vpop.f32.mrb[3].mxu1 }
  0xfb   : >> { %384 = vst.msk [vmem:[%s382_s22] sm:$0xf] %vm383_vm4, %v509_v18  ;;  %v510_v26 = vpack.c.bf16 %v296_v19, %v296_v19 }
  0xfc   : >> { %503 = vst.msk [vmem:[%s382_s22 + $0x8] sm:$0xf] %vm383_vm4, %v512_v22  ;;  %v513_v28 = vpack.c.bf16 %v369_v24, %v369_v24 }
  0xfd   : >> { %v389_v29 = vsel %vm387_vm5, %v510_v26, %v388_v23 }
  0xfe   : >> { %390 = vst [vmem:[%s382_s22 + $0x4] sm:$0x1] %v389_v29  ;;  %v404_v30 = vsel %vm387_vm5, %v513_v28, %v504_v27 }
  0xff   : >> { %505 = vst [vmem:[%s382_s22 + $0xc] sm:$0x1] %v404_v30 }
 0x100 PF: > { %s14_s15 = sadd.s32 1, %s588_s15  }
 0x101   : > { %p11_p5 = scmp.ge.s32.totalorder %s14_s15, 4  }
 0x103   :  { %13 = sbr.rel (!%p11_p5) target bundleno = 1 (0x1), region = 87 }

// kernel: unet_forward.25
= control target key start
LH: loop header
LB: loop body
LE: loop exit
PB: predicated region body
PF: predicated region fallthrough
CT: control target
= control target key end

     0   :  { %s1153_s12 = smov 0   ;;  %s1300_s0 = inlined_call_operand.vmem [shape: bf16[2,16,16,32], index: 0, kind: input, shape index: {}]   ;;  %s1301_s1 = inlined_call_operand.vmem [shape: bf16[3,3,32,32], index: 1, kind: input, shape index: {}]   ;;  %s1302_s2 = inlined_call_operand.vmem [shape: f32[1,32], index: 2, kind: input, shape index: {}]   ;;  %s1303_s3 = inlined_call_operand.vmem [shape: bf16[2,14,14,32], index: 3, kind: output, shape index: {}]  }
   0x1 LB: > { %s887_s13 = sadd.s32 4294967295, %s1125_s12   ;;  %p891_p0 = scmp.ge.s32.totalorder %s1125_s12, 1  ;;  %s1125_s12 = sphi %s1153_s12, %s13_s12  }
   0x2   : > { %p137_p1 = scmp.lt.s32.totalorder %s1125_s12, 3 }
   0x4   : > { %p138_p2 = pnand %p891_p0, %p137_p1 }
   0x5   : > { %p161_p3 = scmp.lt.s32.totalorder (!%p138_p2), %s887_s13, 1  ;;  %v1164_v0 = vld [vmem:[%s1302_s2] ss:$0 sm:$0xff] (!%p138_p2)  ;;  %s1176_s24 = smov (!%p138_p2), 0  }
   0x6   : > { %141 = sbr.rel (%p138_p2) target bundleno = 279 (0x117), region = 32 }
   0xd   : > { %s1305_s13 = smov (!%p161_p3, %s887_s13), 1 }
   0xe   : > { %s971_s16 = sshll.u32 %s1305_s13, 7  ;;  %s1075_s17 = smul.u32 112, %s1305_s13 }
   0xf   : > { %s1169_s20 = scalar_lea.vmem %s1300_s0, %s971_s16 }
  0x10   : > { %s1174_s23 = scalar_lea.vmem %s1303_s3, %s1075_s17 }
  0x11 LB: >> { %v1094_v1 = vld [vmem:[%s1301_s1 + $0x10] sm:$0xff]   ;;  %v1131_v2 = vmov 0.0   ;;  %v1095_v3 = vld [vmem:[%s1301_s1] sm:$0xff]   ;;  %v1096_v4 = vld [vmem:[%s1301_s1 + $0x18] sm:$0xff]   ;;  %vm1132_vm0 = vmmov 0   ;;  %s972_s4 = sshll.u32 %s1129_s24, 3  ;;  %s1129_s24 = sphi %s1176_s24, %s178_s24  }
  0x12   : >> { %1003 = vmatprep.subr.bf16.mxu0 %v1131_v2  ;;  %1011 = vmatprep.subr.bf16.mxu1 %v1131_v2  ;;  %v1097_v5 = vld [vmem:[%s1301_s1 + $0x8] sm:$0xff]   ;;  %s1202_s7 = scalar_lea.vmem %s1169_s20, %s972_s4  ;;  %vm217_vm1 = vcmask 261120   ;;  %v1100_v9 = vld [vmem:[%s1301_s1 + $0x30] sm:$0xff]   ;;  %v1099_v11 = vld [vmem:[%s1301_s1 + $0x20] sm:$0xff]   ;;  %s812_s15 = scalar_lea.vmem %s1174_s23, %s972_s4  ;;  %vm813_vm2 = vcmask 257024   ;;  %vm815_vm3 = vcmask 256000  }
  0x13   : >> { %1004 = vmatpush3.bf16.msra.mxu0 %v1094_v1  ;;  %1007 = vmatprep.mubr.msk.bf16.mxu0 %vm1132_vm0, %v1131_v2  ;;  %v1098_v6 = vld [vmem:[%s1202_s7] sm:$0xff]   ;;  %v1102_v13 = vld [vmem:[%s1301_s1 + $0x38] sm:$0xff]   ;;  %v1104_v14 = vld [vmem:[%s1202_s7 + $0x8] sm:$0xff]   ;;  %s178_s24 = sadd.s32 1, %s1129_s24  }
  0x14   : >> { %1012 = vmatpush3.bf16.msra.mxu1 %v1095_v3  ;;  %1005 = vmatprep.subr.bf16.mxu0 %v1131_v2  ;;  %v199_v7 = vshrl.u32 %v1098_v6, 16  ;;  %v201_v8 = vshll.u32 %v1098_v6, 16  ;;  %v1101_v15 = vld [vmem:[%s1301_s1 + $0x28] sm:$0xff]   ;;  %v1105_v16 = vld [vmem:[%s1301_s1 + $0x50] sm:$0xff]   ;;  %v322_v17 = vrot.slane %v1098_v6, 1  ;;  %v462_v18 = vshll.u32 %v1104_v14, 16 }
  0x15   : >> { %1013 = vmatprep.subr.bf16.mxu1 %v1131_v2  ;;  %1015 = vmatprep.mubr.msk.bf16.mxu1 %vm1132_vm0, %v1131_v2  ;;  %v1103_v19 = vld [vmem:[%s1301_s1 + $0x40] sm:$0xff]   ;;  %v1107_v20 = vld [vmem:[%s1301_s1 + $0x58] sm:$0xff]   ;;  %v1112_v21 = vld [vmem:[%s1202_s7 + $0x10] sm:$0xff]   ;;  %v460_v22 = vshrl.u32 %v1104_v14, 16  ;;  %v529_v25 = vrot.slane %v1104_v14, 1  ;;  %p175_p4 = scmp.ge.s32.totalorder %s178_s24, 14  }
  0x16   : >> { %v203_v10 = vrot.slane %v201_v8, 1  ;;  %v464_v23 = vrot.slane %v462_v18, 1  ;;  %v1106_v24 = vld [vmem:[%s1301_s1 + $0x48] sm:$0xff]   ;;  %v669_v26 = vshll.u32 %v1112_v21, 16  ;;  %v1109_v27 = vld [vmem:[%s1301_s1 + $0x70] sm:$0xff]   ;;  %v1108_v29 = vld [vmem:[%s1301_s1 + $0x60] sm:$0xff]  }
  0x17   : >> { %1006 = vmatpush3.bf16.msra.mxu0 %v1096_v4  ;;  %v667_v30 = vshrl.u32 %v1112_v21, 16  ;;  %v1111_v32 = vld [vmem:[%s1301_s1 + $0x78] sm:$0xff]   ;;  %v1110_v33 = vld [vmem:[%s1301_s1 + $0x68] sm:$0xff]   ;;  %v1113_v35 = vld [vmem:[%s1301_s1 + $0x80] sm:$0xff]   ;;  %v736_v37 = vrot.slane %v1112_v21, 1 }
  0x18   : >> { %1014 = vmatpush3.bf16.msra.mxu1 %v1097_v5  ;;  %1019 = vmatprep.subr.bf16.mxu0 %v1131_v2  ;;  %v204_v12 = vor.u32 %v203_v10, %v199_v7  ;;  %v465_v28 = vor.u32 %v464_v23, %v460_v22  ;;  %v671_v31 = vrot.slane %v669_v26, 1  ;;  %v1114_v36 = vld [vmem:[%s1301_s1 + $0x88] sm:$0xff]  }
  0x19   : >> { %1027 = vmatprep.subr.bf16.mxu1 %v1131_v2 }
  0x1a   : >> { %1008 = vmatmul.mubr.msk.bf16.vlgmr.msra.gmra.mrb[0].mxu0 %vm217_vm1, %v204_v12  ;;  %v672_v34 = vor.u32 %v671_v31, %v667_v30 }
  0x1b   : >> { %1016 = vmatmul.mubr.msk.bf16.vlgmr.msra.gmra.mrb[0].mxu1 %vm217_vm1, %v1098_v6  ;;  %1020 = vmatpush3.bf16.msra.mxu0 %v1099_v11 }
  0x1c   : >> { %1028 = vmatpush3.bf16.msra.mxu1 %v1100_v9  ;;  %1031 = vmatprep.mubr.msk.bf16.mxu1 %vm1132_vm0, %v1131_v2 }
  0x1d   : >> { %1029 = vmatprep.subr.bf16.mxu1 %v1131_v2  ;;  %1023 = vmatprep.mubr.msk.bf16.mxu0 %vm1132_vm0, %v1131_v2 }
  0x1e   : >> { %1021 = vmatprep.subr.bf16.mxu0 %v1131_v2 }
  0x1f   : >> { %1022 = vmatpush3.bf16.msra.mxu0 %v1101_v15 }
  0x20   : >> { %1030 = vmatpush3.bf16.msra.mxu1 %v1102_v13  ;;  %1035 = vmatprep.subr.bf16.mxu0 %v1131_v2 }
  0x21   : >> { %1043 = vmatprep.subr.bf16.mxu1 %v1131_v2 }
  0x22   : >> { %1024 = vmatmul.mubr.msk.bf16.vlgmr.msra.gmra.mrb[4].mxu0 %vm217_vm1, %v322_v17 }
  0x23   : >> { %1032 = vmatmul.mubr.msk.bf16.vlgmr.msra.gmra.mrb[4].mxu1 %vm217_vm1, %v1104_v14  ;;  %1036 = vmatpush3.bf16.msra.mxu0 %v1103_v19 }
  0x24   : >> { %1044 = vmatpush3.bf16.msra.mxu1 %v1105_v16  ;;  %1047 = vmatprep.mubr.msk.bf16.mxu1 %vm1132_vm0, %v1131_v2 }
  0x25   : >> { %1045 = vmatprep.subr.bf16.mxu1 %v1131_v2  ;;  %1039 = vmatprep.mubr.msk.bf16.mxu0 %vm1132_vm0, %v1131_v2 }
  0x26   : >> { %1037 = vmatprep.subr.bf16.mxu0 %v1131_v2 }
  0x27   : >> { %1038 = vmatpush3.bf16.msra.mxu0 %v1106_v24 }
  0x28   : >> { %1046 = vmatpush3.bf16.msra.mxu1 %v1107_v20  ;;  %1051 = vmatprep.subr.bf16.mxu0 %v1131_v2 }
  0x29   : >> { %1059 = vmatprep.subr.bf16.mxu1 %v1131_v2 }
  0x2a   : >> { %1040 = vmatmul.mubr.msk.bf16.vlgmr.msra.gmra.mrb[8].mxu0 %vm217_vm1, %v465_v28 }
  0x2b   : >> { %1048 = vmatmul.mubr.msk.bf16.vlgmr.msra.gmra.mrb[8].mxu1 %vm217_vm1, %v529_v25  ;;  %1052 = vmatpush3.bf16.msra.mxu0 %v1108_v29 }
  0x2c   : >> { %1060 = vmatpush3.bf16.msra.mxu1 %v1109_v27  ;;  %1063 = vmatprep.mubr.msk.bf16.mxu1 %vm1132_vm0, %v1131_v2 }
  0x2d   : >> { %1061 = vmatprep.subr.bf16.mxu1 %v1131_v2  ;;  %1055 = vmatprep.mubr.msk.bf16.mxu0 %vm1132_vm0, %v1131_v2 }
  0x2e   : >> { %1053 = vmatprep.subr.bf16.mxu0 %v1131_v2 }
  0x2f   : >> { %1054 = vmatpush3.bf16.msra.mxu0 %v1110_v33 }
  0x30   : >> { %1062 = vmatpush3.bf16.msra.mxu1 %v1111_v32  ;;  %1067 = vmatprep.subr.bf16.mxu0 %v1131_v2 }
  0x32   : >> { %1056 = vmatmul.mubr.msk.bf16.vlgmr.msra.gmra.mrb[12].mxu0 %vm217_vm1, %v1112_v21 }
  0x33   : >> { %1064 = vmatmul.mubr.msk.bf16.vlgmr.msra.gmra.mrb[12].mxu1 %vm217_vm1, %v672_v34  ;;  %1068 = vmatpush3.bf16.msra.mxu0 %v1113_v35 }
  0x34   : >> { %1071 = vmatprep.mubr.msk.bf16.mxu0 %vm1132_vm0, %v1131_v2  ;;  %1069 = vmatprep.subr.bf16.mxu0 %v1131_v2 }
  0x37   : >> { %1070 = vmatpush3.bf16.msra.mxu0 %v1114_v36 }
  0x3a   : >> { %1072 = vmatmul.mubr.msk.bf16.vlgmr.msra.gmra.mrb[16].mxu0 %vm217_vm1, %v736_v37 }
  0xed   : >> { %v255_v40 = vpop.f32.mrb[0].mxu0 }
  0xee   : >> { %v310_v38 = vpop.f32.mrb[0].mxu1  ;;  %v1009_v43 = vpop.f32.mrb[1].mxu0 }
  0xef   : >> { %v1017_v39 = vpop.f32.mrb[1].mxu1  ;;  %v311_v42 = vadd.f32 %v310_v38, %v255_v40  ;;  %v258_v45 = vpop.f32.mrb[2].mxu0 }
  0xf0   : >> { %v313_v41 = vpop.f32.mrb[2].mxu1  ;;  %v1010_v47 = vpop.f32.mrb[3].mxu0 }
  0xf1   : >> { %v1018_v44 = vpop.f32.mrb[3].mxu1  ;;  %v314_v46 = vadd.f32 %v313_v41, %v258_v45 }
  0xf5   : >> { %v372_v50 = vpop.f32.mrb[4].mxu0 }
  0xf6   : >> { %v446_v48 = vpop.f32.mrb[4].mxu1  ;;  %v379_v52 = vadd.f32 %v372_v50, %v311_v42  ;;  %v1025_v53 = vpop.f32.mrb[5].mxu0 }
  0xf7   : >> { %v1033_v49 = vpop.f32.mrb[5].mxu1  ;;  %v375_v55 = vpop.f32.mrb[6].mxu0 }
  0xf8   : >> { %v449_v51 = vpop.f32.mrb[6].mxu1  ;;  %v380_v56 = vadd.f32 %v375_v55, %v314_v46  ;;  %v453_v57 = vadd.f32 %v446_v48, %v379_v52  ;;  %v1026_v58 = vpop.f32.mrb[7].mxu0 }
  0xf9   : >> { %v1034_v54 = vpop.f32.mrb[7].mxu1 }
  0xfa   : >> { %v454_v59 = vadd.f32 %v449_v51, %v380_v56 }
  0xfd   : >> { %v515_v62 = vpop.f32.mrb[8].mxu0 }
  0xfe   : >> { %v579_v60 = vpop.f32.mrb[8].mxu1  ;;  %v522_v1 = vadd.f32 %v515_v62, %v453_v57  ;;  %v1041_v2 = vpop.f32.mrb[9].mxu0 }
  0xff   : >> { %v1049_v61 = vpop.f32.mrb[9].mxu1  ;;  %v518_v4 = vpop.f32.mrb[10].mxu0 }
 0x100   : >> { %v582_v63 = vpop.f32.mrb[10].mxu1  ;;  %v523_v5 = vadd.f32 %v518_v4, %v454_v59  ;;  %v586_v6 = vadd.f32 %v579_v60, %v522_v1  ;;  %v1042_v7 = vpop.f32.mrb[11].mxu0 }
 0x101   : >> { %v1050_v3 = vpop.f32.mrb[11].mxu1 }
 0x102   : >> { %v587_v8 = vadd.f32 %v582_v63, %v523_v5 }
 0x105   : >> { %v653_v11 = vpop.f32.mrb[12].mxu0 }
 0x106   : >> { %v722_v9 = vpop.f32.mrb[12].mxu1  ;;  %v660_v13 = vadd.f32 %v653_v11, %v586_v6  ;;  %v1057_v14 = vpop.f32.mrb[13].mxu0 }
 0x107   : >> { %v1065_v10 = vpop.f32.mrb[13].mxu1  ;;  %v656_v16 = vpop.f32.mrb[14].mxu0 }
 0x108   : >> { %v725_v12 = vpop.f32.mrb[14].mxu1  ;;  %v661_v17 = vadd.f32 %v656_v16, %v587_v8  ;;  %v729_v18 = vadd.f32 %v722_v9, %v660_v13  ;;  %v1058_v19 = vpop.f32.mrb[15].mxu0 }
 0x109   : >> { %v1066_v15 = vpop.f32.mrb[15].mxu1 }
 0x10a   : >> { %v730_v20 = vadd.f32 %v725_v12, %v661_v17 }
 0x10d   : >> { %v786_v21 = vpop.f32.mrb[16].mxu0 }
 0x10e   : >> { %v793_v22 = vadd.f32 %v786_v21, %v729_v18  ;;  %v1073_v23 = vpop.f32.mrb[17].mxu0 }
 0x10f   : >> { %v789_v24 = vpop.f32.mrb[18].mxu0 }
 0x110   : >> { %v801_v25 = vadd.f32 %v1164_v0, %v793_v22  ;;  %v794_v26 = vadd.f32 %v789_v24, %v730_v20  ;;  %v1074_v27 = vpop.f32.mrb[19].mxu0  ;;  %177 = sbr.rel (!%p175_p4) target bundleno = 17 (0x11), region = 81 }
 0x112   : >> { %v973_v28 = vpack.c.bf16 %v801_v25, %v801_v25  ;;  %v802_v29 = vadd.f32 %v1164_v0, %v794_v26 }
 0x114   : >> { %814 = vst.msk [vmem:[%s812_s15] sm:$0xf] %vm813_vm2, %v973_v28  ;;  %v974_v30 = vpack.c.bf16 %v802_v29, %v802_v29 }
 0x116   : >> { %816 = vst.msk [vmem:[%s812_s15 + $0x4] sm:$0x7] %vm815_vm3, %v974_v30 }
 0x117 PF: > { %s13_s12 = sadd.s32 1, %s1125_s12  }
 0x118   : > { %p10_p5 = scmp.ge.s32.totalorder %s13_s12, 4  }
 0x11a   :  { %12 = sbr.rel (!%p10_p5) target bundleno = 1 (0x1), region = 92 }

// kernel: unet_forward.24
= control target key start
LH: loop header
LB: loop body
LE: loop exit
PB: predicated region body
PF: predicated region fallthrough
CT: control target
= control target key end

     0   :  { %s2144_s18 = smov 0   ;;  %s2440_s0 = inlined_call_operand.vmem [shape: bf16[2,18,18,32], index: 0, kind: input, shape index: {}]   ;;  %s2441_s1 = inlined_call_operand.vmem [shape: bf16[2,18,18,32], index: 1, kind: input, shape index: {}]   ;;  %s2442_s2 = inlined_call_operand.vmem [shape: bf16[3,3,32,32], index: 2, kind: input, shape index: {}]   ;;  %s2443_s3 = inlined_call_operand.vmem [shape: bf16[3,3,32,32], index: 3, kind: input, shape index: {}]   ;;  %s2444_s4 = inlined_call_operand.vmem [shape: f32[1,32], index: 4, kind: input, shape index: {}]   ;;  %s2445_s5 = inlined_call_operand.vmem [shape: bf16[2,16,16,32], index: 5, kind: output, shape index: {}]  }
   0x1 LB: > { %s1665_s19 = sadd.s32 4294967295, %s2106_s18   ;;  %p1669_p0 = scmp.ge.s32.totalorder %s2106_s18, 1  ;;  %s2106_s18 = sphi %s2144_s18, %s15_s18  }
   0x2   : > { %p197_p1 = scmp.lt.s32.totalorder %s2106_s18, 3 }
   0x4   : > { %p198_p2 = pnand %p1669_p0, %p197_p1 }
   0x5   : > { %p230_p3 = scmp.lt.s32.totalorder (!%p198_p2), %s1665_s19, 1  ;;  %v2155_v0 = vld [vmem:[%s2444_s4] ss:$0 sm:$0xff] (!%p198_p2)  ;;  %s2172_s8 = smov (!%p198_p2), 0  }
   0x6   : > { %201 = sbr.rel (%p198_p2) target bundleno = 318 (0x13e), region = 40 }
   0xd   : > { %s2447_s19 = smov (!%p230_p3, %s1665_s19), 1 }
   0xe   : > { %s2029_s22 = smul.u32 216, %s2447_s19  ;;  %s1825_s23 = sshll.u32 %s2447_s19, 7 }
   0xf   : > { %s2160_s26 = scalar_lea.vmem %s2445_s5, %s1825_s23 }
  0x10   : > { %s2165_s29 = scalar_lea.vmem %s2440_s0, %s2029_s22  ;;  %s2170_s7 = scalar_lea.vmem %s2441_s1, %s2029_s22 }
  0x11 LB: >> { %v2048_v1 = vld [vmem:[%s2442_s2 + $0x10] sm:$0xff]   ;;  %v2112_v2 = vmov 0.0   ;;  %v2049_v3 = vld [vmem:[%s2442_s2] sm:$0xff]   ;;  %v2050_v4 = vld [vmem:[%s2442_s2 + $0x18] sm:$0xff]   ;;  %vm2113_vm0 = vmmov 0   ;;  %s1826_s15 = smul.u32 12, %s2110_s8  ;;  %s2110_s8 = sphi %s2172_s8, %s252_s8  }
  0x12   : >> { %1885 = vmatprep.subr.bf16.mxu0 %v2112_v2  ;;  %1893 = vmatprep.subr.bf16.mxu1 %v2112_v2  ;;  %v2051_v5 = vld [vmem:[%s2442_s2 + $0x8] sm:$0xff]   ;;  %vm276_vm1 = vsmask.f32 7424  ;;  %vm301_vm2 = vcmask 261120   ;;  %v2055_v11 = vld [vmem:[%s2442_s2 + $0x30] sm:$0xff]   ;;  %v2054_v15 = vld [vmem:[%s2442_s2 + $0x20] sm:$0xff]  }
  0x13   : >> { %1886 = vmatpush3.bf16.msra.mxu0 %v2048_v1  ;;  %1897 = vmatprep.mubr.msk.bf16.mxu1 %vm2113_vm0, %v2112_v2  ;;  %s2201_s19 = scalar_lea.vmem %s2165_s29, %s1826_s15  ;;  %v2057_v16 = vld [vmem:[%s2442_s2 + $0x38] sm:$0xff]   ;;  %v2056_v18 = vld [vmem:[%s2442_s2 + $0x28] sm:$0xff]   ;;  %v2060_v22 = vld [vmem:[%s2442_s2 + $0x50] sm:$0xff]   ;;  %vm406_vm3 = vcmask 1046528   ;;  %s1830_s27 = sshll.u32 %s2110_s8, 3  ;;  %vm1572_vm4 = vcmask 257024  }
  0x14   : >> { %1894 = vmatpush3.bf16.msra.mxu1 %v2049_v3  ;;  %1887 = vmatprep.subr.bf16.mxu0 %v2112_v2  ;;  %v2052_v6 = vld [vmem:[%s2201_s19] sm:$0xff]   ;;  %v2053_v7 = vld [vmem:[%s2201_s19 + $0x8] ss:$0 sps:$4 sm:$0x11]   ;;  %v2058_v19 = vld [vmem:[%s2201_s19 + $0xc] sm:$0xff]   ;;  %s1571_s28 = scalar_lea.vmem %s2160_s26, %s1830_s27  ;;  %s252_s8 = sadd.s32 1, %s2110_s8  }
  0x15   : >> { %1895 = vmatprep.subr.bf16.mxu1 %v2112_v2  ;;  %1889 = vmatprep.mubr.msk.bf16.mxu0 %vm2113_vm0, %v2112_v2  ;;  %v278_v8 = vshrl.u32 %v2052_v6, 16  ;;  %v280_v9 = vshll.u32 %v2052_v6, 16  ;;  %v285_v10 = vshll.u32 %v2053_v7, 16  ;;  %v407_v20 = vrot.slane %v2052_v6, 1  ;;  %v2059_v25 = vld [vmem:[%s2442_s2 + $0x40] sm:$0xff]   ;;  %v2062_v31 = vld [vmem:[%s2442_s2 + $0x58] sm:$0xff]  }
  0x16   : >> { %v408_v21 = vrot.slane %v2053_v7, 1  ;;  %v2063_v23 = vld [vmem:[%s2201_s19 + $0x14] ss:$0 sps:$4 sm:$0x11]   ;;  %v553_v24 = vshll.u32 %v2058_v19, 16  ;;  %v625_v26 = vrot.slane %v2058_v19, 1 }
  0x17   : >> { %1888 = vmatpush3.bf16.msra.mxu0 %v2050_v4  ;;  %v282_v12 = vrot.slane %v280_v9, 1  ;;  %v287_v13 = vrot.slane %v285_v10, 1  ;;  %v551_v27 = vshrl.u32 %v2058_v19, 16  ;;  %v626_v28 = vrot.slane %v2063_v23, 1  ;;  %v2247_v33 = vld [vmem:[%s2201_s19 + $0x18] sm:$0xff]   ;;  %v2061_v35 = vld [vmem:[%s2442_s2 + $0x48] sm:$0xff]  }
  0x18   : >> { %1896 = vmatpush3.bf16.msra.mxu1 %v2051_v5  ;;  %1901 = vmatprep.subr.bf16.mxu0 %v2112_v2  ;;  %v558_v29 = vshll.u32 %v2063_v23, 16  ;;  %v409_v30 = vsel %vm406_vm3, %v407_v20, %v408_v21  ;;  %v555_v32 = vrot.slane %v553_v24, 1  ;;  %v2250_v34 = vld [vmem:[%s2201_s19 + $0x20] ss:$0 sps:$4 sm:$0x11]   ;;  %v2065_v39 = vld [vmem:[%s2442_s2 + $0x70] sm:$0xff]   ;;  %s2269_s19 = scalar_lea.vmem %s2170_s7, %s1826_s15 }
  0x19   : >> { %1909 = vmatprep.subr.bf16.mxu1 %v2112_v2  ;;  %v283_v14 = vor.u32 %v282_v12, %v278_v8  ;;  %v627_v36 = vsel %vm406_vm3, %v625_v26, %v626_v28  ;;  %v769_v40 = vshrl.u32 %v2247_v33, 16  ;;  %v771_v41 = vshll.u32 %v2247_v33, 16  ;;  %v2064_v45 = vld [vmem:[%s2442_s2 + $0x60] sm:$0xff]   ;;  %v2067_v46 = vld [vmem:[%s2442_s2 + $0x78] sm:$0xff]   ;;  %v2066_v49 = vld [vmem:[%s2442_s2 + $0x68] sm:$0xff]   ;;  %p249_p4 = scmp.ge.s32.totalorder %s252_s8, 16  }
  0x1a   : >> { %v560_v37 = vrot.slane %v558_v29, 1  ;;  %v556_v38 = vor.u32 %v555_v32, %v551_v27  ;;  %v776_v42 = vshll.u32 %v2250_v34, 16  ;;  %v2071_v51 = vld [vmem:[%s2443_s3] sm:$0xff]   ;;  %v2073_v53 = vld [vmem:[%s2443_s3 + $0x8] sm:$0xff]   ;;  %v843_v58 = vrot.slane %v2247_v33, 1  ;;  %v2075_v1 = vld [vmem:[%s2443_s3 + $0x10] sm:$0xff]  }
  0x1b   : >> { %1898 = vmatmul.mubr.msk.bf16.vlgmr.msra.gmra.mrb[0].mxu1 %vm301_vm2, %v2052_v6  ;;  %v288_v17 = vsel %vm276_vm1, %v283_v14, %v287_v13  ;;  %v773_v43 = vrot.slane %v771_v41, 1  ;;  %v2070_v52 = vld [vmem:[%s2442_s2 + $0x80] sm:$0xff]   ;;  %v2072_v55 = vld [vmem:[%s2442_s2 + $0x88] sm:$0xff]   ;;  %v844_v59 = vrot.slane %v2250_v34, 1  ;;  %v2077_v10 = vld [vmem:[%s2443_s3 + $0x18] sm:$0xff]  }
  0x1c   : >> { %1910 = vmatpush3.bf16.msra.mxu1 %v2055_v11  ;;  %1913 = vmatprep.mubr.msk.bf16.mxu1 %vm2113_vm0, %v2112_v2  ;;  %v561_v44 = vsel %vm276_vm1, %v556_v38, %v560_v37  ;;  %v778_v48 = vrot.slane %v776_v42, 1  ;;  %v2074_v54 = vld [vmem:[%s2269_s19] sm:$0xff]   ;;  %v2079_v56 = vld [vmem:[%s2269_s19 + $0x8] ss:$0 sps:$4 sm:$0x11]   ;;  %v2320_v63 = vld [vmem:[%s2269_s19 + $0xc] sm:$0xff]  }
  0x1d   : >> { %1911 = vmatprep.subr.bf16.mxu1 %v2112_v2  ;;  %1890 = vmatmul.mubr.msk.bf16.vlgmr.msra.gmra.mrb[0].mxu0 %vm301_vm2, %v288_v17  ;;  %v774_v47 = vor.u32 %v773_v43, %v769_v40  ;;  %v986_v57 = vshll.u32 %v2074_v54, 16  ;;  %v2076_v60 = vld [vmem:[%s2443_s3 + $0x20] sm:$0xff]   ;;  %v1058_v61 = vrot.slane %v2074_v54, 1  ;;  %v984_v62 = vshrl.u32 %v2074_v54, 16  ;;  %v2078_v3 = vld [vmem:[%s2443_s3 + $0x28] sm:$0xff]   ;;  %v2082_v23 = vld [vmem:[%s2443_s3 + $0x38] sm:$0xff]  }
  0x1e   : >> { %1902 = vmatpush3.bf16.msra.mxu0 %v2054_v15  ;;  %1905 = vmatprep.mubr.msk.bf16.mxu0 %vm2113_vm0, %v2112_v2  ;;  %v1059_v4 = vrot.slane %v2079_v56, 1  ;;  %v991_v6 = vshll.u32 %v2079_v56, 16  ;;  %v845_v7 = vsel %vm406_vm3, %v843_v58, %v844_v59  ;;  %v2335_v8 = vld [vmem:[%s2269_s19 + $0x14] ss:$0 sps:$4 sm:$0x11]   ;;  %v1202_v9 = vshll.u32 %v2320_v63, 16 }
  0x1f   : >> { %1903 = vmatprep.subr.bf16.mxu0 %v2112_v2  ;;  %v779_v50 = vsel %vm276_vm1, %v774_v47, %v778_v48  ;;  %v988_v5 = vrot.slane %v986_v57, 1  ;;  %v2081_v14 = vld [vmem:[%s2443_s3 + $0x40] sm:$0xff]   ;;  %v1200_v15 = vshrl.u32 %v2320_v63, 16  ;;  %v1207_v17 = vshll.u32 %v2335_v8, 16  ;;  %v2083_v20 = vld [vmem:[%s2443_s3 + $0x48] sm:$0xff]   ;;  %v2086_v26 = vld [vmem:[%s2443_s3 + $0x50] sm:$0xff]  }
  0x20   : >> { %1912 = vmatpush3.bf16.msra.mxu1 %v2057_v16  ;;  %v1060_v11 = vsel %vm406_vm3, %v1058_v61, %v1059_v4  ;;  %v993_v12 = vrot.slane %v991_v6, 1  ;;  %v1204_v16 = vrot.slane %v1202_v9, 1  ;;  %v2089_v27 = vld [vmem:[%s2443_s3 + $0x68] sm:$0xff]   ;;  %v2090_v28 = vld [vmem:[%s2269_s19 + $0x18] sm:$0xff]   ;;  %v1274_v29 = vrot.slane %v2320_v63, 1  ;;  %v2092_v32 = vld [vmem:[%s2443_s3 + $0x80] sm:$0xff]  }
  0x21   : >> { %1925 = vmatprep.subr.bf16.mxu1 %v2112_v2  ;;  %v989_v13 = vor.u32 %v988_v5, %v984_v62  ;;  %v1418_v34 = vshll.u32 %v2090_v28, 16  ;;  %v2091_v37 = vld [vmem:[%s2443_s3 + $0x70] sm:$0xff]   ;;  %v2094_v38 = vld [vmem:[%s2443_s3 + $0x88] sm:$0xff]   ;;  %v1416_v40 = vshrl.u32 %v2090_v28, 16  ;;  %v2093_v43 = vld [vmem:[%s2443_s3 + $0x78] sm:$0xff]  }
  0x22   : >> { %1904 = vmatpush3.bf16.msra.mxu0 %v2056_v18  ;;  %v1205_v21 = vor.u32 %v1204_v16, %v1200_v15 }
  0x23   : >> { %1914 = vmatmul.mubr.msk.bf16.vlgmr.msra.gmra.mrb[4].mxu1 %vm301_vm2, %v2058_v19  ;;  %1917 = vmatprep.subr.bf16.mxu0 %v2112_v2  ;;  %v994_v18 = vsel %vm276_vm1, %v989_v13, %v993_v12  ;;  %v2080_v19 = vld [vmem:[%s2443_s3 + $0x30] sm:$0xff]   ;;  %v1420_v41 = vrot.slane %v1418_v34, 1 }
  0x24   : >> { %1926 = vmatpush3.bf16.msra.mxu1 %v2060_v22  ;;  %1929 = vmatprep.mubr.msk.bf16.mxu1 %vm2113_vm0, %v2112_v2  ;;  %v1209_v22 = vrot.slane %v1207_v17, 1 }
  0x25   : >> { %1927 = vmatprep.subr.bf16.mxu1 %v2112_v2  ;;  %1906 = vmatmul.mubr.msk.bf16.vlgmr.msra.gmra.mrb[4].mxu0 %vm301_vm2, %v409_v30  ;;  %v1275_v30 = vrot.slane %v2335_v8, 1 }
  0x26   : >> { %1918 = vmatpush3.bf16.msra.mxu0 %v2059_v25  ;;  %1921 = vmatprep.mubr.msk.bf16.mxu0 %vm2113_vm0, %v2112_v2  ;;  %v1210_v24 = vsel %vm276_vm1, %v1205_v21, %v1209_v22  ;;  %v2087_v25 = vld [vmem:[%s2443_s3 + $0x60] sm:$0xff]  }
  0x27   : >> { %1919 = vmatprep.subr.bf16.mxu0 %v2112_v2 }
  0x28   : >> { %1928 = vmatpush3.bf16.msra.mxu1 %v2062_v31  ;;  %v2088_v31 = vld [vmem:[%s2443_s3 + $0x58] sm:$0xff]  }
  0x29   : >> { %1941 = vmatprep.subr.bf16.mxu1 %v2112_v2 }
  0x2a   : >> { %1920 = vmatpush3.bf16.msra.mxu0 %v2061_v35  ;;  %v1276_v35 = vsel %vm406_vm3, %v1274_v29, %v1275_v30 }
  0x2b   : >> { %1930 = vmatmul.mubr.msk.bf16.vlgmr.msra.gmra.mrb[8].mxu1 %vm301_vm2, %v627_v36  ;;  %1933 = vmatprep.subr.bf16.mxu0 %v2112_v2  ;;  %v1490_v36 = vrot.slane %v2090_v28, 1 }
  0x2c   : >> { %1942 = vmatpush3.bf16.msra.mxu1 %v2065_v39  ;;  %1945 = vmatprep.mubr.msk.bf16.mxu1 %vm2113_vm0, %v2112_v2 }
  0x2d   : >> { %1943 = vmatprep.subr.bf16.mxu1 %v2112_v2  ;;  %1922 = vmatmul.mubr.msk.bf16.vlgmr.msra.gmra.mrb[8].mxu0 %vm301_vm2, %v561_v44 }
  0x2e   : >> { %1934 = vmatpush3.bf16.msra.mxu0 %v2064_v45  ;;  %1937 = vmatprep.mubr.msk.bf16.mxu0 %vm2113_vm0, %v2112_v2  ;;  %v1421_v45 = vor.u32 %v1420_v41, %v1416_v40 }
  0x2f   : >> { %1935 = vmatprep.subr.bf16.mxu0 %v2112_v2 }
  0x30   : >> { %1944 = vmatpush3.bf16.msra.mxu1 %v2067_v46 }
  0x31   : >> { %1957 = vmatprep.subr.bf16.mxu1 %v2112_v2 }
  0x32   : >> { %1936 = vmatpush3.bf16.msra.mxu0 %v2066_v49 }
  0x33   : >> { %1946 = vmatmul.mubr.msk.bf16.vlgmr.msra.gmra.mrb[12].mxu1 %vm301_vm2, %v779_v50  ;;  %1949 = vmatprep.subr.bf16.mxu0 %v2112_v2 }
  0x34   : >> { %1958 = vmatpush3.bf16.msra.mxu1 %v2071_v51  ;;  %1961 = vmatprep.mubr.msk.bf16.mxu1 %vm2113_vm0, %v2112_v2 }
  0x35   : >> { %1959 = vmatprep.subr.bf16.mxu1 %v2112_v2  ;;  %1938 = vmatmul.mubr.msk.bf16.vlgmr.msra.gmra.mrb[12].mxu0 %vm301_vm2, %v2247_v33  ;;  %v2095_v33 = vld [vmem:[%s2269_s19 + $0x20] ss:$0 sps:$4 sm:$0x11]  }
  0x36   : >> { %1950 = vmatpush3.bf16.msra.mxu0 %v2070_v52  ;;  %1953 = vmatprep.mubr.msk.bf16.mxu0 %vm2113_vm0, %v2112_v2  ;;  %v1491_v39 = vrot.slane %v2095_v33, 1  ;;  %v1423_v42 = vshll.u32 %v2095_v33, 16 }
  0x37   : >> { %1951 = vmatprep.subr.bf16.mxu0 %v2112_v2 }
  0x38   : >> { %1960 = vmatpush3.bf16.msra.mxu1 %v2073_v53  ;;  %v1492_v44 = vsel %vm406_vm3, %v1490_v36, %v1491_v39  ;;  %v1425_v46 = vrot.slane %v1423_v42, 1 }
  0x39   : >> { %1973 = vmatprep.subr.bf16.mxu1 %v2112_v2 }
  0x3a   : >> { %1952 = vmatpush3.bf16.msra.mxu0 %v2072_v55  ;;  %v1426_v47 = vsel %vm276_vm1, %v1421_v45, %v1425_v46 }
  0x3b   : >> { %1962 = vmatmul.mubr.msk.bf16.vlgmr.msra.gmra.mrb[16].mxu1 %vm301_vm2, %v2074_v54  ;;  %1965 = vmatprep.subr.bf16.mxu0 %v2112_v2 }
  0x3c   : >> { %1974 = vmatpush3.bf16.msra.mxu1 %v2076_v60  ;;  %1977 = vmatprep.mubr.msk.bf16.mxu1 %vm2113_vm0, %v2112_v2 }
  0x3d   : >> { %1975 = vmatprep.subr.bf16.mxu1 %v2112_v2  ;;  %1954 = vmatmul.mubr.msk.bf16.vlgmr.msra.gmra.mrb[16].mxu0 %vm301_vm2, %v845_v7 }
  0x3e   : >> { %1966 = vmatpush3.bf16.msra.mxu0 %v2075_v1  ;;  %1969 = vmatprep.mubr.msk.bf16.mxu0 %vm2113_vm0, %v2112_v2 }
  0x3f   : >> { %1967 = vmatprep.subr.bf16.mxu0 %v2112_v2 }
  0x40   : >> { %1976 = vmatpush3.bf16.msra.mxu1 %v2078_v3 }
  0x41   : >> { %1989 = vmatprep.subr.bf16.mxu1 %v2112_v2 }
  0x42   : >> { %1968 = vmatpush3.bf16.msra.mxu0 %v2077_v10 }
  0x43   : >> { %1978 = vmatmul.mubr.msk.bf16.vlgmr.msra.gmra.mrb[20].mxu1 %vm301_vm2, %v1060_v11  ;;  %1981 = vmatprep.subr.bf16.mxu0 %v2112_v2 }
  0x44   : >> { %1990 = vmatpush3.bf16.msra.mxu1 %v2081_v14  ;;  %1993 = vmatprep.mubr.msk.bf16.mxu1 %vm2113_vm0, %v2112_v2 }
  0x45   : >> { %1991 = vmatprep.subr.bf16.mxu1 %v2112_v2  ;;  %1970 = vmatmul.mubr.msk.bf16.vlgmr.msra.gmra.mrb[20].mxu0 %vm301_vm2, %v994_v18 }
  0x46   : >> { %1982 = vmatpush3.bf16.msra.mxu0 %v2080_v19  ;;  %1985 = vmatprep.mubr.msk.bf16.mxu0 %vm2113_vm0, %v2112_v2 }
  0x47   : >> { %1983 = vmatprep.subr.bf16.mxu0 %v2112_v2 }
  0x48   : >> { %1992 = vmatpush3.bf16.msra.mxu1 %v2083_v20 }
  0x49   : >> { %2005 = vmatprep.subr.bf16.mxu1 %v2112_v2 }
  0x4a   : >> { %1984 = vmatpush3.bf16.msra.mxu0 %v2082_v23 }
  0x4b   : >> { %1994 = vmatmul.mubr.msk.bf16.vlgmr.msra.gmra.mrb[24].mxu1 %vm301_vm2, %v1210_v24  ;;  %1997 = vmatprep.subr.bf16.mxu0 %v2112_v2 }
  0x4c   : >> { %2006 = vmatpush3.bf16.msra.mxu1 %v2087_v25  ;;  %2009 = vmatprep.mubr.msk.bf16.mxu1 %vm2113_vm0, %v2112_v2 }
  0x4d   : >> { %2007 = vmatprep.subr.bf16.mxu1 %v2112_v2  ;;  %1986 = vmatmul.mubr.msk.bf16.vlgmr.msra.gmra.mrb[24].mxu0 %vm301_vm2, %v2320_v63 }
  0x4e   : >> { %1998 = vmatpush3.bf16.msra.mxu0 %v2086_v26  ;;  %2001 = vmatprep.mubr.msk.bf16.mxu0 %vm2113_vm0, %v2112_v2 }
  0x4f   : >> { %1999 = vmatprep.subr.bf16.mxu0 %v2112_v2 }
  0x50   : >> { %2008 = vmatpush3.bf16.msra.mxu1 %v2089_v27 }
  0x51   : >> { %2021 = vmatprep.subr.bf16.mxu1 %v2112_v2 }
  0x52   : >> { %2000 = vmatpush3.bf16.msra.mxu0 %v2088_v31 }
  0x53   : >> { %2010 = vmatmul.mubr.msk.bf16.vlgmr.msra.gmra.mrb[28].mxu1 %vm301_vm2, %v2090_v28  ;;  %2013 = vmatprep.subr.bf16.mxu0 %v2112_v2 }
  0x54   : >> { %2022 = vmatpush3.bf16.msra.mxu1 %v2092_v32  ;;  %2025 = vmatprep.mubr.msk.bf16.mxu1 %vm2113_vm0, %v2112_v2 }
  0x55   : >> { %2023 = vmatprep.subr.bf16.mxu1 %v2112_v2  ;;  %2002 = vmatmul.mubr.msk.bf16.vlgmr.msra.gmra.mrb[28].mxu0 %vm301_vm2, %v1276_v35 }
  0x56   : >> { %2014 = vmatpush3.bf16.msra.mxu0 %v2091_v37  ;;  %2017 = vmatprep.mubr.msk.bf16.mxu0 %vm2113_vm0, %v2112_v2 }
  0x57   : >> { %2015 = vmatprep.subr.bf16.mxu0 %v2112_v2 }
  0x58   : >> { %2024 = vmatpush3.bf16.msra.mxu1 %v2094_v38 }
  0x5a   : >> { %2016 = vmatpush3.bf16.msra.mxu0 %v2093_v43 }
  0x5b   : >> { %2026 = vmatmul.mubr.msk.bf16.vlgmr.msra.gmra.mrb[32].mxu1 %vm301_vm2, %v1492_v44 }
  0x5d   : >> { %2018 = vmatmul.mubr.msk.bf16.vlgmr.msra.gmra.mrb[32].mxu0 %vm301_vm2, %v1426_v47 }
  0xee   : >> { %v394_v48 = vpop.f32.mrb[0].mxu1 }
  0xef   : >> { %v1899_v49 = vpop.f32.mrb[1].mxu1 }
  0xf0   : >> { %v397_v50 = vpop.f32.mrb[2].mxu1  ;;  %v339_v52 = vpop.f32.mrb[0].mxu0 }
  0xf1   : >> { %v1900_v51 = vpop.f32.mrb[3].mxu1  ;;  %v395_v53 = vadd.f32 %v394_v48, %v339_v52  ;;  %v1891_v54 = vpop.f32.mrb[1].mxu0 }
  0xf2   : >> { %v342_v55 = vpop.f32.mrb[2].mxu0 }
  0xf3   : >> { %v398_v56 = vadd.f32 %v397_v50, %v342_v55  ;;  %v1892_v57 = vpop.f32.mrb[3].mxu0 }
  0xf6   : >> { %v534_v58 = vpop.f32.mrb[4].mxu1 }
  0xf7   : >> { %v1915_v59 = vpop.f32.mrb[5].mxu1 }
  0xf8   : >> { %v537_v2 = vpop.f32.mrb[6].mxu1  ;;  %v459_v61 = vpop.f32.mrb[4].mxu0 }
  0xf9   : >> { %v1916_v60 = vpop.f32.mrb[7].mxu1  ;;  %v466_v62 = vadd.f32 %v459_v61, %v395_v53  ;;  %v1907_v63 = vpop.f32.mrb[5].mxu0 }
  0xfa   : >> { %v462_v1 = vpop.f32.mrb[6].mxu0 }
  0xfb   : >> { %v467_v3 = vadd.f32 %v462_v1, %v398_v56  ;;  %v1908_v4 = vpop.f32.mrb[7].mxu0  ;;  %v541_v5 = vadd.f32 %v534_v58, %v466_v62 }
  0xfd   : >> { %v542_v8 = vadd.f32 %v537_v2, %v467_v3 }
  0xfe   : >> { %v677_v6 = vpop.f32.mrb[8].mxu1 }
  0xff   : >> { %v1931_v7 = vpop.f32.mrb[9].mxu1 }
 0x100   : >> { %v680_v9 = vpop.f32.mrb[10].mxu1  ;;  %v611_v11 = vpop.f32.mrb[8].mxu0 }
 0x101   : >> { %v1932_v10 = vpop.f32.mrb[11].mxu1  ;;  %v618_v12 = vadd.f32 %v611_v11, %v541_v5  ;;  %v1923_v13 = vpop.f32.mrb[9].mxu0 }
 0x102   : >> { %v614_v14 = vpop.f32.mrb[10].mxu0 }
 0x103   : >> { %v619_v15 = vadd.f32 %v614_v14, %v542_v8  ;;  %v1924_v16 = vpop.f32.mrb[11].mxu0  ;;  %v684_v17 = vadd.f32 %v677_v6, %v618_v12 }
 0x105   : >> { %v685_v20 = vadd.f32 %v680_v9, %v619_v15 }
 0x106   : >> { %v829_v18 = vpop.f32.mrb[12].mxu1 }
 0x107   : >> { %v1947_v19 = vpop.f32.mrb[13].mxu1 }
 0x108   : >> { %v832_v21 = vpop.f32.mrb[14].mxu1  ;;  %v752_v23 = vpop.f32.mrb[12].mxu0 }
 0x109   : >> { %v1948_v22 = vpop.f32.mrb[15].mxu1  ;;  %v759_v24 = vadd.f32 %v752_v23, %v684_v17  ;;  %v1939_v25 = vpop.f32.mrb[13].mxu0 }
 0x10a   : >> { %v755_v26 = vpop.f32.mrb[14].mxu0 }
 0x10b   : >> { %v760_v27 = vadd.f32 %v755_v26, %v685_v20  ;;  %v1940_v28 = vpop.f32.mrb[15].mxu0  ;;  %v836_v29 = vadd.f32 %v829_v18, %v759_v24 }
 0x10d   : >> { %v837_v32 = vadd.f32 %v832_v21, %v760_v27 }
 0x10e   : >> { %v967_v30 = vpop.f32.mrb[16].mxu1 }
 0x10f   : >> { %v1963_v31 = vpop.f32.mrb[17].mxu1 }
 0x110   : >> { %v970_v33 = vpop.f32.mrb[18].mxu1  ;;  %v895_v35 = vpop.f32.mrb[16].mxu0 }
 0x111   : >> { %v1964_v34 = vpop.f32.mrb[19].mxu1  ;;  %v902_v36 = vadd.f32 %v895_v35, %v836_v29  ;;  %v1955_v37 = vpop.f32.mrb[17].mxu0 }
 0x112   : >> { %v898_v38 = vpop.f32.mrb[18].mxu0 }
 0x113   : >> { %v903_v39 = vadd.f32 %v898_v38, %v837_v32  ;;  %v1956_v40 = vpop.f32.mrb[19].mxu0  ;;  %v974_v41 = vadd.f32 %v967_v30, %v902_v36 }
 0x115   : >> { %v975_v44 = vadd.f32 %v970_v33, %v903_v39 }
 0x116   : >> { %v1110_v42 = vpop.f32.mrb[20].mxu1 }
 0x117   : >> { %v1979_v43 = vpop.f32.mrb[21].mxu1 }
 0x118   : >> { %v1113_v45 = vpop.f32.mrb[22].mxu1  ;;  %v1044_v47 = vpop.f32.mrb[20].mxu0 }
 0x119   : >> { %v1980_v46 = vpop.f32.mrb[23].mxu1  ;;  %v1051_v48 = vadd.f32 %v1044_v47, %v974_v41  ;;  %v1971_v49 = vpop.f32.mrb[21].mxu0 }
 0x11a   : >> { %v1047_v50 = vpop.f32.mrb[22].mxu0 }
 0x11b   : >> { %v1052_v51 = vadd.f32 %v1047_v50, %v975_v44  ;;  %v1972_v52 = vpop.f32.mrb[23].mxu0  ;;  %v1117_v53 = vadd.f32 %v1110_v42, %v1051_v48 }
 0x11d   : >> { %v1118_v56 = vadd.f32 %v1113_v45, %v1052_v51 }
 0x11e   : >> { %v1260_v54 = vpop.f32.mrb[24].mxu1 }
 0x11f   : >> { %v1995_v55 = vpop.f32.mrb[25].mxu1 }
 0x120   : >> { %v1263_v57 = vpop.f32.mrb[26].mxu1  ;;  %v1183_v59 = vpop.f32.mrb[24].mxu0 }
 0x121   : >> { %v1996_v58 = vpop.f32.mrb[27].mxu1  ;;  %v1190_v2 = vadd.f32 %v1183_v59, %v1117_v53  ;;  %v1987_v60 = vpop.f32.mrb[25].mxu0 }
 0x122   : >> { %v1186_v61 = vpop.f32.mrb[26].mxu0 }
 0x123   : >> { %v1191_v62 = vadd.f32 %v1186_v61, %v1118_v56  ;;  %v1988_v63 = vpop.f32.mrb[27].mxu0  ;;  %v1267_v1 = vadd.f32 %v1260_v54, %v1190_v2 }
 0x125   : >> { %v1268_v5 = vadd.f32 %v1263_v57, %v1191_v62 }
 0x126   : >> { %v1399_v3 = vpop.f32.mrb[28].mxu1 }
 0x127   : >> { %v2011_v4 = vpop.f32.mrb[29].mxu1 }
 0x128   : >> { %v1402_v6 = vpop.f32.mrb[30].mxu1  ;;  %v1326_v8 = vpop.f32.mrb[28].mxu0 }
 0x129   : >> { %v2012_v7 = vpop.f32.mrb[31].mxu1  ;;  %v1333_v9 = vadd.f32 %v1326_v8, %v1267_v1  ;;  %v2003_v10 = vpop.f32.mrb[29].mxu0 }
 0x12a   : >> { %v1329_v11 = vpop.f32.mrb[30].mxu0 }
 0x12b   : >> { %v1334_v12 = vadd.f32 %v1329_v11, %v1268_v5  ;;  %v2004_v13 = vpop.f32.mrb[31].mxu0  ;;  %v1406_v14 = vadd.f32 %v1399_v3, %v1333_v9 }
 0x12d   : >> { %v1407_v17 = vadd.f32 %v1402_v6, %v1334_v12 }
 0x12e   : >> { %v1542_v15 = vpop.f32.mrb[32].mxu1 }
 0x12f   : >> { %v2027_v16 = vpop.f32.mrb[33].mxu1 }
 0x130   : >> { %v1545_v18 = vpop.f32.mrb[34].mxu1  ;;  %v1476_v20 = vpop.f32.mrb[32].mxu0 }
 0x131   : >> { %v2028_v19 = vpop.f32.mrb[35].mxu1  ;;  %v1483_v21 = vadd.f32 %v1476_v20, %v1406_v14  ;;  %v2019_v22 = vpop.f32.mrb[33].mxu0 }
 0x132   : >> { %v1479_v23 = vpop.f32.mrb[34].mxu0 }
 0x133   : >> { %v1549_v24 = vadd.f32 %v1542_v15, %v1483_v21  ;;  %v1484_v25 = vadd.f32 %v1479_v23, %v1407_v17  ;;  %v2020_v26 = vpop.f32.mrb[35].mxu0 }
 0x135   : >> { %v1557_v27 = vadd.f32 %v2155_v0, %v1549_v24  ;;  %v1550_v28 = vadd.f32 %v1545_v18, %v1484_v25 }
 0x137   : >> { %v1559_v29 = vmax.f32 %v1557_v27, 0.0  ;;  %v1558_v30 = vadd.f32 %v2155_v0, %v1550_v28  ;;  %251 = sbr.rel (!%p249_p4) target bundleno = 17 (0x11), region = 103 }
 0x139   : >> { %v1828_v31 = vpack.c.bf16 %v1559_v29, %v1559_v29  ;;  %v1560_v32 = vmax.f32 %v1558_v30, 0.0 }
 0x13b   : >> { %1573 = vst.msk [vmem:[%s1571_s28] sm:$0xf] %vm1572_vm4, %v1828_v31  ;;  %v1829_v33 = vpack.c.bf16 %v1560_v32, %v1560_v32 }
 0x13d   : >> { %1574 = vst.msk [vmem:[%s1571_s28 + $0x4] sm:$0xf] %vm1572_vm4, %v1829_v33 }
 0x13e PF: > { %s15_s18 = sadd.s32 1, %s2106_s18  }
 0x13f   : > { %p12_p5 = scmp.ge.s32.totalorder %s15_s18, 4  }
 0x141   :  { %14 = sbr.rel (!%p12_p5) target bundleno = 1 (0x1), region = 114 }

// kernel: unet_forward.26
= control target key start
LH: loop header
LB: loop body
LE: loop exit
PB: predicated region body
PF: predicated region fallthrough
CT: control target
= control target key end

     0   :  { %s562_s15 = smov 0   ;;  %s610_s0 = inlined_call_operand.vmem [shape: bf16[2,14,14,32], index: 0, kind: input, shape index: {}]   ;;  %s611_s1 = inlined_call_operand.vmem [shape: bf16[32,32], index: 1, kind: input, shape index: {}]   ;;  %s612_s2 = inlined_call_operand.vmem [shape: bf16[32,32], index: 2, kind: input, shape index: {}]   ;;  %s613_s3 = inlined_call_operand.vmem [shape: f32[1,32], index: 3, kind: input, shape index: {}]   ;;  %s614_s4 = inlined_call_operand.vmem [shape: bf16[2,14,2,14,32], index: 4, kind: output, shape index: {}]  }
   0x1 LB: > { %s436_s16 = sadd.s32 4294967295, %s529_s15   ;;  %p440_p0 = scmp.ge.s32.totalorder %s529_s15, 1  ;;  %s529_s15 = sphi %s562_s15, %s14_s15  }
   0x2   : > { %p162_p1 = scmp.lt.s32.totalorder %s529_s15, 3 }
   0x4   : > { %p163_p2 = pnand %p440_p0, %p162_p1 }
   0x5   : > { %p188_p3 = scmp.lt.s32.totalorder (!%p163_p2), %s436_s16, 1  ;;  %v445_v0 = vld [vmem:[%s613_s3] ss:$0 sm:$0xff] (!%p163_p2)  ;;  %s583_s27 = smov (!%p163_p2), 0  }
   0x6   : > { %166 = sbr.rel (%p163_p2) target bundleno = 247 (0xf7), region = 36 }
   0xd   : > { %s616_s16 = smov (!%p188_p3, %s436_s16), 1 }
   0xe   : > { %s494_s19 = smul.u32 112, %s616_s16 }
   0xf   : > { %s495_s20 = smul.u32 224, %s616_s16 }
  0x10   : > { %s576_s23 = scalar_lea.vmem %s610_s0, %s494_s19 }
  0x11   : > { %s581_s26 = scalar_lea.vmem %s614_s4, %s495_s20 }
  0x12 LB: >> { %v514_v1 = vld [vmem:[%s611_s1] sm:$0xff]   ;;  %v535_v2 = vmov 0.0   ;;  %v516_v4 = vld [vmem:[%s611_s1 + $0x8] sm:$0xff]   ;;  %vm536_vm0 = vmmov 0   ;;  %s465_s8 = sshll.u32 %s533_s27, 3  ;;  %vm238_vm1 = vcmask 261120   ;;  %s533_s27 = sphi %s583_s27, %s205_s27  }
  0x13   : >> { %478 = vmatprep.subr.bf16.mxu0 %v535_v2  ;;  %486 = vmatprep.subr.bf16.mxu1 %v535_v2  ;;  %v515_v3 = vld [vmem:[%s612_s2] sm:$0xff]   ;;  %v517_v5 = vld [vmem:[%s612_s2 + $0x8] sm:$0xff]   ;;  %s208_s11 = scalar_lea.vmem %s576_s23, %s465_s8  ;;  %s468_s12 = sshll.u32 %s533_s27, 4  ;;  %vm351_vm2 = vcmask 257024   ;;  %vm353_vm3 = vcmask 256000  }
  0x14   : >> { %479 = vmatpush3.bf16.msra.mxu0 %v514_v1  ;;  %482 = vmatprep.mubr.msk.bf16.mxu0 %vm536_vm0, %v535_v2  ;;  %v518_v6 = vld [vmem:[%s208_s11] sm:$0x7f]   ;;  %s350_s13 = scalar_lea.vmem %s581_s26, %s468_s12  ;;  %s205_s27 = sadd.s32 1, %s533_s27  }
  0x15   : >> { %487 = vmatpush3.bf16.msra.mxu1 %v515_v3  ;;  %480 = vmatprep.subr.bf16.mxu0 %v535_v2  ;;  %p202_p4 = scmp.ge.s32.totalorder %s205_s27, 14  }
  0x16   : >> { %488 = vmatprep.subr.bf16.mxu1 %v535_v2  ;;  %490 = vmatprep.mubr.msk.bf16.mxu1 %vm536_vm0, %v535_v2 }
  0x18   : >> { %481 = vmatpush3.bf16.msra.mxu0 %v516_v4 }
  0x19   : >> { %489 = vmatpush3.bf16.msra.mxu1 %v517_v5 }
  0x1b   : >> { %483 = vmatmul.mubr.msk.bf16.vlgmr.msra.gmra.mrb[0].mxu0 %vm238_vm1, %v518_v6 }
  0x1c   : >> { %491 = vmatmul.mubr.msk.bf16.vlgmr.msra.gmra.mrb[0].mxu1 %vm238_vm1, %v518_v6 }
  0xee   : >> { %v276_v7 = vpop.f32.mrb[0].mxu0 }
  0xef   : >> { %v277_v8 = vadd.f32 %v445_v0, %v276_v7  ;;  %v333_v9 = vpop.f32.mrb[0].mxu1  ;;  %v484_v10 = vpop.f32.mrb[1].mxu0 }
  0xf0   : >> { %v334_v11 = vadd.f32 %v445_v0, %v333_v9  ;;  %v492_v12 = vpop.f32.mrb[1].mxu1  ;;  %v279_v13 = vpop.f32.mrb[2].mxu0  ;;  %204 = sbr.rel (!%p202_p4) target bundleno = 18 (0x12), region = 76 }
  0xf1   : >> { %v466_v14 = vpack.c.bf16 %v277_v8, %v277_v8  ;;  %v280_v15 = vadd.f32 %v445_v0, %v279_v13  ;;  %v336_v16 = vpop.f32.mrb[2].mxu1  ;;  %v485_v17 = vpop.f32.mrb[3].mxu0 }
  0xf2   : >> { %v469_v18 = vpack.c.bf16 %v334_v11, %v334_v11  ;;  %v337_v19 = vadd.f32 %v445_v0, %v336_v16  ;;  %v493_v20 = vpop.f32.mrb[3].mxu1 }
  0xf3   : >> { %352 = vst.msk [vmem:[%s350_s13] sm:$0xf] %vm351_vm2, %v466_v14  ;;  %v467_v21 = vpack.c.bf16 %v280_v15, %v280_v15 }
  0xf4   : >> { %461 = vst.msk [vmem:[%s350_s13 + $0x8] sm:$0xf] %vm351_vm2, %v469_v18  ;;  %v470_v22 = vpack.c.bf16 %v337_v19, %v337_v19 }
  0xf5   : >> { %354 = vst.msk [vmem:[%s350_s13 + $0x4] sm:$0x7] %vm353_vm3, %v467_v21 }
  0xf6   : >> { %462 = vst.msk [vmem:[%s350_s13 + $0xc] sm:$0x7] %vm353_vm3, %v470_v22 }
  0xf7 PF: > { %s14_s15 = sadd.s32 1, %s529_s15  }
  0xf8   : > { %p11_p5 = scmp.ge.s32.totalorder %s14_s15, 4  }
  0xfa   :  { %13 = sbr.rel (!%p11_p5) target bundleno = 1 (0x1), region = 87 }

// kernel: unet_forward.28
= control target key start
LH: loop header
LB: loop body
LE: loop exit
PB: predicated region body
PF: predicated region fallthrough
CT: control target
= control target key end

     0   :  { %s1211_s12 = smov 0   ;;  %s1314_s0 = inlined_call_operand.vmem [shape: bf16[2,26,26,16], index: 0, kind: input, shape index: {}]   ;;  %s1315_s1 = inlined_call_operand.vmem [shape: bf16[3,3,16,16], index: 1, kind: input, shape index: {}]   ;;  %s1316_s2 = inlined_call_operand.vmem [shape: f32[1,16], index: 2, kind: input, shape index: {}]   ;;  %s1317_s3 = inlined_call_operand.vmem [shape: bf16[2,24,24,16], index: 3, kind: output, shape index: {}]  }
   0x1 LB: > { %s975_s13 = sadd.s32 4294967295, %s1185_s12   ;;  %p979_p0 = scmp.ge.s32.totalorder %s1185_s12, 1  ;;  %s1185_s12 = sphi %s1211_s12, %s13_s12  }
   0x2   : > { %p137_p1 = scmp.lt.s32.totalorder %s1185_s12, 3 }
   0x4   : > { %p138_p2 = pnand %p979_p0, %p137_p1 }
   0x5   : > { %p161_p3 = scmp.lt.s32.totalorder (!%p138_p2), %s975_s13, 1  ;;  %v1222_v0 = vld [vmem:[%s1316_s2] ss:$0 sm:$0xff] (!%p138_p2)  ;;  %s1234_s24 = smov (!%p138_p2), 0  }
   0x6   : > { %141 = sbr.rel (%p138_p2) target bundleno = 283 (0x11b), region = 32 }
   0xd   : > { %s1319_s13 = smov (!%p161_p3, %s975_s13), 1 }
   0xe   : > { %s1139_s16 = smul.u32 416, %s1319_s13 }
   0xf   : > { %s1140_s17 = smul.u32 288, %s1319_s13 }
  0x10   : > { %s1227_s20 = scalar_lea.vmem %s1314_s0, %s1139_s16 }
  0x11   : > { %s1232_s23 = scalar_lea.vmem %s1317_s3, %s1140_s17 }
  0x12 LB: >> { %v1157_v1 = vld [vmem:[%s1315_s1 + $0x8] sm:$0xff]   ;;  %v1158_v2 = vld [vmem:[%s1315_s1] sm:$0xff]   ;;  %s1053_s29 = sshll.u32 %s1189_s24, 4  ;;  %vm223_vm0 = vcmask 130048   ;;  %v1161_v3 = vld [vmem:[%s1315_s1 + $0x10] sm:$0xff]   ;;  %vm341_vm2 = vcmask 1046528   ;;  %s1189_s24 = sphi %s1234_s24, %s178_s24  }
  0x13   : >> { %1085 = vmatprep.subr.bf16.mxu0 %v1157_v1  ;;  %1091 = vmatprep.subr.bf16.mxu1 %v1158_v2  ;;  %s1250_s5 = scalar_lea.vmem %s1227_s20, %s1053_s29  ;;  %v1163_v8 = vld [vmem:[%s1315_s1 + $0x18] sm:$0xff]   ;;  %vm201_vm1 = vsmask.f32 7424  ;;  %v1167_v17 = vld [vmem:[%s1315_s1 + $0x28] sm:$0xff]   ;;  %v1164_v28 = vld [vmem:[%s1315_s1 + $0x20] sm:$0xff]   ;;  %s1057_s19 = smul.u32 12, %s1189_s24 }
  0x14   : >> { %1086 = vmatpush3.bf16.msra.mxu0 %v1157_v1  ;;  %1092 = vmatpush3.bf16.msra.mxu1 %v1158_v2  ;;  %v184_v4 = vld [vmem:[%s1250_s5 + $0x8] sm:$0xf]  ;;  %v185_v5 = vld [vmem:[%s1250_s5 + $0xc] sm:$0x1]  ;;  %v1159_v6 = vld [vmem:[%s1250_s5] sm:$0xff]   ;;  %vm901_vm3 = vcmask 125952  }
  0x15   : >> { %1097 = vmatprep.subr.bf16.mxu0 %v1161_v3  ;;  %v991_v7 = vcombine.low %v184_v4, %v184_v4  ;;  %v987_v9 = vcombine.low %v184_v4, %v185_v5  ;;  %v203_v10 = vshrl.u32 %v1159_v6, 16  ;;  %v205_v11 = vshll.u32 %v1159_v6, 16  ;;  %1093 = vmatprep.mubr.msk.bf16.mxu1 %vm223_vm0, %v1159_v6  ;;  %v1165_v13 = vld [vmem:[%s1250_s5 + $0x10] sm:$0xff]   ;;  %v1003_v19 = vld [vmem:[%s1250_s5 + $0x18] sm:$0xf]  ;;  %v1171_v35 = vld [vmem:[%s1250_s5 + $0x20] sm:$0xff]   ;;  %s900_s21 = scalar_lea.vmem %s1232_s23, %s1057_s19 }
  0x16   : >> { %1103 = vmatprep.subr.bf16.mxu1 %v1163_v8  ;;  %v342_v12 = vrot.slane %v1159_v6, 1  ;;  %v1004_v21 = vld [vmem:[%s1250_s5 + $0x1c] sm:$0x1]  ;;  %v498_v22 = vshll.u32 %v1165_v13, 16  ;;  %v576_v25 = vrot.slane %v1165_v13, 1  ;;  %v1008_v29 = vcombine.low %v1003_v19, %v1003_v19  ;;  %v1169_v50 = vld [vmem:[%s1315_s1 + $0x30] sm:$0xff]  }
  0x17   : >> { %v210_v14 = vshll.u32 %v987_v9, 16  ;;  %v214_v15 = vshrl.u32 %v987_v9, 16  ;;  %1094 = vmatmul.mubr.msk.bf16.vlgmr.msra.gmra.mrb[0].mxu1 %vm223_vm0, %v991_v7  ;;  %v343_v16 = vrot.slane %v987_v9, 1  ;;  %v207_v18 = vrot.slane %v205_v11, 1  ;;  %v1170_v37 = vld [vmem:[%s1315_s1 + $0x38] sm:$0xff]   ;;  %v1172_v55 = vld [vmem:[%s1315_s1 + $0x40] sm:$0xff]  }
  0x18   : >> { %1104 = vmatpush3.bf16.msra.mxu1 %v1163_v8  ;;  %1105 = vmatprep.mubr.msk.bf16.mxu1 %vm223_vm0, %v1165_v13  ;;  %v1014_v24 = vcombine.low %v1003_v19, %v1004_v21  ;;  %v496_v30 = vshrl.u32 %v1165_v13, 16  ;;  %v500_v32 = vrot.slane %v498_v22, 1  ;;  %v1026_v38 = vld [vmem:[%s1250_s5 + $0x28] sm:$0xf]  ;;  %v1027_v39 = vld [vmem:[%s1250_s5 + $0x2c] sm:$0x1] }
  0x19   : >> { %v212_v20 = vrot.slane %v210_v14, 1  ;;  %1115 = vmatprep.subr.bf16.mxu1 %v1167_v17  ;;  %v208_v23 = vor.u32 %v207_v18, %v203_v10  ;;  %v344_v27 = vsel %vm341_vm2, %v342_v12, %v343_v16  ;;  %v1037_v40 = vcombine.low %v1026_v38, %v1027_v39  ;;  %s178_s24 = sadd.s32 1, %s1189_s24  }
  0x1a   : >> { %v503_v33 = vshll.u32 %v1014_v24, 16  ;;  %v577_v34 = vrot.slane %v1014_v24, 1  ;;  %v730_v41 = vshrl.u32 %v1171_v35, 16  ;;  %v732_v42 = vshll.u32 %v1171_v35, 16  ;;  %p175_p4 = scmp.ge.s32.totalorder %s178_s24, 24  }
  0x1b   : >> { %v216_v26 = vor.u32 %v214_v15, %v212_v20  ;;  %v213_v31 = vsel %vm201_vm1, %v208_v23, %v212_v20  ;;  %v501_v43 = vor.u32 %v500_v32, %v496_v30  ;;  %v737_v46 = vshll.u32 %v1037_v40, 16 }
  0x1c   : >> { %1087 = vmatprep.mubr.msk.bf16.mxu0 %vm223_vm0, %v213_v31  ;;  %v578_v36 = vsel %vm341_vm2, %v576_v25, %v577_v34  ;;  %v505_v44 = vrot.slane %v503_v33, 1  ;;  %v734_v45 = vrot.slane %v732_v42, 1  ;;  %v507_v51 = vshrl.u32 %v1014_v24, 16 }
  0x1d   : >> { %1088 = vmatmul.mubr.msk.bf16.vlgmr.msra.gmra.mrb[0].mxu0 %vm223_vm0, %v216_v26  ;;  %v739_v48 = vrot.slane %v737_v46, 1  ;;  %v741_v53 = vshrl.u32 %v1037_v40, 16  ;;  %v810_v57 = vrot.slane %v1171_v35, 1  ;;  %v811_v58 = vrot.slane %v1037_v40, 1 }
  0x1e   : >> { %1098 = vmatpush3.bf16.msra.mxu0 %v1161_v3  ;;  %1099 = vmatprep.mubr.msk.bf16.mxu0 %vm223_vm0, %v344_v27  ;;  %v735_v47 = vor.u32 %v734_v45, %v730_v41  ;;  %v506_v49 = vsel %vm201_vm1, %v501_v43, %v505_v44  ;;  %v509_v54 = vor.u32 %v507_v51, %v505_v44 }
  0x1f   : >> { %1109 = vmatprep.subr.bf16.mxu0 %v1164_v28  ;;  %1106 = vmatmul.mubr.msk.bf16.vlgmr.msra.gmra.mrb[4].mxu1 %vm223_vm0, %v1008_v29  ;;  %v743_v56 = vor.u32 %v741_v53, %v739_v48  ;;  %v1031_v59 = vcombine.low %v1026_v38, %v1026_v38  ;;  %v812_v60 = vsel %vm341_vm2, %v810_v57, %v811_v58 }
  0x20   : >> { %1116 = vmatpush3.bf16.msra.mxu1 %v1167_v17  ;;  %1117 = vmatprep.mubr.msk.bf16.mxu1 %vm223_vm0, %v578_v36  ;;  %v740_v52 = vsel %vm201_vm1, %v735_v47, %v739_v48 }
  0x21   : >> { %1127 = vmatprep.subr.bf16.mxu1 %v1170_v37 }
  0x25   : >> { %1100 = vmatmul.mubr.msk.bf16.vlgmr.msra.gmra.mrb[4].mxu0 %vm223_vm0, %v343_v16 }
  0x26   : >> { %1110 = vmatpush3.bf16.msra.mxu0 %v1164_v28  ;;  %1111 = vmatprep.mubr.msk.bf16.mxu0 %vm223_vm0, %v506_v49 }
  0x27   : >> { %1121 = vmatprep.subr.bf16.mxu0 %v1169_v50  ;;  %1118 = vmatmul.mubr.msk.bf16.vlgmr.msra.gmra.mrb[8].mxu1 %vm223_vm0, %v577_v34 }
  0x28   : >> { %1128 = vmatpush3.bf16.msra.mxu1 %v1170_v37  ;;  %1129 = vmatprep.mubr.msk.bf16.mxu1 %vm223_vm0, %v740_v52 }
  0x2d   : >> { %1112 = vmatmul.mubr.msk.bf16.vlgmr.msra.gmra.mrb[8].mxu0 %vm223_vm0, %v509_v54 }
  0x2e   : >> { %1122 = vmatpush3.bf16.msra.mxu0 %v1169_v50  ;;  %1123 = vmatprep.mubr.msk.bf16.mxu0 %vm223_vm0, %v1171_v35 }
  0x2f   : >> { %1133 = vmatprep.subr.bf16.mxu0 %v1172_v55  ;;  %1130 = vmatmul.mubr.msk.bf16.vlgmr.msra.gmra.mrb[12].mxu1 %vm223_vm0, %v743_v56 }
  0x35   : >> { %1124 = vmatmul.mubr.msk.bf16.vlgmr.msra.gmra.mrb[12].mxu0 %vm223_vm0, %v1031_v59 }
  0x36   : >> { %1134 = vmatpush3.bf16.msra.mxu0 %v1172_v55  ;;  %1135 = vmatprep.mubr.msk.bf16.mxu0 %vm223_vm0, %v812_v60 }
  0x3d   : >> { %1136 = vmatmul.mubr.msk.bf16.vlgmr.msra.gmra.mrb[16].mxu0 %vm223_vm0, %v811_v58 }
  0xea   : >> { %v1095_v61 = vpop.f32.mrb[0].mxu1 }
  0xeb   : >> { %v324_v62 = vpop.f32.mrb[1].mxu1 }
  0xec   : >> { %v1096_v63 = vpop.f32.mrb[2].mxu1 }
  0xed   : >> { %v327_v1 = vpop.f32.mrb[3].mxu1 }
  0xf0   : >> { %v1089_v2 = vpop.f32.mrb[0].mxu0 }
  0xf1   : >> { %v333_v3 = vadd.f32 %v1095_v61, %v1089_v2  ;;  %v264_v4 = vpop.f32.mrb[1].mxu0 }
  0xf2   : >> { %v325_v5 = vadd.f32 %v324_v62, %v264_v4  ;;  %v1090_v6 = vpop.f32.mrb[2].mxu0  ;;  %v1107_v7 = vpop.f32.mrb[4].mxu1 }
  0xf3   : >> { %v267_v8 = vpop.f32.mrb[3].mxu0  ;;  %v473_v9 = vpop.f32.mrb[5].mxu1 }
  0xf4   : >> { %v328_v10 = vadd.f32 %v327_v1, %v267_v8  ;;  %v1108_v11 = vpop.f32.mrb[6].mxu1 }
  0xf5   : >> { %v476_v12 = vpop.f32.mrb[7].mxu1 }
  0xf8   : >> { %v1101_v13 = vpop.f32.mrb[4].mxu0 }
  0xf9   : >> { %v407_v14 = vadd.f32 %v1101_v13, %v333_v3  ;;  %v391_v15 = vpop.f32.mrb[5].mxu0 }
  0xfa   : >> { %v405_v16 = vadd.f32 %v391_v15, %v325_v5  ;;  %v1102_v17 = vpop.f32.mrb[6].mxu0  ;;  %v1119_v18 = vpop.f32.mrb[8].mxu1 }
  0xfb   : >> { %v489_v19 = vadd.f32 %v1107_v7, %v407_v14  ;;  %v394_v20 = vpop.f32.mrb[7].mxu0  ;;  %v625_v21 = vpop.f32.mrb[9].mxu1 }
  0xfc   : >> { %v406_v22 = vadd.f32 %v394_v20, %v328_v10  ;;  %v487_v23 = vadd.f32 %v473_v9, %v405_v16  ;;  %v1120_v24 = vpop.f32.mrb[10].mxu1 }
  0xfd   : >> { %v628_v25 = vpop.f32.mrb[11].mxu1 }
  0xfe   : >> { %v488_v26 = vadd.f32 %v476_v12, %v406_v22 }
 0x100   : >> { %v1113_v27 = vpop.f32.mrb[8].mxu0 }
 0x101   : >> { %v572_v28 = vadd.f32 %v1113_v27, %v489_v19  ;;  %v556_v29 = vpop.f32.mrb[9].mxu0 }
 0x102   : >> { %v570_v30 = vadd.f32 %v556_v29, %v487_v23  ;;  %v1114_v31 = vpop.f32.mrb[10].mxu0  ;;  %v1131_v32 = vpop.f32.mrb[12].mxu1 }
 0x103   : >> { %v641_v33 = vadd.f32 %v1119_v18, %v572_v28  ;;  %v559_v34 = vpop.f32.mrb[11].mxu0  ;;  %v790_v35 = vpop.f32.mrb[13].mxu1 }
 0x104   : >> { %v571_v36 = vadd.f32 %v559_v34, %v488_v26  ;;  %v639_v37 = vadd.f32 %v625_v21, %v570_v30  ;;  %v1132_v38 = vpop.f32.mrb[14].mxu1 }
 0x105   : >> { %v793_v39 = vpop.f32.mrb[15].mxu1 }
 0x106   : >> { %v640_v40 = vadd.f32 %v628_v25, %v571_v36 }
 0x108   : >> { %v1125_v41 = vpop.f32.mrb[12].mxu0 }
 0x109   : >> { %v723_v42 = vadd.f32 %v1125_v41, %v641_v33  ;;  %v707_v43 = vpop.f32.mrb[13].mxu0 }
 0x10a   : >> { %v721_v44 = vadd.f32 %v707_v43, %v639_v37  ;;  %v1126_v45 = vpop.f32.mrb[14].mxu0 }
 0x10b   : >> { %v806_v46 = vadd.f32 %v1131_v32, %v723_v42  ;;  %v710_v47 = vpop.f32.mrb[15].mxu0 }
 0x10c   : >> { %v722_v48 = vadd.f32 %v710_v47, %v640_v40  ;;  %v804_v49 = vadd.f32 %v790_v35, %v721_v44 }
 0x10e   : >> { %v805_v50 = vadd.f32 %v793_v39, %v722_v48 }
 0x110   : >> { %v1137_v51 = vpop.f32.mrb[16].mxu0 }
 0x111   : >> { %v875_v52 = vadd.f32 %v1137_v51, %v806_v46  ;;  %v859_v53 = vpop.f32.mrb[17].mxu0 }
 0x112   : >> { %v873_v54 = vadd.f32 %v859_v53, %v804_v49  ;;  %v1138_v55 = vpop.f32.mrb[18].mxu0 }
 0x113   : >> { %v884_v56 = vadd.f32 %v1222_v0, %v875_v52  ;;  %v862_v57 = vpop.f32.mrb[19].mxu0 }
 0x114   : >> { %v882_v58 = vadd.f32 %v1222_v0, %v873_v54  ;;  %v874_v59 = vadd.f32 %v862_v57, %v805_v50  ;;  %177 = sbr.rel (!%p175_p4) target bundleno = 18 (0x12), region = 81 }
 0x115   : >> { %v1056_v60 = vpack.c.bf16 %v884_v56, %v884_v56 }
 0x116   : >> { %v1054_v61 = vpack.c.bf16 %v882_v58, %v882_v58  ;;  %v883_v62 = vadd.f32 %v1222_v0, %v874_v59 }
 0x117   : >> { %904 = vst.msk [vmem:[%s900_s21 + $0x8] sm:$0xf] %vm901_vm3, %v1056_v60 }
 0x118   : >> { %902 = vst.msk [vmem:[%s900_s21] sm:$0xf] %vm901_vm3, %v1054_v61  ;;  %v1055_v63 = vpack.c.bf16 %v883_v62, %v883_v62 }
 0x11a   : >> { %903 = vst.msk [vmem:[%s900_s21 + $0x4] sm:$0xf] %vm901_vm3, %v1055_v63 }
 0x11b PF: > { %s13_s12 = sadd.s32 1, %s1185_s12  }
 0x11c   : > { %p10_p5 = scmp.ge.s32.totalorder %s13_s12, 4  }
 0x11e   :  { %12 = sbr.rel (!%p10_p5) target bundleno = 1 (0x1), region = 92 }

// kernel: unet_forward.29
= control target key start
LH: loop header
LB: loop body
LE: loop exit
PB: predicated region body
PF: predicated region fallthrough
CT: control target
= control target key end

     0   :  { %s1273_s14 = smov 0   ;;  %s1591_s0 = inlined_call_operand.vmem [shape: bf16[2,576,16], index: 0, kind: input, shape index: {}]   ;;  %s1592_s1 = inlined_call_operand.vmem [shape: bf16[16,1], index: 1, kind: input, shape index: {}]   ;;  %s1593_s2 = inlined_call_operand.<no memory space> [shape: f32[1,1], index: 2, kind: input, shape index: {}]   ;;  %s1594_s3 = inlined_call_operand.vmem [shape: f32[2,576,1], index: 3, kind: output, shape index: {}]  }
   0x1   :  { %v8_v0 = vstv %s1593_s2 }
   0x2   :  { %9 = vst [vmem:[#allocation2] sm:$0x1] %v8_v0 }
   0x3 LB: > { %s999_s15 = sadd.s32 4294967295, %s1248_s14   ;;  %p1003_p0 = scmp.ge.s32.totalorder %s1248_s14, 1  ;;  %s1248_s14 = sphi %s1273_s14, %s15_s14  }
   0x4   : > { %p139_p1 = scmp.lt.s32.totalorder %s1248_s14, 3 }
   0x6   : > { %p140_p2 = pnand %p1003_p0, %p139_p1 }
   0x7   : > { %v1205_v1 = vld [vmem:[%s1592_s1] sm:$0xff] (!%p140_p2)   ;;  %p163_p3 = scmp.lt.s32.totalorder (!%p140_p2), %s999_s15, 1  ;;  %vm441_vm0 = vcmask (!%p140_p2), 130048   ;;  %vm871_vm1 = vcmask (!%p140_p2), 7168  }
   0x8   : > { %143 = sbr.rel (%p140_p2) target bundleno = 303 (0x12f), region = 32  ;;  %1119 = vmatprep.subr.bf16.mxu0 (!%p140_p2), %v1205_v1  ;;  %1193 = vmatprep.subr.bf16.mxu1 (!%p140_p2), %v1205_v1 }
   0x9   : > { %1120 = vmatpush3.bf16.msra.mxu0 (!%p140_p2), %v1205_v1  ;;  %1194 = vmatpush3.bf16.msra.mxu1 (!%p140_p2), %v1205_v1  ;;  %v1365_v38 = vld [vmem:[#allocation2] ss:$0 sm:$0xff] (!%p140_p2) }
   0xf   : > { %s1596_s15 = smov (!%p163_p3, %s999_s15), 1 }
  0x10   : > { %s1195_s2 = smul.u32 288, %s1596_s15 }
  0x11   : > { %s1196_s21 = smul.u32 576, %s1596_s15 }
  0x12   : > { %s1290_s20 = scalar_lea.vmem %s1591_s0, %s1195_s2 }
  0x13   : > { %v1206_v2 = vld [vmem:[%s1290_s20] sm:$0xff]   ;;  %v1207_v3 = vld [vmem:[%s1290_s20 + $0x90] sm:$0xff]   ;;  %v1208_v4 = vld [vmem:[%s1290_s20 + $0x8] sm:$0xff]   ;;  %s1370_s24 = scalar_lea.vmem %s1594_s3, %s1196_s21 }
  0x14   : > { %1121 = vmatprep.mubr.msk.bf16.mxu0 %vm441_vm0, %v1206_v2  ;;  %1157 = vmatprep.mubr.msk.bf16.mxu1 %vm441_vm0, %v1207_v3  ;;  %v1209_v5 = vld [vmem:[%s1290_s20 + $0x98] sm:$0xff]   ;;  %v1210_v6 = vld [vmem:[%s1290_s20 + $0x10] sm:$0xff]   ;;  %v1211_v7 = vld [vmem:[%s1290_s20 + $0xa0] sm:$0xff]  }
  0x15   : > { %1122 = vmatmul.mubr.msk.bf16.vlgmr.msra.gmra.mrb[0].mxu0 %vm441_vm0, %v1208_v4  ;;  %1158 = vmatmul.mubr.msk.bf16.vlgmr.msra.gmra.mrb[0].mxu1 %vm441_vm0, %v1209_v5  ;;  %v1212_v8 = vld [vmem:[%s1290_s20 + $0x18] sm:$0xff]   ;;  %v1213_v9 = vld [vmem:[%s1290_s20 + $0xa8] sm:$0xff]   ;;  %v1214_v10 = vld [vmem:[%s1290_s20 + $0x20] sm:$0xff]  }
  0x16   : > { %1125 = vmatprep.mubr.msk.bf16.mxu0 %vm441_vm0, %v1210_v6  ;;  %1161 = vmatprep.mubr.msk.bf16.mxu1 %vm441_vm0, %v1211_v7  ;;  %v1215_v11 = vld [vmem:[%s1290_s20 + $0xb0] sm:$0xff]   ;;  %v1216_v12 = vld [vmem:[%s1290_s20 + $0x28] sm:$0xff]   ;;  %v1217_v13 = vld [vmem:[%s1290_s20 + $0xb8] sm:$0xff]  }
  0x17   : > { %v1218_v14 = vld [vmem:[%s1290_s20 + $0x30] sm:$0xff]   ;;  %v1219_v15 = vld [vmem:[%s1290_s20 + $0xc0] sm:$0xff]   ;;  %v1220_v16 = vld [vmem:[%s1290_s20 + $0x38] sm:$0xff]  }
  0x18   : > { %v1221_v17 = vld [vmem:[%s1290_s20 + $0xc8] sm:$0xff]   ;;  %v1222_v18 = vld [vmem:[%s1290_s20 + $0x40] sm:$0xff]   ;;  %v1223_v19 = vld [vmem:[%s1290_s20 + $0xd0] sm:$0xff]  }
  0x19   : > { %v1224_v20 = vld [vmem:[%s1290_s20 + $0x48] sm:$0xff]   ;;  %v1225_v21 = vld [vmem:[%s1290_s20 + $0xd8] sm:$0xff]   ;;  %v1226_v22 = vld [vmem:[%s1290_s20 + $0x50] sm:$0xff]  }
  0x1a   : > { %v1227_v23 = vld [vmem:[%s1290_s20 + $0xe0] sm:$0xff]   ;;  %v1228_v24 = vld [vmem:[%s1290_s20 + $0x58] sm:$0xff]   ;;  %v1229_v25 = vld [vmem:[%s1290_s20 + $0xe8] sm:$0xff]  }
  0x1b   : > { %v1230_v26 = vld [vmem:[%s1290_s20 + $0x60] sm:$0xff]   ;;  %v1231_v27 = vld [vmem:[%s1290_s20 + $0xf0] sm:$0xff]   ;;  %v1232_v28 = vld [vmem:[%s1290_s20 + $0x68] sm:$0xff]  }
  0x1c   : > { %v1233_v29 = vld [vmem:[%s1290_s20 + $0xf8] sm:$0xff]   ;;  %v1234_v30 = vld [vmem:[%s1290_s20 + $0x70] sm:$0xff]   ;;  %v1235_v31 = vld [vmem:[%s1290_s20 + $0x100] sm:$0xff]  }
  0x1d   : > { %1126 = vmatmul.mubr.msk.bf16.gmra.mrb[4].mxu0 %vm441_vm0, %v1212_v8  ;;  %1162 = vmatmul.mubr.msk.bf16.gmra.mrb[4].mxu1 %vm441_vm0, %v1213_v9  ;;  %v1236_v32 = vld [vmem:[%s1290_s20 + $0x78] sm:$0xff]   ;;  %v1237_v33 = vld [vmem:[%s1290_s20 + $0x108] sm:$0xff]   ;;  %v1238_v34 = vld [vmem:[%s1290_s20 + $0x80] sm:$0xff]  }
  0x1e   : > { %1129 = vmatprep.mubr.msk.bf16.mxu0 %vm441_vm0, %v1214_v10  ;;  %1165 = vmatprep.mubr.msk.bf16.mxu1 %vm441_vm0, %v1215_v11  ;;  %v1239_v35 = vld [vmem:[%s1290_s20 + $0x110] sm:$0xff]   ;;  %v1240_v36 = vld [vmem:[%s1290_s20 + $0x88] sm:$0xff]   ;;  %v1241_v37 = vld [vmem:[%s1290_s20 + $0x118] sm:$0xff]  }
  0x25   : > { %1130 = vmatmul.mubr.msk.bf16.gmra.mrb[8].mxu0 %vm441_vm0, %v1216_v12  ;;  %1166 = vmatmul.mubr.msk.bf16.gmra.mrb[8].mxu1 %vm441_vm0, %v1217_v13 }
  0x26   : > { %1133 = vmatprep.mubr.msk.bf16.mxu0 %vm441_vm0, %v1218_v14  ;;  %1169 = vmatprep.mubr.msk.bf16.mxu1 %vm441_vm0, %v1219_v15 }
  0x2d   : > { %1134 = vmatmul.mubr.msk.bf16.gmra.mrb[12].mxu0 %vm441_vm0, %v1220_v16  ;;  %1170 = vmatmul.mubr.msk.bf16.gmra.mrb[12].mxu1 %vm441_vm0, %v1221_v17 }
  0x2e   : > { %1137 = vmatprep.mubr.msk.bf16.mxu0 %vm441_vm0, %v1222_v18  ;;  %1173 = vmatprep.mubr.msk.bf16.mxu1 %vm441_vm0, %v1223_v19 }
  0x35   : > { %1138 = vmatmul.mubr.msk.bf16.gmra.mrb[16].mxu0 %vm441_vm0, %v1224_v20  ;;  %1174 = vmatmul.mubr.msk.bf16.gmra.mrb[16].mxu1 %vm441_vm0, %v1225_v21 }
  0x36   : > { %1141 = vmatprep.mubr.msk.bf16.mxu0 %vm441_vm0, %v1226_v22  ;;  %1177 = vmatprep.mubr.msk.bf16.mxu1 %vm441_vm0, %v1227_v23 }
  0x3d   : > { %1142 = vmatmul.mubr.msk.bf16.gmra.mrb[20].mxu0 %vm441_vm0, %v1228_v24  ;;  %1178 = vmatmul.mubr.msk.bf16.gmra.mrb[20].mxu1 %vm441_vm0, %v1229_v25 }
  0x3e   : > { %1145 = vmatprep.mubr.msk.bf16.mxu0 %vm441_vm0, %v1230_v26  ;;  %1181 = vmatprep.mubr.msk.bf16.mxu1 %vm441_vm0, %v1231_v27 }
  0x45   : > { %1146 = vmatmul.mubr.msk.bf16.gmra.mrb[24].mxu0 %vm441_vm0, %v1232_v28  ;;  %1182 = vmatmul.mubr.msk.bf16.gmra.mrb[24].mxu1 %vm441_vm0, %v1233_v29 }
  0x46   : > { %1149 = vmatprep.mubr.msk.bf16.mxu0 %vm441_vm0, %v1234_v30  ;;  %1185 = vmatprep.mubr.msk.bf16.mxu1 %vm441_vm0, %v1235_v31 }
  0x4d   : > { %1150 = vmatmul.mubr.msk.bf16.gmra.mrb[28].mxu0 %vm441_vm0, %v1236_v32  ;;  %1186 = vmatmul.mubr.msk.bf16.gmra.mrb[28].mxu1 %vm441_vm0, %v1237_v33 }
  0x4e   : > { %1153 = vmatprep.mubr.msk.bf16.mxu0 %vm441_vm0, %v1238_v34  ;;  %1189 = vmatprep.mubr.msk.bf16.mxu1 %vm441_vm0, %v1239_v35 }
  0x55   : > { %1154 = vmatmul.mubr.msk.bf16.gmra.mrb[32].mxu0 %vm441_vm0, %v1240_v36  ;;  %1190 = vmatmul.mubr.msk.bf16.gmra.mrb[32].mxu1 %vm441_vm0, %v1241_v37 }
  0xe8   : > { %v1123_v39 = vpop.f32.mrb[0].mxu0  ;;  %v1159_v41 = vpop.f32.mrb[0].mxu1 }
  0xe9   : > { %v593_v40 = vadd.f32 %v1123_v39, %v1365_v38  ;;  %v584_v42 = vpop.f32.mrb[1].mxu0  ;;  %v737_v43 = vadd.f32 %v1159_v41, %v1365_v38  ;;  %v728_v45 = vpop.f32.mrb[1].mxu1 }
  0xea   : > { %v585_v44 = vadd.f32 %v1365_v38, %v584_v42  ;;  %v1124_v46 = vpop.f32.mrb[2].mxu0  ;;  %v729_v47 = vadd.f32 %v1365_v38, %v728_v45  ;;  %v1160_v49 = vpop.f32.mrb[2].mxu1 }
  0xeb   : > { %874 = vst.msk [vmem:[%s1370_s24 + $0x10] sm:$0xff] %vm871_vm1, %v593_v40  ;;  %v596_v48 = vadd.f32 %v1124_v46, %v1365_v38  ;;  %v587_v50 = vpop.f32.mrb[3].mxu0  ;;  %910 = vst.msk [vmem:[%s1370_s24 + $0x130] sm:$0xff] %vm871_vm1, %v737_v43  ;;  %v740_v51 = vadd.f32 %v1160_v49, %v1365_v38  ;;  %v731_v53 = vpop.f32.mrb[3].mxu1 }
  0xec   : > { %872 = vst.msk [vmem:[%s1370_s24] sm:$0xff] %vm871_vm1, %v585_v44  ;;  %v588_v52 = vadd.f32 %v1365_v38, %v587_v50  ;;  %908 = vst.msk [vmem:[%s1370_s24 + $0x120] sm:$0xff] %vm871_vm1, %v729_v47  ;;  %v732_v54 = vadd.f32 %v1365_v38, %v731_v53 }
  0xed   : > { %875 = vst.msk [vmem:[%s1370_s24 + $0x18] sm:$0xff] %vm871_vm1, %v596_v48  ;;  %911 = vst.msk [vmem:[%s1370_s24 + $0x138] sm:$0xff] %vm871_vm1, %v740_v51 }
  0xee   : > { %873 = vst.msk [vmem:[%s1370_s24 + $0x8] sm:$0xff] %vm871_vm1, %v588_v52  ;;  %909 = vst.msk [vmem:[%s1370_s24 + $0x128] sm:$0xff] %vm871_vm1, %v732_v54 }
  0xf0   : > { %v1127_v55 = vpop.f32.mrb[4].mxu0  ;;  %v1163_v57 = vpop.f32.mrb[4].mxu1 }
  0xf1   : > { %v609_v56 = vadd.f32 %v1127_v55, %v1365_v38  ;;  %v600_v58 = vpop.f32.mrb[5].mxu0  ;;  %v753_v59 = vadd.f32 %v1163_v57, %v1365_v38  ;;  %v744_v61 = vpop.f32.mrb[5].mxu1 }
  0xf2   : > { %v601_v60 = vadd.f32 %v1365_v38, %v600_v58  ;;  %v1128_v62 = vpop.f32.mrb[6].mxu0  ;;  %v745_v63 = vadd.f32 %v1365_v38, %v744_v61  ;;  %v1164_v1 = vpop.f32.mrb[6].mxu1 }
  0xf3   : > { %878 = vst.msk [vmem:[%s1370_s24 + $0x30] sm:$0xff] %vm871_vm1, %v609_v56  ;;  %v612_v0 = vadd.f32 %v1128_v62, %v1365_v38  ;;  %v603_v2 = vpop.f32.mrb[7].mxu0  ;;  %914 = vst.msk [vmem:[%s1370_s24 + $0x150] sm:$0xff] %vm871_vm1, %v753_v59  ;;  %v756_v3 = vadd.f32 %v1164_v1, %v1365_v38  ;;  %v747_v5 = vpop.f32.mrb[7].mxu1 }
  0xf4   : > { %876 = vst.msk [vmem:[%s1370_s24 + $0x20] sm:$0xff] %vm871_vm1, %v601_v60  ;;  %v604_v4 = vadd.f32 %v1365_v38, %v603_v2  ;;  %912 = vst.msk [vmem:[%s1370_s24 + $0x140] sm:$0xff] %vm871_vm1, %v745_v63  ;;  %v748_v6 = vadd.f32 %v1365_v38, %v747_v5 }
  0xf5   : > { %879 = vst.msk [vmem:[%s1370_s24 + $0x38] sm:$0xff] %vm871_vm1, %v612_v0  ;;  %915 = vst.msk [vmem:[%s1370_s24 + $0x158] sm:$0xff] %vm871_vm1, %v756_v3 }
  0xf6   : > { %877 = vst.msk [vmem:[%s1370_s24 + $0x28] sm:$0xff] %vm871_vm1, %v604_v4  ;;  %913 = vst.msk [vmem:[%s1370_s24 + $0x148] sm:$0xff] %vm871_vm1, %v748_v6 }
  0xf8   : > { %v1131_v7 = vpop.f32.mrb[8].mxu0  ;;  %v1167_v9 = vpop.f32.mrb[8].mxu1 }
  0xf9   : > { %v625_v8 = vadd.f32 %v1131_v7, %v1365_v38  ;;  %v616_v10 = vpop.f32.mrb[9].mxu0  ;;  %v769_v11 = vadd.f32 %v1167_v9, %v1365_v38  ;;  %v760_v13 = vpop.f32.mrb[9].mxu1 }
  0xfa   : > { %v617_v12 = vadd.f32 %v1365_v38, %v616_v10  ;;  %v1132_v14 = vpop.f32.mrb[10].mxu0  ;;  %v761_v15 = vadd.f32 %v1365_v38, %v760_v13  ;;  %v1168_v17 = vpop.f32.mrb[10].mxu1 }
  0xfb   : > { %882 = vst.msk [vmem:[%s1370_s24 + $0x50] sm:$0xff] %vm871_vm1, %v625_v8  ;;  %v628_v16 = vadd.f32 %v1132_v14, %v1365_v38  ;;  %v619_v18 = vpop.f32.mrb[11].mxu0  ;;  %918 = vst.msk [vmem:[%s1370_s24 + $0x170] sm:$0xff] %vm871_vm1, %v769_v11  ;;  %v772_v19 = vadd.f32 %v1168_v17, %v1365_v38  ;;  %v763_v21 = vpop.f32.mrb[11].mxu1 }
  0xfc   : > { %880 = vst.msk [vmem:[%s1370_s24 + $0x40] sm:$0xff] %vm871_vm1, %v617_v12  ;;  %v620_v20 = vadd.f32 %v1365_v38, %v619_v18  ;;  %916 = vst.msk [vmem:[%s1370_s24 + $0x160] sm:$0xff] %vm871_vm1, %v761_v15  ;;  %v764_v22 = vadd.f32 %v1365_v38, %v763_v21 }
  0xfd   : > { %883 = vst.msk [vmem:[%s1370_s24 + $0x58] sm:$0xff] %vm871_vm1, %v628_v16  ;;  %919 = vst.msk [vmem:[%s1370_s24 + $0x178] sm:$0xff] %vm871_vm1, %v772_v19 }
  0xfe   : > { %881 = vst.msk [vmem:[%s1370_s24 + $0x48] sm:$0xff] %vm871_vm1, %v620_v20  ;;  %917 = vst.msk [vmem:[%s1370_s24 + $0x168] sm:$0xff] %vm871_vm1, %v764_v22 }
 0x100   : > { %v1135_v23 = vpop.f32.mrb[12].mxu0  ;;  %v1171_v25 = vpop.f32.mrb[12].mxu1 }
 0x101   : > { %v641_v24 = vadd.f32 %v1135_v23, %v1365_v38  ;;  %v632_v26 = vpop.f32.mrb[13].mxu0  ;;  %v785_v27 = vadd.f32 %v1171_v25, %v1365_v38  ;;  %v776_v29 = vpop.f32.mrb[13].mxu1 }
 0x102   : > { %v633_v28 = vadd.f32 %v1365_v38, %v632_v26  ;;  %v1136_v30 = vpop.f32.mrb[14].mxu0  ;;  %v777_v31 = vadd.f32 %v1365_v38, %v776_v29  ;;  %v1172_v33 = vpop.f32.mrb[14].mxu1 }
 0x103   : > { %886 = vst.msk [vmem:[%s1370_s24 + $0x70] sm:$0xff] %vm871_vm1, %v641_v24  ;;  %v644_v32 = vadd.f32 %v1136_v30, %v1365_v38  ;;  %v635_v34 = vpop.f32.mrb[15].mxu0  ;;  %922 = vst.msk [vmem:[%s1370_s24 + $0x190] sm:$0xff] %vm871_vm1, %v785_v27  ;;  %v788_v35 = vadd.f32 %v1172_v33, %v1365_v38  ;;  %v779_v37 = vpop.f32.mrb[15].mxu1 }
 0x104   : > { %884 = vst.msk [vmem:[%s1370_s24 + $0x60] sm:$0xff] %vm871_vm1, %v633_v28  ;;  %v636_v36 = vadd.f32 %v1365_v38, %v635_v34  ;;  %920 = vst.msk [vmem:[%s1370_s24 + $0x180] sm:$0xff] %vm871_vm1, %v777_v31  ;;  %v780_v39 = vadd.f32 %v1365_v38, %v779_v37 }
 0x105   : > { %887 = vst.msk [vmem:[%s1370_s24 + $0x78] sm:$0xff] %vm871_vm1, %v644_v32  ;;  %923 = vst.msk [vmem:[%s1370_s24 + $0x198] sm:$0xff] %vm871_vm1, %v788_v35 }
 0x106   : > { %885 = vst.msk [vmem:[%s1370_s24 + $0x68] sm:$0xff] %vm871_vm1, %v636_v36  ;;  %921 = vst.msk [vmem:[%s1370_s24 + $0x188] sm:$0xff] %vm871_vm1, %v780_v39 }
 0x108   : > { %v1139_v40 = vpop.f32.mrb[16].mxu0  ;;  %v1175_v42 = vpop.f32.mrb[16].mxu1 }
 0x109   : > { %v657_v41 = vadd.f32 %v1139_v40, %v1365_v38  ;;  %v648_v43 = vpop.f32.mrb[17].mxu0  ;;  %v801_v44 = vadd.f32 %v1175_v42, %v1365_v38  ;;  %v792_v46 = vpop.f32.mrb[17].mxu1 }
 0x10a   : > { %v649_v45 = vadd.f32 %v1365_v38, %v648_v43  ;;  %v1140_v47 = vpop.f32.mrb[18].mxu0  ;;  %v793_v48 = vadd.f32 %v1365_v38, %v792_v46  ;;  %v1176_v50 = vpop.f32.mrb[18].mxu1 }
 0x10b   : > { %890 = vst.msk [vmem:[%s1370_s24 + $0x90] sm:$0xff] %vm871_vm1, %v657_v41  ;;  %v660_v49 = vadd.f32 %v1140_v47, %v1365_v38  ;;  %v651_v51 = vpop.f32.mrb[19].mxu0  ;;  %926 = vst.msk [vmem:[%s1370_s24 + $0x1b0] sm:$0xff] %vm871_vm1, %v801_v44  ;;  %v804_v52 = vadd.f32 %v1176_v50, %v1365_v38  ;;  %v795_v54 = vpop.f32.mrb[19].mxu1 }
 0x10c   : > { %888 = vst.msk [vmem:[%s1370_s24 + $0x80] sm:$0xff] %vm871_vm1, %v649_v45  ;;  %v652_v53 = vadd.f32 %v1365_v38, %v651_v51  ;;  %924 = vst.msk [vmem:[%s1370_s24 + $0x1a0] sm:$0xff] %vm871_vm1, %v793_v48  ;;  %v796_v55 = vadd.f32 %v1365_v38, %v795_v54 }
 0x10d   : > { %891 = vst.msk [vmem:[%s1370_s24 + $0x98] sm:$0xff] %vm871_vm1, %v660_v49  ;;  %927 = vst.msk [vmem:[%s1370_s24 + $0x1b8] sm:$0xff] %vm871_vm1, %v804_v52 }
 0x10e   : > { %889 = vst.msk [vmem:[%s1370_s24 + $0x88] sm:$0xff] %vm871_vm1, %v652_v53  ;;  %925 = vst.msk [vmem:[%s1370_s24 + $0x1a8] sm:$0xff] %vm871_vm1, %v796_v55 }
 0x110   : > { %v1143_v56 = vpop.f32.mrb[20].mxu0  ;;  %v1179_v58 = vpop.f32.mrb[20].mxu1 }
 0x111   : > { %v673_v57 = vadd.f32 %v1143_v56, %v1365_v38  ;;  %v664_v59 = vpop.f32.mrb[21].mxu0  ;;  %v817_v60 = vadd.f32 %v1179_v58, %v1365_v38  ;;  %v808_v62 = vpop.f32.mrb[21].mxu1 }
 0x112   : > { %v665_v61 = vadd.f32 %v1365_v38, %v664_v59  ;;  %v1144_v63 = vpop.f32.mrb[22].mxu0  ;;  %v809_v0 = vadd.f32 %v1365_v38, %v808_v62  ;;  %v1180_v2 = vpop.f32.mrb[22].mxu1 }
 0x113   : > { %894 = vst.msk [vmem:[%s1370_s24 + $0xb0] sm:$0xff] %vm871_vm1, %v673_v57  ;;  %v676_v1 = vadd.f32 %v1144_v63, %v1365_v38  ;;  %v667_v3 = vpop.f32.mrb[23].mxu0  ;;  %930 = vst.msk [vmem:[%s1370_s24 + $0x1d0] sm:$0xff] %vm871_vm1, %v817_v60  ;;  %v820_v4 = vadd.f32 %v1180_v2, %v1365_v38  ;;  %v811_v6 = vpop.f32.mrb[23].mxu1 }
 0x114   : > { %892 = vst.msk [vmem:[%s1370_s24 + $0xa0] sm:$0xff] %vm871_vm1, %v665_v61  ;;  %v668_v5 = vadd.f32 %v1365_v38, %v667_v3  ;;  %928 = vst.msk [vmem:[%s1370_s24 + $0x1c0] sm:$0xff] %vm871_vm1, %v809_v0  ;;  %v812_v7 = vadd.f32 %v1365_v38, %v811_v6 }
 0x115   : > { %895 = vst.msk [vmem:[%s1370_s24 + $0xb8] sm:$0xff] %vm871_vm1, %v676_v1  ;;  %931 = vst.msk [vmem:[%s1370_s24 + $0x1d8] sm:$0xff] %vm871_vm1, %v820_v4 }
 0x116   : > { %893 = vst.msk [vmem:[%s1370_s24 + $0xa8] sm:$0xff] %vm871_vm1, %v668_v5  ;;  %929 = vst.msk [vmem:[%s1370_s24 + $0x1c8] sm:$0xff] %vm871_vm1, %v812_v7 }
 0x118   : > { %v1147_v8 = vpop.f32.mrb[24].mxu0  ;;  %v1183_v10 = vpop.f32.mrb[24].mxu1 }
 0x119   : > { %v689_v9 = vadd.f32 %v1147_v8, %v1365_v38  ;;  %v680_v11 = vpop.f32.mrb[25].mxu0  ;;  %v833_v12 = vadd.f32 %v1183_v10, %v1365_v38  ;;  %v824_v14 = vpop.f32.mrb[25].mxu1 }
 0x11a   : > { %v681_v13 = vadd.f32 %v1365_v38, %v680_v11  ;;  %v1148_v15 = vpop.f32.mrb[26].mxu0  ;;  %v825_v16 = vadd.f32 %v1365_v38, %v824_v14  ;;  %v1184_v18 = vpop.f32.mrb[26].mxu1 }
 0x11b   : > { %898 = vst.msk [vmem:[%s1370_s24 + $0xd0] sm:$0xff] %vm871_vm1, %v689_v9  ;;  %v692_v17 = vadd.f32 %v1148_v15, %v1365_v38  ;;  %v683_v19 = vpop.f32.mrb[27].mxu0  ;;  %934 = vst.msk [vmem:[%s1370_s24 + $0x1f0] sm:$0xff] %vm871_vm1, %v833_v12  ;;  %v836_v20 = vadd.f32 %v1184_v18, %v1365_v38  ;;  %v827_v22 = vpop.f32.mrb[27].mxu1 }
 0x11c   : > { %896 = vst.msk [vmem:[%s1370_s24 + $0xc0] sm:$0xff] %vm871_vm1, %v681_v13  ;;  %v684_v21 = vadd.f32 %v1365_v38, %v683_v19  ;;  %932 = vst.msk [vmem:[%s1370_s24 + $0x1e0] sm:$0xff] %vm871_vm1, %v825_v16  ;;  %v828_v23 = vadd.f32 %v1365_v38, %v827_v22 }
 0x11d   : > { %899 = vst.msk [vmem:[%s1370_s24 + $0xd8] sm:$0xff] %vm871_vm1, %v692_v17  ;;  %935 = vst.msk [vmem:[%s1370_s24 + $0x1f8] sm:$0xff] %vm871_vm1, %v836_v20 }
 0x11e   : > { %897 = vst.msk [vmem:[%s1370_s24 + $0xc8] sm:$0xff] %vm871_vm1, %v684_v21  ;;  %933 = vst.msk [vmem:[%s1370_s24 + $0x1e8] sm:$0xff] %vm871_vm1, %v828_v23 }
 0x120   : > { %v1151_v24 = vpop.f32.mrb[28].mxu0  ;;  %v1187_v26 = vpop.f32.mrb[28].mxu1 }
 0x121   : > { %v705_v25 = vadd.f32 %v1151_v24, %v1365_v38  ;;  %v696_v27 = vpop.f32.mrb[29].mxu0  ;;  %v849_v28 = vadd.f32 %v1187_v26, %v1365_v38  ;;  %v840_v30 = vpop.f32.mrb[29].mxu1 }
 0x122   : > { %v697_v29 = vadd.f32 %v1365_v38, %v696_v27  ;;  %v1152_v31 = vpop.f32.mrb[30].mxu0  ;;  %v841_v32 = vadd.f32 %v1365_v38, %v840_v30  ;;  %v1188_v34 = vpop.f32.mrb[30].mxu1 }
 0x123   : > { %902 = vst.msk [vmem:[%s1370_s24 + $0xf0] sm:$0xff] %vm871_vm1, %v705_v25  ;;  %v708_v33 = vadd.f32 %v1152_v31, %v1365_v38  ;;  %v699_v35 = vpop.f32.mrb[31].mxu0  ;;  %938 = vst.msk [vmem:[%s1370_s24 + $0x210] sm:$0xff] %vm871_vm1, %v849_v28  ;;  %v852_v36 = vadd.f32 %v1188_v34, %v1365_v38  ;;  %v843_v39 = vpop.f32.mrb[31].mxu1 }
 0x124   : > { %900 = vst.msk [vmem:[%s1370_s24 + $0xe0] sm:$0xff] %vm871_vm1, %v697_v29  ;;  %v700_v37 = vadd.f32 %v1365_v38, %v699_v35  ;;  %936 = vst.msk [vmem:[%s1370_s24 + $0x200] sm:$0xff] %vm871_vm1, %v841_v32  ;;  %v844_v40 = vadd.f32 %v1365_v38, %v843_v39 }
 0x125   : > { %903 = vst.msk [vmem:[%s1370_s24 + $0xf8] sm:$0xff] %vm871_vm1, %v708_v33  ;;  %939 = vst.msk [vmem:[%s1370_s24 + $0x218] sm:$0xff] %vm871_vm1, %v852_v36 }
 0x126   : > { %901 = vst.msk [vmem:[%s1370_s24 + $0xe8] sm:$0xff] %vm871_vm1, %v700_v37  ;;  %937 = vst.msk [vmem:[%s1370_s24 + $0x208] sm:$0xff] %vm871_vm1, %v844_v40 }
 0x128   : > { %v1155_v41 = vpop.f32.mrb[32].mxu0  ;;  %v1191_v43 = vpop.f32.mrb[32].mxu1 }
 0x129   : > { %v721_v42 = vadd.f32 %v1155_v41, %v1365_v38  ;;  %v712_v44 = vpop.f32.mrb[33].mxu0  ;;  %v865_v45 = vadd.f32 %v1191_v43, %v1365_v38  ;;  %v856_v47 = vpop.f32.mrb[33].mxu1 }
 0x12a   : > { %v713_v46 = vadd.f32 %v1365_v38, %v712_v44  ;;  %v1156_v48 = vpop.f32.mrb[34].mxu0  ;;  %v857_v49 = vadd.f32 %v1365_v38, %v856_v47  ;;  %v1192_v51 = vpop.f32.mrb[34].mxu1 }
 0x12b   : > { %906 = vst.msk [vmem:[%s1370_s24 + $0x110] sm:$0xff] %vm871_vm1, %v721_v42  ;;  %v724_v50 = vadd.f32 %v1156_v48, %v1365_v38  ;;  %v715_v52 = vpop.f32.mrb[35].mxu0  ;;  %942 = vst.msk [vmem:[%s1370_s24 + $0x230] sm:$0xff] %vm871_vm1, %v865_v45  ;;  %v868_v53 = vadd.f32 %v1192_v51, %v1365_v38  ;;  %v859_v55 = vpop.f32.mrb[35].mxu1 }
 0x12c   : > { %904 = vst.msk [vmem:[%s1370_s24 + $0x100] sm:$0xff] %vm871_vm1, %v713_v46  ;;  %v716_v54 = vadd.f32 %v1365_v38, %v715_v52  ;;  %940 = vst.msk [vmem:[%s1370_s24 + $0x220] sm:$0xff] %vm871_vm1, %v857_v49  ;;  %v860_v56 = vadd.f32 %v1365_v38, %v859_v55 }
 0x12d   : > { %907 = vst.msk [vmem:[%s1370_s24 + $0x118] sm:$0xff] %vm871_vm1, %v724_v50  ;;  %943 = vst.msk [vmem:[%s1370_s24 + $0x238] sm:$0xff] %vm871_vm1, %v868_v53 }
 0x12e   : > { %905 = vst.msk [vmem:[%s1370_s24 + $0x108] sm:$0xff] %vm871_vm1, %v716_v54  ;;  %941 = vst.msk [vmem:[%s1370_s24 + $0x228] sm:$0xff] %vm871_vm1, %v860_v56 }
 0x12f PF: > { %s15_s14 = sadd.s32 1, %s1248_s14  }
 0x130   : > { %p12_p4 = scmp.ge.s32.totalorder %s15_s14, 4  }
 0x132   :  { %14 = sbr.rel (!%p12_p4) target bundleno = 3 (0x3), region = 62 }

// kernel: unet_forward.27
= control target key start
LH: loop header
LB: loop body
LE: loop exit
PB: predicated region body
PF: predicated region fallthrough
CT: control target
= control target key end

     0   :  { %s2263_s18 = smov 0   ;;  %s2509_s0 = inlined_call_operand.vmem [shape: bf16[2,28,28,16], index: 0, kind: input, shape index: {}]   ;;  %s2510_s1 = inlined_call_operand.vmem [shape: bf16[2,28,28,16], index: 1, kind: input, shape index: {}]   ;;  %s2511_s2 = inlined_call_operand.vmem [shape: bf16[3,3,16,16], index: 2, kind: input, shape index: {}]   ;;  %s2512_s3 = inlined_call_operand.vmem [shape: bf16[3,3,16,16], index: 3, kind: input, shape index: {}]   ;;  %s2513_s4 = inlined_call_operand.vmem [shape: f32[1,16], index: 4, kind: input, shape index: {}]   ;;  %s2514_s5 = inlined_call_operand.vmem [shape: bf16[2,26,26,16], index: 5, kind: output, shape index: {}]  }
   0x1 LB: > { %s1795_s19 = sadd.s32 4294967295, %s2227_s18   ;;  %p1799_p0 = scmp.ge.s32.totalorder %s2227_s18, 1  ;;  %s2227_s18 = sphi %s2263_s18, %s15_s18  }
   0x2   : > { %p197_p1 = scmp.lt.s32.totalorder %s2227_s18, 3 }
   0x4   : > { %p198_p2 = pnand %p1799_p0, %p197_p1 }
   0x5   : > { %p230_p3 = scmp.lt.s32.totalorder (!%p198_p2), %s1795_s19, 1  ;;  %v2274_v0 = vld [vmem:[%s2513_s4] ss:$0 sm:$0xff] (!%p198_p2)  ;;  %s2291_s8 = smov (!%p198_p2), 0  }
   0x6   : > { %201 = sbr.rel (%p198_p2) target bundleno = 350 (0x15e), region = 40 }
   0xd   : > { %s2516_s19 = smov (!%p230_p3, %s1795_s19), 1 }
   0xe   : > { %s2169_s22 = smul.u32 448, %s2516_s19 }
   0xf   : > { %s2170_s23 = smul.u32 416, %s2516_s19 }
  0x10   : > { %s2279_s26 = scalar_lea.vmem %s2509_s0, %s2169_s22  ;;  %s2284_s29 = scalar_lea.vmem %s2510_s1, %s2169_s22 }
  0x11   : > { %s2289_s7 = scalar_lea.vmem %s2514_s5, %s2170_s23 }
  0x12 LB: >> { %v2187_v1 = vld [vmem:[%s2512_s3] sm:$0xff]   ;;  %v2190_v2 = vld [vmem:[%s2511_s2 + $0x8] sm:$0xff]   ;;  %s2303_s13 = sshll.u32 %s2231_s8, 4  ;;  %vm297_vm0 = vcmask 130048   ;;  %v2196_v18 = vld [vmem:[%s2512_s3 + $0x10] sm:$0xff]   ;;  %vm415_vm2 = vcmask 1046528   ;;  %s2231_s8 = sphi %s2291_s8, %s252_s8  }
  0x13   : >> { %2047 = vmatprep.subr.bf16.mxu0 %v2187_v1  ;;  %v2193_v3 = vld [vmem:[%s2511_s2] sm:$0xff]   ;;  %s2310_s16 = scalar_lea.vmem %s2284_s29, %s2303_s13  ;;  %1993 = vmatprep.subr.bf16.mxu1 %v2190_v2  ;;  %s2314_s17 = scalar_lea.vmem %s2279_s26, %s2303_s13  ;;  %v2194_v8 = vld [vmem:[%s2512_s3 + $0x8] sm:$0xff]   ;;  %vm275_vm1 = vsmask.f32 7424  ;;  %v2195_v30 = vld [vmem:[%s2511_s2 + $0x10] sm:$0xff]   ;;  %vm1699_vm3 = vcmask 125952  }
  0x14   : >> { %2048 = vmatpush3.bf16.msra.mxu0 %v2187_v1  ;;  %v2188_v4 = vld [vmem:[%s2310_s16] sm:$0xff]   ;;  %1994 = vmatpush3.bf16.msra.mxu1 %v2190_v2  ;;  %v2318_v5 = vld [vmem:[%s2310_s16 + $0x8] sm:$0x3f]   ;;  %v2198_v32 = vld [vmem:[%s2512_s3 + $0x18] sm:$0xff]   ;;  %s1698_s9 = scalar_lea.vmem %s2289_s7, %s2303_s13  ;;  %vm1703_vm4 = vcmask 122880   ;;  %s252_s8 = sadd.s32 1, %s2231_s8  }
  0x15   : >> { %1999 = vmatprep.subr.bf16.mxu1 %v2193_v3  ;;  %2049 = vmatprep.mubr.msk.bf16.mxu0 %vm297_vm0, %v2188_v4  ;;  %v2191_v6 = vld [vmem:[%s2314_s17] sm:$0xff]   ;;  %v2325_v7 = vld [vmem:[%s2314_s17 + $0x8] sm:$0x3f]   ;;  %v1046_v9 = vshrl.u32 %v2188_v4, 16  ;;  %v1048_v10 = vshll.u32 %v2188_v4, 16  ;;  %v1052_v11 = vshll.u32 %v2318_v5, 16 }
  0x16   : >> { %v277_v12 = vshrl.u32 %v2191_v6, 16  ;;  %v279_v13 = vshll.u32 %v2191_v6, 16  ;;  %v284_v14 = vshll.u32 %v2325_v7, 16  ;;  %v288_v15 = vshrl.u32 %v2325_v7, 16  ;;  %2053 = vmatprep.subr.bf16.mxu0 %v2194_v8  ;;  %v2355_v35 = vld [vmem:[%s2310_s16 + $0x10] sm:$0xff]   ;;  %v2197_v36 = vld [vmem:[%s2511_s2 + $0x18] sm:$0xff]  }
  0x17   : >> { %2050 = vmatmul.mubr.msk.bf16.vlgmr.msra.gmra.mrb[0].mxu0 %vm297_vm0, %v2318_v5  ;;  %v1050_v16 = vrot.slane %v1048_v10, 1  ;;  %v1054_v17 = vrot.slane %v1052_v11, 1  ;;  %v1056_v21 = vshrl.u32 %v2318_v5, 16  ;;  %v1127_v25 = vrot.slane %v2188_v4, 1  ;;  %v2203_v38 = vld [vmem:[%s2512_s3 + $0x20] sm:$0xff]   ;;  %v2201_v1 = vld [vmem:[%s2314_s17 + $0x10] sm:$0xff]  }
  0x18   : >> { %v281_v19 = vrot.slane %v279_v13, 1  ;;  %v286_v20 = vrot.slane %v284_v14, 1  ;;  %2054 = vmatpush3.bf16.msra.mxu0 %v2194_v8  ;;  %v1128_v26 = vrot.slane %v2318_v5, 1  ;;  %v416_v33 = vrot.slane %v2191_v6, 1  ;;  %v2366_v40 = vld [vmem:[%s2310_s16 + $0x20] sm:$0xff]   ;;  %p249_p4 = scmp.ge.s32.totalorder %s252_s8, 26  }
  0x19   : >> { %v1051_v22 = vor.u32 %v1050_v16, %v1046_v9  ;;  %2059 = vmatprep.subr.bf16.mxu0 %v2196_v18  ;;  %v1058_v29 = vor.u32 %v1056_v21, %v1054_v17  ;;  %v417_v34 = vrot.slane %v2325_v7, 1  ;;  %v1284_v39 = vshll.u32 %v2355_v35, 16  ;;  %v2369_v41 = vld [vmem:[%s2310_s16 + $0x18] sm:$0x3f]   ;;  %v2372_v42 = vld [vmem:[%s2310_s16 + $0x28] sm:$0x3f]  }
  0x1a   : >> { %v282_v23 = vor.u32 %v281_v19, %v277_v12  ;;  %v290_v24 = vor.u32 %v288_v15, %v286_v20  ;;  %v1129_v31 = vsel %vm415_vm2, %v1127_v25, %v1128_v26  ;;  %v2377_v43 = vld [vmem:[%s2314_s17 + $0x20] sm:$0xff]   ;;  %v1520_v44 = vshll.u32 %v2366_v40, 16  ;;  %v2385_v47 = vld [vmem:[%s2314_s17 + $0x28] sm:$0x3f]   ;;  %v2204_v10 = vld [vmem:[%s2314_s17 + $0x18] sm:$0x3f]  }
  0x1b   : >> { %v1055_v27 = vsel %vm275_vm1, %v1051_v22, %v1054_v17  ;;  %v418_v37 = vsel %vm415_vm2, %v416_v33, %v417_v34  ;;  %v1518_v45 = vshrl.u32 %v2366_v40, 16  ;;  %v1524_v46 = vshll.u32 %v2372_v42, 16  ;;  %v2206_v12 = vld [vmem:[%s2512_s3 + $0x28] sm:$0xff]   ;;  %v2208_v25 = vld [vmem:[%s2512_s3 + $0x30] sm:$0xff]   ;;  %v2212_v33 = vld [vmem:[%s2511_s2 + $0x38] sm:$0xff]  }
  0x1c   : >> { %v287_v28 = vsel %vm275_vm1, %v282_v23, %v286_v20  ;;  %2055 = vmatprep.mubr.msk.bf16.mxu0 %vm297_vm0, %v1055_v27  ;;  %v1282_v48 = vshrl.u32 %v2355_v35, 16  ;;  %v1288_v49 = vshll.u32 %v2369_v41, 16  ;;  %v1522_v50 = vrot.slane %v1520_v44, 1  ;;  %v2205_v23 = vld [vmem:[%s2511_s2 + $0x28] sm:$0xff]  }
  0x1d   : >> { %1995 = vmatprep.mubr.msk.bf16.mxu1 %vm297_vm0, %v287_v28  ;;  %v2391_v51 = vrot.slane %v1524_v46, 1  ;;  %v1286_v52 = vrot.slane %v1284_v39, 1  ;;  %v811_v53 = vshrl.u32 %v2377_v43, 16  ;;  %v813_v54 = vshll.u32 %v2377_v43, 16 }
  0x1e   : >> { %1996 = vmatmul.mubr.msk.bf16.vlgmr.msra.gmra.mrb[0].mxu1 %vm297_vm0, %v290_v24  ;;  %v817_v55 = vshll.u32 %v2385_v47, 16  ;;  %v1523_v56 = vor.u32 %v1522_v50, %v1518_v45  ;;  %v1599_v57 = vrot.slane %v2366_v40, 1  ;;  %v1600_v60 = vrot.slane %v2372_v42, 1 }
  0x1f   : >> { %2000 = vmatpush3.bf16.msra.mxu1 %v2193_v3  ;;  %2001 = vmatprep.mubr.msk.bf16.mxu1 %vm297_vm0, %v2191_v6  ;;  %v815_v58 = vrot.slane %v813_v54, 1  ;;  %v892_v61 = vrot.slane %v2377_v43, 1  ;;  %v893_v63 = vrot.slane %v2385_v47, 1  ;;  %v1287_v2 = vor.u32 %v1286_v52, %v1282_v48 }
  0x20   : >> { %2005 = vmatprep.subr.bf16.mxu1 %v2195_v30  ;;  %v2397_v59 = vrot.slane %v817_v55, 1  ;;  %v2403_v62 = vsel %vm275_vm1, %v1523_v56, %v2391_v51  ;;  %v1290_v3 = vrot.slane %v1288_v49, 1  ;;  %v2410_v5 = vsel %vm415_vm2, %v1599_v57, %v1600_v60 }
  0x21   : >> { %v816_v4 = vor.u32 %v815_v58, %v811_v53  ;;  %v2415_v6 = vsel %vm415_vm2, %v892_v61, %v893_v63  ;;  %v575_v8 = vshll.u32 %v2201_v1, 16  ;;  %v573_v13 = vshrl.u32 %v2201_v1, 16 }
  0x22   : >> { %v1291_v11 = vsel %vm275_vm1, %v1287_v2, %v1290_v3  ;;  %v579_v15 = vshll.u32 %v2204_v10, 16  ;;  %v1292_v16 = vshrl.u32 %v2369_v41, 16  ;;  %v1363_v19 = vrot.slane %v2355_v35, 1 }
  0x23   : >> { %2056 = vmatmul.mubr.msk.bf16.vlgmr.msra.gmra.mrb[0].mxu0 %vm297_vm0, %v1058_v29  ;;  %v2422_v9 = vsel %vm275_vm1, %v816_v4, %v2397_v59  ;;  %v577_v14 = vrot.slane %v575_v8, 1  ;;  %v1364_v20 = vrot.slane %v2369_v41, 1  ;;  %v654_v27 = vrot.slane %v2201_v1, 1 }
  0x24   : >> { %2060 = vmatpush3.bf16.msra.mxu0 %v2196_v18  ;;  %2061 = vmatprep.mubr.msk.bf16.mxu0 %vm297_vm0, %v1129_v31  ;;  %v581_v18 = vrot.slane %v579_v15, 1  ;;  %v1294_v21 = vor.u32 %v1292_v16, %v1290_v3  ;;  %v655_v28 = vrot.slane %v2204_v10, 1  ;;  %v2207_v31 = vld [vmem:[%s2511_s2 + $0x30] sm:$0xff]  }
  0x25   : >> { %2065 = vmatprep.subr.bf16.mxu0 %v2198_v32  ;;  %v578_v17 = vor.u32 %v577_v14, %v573_v13  ;;  %v1365_v24 = vsel %vm415_vm2, %v1363_v19, %v1364_v20 }
  0x27   : >> { %v582_v22 = vsel %vm275_vm1, %v578_v17, %v581_v18 }
  0x2a   : >> { %2002 = vmatmul.mubr.msk.bf16.vlgmr.msra.gmra.mrb[0].mxu1 %vm297_vm0, %v2325_v7  ;;  %v2202_v7 = vld [vmem:[%s2511_s2 + $0x20] sm:$0xff]  }
  0x2b   : >> { %2006 = vmatpush3.bf16.msra.mxu1 %v2195_v30  ;;  %2007 = vmatprep.mubr.msk.bf16.mxu1 %vm297_vm0, %v418_v37  ;;  %v656_v30 = vsel %vm415_vm2, %v654_v27, %v655_v28  ;;  %v2215_v37 = vld [vmem:[%s2511_s2 + $0x40] sm:$0xff]  }
  0x2c   : >> { %2011 = vmatprep.subr.bf16.mxu1 %v2197_v36 }
  0x2f   : >> { %2062 = vmatmul.mubr.msk.bf16.vlgmr.msra.gmra.mrb[0].mxu0 %vm297_vm0, %v1128_v26  ;;  %v583_v26 = vshrl.u32 %v2204_v10, 16 }
  0x30   : >> { %2066 = vmatpush3.bf16.msra.mxu0 %v2198_v32  ;;  %2067 = vmatprep.mubr.msk.bf16.mxu0 %vm297_vm0, %v2355_v35  ;;  %v2213_v32 = vld [vmem:[%s2512_s3 + $0x38] sm:$0xff]   ;;  %v1528_v35 = vshrl.u32 %v2372_v42, 16 }
  0x31   : >> { %2071 = vmatprep.subr.bf16.mxu0 %v2203_v38  ;;  %v585_v29 = vor.u32 %v583_v26, %v581_v18 }
  0x36   : >> { %2008 = vmatmul.mubr.msk.bf16.vlgmr.msra.gmra.mrb[0].mxu1 %vm297_vm0, %v417_v34  ;;  %v2216_v34 = vld [vmem:[%s2512_s3 + $0x40] sm:$0xff]  }
  0x37   : >> { %2012 = vmatpush3.bf16.msra.mxu1 %v2197_v36  ;;  %2013 = vmatprep.mubr.msk.bf16.mxu1 %vm297_vm0, %v2201_v1  ;;  %v1530_v36 = vor.u32 %v1528_v35, %v2391_v51 }
  0x38   : >> { %2017 = vmatprep.subr.bf16.mxu1 %v2202_v7 }
  0x3b   : >> { %2068 = vmatmul.mubr.msk.bf16.vlgmr.msra.gmra.mrb[0].mxu0 %vm297_vm0, %v2369_v41 }
  0x3c   : >> { %2072 = vmatpush3.bf16.msra.mxu0 %v2203_v38  ;;  %2073 = vmatprep.mubr.msk.bf16.mxu0 %vm297_vm0, %v1291_v11  ;;  %v821_v38 = vshrl.u32 %v2385_v47, 16 }
  0x3d   : >> { %2077 = vmatprep.subr.bf16.mxu0 %v2206_v12 }
  0x3e   : >> { %v823_v39 = vor.u32 %v821_v38, %v2397_v59 }
  0x42   : >> { %2014 = vmatmul.mubr.msk.bf16.vlgmr.msra.gmra.mrb[0].mxu1 %vm297_vm0, %v2204_v10 }
  0x43   : >> { %2018 = vmatpush3.bf16.msra.mxu1 %v2202_v7  ;;  %2019 = vmatprep.mubr.msk.bf16.mxu1 %vm297_vm0, %v582_v22 }
  0x44   : >> { %2023 = vmatprep.subr.bf16.mxu1 %v2205_v23 }
  0x47   : >> { %2074 = vmatmul.mubr.msk.bf16.vlgmr.msra.gmra.mrb[0].mxu0 %vm297_vm0, %v1294_v21 }
  0x48   : >> { %2078 = vmatpush3.bf16.msra.mxu0 %v2206_v12  ;;  %2079 = vmatprep.mubr.msk.bf16.mxu0 %vm297_vm0, %v1365_v24 }
  0x49   : >> { %2083 = vmatprep.subr.bf16.mxu0 %v2208_v25 }
  0x4e   : >> { %2020 = vmatmul.mubr.msk.bf16.vlgmr.msra.gmra.mrb[0].mxu1 %vm297_vm0, %v585_v29 }
  0x4f   : >> { %2024 = vmatpush3.bf16.msra.mxu1 %v2205_v23  ;;  %2025 = vmatprep.mubr.msk.bf16.mxu1 %vm297_vm0, %v656_v30 }
  0x50   : >> { %2029 = vmatprep.subr.bf16.mxu1 %v2207_v31 }
  0x53   : >> { %2080 = vmatmul.mubr.msk.bf16.vlgmr.msra.gmra.mrb[0].mxu0 %vm297_vm0, %v1364_v20 }
  0x54   : >> { %2084 = vmatpush3.bf16.msra.mxu0 %v2208_v25  ;;  %2085 = vmatprep.mubr.msk.bf16.mxu0 %vm297_vm0, %v2366_v40 }
  0x55   : >> { %2089 = vmatprep.subr.bf16.mxu0 %v2213_v32 }
  0x5a   : >> { %2026 = vmatmul.mubr.msk.bf16.vlgmr.msra.gmra.mrb[0].mxu1 %vm297_vm0, %v655_v28 }
  0x5b   : >> { %2030 = vmatpush3.bf16.msra.mxu1 %v2207_v31  ;;  %2031 = vmatprep.mubr.msk.bf16.mxu1 %vm297_vm0, %v2377_v43 }
  0x5c   : >> { %2035 = vmatprep.subr.bf16.mxu1 %v2212_v33 }
  0x5f   : >> { %2086 = vmatmul.mubr.msk.bf16.vlgmr.msra.gmra.mrb[0].mxu0 %vm297_vm0, %v2372_v42 }
  0x60   : >> { %2090 = vmatpush3.bf16.msra.mxu0 %v2213_v32  ;;  %2091 = vmatprep.mubr.msk.bf16.mxu0 %vm297_vm0, %v2403_v62 }
  0x61   : >> { %2095 = vmatprep.subr.bf16.mxu0 %v2216_v34 }
  0x66   : >> { %2032 = vmatmul.mubr.msk.bf16.vlgmr.msra.gmra.mrb[0].mxu1 %vm297_vm0, %v2385_v47 }
  0x67   : >> { %2036 = vmatpush3.bf16.msra.mxu1 %v2212_v33  ;;  %2037 = vmatprep.mubr.msk.bf16.mxu1 %vm297_vm0, %v2422_v9 }
  0x68   : >> { %2041 = vmatprep.subr.bf16.mxu1 %v2215_v37 }
  0x6b   : >> { %2092 = vmatmul.mubr.msk.bf16.vlgmr.msra.gmra.mrb[0].mxu0 %vm297_vm0, %v1530_v36 }
  0x6c   : >> { %2096 = vmatpush3.bf16.msra.mxu0 %v2216_v34  ;;  %2097 = vmatprep.mubr.msk.bf16.mxu0 %vm297_vm0, %v2410_v5 }
  0x72   : >> { %2038 = vmatmul.mubr.msk.bf16.vlgmr.msra.gmra.mrb[0].mxu1 %vm297_vm0, %v823_v39 }
  0x73   : >> { %2042 = vmatpush3.bf16.msra.mxu1 %v2215_v37  ;;  %2043 = vmatprep.mubr.msk.bf16.mxu1 %vm297_vm0, %v2415_v6 }
  0x77   : >> { %2098 = vmatmul.mubr.msk.bf16.vlgmr.msra.gmra.mrb[0].mxu0 %vm297_vm0, %v1600_v60 }
  0x7e   : >> { %2044 = vmatmul.mubr.msk.bf16.vlgmr.msra.gmra.mrb[0].mxu1 %vm297_vm0, %v893_v63 }
 0x14a   : >> { %v2099_v40 = vpop.f32.mrb[0].mxu0 }
 0x14b   : >> { %v1648_v41 = vpop.f32.mrb[1].mxu0 }
 0x14c   : >> { %v2100_v43 = vpop.f32.mrb[2].mxu0 }
 0x14d   : >> { %v1651_v44 = vpop.f32.mrb[3].mxu0 }
 0x151   : >> { %v2045_v45 = vpop.f32.mrb[0].mxu1 }
 0x152   : >> { %v2101_v46 = vadd.f32 %v2099_v40, %v2045_v45  ;;  %v941_v48 = vpop.f32.mrb[1].mxu1 }
 0x153   : >> { %v2102_v49 = vadd.f32 %v1648_v41, %v941_v48  ;;  %v2046_v50 = vpop.f32.mrb[2].mxu1 }
 0x154   : >> { %v1675_v51 = vadd.f32 %v2101_v46, %v2274_v0  ;;  %v2103_v42 = vadd.f32 %v2100_v43, %v2046_v50  ;;  %v944_v52 = vpop.f32.mrb[3].mxu1 }
 0x155   : >> { %v1673_v53 = vadd.f32 %v2102_v49, %v2274_v0  ;;  %v2104_v47 = vadd.f32 %v1651_v44, %v944_v52 }
 0x156   : >> { %v1679_v54 = vmax.f32 %v1675_v51, 0.0  ;;  %v1676_v55 = vadd.f32 %v2103_v42, %v2274_v0 }
 0x157   : >> { %v1677_v56 = vmax.f32 %v1673_v53, 0.0  ;;  %v1674_v57 = vadd.f32 %v2104_v47, %v2274_v0  ;;  %251 = sbr.rel (!%p249_p4) target bundleno = 18 (0x12), region = 103 }
 0x158   : >> { %v1936_v58 = vpack.c.bf16 %v1679_v54, %v1679_v54  ;;  %v1680_v59 = vmax.f32 %v1676_v55, 0.0 }
 0x159   : >> { %v1934_v60 = vpack.c.bf16 %v1677_v56, %v1677_v56  ;;  %v1678_v61 = vmax.f32 %v1674_v57, 0.0 }
 0x15a   : >> { %1702 = vst.msk [vmem:[%s1698_s9 + $0x8] sm:$0xf] %vm1699_vm3, %v1936_v58  ;;  %v1937_v62 = vpack.c.bf16 %v1680_v59, %v1680_v59 }
 0x15b   : >> { %1700 = vst.msk [vmem:[%s1698_s9] sm:$0xf] %vm1699_vm3, %v1934_v60  ;;  %v1935_v63 = vpack.c.bf16 %v1678_v61, %v1678_v61 }
 0x15c   : >> { %1704 = vst.msk [vmem:[%s1698_s9 + $0xc] sm:$0x1] %vm1703_vm4, %v1937_v62 }
 0x15d   : >> { %1701 = vst.msk [vmem:[%s1698_s9 + $0x4] sm:$0xf] %vm1699_vm3, %v1935_v63 }
 0x15e PF: > { %s15_s18 = sadd.s32 1, %s2227_s18  }
 0x15f   : > { %p12_p5 = scmp.ge.s32.totalorder %s15_s18, 4  }
 0x161   :  { %14 = sbr.rel (!%p12_p5) target bundleno = 1 (0x1), region = 114 }

</bundles_post_ra>
